<compile_context>
chip_gen: v5e
topology: v5e:2x2
jax: 0.10.0
libtpu: 0.0.40
codegen_flags: <defaults>
</compile_context>

<pallas_src>
import functools

import jax
import jax.numpy as jnp
from jax import lax
from jax.experimental import pallas as pl
from jax.experimental.pallas import tpu as pltpu

EPS = 1e-5          # nn.BatchNorm1d default eps
NEG_SLOPE = 0.01    # nn.LeakyReLU default negative_slope


def _tree_sum(terms):
    """Pairwise (tree) reduction of a Python list of arrays."""
    terms = list(terms)
    while len(terms) > 1:
        nxt = [terms[i] + terms[i + 1] for i in range(0, len(terms) - 1, 2)]
        if len(terms) % 2:
            nxt.append(terms[-1])
        terms = nxt
    return terms[0]


# ----------------------------------------------------------------------------
# The fused whole-network kernel (one batch element per grid step).
# Refs: x (1, L0) VMEM, convw (10, Cmax, K*Cmax) VMEM (bf16),
#       shift (10, Cmax, 1) VMEM (f32), cbam (10, 19) SMEM (f32), out (1, L0).
# ----------------------------------------------------------------------------
def _dae_kernel(x_ref, w_ref, sh_ref, cb_ref, o_ref, *, filters, K, L0):
    f32 = jnp.float32
    mxu_dtype = w_ref.dtype

    # 0/1 validity masks for every dilation level, built once from a lane iota.
    lane = lax.broadcasted_iota(jnp.int32, (1, L0), 1)
    mask = {dd: ((lane & (dd - 1)) == 0).astype(f32) for dd in (2, 4, 8, 16, 32)}

    def leaky(y):
        return jnp.where(y > 0, y, NEG_SLOPE * y)

    def conv(x, idx, cin, cout, d, pad_l, pad_r):
        # Dilated im2col conv: zero-pad along lanes, stack K shifted slices
        # along sublanes, then ONE (cout, K*cin) x (K*cin, L0) MXU matmul.
        kcin = K * cin
        xpad = jnp.concatenate(
            [jnp.zeros((cin, pad_l * d), f32), x,
             jnp.zeros((cin, pad_r * d), f32)], axis=1)        # (cin, L0+15*d)
        col = jnp.concatenate([xpad[:, k * d:k * d + L0] for k in range(K)],
                              axis=0)                          # (K*cin, L0)
        w = w_ref[idx, 0:cout, 0:kcin]                         # (cout, K*cin)
        y = jnp.dot(w, col.astype(mxu_dtype),
                    preferred_element_type=jnp.float32)        # (cout, L0) f32
        return y + sh_ref[idx, 0:cout, :]                      # bias + BN shift

    def cbam(x, idx, cout, d):
        # ---- channel gate: masked mean over length -> 3-tap conv over C ----
        if d == 1:
            m = jnp.mean(x, axis=1, keepdims=True)             # (cout, 1)
        else:
            m = jnp.sum(x * mask[d], axis=1, keepdims=True) * (float(d) / L0)
        if cout == 1:
            g = cb_ref[idx, 1] * m + cb_ref[idx, 3]
        else:
            z = jnp.zeros((1, 1), f32)
            m_lo = jnp.concatenate([z, m[:-1, :]], axis=0)     # m[i-1]
            m_hi = jnp.concatenate([m[1:, :], z], axis=0)      # m[i+1]
            g = (cb_ref[idx, 0] * m_lo + cb_ref[idx, 1] * m
                 + cb_ref[idx, 2] * m_hi + cb_ref[idx, 3])
        x1 = jax.nn.sigmoid(g) * x                             # (cout, L0)
        # ---- spatial gate: mean/max over C -> 7-tap conv over length -------
        avg = jnp.mean(x1, axis=0, keepdims=True)              # (1, L0)
        mxv = jnp.max(x1, axis=0, keepdims=True)               # (1, L0)
        zp = jnp.zeros((1, 3 * d), f32)
        ap = jnp.concatenate([zp, avg, zp], axis=1)            # (1, L0+6*d)
        mp = jnp.concatenate([zp, mxv, zp], axis=1)
        terms = [cb_ref[idx, 4 + k] * ap[:, k * d:k * d + L0] for k in range(7)]
        terms += [cb_ref[idx, 11 + k] * mp[:, k * d:k * d + L0] for k in range(7)]
        s = _tree_sum(terms) + cb_ref[idx, 18]
        return jax.nn.sigmoid(s) * x1

    def enc_block(x, idx, cin, cout, d):
        # AsymPad(7,8)+Conv+BN -> LeakyReLU -> Dropout(id) -> CBAM -> MaxPool(2).
        y = cbam(leaky(conv(x, idx, cin, cout, d, K // 2 - 1, K // 2)),
                 idx, cout, d)
        shifted = jnp.concatenate([y[:, d:], jnp.zeros((cout, d), f32)], axis=1)
        return jnp.maximum(y, shifted) * mask[2 * d]           # dilation 2*d

    def dec_block(x, idx, cin, cout, d, act):
        # ConvTranspose1d(stride 2, pad K/2-1)+BN -> (LeakyReLU) -> CBAM.
        # x is at dilation 2*d with exact zeros off its grid, i.e. it already
        # IS the zero-stuffed deconv input -- no upsampling work needed.
        y = conv(x, idx, cin, cout, d, K // 2, K // 2 - 1)
        if act:
            y = leaky(y)
        return cbam(y, idx, cout, d)                           # dilation d

    f = filters
    enc_cfg = [(1, f), (f, 2 * f), (2 * f, 4 * f), (4 * f, 4 * f), (4 * f, 1)]
    dec_cfg = [(1, 4 * f), (4 * f, 4 * f), (4 * f, 2 * f), (2 * f, f), (f, 1)]

    h = x_ref[...].astype(f32)                                 # (1, L0)
    skips = []
    d = 1
    for i, (cin, cout) in enumerate(enc_cfg):
        h = enc_block(h, i, cin, cout, d)
        d *= 2
        skips.append(h)

    g = skips[4]                                               # dilation 32
    for j, (cin, cout) in enumerate(dec_cfg):
        d //= 2
        g = dec_block(g, 5 + j, cin, cout, d, act=(j < 4))
        if j < 4:
            # Re-zero off-grid lanes (next deconv's zero-stuffing) + skip add.
            g = g * mask[d] + skips[3 - j]
    o_ref[...] = g                                             # (1, L0), d == 1


# ----------------------------------------------------------------------------
# Host-side parameter packing (tiny, hoisted under jit).
# ----------------------------------------------------------------------------
def pack_params(params, filters, K=16, mxu_dtype=jnp.bfloat16):
    """Fold BN (eval) + conv bias into dense per-layer tables.

    convw[i, co, k*cin + ci] = BN-scaled conv tap (flipped for deconv)  [im2col]
    shift[i, co, 0]          = conv bias + BN shift (folded), float32
    cbam[i]                  = [cw(3), cb(1), sw_avg(7), sw_max(7), sb(1)]
    """
    f = filters
    enc_cfg = [(1, f), (f, 2 * f), (2 * f, 4 * f), (4 * f, 4 * f), (4 * f, 1)]
    dec_cfg = [(1, 4 * f), (4 * f, 4 * f), (4 * f, 2 * f), (2 * f, f), (f, 1)]
    names = ['b1', 'b2', 'b3', 'b4', 'b5', 'd5', 'd4', 'd3', 'd2', 'd1']
    cfgs = ([(n, ci, co, True) for n, (ci, co) in zip(names[:5], enc_cfg)]
            + [(n, ci, co, False) for n, (ci, co) in zip(names[5:], dec_cfg)])
    cmax = max(max(ci, co) for _, ci, co, _ in cfgs)
    ws, shs, cbs = [], [], []
    for name, ci, co, is_enc in cfgs:
        p = params[name]
        s = p['gamma'] / jnp.sqrt(p['var'] + EPS)
        shift = p['beta'] + (p['b'] - p['mean']) * s
        if is_enc:
            w = p['w']                                        # (co, ci, K)
        else:
            # torch ConvTranspose weight (ci, co, K) -> flipped conv (co, ci, K)
            w = jnp.transpose(p['w'][:, :, ::-1], (1, 0, 2))
        w = w * s[:, None, None]
        wpack = jnp.transpose(w, (0, 2, 1)).reshape(co, K * ci)   # (co, K*ci)
        ws.append(jnp.pad(wpack, ((0, cmax - co), (0, K * (cmax - ci)))))
        shs.append(jnp.pad(shift.reshape(co, 1), ((0, cmax - co), (0, 0))))
        cbs.append(jnp.concatenate([
            p['cw'].reshape(3), p['cb'].reshape(1),
            p['sw'][0, 0].reshape(7), p['sw'][0, 1].reshape(7),
            p['sb'].reshape(1)]))
    return (jnp.stack(ws).astype(mxu_dtype),
            jnp.stack(shs).astype(jnp.float32),
            jnp.stack(cbs).astype(jnp.float32))


def _cost_estimate(B, L0, filters, K, bytes_accessed):
    f = filters
    cfg = [(1, f), (f, 2 * f), (2 * f, 4 * f), (4 * f, 4 * f), (4 * f, 1),
           (1, 4 * f), (4 * f, 4 * f), (4 * f, 2 * f), (2 * f, f), (f, 1)]
    flops, trans = 0, 0
    for ci, co in cfg:
        flops += 2 * co * K * ci * L0 + (2 * 14 + 8) * L0 + 10 * co
        trans += L0 + co                       # spatial + channel sigmoids
    return pl.CostEstimate(flops=int(B * flops),
                           transcendentals=int(B * trans),
                           bytes_accessed=int(bytes_accessed))


def attention_skip_dae2_forward(x, params, mxu_dtype=jnp.bfloat16):
    B, cin0, L0 = x.shape
    assert cin0 == 1, "model expects a single input channel"
    assert L0 % 32 == 0, "signal_size must be divisible by 2**5"
    filters = int(params['b1']['w'].shape[0])
    K = int(params['b1']['w'].shape[2])
    convw, shift, cbam_tbl = pack_params(params, filters, K, mxu_dtype)
    kernel = functools.partial(_dae_kernel, filters=filters, K=K, L0=L0)
    tbl_bytes = (convw.size * convw.dtype.itemsize
                 + shift.size * shift.dtype.itemsize
                 + cbam_tbl.size * cbam_tbl.dtype.itemsize)
    io_bytes = 2 * B * L0 * 4 + tbl_bytes
    return pl.pallas_call(
        kernel,
        out_shape=jax.ShapeDtypeStruct((B, 1, L0), jnp.float32),
        grid=(B,),
        in_specs=[
            pl.BlockSpec((None, 1, L0), lambda b: (b, 0, 0)),
            # Constant index maps => Pallas only copies these small tables once.
            pl.BlockSpec(convw.shape, lambda b: (0, 0, 0)),
            pl.BlockSpec(shift.shape, lambda b: (0, 0, 0)),
            # CBAM scalars live in SMEM: read as scalars, no (1,1) VMEM loads.
            pl.BlockSpec(memory_space=pltpu.MemorySpace.SMEM),
        ],
        out_specs=pl.BlockSpec((None, 1, L0), lambda b: (b, 0, 0)),
        compiler_params=pltpu.CompilerParams(
            dimension_semantics=("parallel",),     # megacore on v7x (2 TCs)
            vmem_limit_bytes=32 * 1024 * 1024),
        cost_estimate=_cost_estimate(B, L0, filters, K, io_bytes),
    )(x.astype(jnp.float32), convw, shift, cbam_tbl)


# ----------------------------------------------------------------------------
# Pure-JAX reference (mirrors the PyTorch module directly) for a sanity check.
# ----------------------------------------------------------------------------
_DN = ('NCH', 'OIH', 'NCH')
_HP = lax.Precision.HIGHEST


def _ref_bn(x, p):
    s = p['gamma'] / jnp.sqrt(p['var'] + EPS)
    return s[None, :, None] * (x - p['mean'][None, :, None]) + p['beta'][None, :, None]


def _ref_cbam(x, p):
    m = jnp.mean(x, axis=2, keepdims=True)                       # (B,C,1)
    g = lax.conv_general_dilated(jnp.transpose(m, (0, 2, 1)), p['cw'], (1,),
                                 [(1, 1)], dimension_numbers=_DN, precision=_HP)
    g = g + p['cb'][None, :, None]
    x1 = jax.nn.sigmoid(jnp.transpose(g, (0, 2, 1))) * x
    cat = jnp.concatenate([jnp.mean(x1, axis=1, keepdims=True),
                           jnp.max(x1, axis=1, keepdims=True)], axis=1)
    s = lax.conv_general_dilated(cat, p['sw'], (1,), [(3, 3)],
                                 dimension_numbers=_DN, precision=_HP)
    s = s + p['sb'][None, :, None]
    return jax.nn.sigmoid(s) * x1


def _ref_enc_block(x, p):
    K = p['w'].shape[2]
    y = lax.conv_general_dilated(x, p['w'], (1,), [(K // 2 - 1, K // 2)],
                                 dimension_numbers=_DN, precision=_HP)
    y = y + p['b'][None, :, None]
    y = _ref_bn(y, p)
    y = jnp.where(y > 0, y, NEG_SLOPE * y)
    y = _ref_cbam(y, p)
    B, C, L = y.shape
    return jnp.max(y.reshape(B, C, L // 2, 2), axis=-1)


def _ref_dec_block(x, p, act):
    K = p['w'].shape[2]
    wf = jnp.transpose(p['w'][:, :, ::-1], (1, 0, 2))            # (Cout,Cin,K)
    y = lax.conv_general_dilated(x, wf, (1,), [(K // 2, K // 2)],
                                 lhs_dilation=(2,),
                                 dimension_numbers=_DN, precision=_HP)
    y = y + p['b'][None, :, None]
    y = _ref_bn(y, p)
    if act:
        y = jnp.where(y > 0, y, NEG_SLOPE * y)
    return _ref_cbam(y, p)


def attention_skip_dae2_reference(x, params):
    e1 = _ref_enc_block(x, params['b1'])
    e2 = _ref_enc_block(e1, params['b2'])
    e3 = _ref_enc_block(e2, params['b3'])
    e4 = _ref_enc_block(e3, params['b4'])
    e5 = _ref_enc_block(e4, params['b5'])
    d5 = _ref_dec_block(e5, params['d5'], True)
    d4 = _ref_dec_block(d5 + e4, params['d4'], True)
    d3 = _ref_dec_block(d4 + e3, params['d3'], True)
    d2 = _ref_dec_block(d3 + e2, params['d2'], True)
    return _ref_dec_block(d2 + e1, params['d1'], False)


# ----------------------------------------------------------------------------
# Deterministic synthetic parameter init (shapes per the PyTorch __init__)
# ----------------------------------------------------------------------------
def _init_common(keys, cout):
    return dict(
        gamma=1.0 + 0.1 * jax.random.normal(keys[2], (cout,), jnp.float32),
        beta=0.1 * jax.random.normal(keys[3], (cout,), jnp.float32),
        mean=0.1 * jax.random.normal(keys[4], (cout,), jnp.float32),
        var=1.0 + 0.1 * jax.random.uniform(keys[5], (cout,), jnp.float32),
        cw=0.5 * jax.random.normal(keys[6], (1, 1, 3), jnp.float32),
        cb=0.1 * jax.random.normal(keys[7], (1,), jnp.float32),
        sw=0.3 * jax.random.normal(keys[8], (1, 2, 7), jnp.float32),
        sb=0.1 * jax.random.normal(keys[9], (1,), jnp.float32),
    )


def init_enc_block(key, cin, cout, K=16):
    keys = jax.random.split(key, 10)
    p = _init_common(keys, cout)
    p['w'] = jax.random.normal(keys[0], (cout, cin, K), jnp.float32) / jnp.sqrt(cin * K)
    p['b'] = 0.1 * jax.random.normal(keys[1], (cout,), jnp.float32)
    return p


def init_dec_block(key, cin, cout, K=16):
    keys = jax.random.split(key, 10)
    p = _init_common(keys, cout)
    p['w'] = jax.random.normal(keys[0], (cin, cout, K), jnp.float32) / jnp.sqrt(cin * K)
    p['b'] = 0.1 * jax.random.normal(keys[1], (cout,), jnp.float32)
    return p


def init_params(key, filters=4):
    ks = jax.random.split(key, 10)
    f = filters
    return {
        'b1': init_enc_block(ks[0], 1, f),
        'b2': init_enc_block(ks[1], f, 2 * f),
        'b3': init_enc_block(ks[2], 2 * f, 4 * f),
        'b4': init_enc_block(ks[3], 4 * f, 4 * f),
        'b5': init_enc_block(ks[4], 4 * f, 1),
        'd5': init_dec_block(ks[5], 1, 4 * f),
        'd4': init_dec_block(ks[6], 4 * f, 4 * f),
        'd3': init_dec_block(ks[7], 4 * f, 2 * f),
        'd2': init_dec_block(ks[8], 2 * f, f),
        'd1': init_dec_block(ks[9], f, 1),
    }


if __name__ == "__main__":
    key = jax.random.PRNGKey(0)
    pkey, xkey = jax.random.split(key)
    # Small demo config: L0 multiple of 128 (lane-dense stores) and of 2**5.
    batch, signal_size, filters = 2, 128, 4
    params = init_params(pkey, filters=filters)
    x = jax.random.normal(xkey, (batch, 1, signal_size), jnp.float32)

    fwd = jax.jit(attention_skip_dae2_forward)
    out = jax.block_until_ready(fwd(x, params))
    assert out.shape == (batch, 1, signal_size), out.shape
    assert bool(jnp.all(jnp.isfinite(out)))

    ref = jax.jit(attention_skip_dae2_reference)(x, params)
    err = jnp.sqrt(jnp.sum((out - ref) ** 2))
    den = jnp.sqrt(jnp.sum(ref ** 2)) + 1e-12
    rel = float(err / den)
    # Tolerance accounts for the bf16 MXU path (VPU math stays f32).
    assert rel < 5e-2, f"kernel vs reference relative L2 error {rel:.3e}"
    print("KERNEL_OK")
</pallas_src>

<mosaic_0001>
module attributes {stable_mosaic.version = 11 : i64} {
  func.func @_dae_kernel(%arg0: i32, %arg1: memref<1x1x128xf32, #tpu.memory_space<vmem>>, %arg2: memref<10x16x256xbf16, #tpu.memory_space<vmem>>, %arg3: memref<10x16x1xf32, #tpu.memory_space<vmem>>, %arg4: memref<10x19xf32, #tpu.memory_space<smem>>, %arg5: memref<1x1x128xf32, #tpu.memory_space<vmem>>) attributes {dimension_semantics = [#tpu.dimension_semantics<parallel>], iteration_bounds = array<i64: 2>, scalar_prefetch = 0 : i64, scratch_operands = 0 : i64, tpu.core_type = #tpu.core_type<tc>, window_params = [{transform_indices = @transform_0, window_bounds = array<i64: 1, 1, 128>}, {pipeline_mode = #tpu.pipeline_mode<synchronous>, transform_indices = @transform_1, window_bounds = array<i64: 10, 16, 256>}, {pipeline_mode = #tpu.pipeline_mode<synchronous>, transform_indices = @transform_2, window_bounds = array<i64: 10, 16, 1>}, {transform_indices = @transform_3, window_bounds = array<i64: 10, 19>}, {transform_indices = @transform_4, window_bounds = array<i64: 1, 1, 128>}]} {
    %0 = tpu.iota {dimensions = array<i32: 1>} : vector<1x128xi32>
    %c1_i32 = arith.constant 1 : i32
    %1 = vector.broadcast %c1_i32 : i32 to vector<1x128xi32>
    %2 = arith.andi %0, %1 : vector<1x128xi32>
    %c0_i32 = arith.constant 0 : i32
    %3 = vector.broadcast %c0_i32 : i32 to vector<1x128xi32>
    %4 = arith.cmpi eq, %2, %3 : vector<1x128xi32>
    %5 = arith.extui %4 : vector<1x128xi1> to vector<1x128xi32>
    %6 = arith.sitofp %5 : vector<1x128xi32> to vector<1x128xf32>
    %c3_i32 = arith.constant 3 : i32
    %7 = vector.broadcast %c3_i32 : i32 to vector<1x128xi32>
    %8 = arith.andi %0, %7 : vector<1x128xi32>
    %c0_i32_0 = arith.constant 0 : i32
    %9 = vector.broadcast %c0_i32_0 : i32 to vector<1x128xi32>
    %10 = arith.cmpi eq, %8, %9 : vector<1x128xi32>
    %11 = arith.extui %10 : vector<1x128xi1> to vector<1x128xi32>
    %12 = arith.sitofp %11 : vector<1x128xi32> to vector<1x128xf32>
    %c7_i32 = arith.constant 7 : i32
    %13 = vector.broadcast %c7_i32 : i32 to vector<1x128xi32>
    %14 = arith.andi %0, %13 : vector<1x128xi32>
    %c0_i32_1 = arith.constant 0 : i32
    %15 = vector.broadcast %c0_i32_1 : i32 to vector<1x128xi32>
    %16 = arith.cmpi eq, %14, %15 : vector<1x128xi32>
    %17 = arith.extui %16 : vector<1x128xi1> to vector<1x128xi32>
    %18 = arith.sitofp %17 : vector<1x128xi32> to vector<1x128xf32>
    %c15_i32 = arith.constant 15 : i32
    %19 = vector.broadcast %c15_i32 : i32 to vector<1x128xi32>
    %20 = arith.andi %0, %19 : vector<1x128xi32>
    %c0_i32_2 = arith.constant 0 : i32
    %21 = vector.broadcast %c0_i32_2 : i32 to vector<1x128xi32>
    %22 = arith.cmpi eq, %20, %21 : vector<1x128xi32>
    %23 = arith.extui %22 : vector<1x128xi1> to vector<1x128xi32>
    %24 = arith.sitofp %23 : vector<1x128xi32> to vector<1x128xf32>
    %c31_i32 = arith.constant 31 : i32
    %25 = vector.broadcast %c31_i32 : i32 to vector<1x128xi32>
    %26 = arith.andi %0, %25 : vector<1x128xi32>
    %c0_i32_3 = arith.constant 0 : i32
    %27 = vector.broadcast %c0_i32_3 : i32 to vector<1x128xi32>
    %28 = arith.cmpi eq, %26, %27 : vector<1x128xi32>
    %29 = arith.extui %28 : vector<1x128xi1> to vector<1x128xi32>
    %30 = arith.sitofp %29 : vector<1x128xi32> to vector<1x128xf32>
    %c0 = arith.constant 0 : index
    %c0_4 = arith.constant 0 : index
    %c0_5 = arith.constant 0 : index
    %31 = vector.load %arg1[%c0, %c0_4, %c0_5] : memref<1x1x128xf32, #tpu.memory_space<vmem>>, vector<1x1x128xf32>
    %32 = vector.shape_cast %31 : vector<1x1x128xf32> to vector<1x128xf32>
    %cst = arith.constant 0.000000e+00 : f32
    %33 = vector.broadcast %cst : f32 to vector<1x7xf32>
    %cst_6 = arith.constant 0.000000e+00 : f32
    %34 = vector.broadcast %cst_6 : f32 to vector<1x8xf32>
    %35 = tpu.concatenate %33, %32, %34 in 1 : vector<1x7xf32>, vector<1x128xf32>, vector<1x8xf32> -> vector<1x143xf32>
    %36 = vector.extract_strided_slice %35 {offsets = [0, 0], sizes = [1, 128], strides = [1, 1]} : vector<1x143xf32> to vector<1x128xf32>
    %37 = vector.extract_strided_slice %35 {offsets = [0, 1], sizes = [1, 128], strides = [1, 1]} : vector<1x143xf32> to vector<1x128xf32>
    %38 = vector.extract_strided_slice %35 {offsets = [0, 2], sizes = [1, 128], strides = [1, 1]} : vector<1x143xf32> to vector<1x128xf32>
    %39 = vector.extract_strided_slice %35 {offsets = [0, 3], sizes = [1, 128], strides = [1, 1]} : vector<1x143xf32> to vector<1x128xf32>
    %40 = vector.extract_strided_slice %35 {offsets = [0, 4], sizes = [1, 128], strides = [1, 1]} : vector<1x143xf32> to vector<1x128xf32>
    %41 = vector.extract_strided_slice %35 {offsets = [0, 5], sizes = [1, 128], strides = [1, 1]} : vector<1x143xf32> to vector<1x128xf32>
    %42 = vector.extract_strided_slice %35 {offsets = [0, 6], sizes = [1, 128], strides = [1, 1]} : vector<1x143xf32> to vector<1x128xf32>
    %43 = vector.extract_strided_slice %35 {offsets = [0, 7], sizes = [1, 128], strides = [1, 1]} : vector<1x143xf32> to vector<1x128xf32>
    %44 = vector.extract_strided_slice %35 {offsets = [0, 8], sizes = [1, 128], strides = [1, 1]} : vector<1x143xf32> to vector<1x128xf32>
    %45 = vector.extract_strided_slice %35 {offsets = [0, 9], sizes = [1, 128], strides = [1, 1]} : vector<1x143xf32> to vector<1x128xf32>
    %46 = vector.extract_strided_slice %35 {offsets = [0, 10], sizes = [1, 128], strides = [1, 1]} : vector<1x143xf32> to vector<1x128xf32>
    %47 = vector.extract_strided_slice %35 {offsets = [0, 11], sizes = [1, 128], strides = [1, 1]} : vector<1x143xf32> to vector<1x128xf32>
    %48 = vector.extract_strided_slice %35 {offsets = [0, 12], sizes = [1, 128], strides = [1, 1]} : vector<1x143xf32> to vector<1x128xf32>
    %49 = vector.extract_strided_slice %35 {offsets = [0, 13], sizes = [1, 128], strides = [1, 1]} : vector<1x143xf32> to vector<1x128xf32>
    %50 = vector.extract_strided_slice %35 {offsets = [0, 14], sizes = [1, 128], strides = [1, 1]} : vector<1x143xf32> to vector<1x128xf32>
    %51 = vector.extract_strided_slice %35 {offsets = [0, 15], sizes = [1, 128], strides = [1, 1]} : vector<1x143xf32> to vector<1x128xf32>
    %52 = tpu.concatenate %36, %37, %38, %39, %40, %41, %42, %43, %44, %45, %46, %47, %48, %49, %50, %51 in 0 : vector<1x128xf32>, vector<1x128xf32>, vector<1x128xf32>, vector<1x128xf32>, vector<1x128xf32>, vector<1x128xf32>, vector<1x128xf32>, vector<1x128xf32>, vector<1x128xf32>, vector<1x128xf32>, vector<1x128xf32>, vector<1x128xf32>, vector<1x128xf32>, vector<1x128xf32>, vector<1x128xf32>, vector<1x128xf32> -> vector<16x128xf32>
    %c0_7 = arith.constant 0 : index
    %c0_8 = arith.constant 0 : index
    %c0_9 = arith.constant 0 : index
    %53 = vector.load %arg2[%c0_7, %c0_8, %c0_9] : memref<10x16x256xbf16, #tpu.memory_space<vmem>>, vector<1x4x16xbf16>
    %54 = vector.shape_cast %53 : vector<1x4x16xbf16> to vector<4x16xbf16>
    %55 = arith.truncf %52 : vector<16x128xf32> to vector<16x128xbf16>
    %cst_10 = arith.constant dense<0.000000e+00> : vector<4x128xf32>
    %56 = tpu.matmul %54, %55, %cst_10 {dimension_numbers = #tpu.dot_dimension_numbers<[1], [0], [0], [1], [0, 0, 1, 1], [], []>} : vector<4x16xbf16>, vector<16x128xbf16>, vector<4x128xf32> -> vector<4x128xf32>
    %c0_11 = arith.constant 0 : index
    %c0_12 = arith.constant 0 : index
    %c0_13 = arith.constant 0 : index
    %57 = vector.load %arg3[%c0_11, %c0_12, %c0_13] : memref<10x16x1xf32, #tpu.memory_space<vmem>>, vector<1x4x1xf32>
    %58 = vector.shape_cast %57 : vector<1x4x1xf32> to vector<4x1xf32>
    %59 = vector.broadcast %58 : vector<4x1xf32> to vector<4x128xf32>
    %60 = arith.addf %56, %59 : vector<4x128xf32>
    %cst_14 = arith.constant 0.000000e+00 : f32
    %61 = vector.broadcast %cst_14 : f32 to vector<4x128xf32>
    %62 = arith.cmpf ogt, %60, %61 : vector<4x128xf32>
    %cst_15 = arith.constant 0.00999999977 : f32
    %63 = vector.broadcast %cst_15 : f32 to vector<4x128xf32>
    %64 = arith.mulf %63, %60 : vector<4x128xf32>
    %65 = arith.select %62, %60, %64 : vector<4x128xi1>, vector<4x128xf32>
    %cst_16 = arith.constant dense<0.000000e+00> : vector<4xf32>
    %66 = vector.multi_reduction <add>, %65, %cst_16 [1] : vector<4x128xf32> to vector<4xf32>
    %67 = vector.shape_cast %66 : vector<4xf32> to vector<4x1xf32>
    %cst_17 = arith.constant 1.280000e+02 : f32
    %68 = vector.broadcast %cst_17 : f32 to vector<4x1xf32>
    %69 = arith.divf %67, %68 : vector<4x1xf32>
    %cst_18 = arith.constant 0.000000e+00 : f32
    %70 = vector.broadcast %cst_18 : f32 to vector<1x1xf32>
    %71 = vector.extract_strided_slice %69 {offsets = [0, 0], sizes = [3, 1], strides = [1, 1]} : vector<4x1xf32> to vector<3x1xf32>
    %72 = tpu.concatenate %70, %71 in 0 : vector<1x1xf32>, vector<3x1xf32> -> vector<4x1xf32>
    %73 = vector.extract_strided_slice %69 {offsets = [1, 0], sizes = [3, 1], strides = [1, 1]} : vector<4x1xf32> to vector<3x1xf32>
    %74 = tpu.concatenate %73, %70 in 0 : vector<3x1xf32>, vector<1x1xf32> -> vector<4x1xf32>
    %c0_19 = arith.constant 0 : index
    %c0_20 = arith.constant 0 : index
    %75 = memref.load %arg4[%c0_19, %c0_20] : memref<10x19xf32, #tpu.memory_space<smem>>
    %76 = vector.broadcast %75 : f32 to vector<4x1xf32>
    %77 = arith.mulf %76, %72 : vector<4x1xf32>
    %c0_21 = arith.constant 0 : index
    %c1 = arith.constant 1 : index
    %78 = memref.load %arg4[%c0_21, %c1] : memref<10x19xf32, #tpu.memory_space<smem>>
    %79 = vector.broadcast %78 : f32 to vector<4x1xf32>
    %80 = arith.mulf %79, %69 : vector<4x1xf32>
    %81 = arith.addf %77, %80 : vector<4x1xf32>
    %c0_22 = arith.constant 0 : index
    %c2 = arith.constant 2 : index
    %82 = memref.load %arg4[%c0_22, %c2] : memref<10x19xf32, #tpu.memory_space<smem>>
    %83 = vector.broadcast %82 : f32 to vector<4x1xf32>
    %84 = arith.mulf %83, %74 : vector<4x1xf32>
    %85 = arith.addf %81, %84 : vector<4x1xf32>
    %c0_23 = arith.constant 0 : index
    %c3 = arith.constant 3 : index
    %86 = memref.load %arg4[%c0_23, %c3] : memref<10x19xf32, #tpu.memory_space<smem>>
    %87 = vector.broadcast %86 : f32 to vector<4x1xf32>
    %88 = arith.addf %85, %87 : vector<4x1xf32>
    %89 = arith.negf %88 : vector<4x1xf32>
    %90 = math.exp %89 : vector<4x1xf32>
    %cst_24 = arith.constant 1.000000e+00 : f32
    %91 = vector.broadcast %cst_24 : f32 to vector<4x1xf32>
    %92 = arith.addf %91, %90 : vector<4x1xf32>
    %93 = arith.divf %91, %92 : vector<4x1xf32>
    %94 = vector.broadcast %93 : vector<4x1xf32> to vector<4x128xf32>
    %95 = arith.mulf %94, %65 : vector<4x128xf32>
    %cst_25 = arith.constant dense<0.000000e+00> : vector<128xf32>
    %96 = vector.multi_reduction <add>, %95, %cst_25 [0] : vector<4x128xf32> to vector<128xf32>
    %97 = vector.shape_cast %96 : vector<128xf32> to vector<1x128xf32>
    %cst_26 = arith.constant 4.000000e+00 : f32
    %98 = vector.broadcast %cst_26 : f32 to vector<1x128xf32>
    %99 = arith.divf %97, %98 : vector<1x128xf32>
    %cst_27 = arith.constant dense<0xFF800000> : vector<128xf32>
    %100 = vector.multi_reduction <maximumf>, %95, %cst_27 [0] : vector<4x128xf32> to vector<128xf32>
    %101 = vector.shape_cast %100 : vector<128xf32> to vector<1x128xf32>
    %cst_28 = arith.constant 0.000000e+00 : f32
    %102 = vector.broadcast %cst_28 : f32 to vector<1x3xf32>
    %103 = tpu.concatenate %102, %99, %102 in 1 : vector<1x3xf32>, vector<1x128xf32>, vector<1x3xf32> -> vector<1x134xf32>
    %104 = tpu.concatenate %102, %101, %102 in 1 : vector<1x3xf32>, vector<1x128xf32>, vector<1x3xf32> -> vector<1x134xf32>
    %c0_29 = arith.constant 0 : index
    %c4 = arith.constant 4 : index
    %105 = memref.load %arg4[%c0_29, %c4] : memref<10x19xf32, #tpu.memory_space<smem>>
    %106 = vector.extract_strided_slice %103 {offsets = [0, 0], sizes = [1, 128], strides = [1, 1]} : vector<1x134xf32> to vector<1x128xf32>
    %107 = vector.broadcast %105 : f32 to vector<1x128xf32>
    %108 = arith.mulf %107, %106 : vector<1x128xf32>
    %c0_30 = arith.constant 0 : index
    %c5 = arith.constant 5 : index
    %109 = memref.load %arg4[%c0_30, %c5] : memref<10x19xf32, #tpu.memory_space<smem>>
    %110 = vector.extract_strided_slice %103 {offsets = [0, 1], sizes = [1, 128], strides = [1, 1]} : vector<1x134xf32> to vector<1x128xf32>
    %111 = vector.broadcast %109 : f32 to vector<1x128xf32>
    %112 = arith.mulf %111, %110 : vector<1x128xf32>
    %c0_31 = arith.constant 0 : index
    %c6 = arith.constant 6 : index
    %113 = memref.load %arg4[%c0_31, %c6] : memref<10x19xf32, #tpu.memory_space<smem>>
    %114 = vector.extract_strided_slice %103 {offsets = [0, 2], sizes = [1, 128], strides = [1, 1]} : vector<1x134xf32> to vector<1x128xf32>
    %115 = vector.broadcast %113 : f32 to vector<1x128xf32>
    %116 = arith.mulf %115, %114 : vector<1x128xf32>
    %c0_32 = arith.constant 0 : index
    %c7 = arith.constant 7 : index
    %117 = memref.load %arg4[%c0_32, %c7] : memref<10x19xf32, #tpu.memory_space<smem>>
    %118 = vector.extract_strided_slice %103 {offsets = [0, 3], sizes = [1, 128], strides = [1, 1]} : vector<1x134xf32> to vector<1x128xf32>
    %119 = vector.broadcast %117 : f32 to vector<1x128xf32>
    %120 = arith.mulf %119, %118 : vector<1x128xf32>
    %c0_33 = arith.constant 0 : index
    %c8 = arith.constant 8 : index
    %121 = memref.load %arg4[%c0_33, %c8] : memref<10x19xf32, #tpu.memory_space<smem>>
    %122 = vector.extract_strided_slice %103 {offsets = [0, 4], sizes = [1, 128], strides = [1, 1]} : vector<1x134xf32> to vector<1x128xf32>
    %123 = vector.broadcast %121 : f32 to vector<1x128xf32>
    %124 = arith.mulf %123, %122 : vector<1x128xf32>
    %c0_34 = arith.constant 0 : index
    %c9 = arith.constant 9 : index
    %125 = memref.load %arg4[%c0_34, %c9] : memref<10x19xf32, #tpu.memory_space<smem>>
    %126 = vector.extract_strided_slice %103 {offsets = [0, 5], sizes = [1, 128], strides = [1, 1]} : vector<1x134xf32> to vector<1x128xf32>
    %127 = vector.broadcast %125 : f32 to vector<1x128xf32>
    %128 = arith.mulf %127, %126 : vector<1x128xf32>
    %c0_35 = arith.constant 0 : index
    %c10 = arith.constant 10 : index
    %129 = memref.load %arg4[%c0_35, %c10] : memref<10x19xf32, #tpu.memory_space<smem>>
    %130 = vector.extract_strided_slice %103 {offsets = [0, 6], sizes = [1, 128], strides = [1, 1]} : vector<1x134xf32> to vector<1x128xf32>
    %131 = vector.broadcast %129 : f32 to vector<1x128xf32>
    %132 = arith.mulf %131, %130 : vector<1x128xf32>
    %c0_36 = arith.constant 0 : index
    %c11 = arith.constant 11 : index
    %133 = memref.load %arg4[%c0_36, %c11] : memref<10x19xf32, #tpu.memory_space<smem>>
    %134 = vector.extract_strided_slice %104 {offsets = [0, 0], sizes = [1, 128], strides = [1, 1]} : vector<1x134xf32> to vector<1x128xf32>
    %135 = vector.broadcast %133 : f32 to vector<1x128xf32>
    %136 = arith.mulf %135, %134 : vector<1x128xf32>
    %c0_37 = arith.constant 0 : index
    %c12 = arith.constant 12 : index
    %137 = memref.load %arg4[%c0_37, %c12] : memref<10x19xf32, #tpu.memory_space<smem>>
    %138 = vector.extract_strided_slice %104 {offsets = [0, 1], sizes = [1, 128], strides = [1, 1]} : vector<1x134xf32> to vector<1x128xf32>
    %139 = vector.broadcast %137 : f32 to vector<1x128xf32>
    %140 = arith.mulf %139, %138 : vector<1x128xf32>
    %c0_38 = arith.constant 0 : index
    %c13 = arith.constant 13 : index
    %141 = memref.load %arg4[%c0_38, %c13] : memref<10x19xf32, #tpu.memory_space<smem>>
    %142 = vector.extract_strided_slice %104 {offsets = [0, 2], sizes = [1, 128], strides = [1, 1]} : vector<1x134xf32> to vector<1x128xf32>
    %143 = vector.broadcast %141 : f32 to vector<1x128xf32>
    %144 = arith.mulf %143, %142 : vector<1x128xf32>
    %c0_39 = arith.constant 0 : index
    %c14 = arith.constant 14 : index
    %145 = memref.load %arg4[%c0_39, %c14] : memref<10x19xf32, #tpu.memory_space<smem>>
    %146 = vector.extract_strided_slice %104 {offsets = [0, 3], sizes = [1, 128], strides = [1, 1]} : vector<1x134xf32> to vector<1x128xf32>
    %147 = vector.broadcast %145 : f32 to vector<1x128xf32>
    %148 = arith.mulf %147, %146 : vector<1x128xf32>
    %c0_40 = arith.constant 0 : index
    %c15 = arith.constant 15 : index
    %149 = memref.load %arg4[%c0_40, %c15] : memref<10x19xf32, #tpu.memory_space<smem>>
    %150 = vector.extract_strided_slice %104 {offsets = [0, 4], sizes = [1, 128], strides = [1, 1]} : vector<1x134xf32> to vector<1x128xf32>
    %151 = vector.broadcast %149 : f32 to vector<1x128xf32>
    %152 = arith.mulf %151, %150 : vector<1x128xf32>
    %c0_41 = arith.constant 0 : index
    %c16 = arith.constant 16 : index
    %153 = memref.load %arg4[%c0_41, %c16] : memref<10x19xf32, #tpu.memory_space<smem>>
    %154 = vector.extract_strided_slice %104 {offsets = [0, 5], sizes = [1, 128], strides = [1, 1]} : vector<1x134xf32> to vector<1x128xf32>
    %155 = vector.broadcast %153 : f32 to vector<1x128xf32>
    %156 = arith.mulf %155, %154 : vector<1x128xf32>
    %c0_42 = arith.constant 0 : index
    %c17 = arith.constant 17 : index
    %157 = memref.load %arg4[%c0_42, %c17] : memref<10x19xf32, #tpu.memory_space<smem>>
    %158 = vector.extract_strided_slice %104 {offsets = [0, 6], sizes = [1, 128], strides = [1, 1]} : vector<1x134xf32> to vector<1x128xf32>
    %159 = vector.broadcast %157 : f32 to vector<1x128xf32>
    %160 = arith.mulf %159, %158 : vector<1x128xf32>
    %161 = arith.addf %108, %112 : vector<1x128xf32>
    %162 = arith.addf %116, %120 : vector<1x128xf32>
    %163 = arith.addf %124, %128 : vector<1x128xf32>
    %164 = arith.addf %132, %136 : vector<1x128xf32>
    %165 = arith.addf %140, %144 : vector<1x128xf32>
    %166 = arith.addf %148, %152 : vector<1x128xf32>
    %167 = arith.addf %156, %160 : vector<1x128xf32>
    %168 = arith.addf %161, %162 : vector<1x128xf32>
    %169 = arith.addf %163, %164 : vector<1x128xf32>
    %170 = arith.addf %165, %166 : vector<1x128xf32>
    %171 = arith.addf %168, %169 : vector<1x128xf32>
    %172 = arith.addf %170, %167 : vector<1x128xf32>
    %173 = arith.addf %171, %172 : vector<1x128xf32>
    %c0_43 = arith.constant 0 : index
    %c18 = arith.constant 18 : index
    %174 = memref.load %arg4[%c0_43, %c18] : memref<10x19xf32, #tpu.memory_space<smem>>
    %175 = vector.broadcast %174 : f32 to vector<1x128xf32>
    %176 = arith.addf %173, %175 : vector<1x128xf32>
    %177 = arith.negf %176 : vector<1x128xf32>
    %178 = math.exp %177 : vector<1x128xf32>
    %cst_44 = arith.constant 1.000000e+00 : f32
    %179 = vector.broadcast %cst_44 : f32 to vector<1x128xf32>
    %180 = arith.addf %179, %178 : vector<1x128xf32>
    %181 = arith.divf %179, %180 : vector<1x128xf32>
    %182 = vector.broadcast %181 : vector<1x128xf32> to vector<4x128xf32>
    %183 = arith.mulf %182, %95 : vector<4x128xf32>
    %184 = vector.extract_strided_slice %183 {offsets = [0, 1], sizes = [4, 127], strides = [1, 1]} : vector<4x128xf32> to vector<4x127xf32>
    %cst_45 = arith.constant 0.000000e+00 : f32
    %185 = vector.broadcast %cst_45 : f32 to vector<4x1xf32>
    %186 = tpu.concatenate %184, %185 in 1 : vector<4x127xf32>, vector<4x1xf32> -> vector<4x128xf32>
    %187 = arith.maximumf %183, %186 : vector<4x128xf32>
    %188 = vector.broadcast %6 : vector<1x128xf32> to vector<4x128xf32>
    %189 = arith.mulf %187, %188 : vector<4x128xf32>
    %cst_46 = arith.constant 0.000000e+00 : f32
    %190 = vector.broadcast %cst_46 : f32 to vector<4x14xf32>
    %cst_47 = arith.constant 0.000000e+00 : f32
    %191 = vector.broadcast %cst_47 : f32 to vector<4x16xf32>
    %192 = tpu.concatenate %190, %189, %191 in 1 : vector<4x14xf32>, vector<4x128xf32>, vector<4x16xf32> -> vector<4x158xf32>
    %193 = vector.extract_strided_slice %192 {offsets = [0, 0], sizes = [4, 128], strides = [1, 1]} : vector<4x158xf32> to vector<4x128xf32>
    %194 = vector.extract_strided_slice %192 {offsets = [0, 2], sizes = [4, 128], strides = [1, 1]} : vector<4x158xf32> to vector<4x128xf32>
    %195 = vector.extract_strided_slice %192 {offsets = [0, 4], sizes = [4, 128], strides = [1, 1]} : vector<4x158xf32> to vector<4x128xf32>
    %196 = vector.extract_strided_slice %192 {offsets = [0, 6], sizes = [4, 128], strides = [1, 1]} : vector<4x158xf32> to vector<4x128xf32>
    %197 = vector.extract_strided_slice %192 {offsets = [0, 8], sizes = [4, 128], strides = [1, 1]} : vector<4x158xf32> to vector<4x128xf32>
    %198 = vector.extract_strided_slice %192 {offsets = [0, 10], sizes = [4, 128], strides = [1, 1]} : vector<4x158xf32> to vector<4x128xf32>
    %199 = vector.extract_strided_slice %192 {offsets = [0, 12], sizes = [4, 128], strides = [1, 1]} : vector<4x158xf32> to vector<4x128xf32>
    %200 = vector.extract_strided_slice %192 {offsets = [0, 14], sizes = [4, 128], strides = [1, 1]} : vector<4x158xf32> to vector<4x128xf32>
    %201 = vector.extract_strided_slice %192 {offsets = [0, 16], sizes = [4, 128], strides = [1, 1]} : vector<4x158xf32> to vector<4x128xf32>
    %202 = vector.extract_strided_slice %192 {offsets = [0, 18], sizes = [4, 128], strides = [1, 1]} : vector<4x158xf32> to vector<4x128xf32>
    %203 = vector.extract_strided_slice %192 {offsets = [0, 20], sizes = [4, 128], strides = [1, 1]} : vector<4x158xf32> to vector<4x128xf32>
    %204 = vector.extract_strided_slice %192 {offsets = [0, 22], sizes = [4, 128], strides = [1, 1]} : vector<4x158xf32> to vector<4x128xf32>
    %205 = vector.extract_strided_slice %192 {offsets = [0, 24], sizes = [4, 128], strides = [1, 1]} : vector<4x158xf32> to vector<4x128xf32>
    %206 = vector.extract_strided_slice %192 {offsets = [0, 26], sizes = [4, 128], strides = [1, 1]} : vector<4x158xf32> to vector<4x128xf32>
    %207 = vector.extract_strided_slice %192 {offsets = [0, 28], sizes = [4, 128], strides = [1, 1]} : vector<4x158xf32> to vector<4x128xf32>
    %208 = vector.extract_strided_slice %192 {offsets = [0, 30], sizes = [4, 128], strides = [1, 1]} : vector<4x158xf32> to vector<4x128xf32>
    %209 = tpu.concatenate %193, %194, %195, %196, %197, %198, %199, %200, %201, %202, %203, %204, %205, %206, %207, %208 in 0 : vector<4x128xf32>, vector<4x128xf32>, vector<4x128xf32>, vector<4x128xf32>, vector<4x128xf32>, vector<4x128xf32>, vector<4x128xf32>, vector<4x128xf32>, vector<4x128xf32>, vector<4x128xf32>, vector<4x128xf32>, vector<4x128xf32>, vector<4x128xf32>, vector<4x128xf32>, vector<4x128xf32>, vector<4x128xf32> -> vector<64x128xf32>
    %c1_48 = arith.constant 1 : index
    %c0_49 = arith.constant 0 : index
    %c0_50 = arith.constant 0 : index
    %210 = vector.load %arg2[%c1_48, %c0_49, %c0_50] : memref<10x16x256xbf16, #tpu.memory_space<vmem>>, vector<1x8x64xbf16>
    %211 = vector.shape_cast %210 : vector<1x8x64xbf16> to vector<8x64xbf16>
    %212 = arith.truncf %209 : vector<64x128xf32> to vector<64x128xbf16>
    %cst_51 = arith.constant dense<0.000000e+00> : vector<8x128xf32>
    %213 = tpu.matmul %211, %212, %cst_51 {dimension_numbers = #tpu.dot_dimension_numbers<[1], [0], [0], [1], [0, 0, 1, 1], [], []>} : vector<8x64xbf16>, vector<64x128xbf16>, vector<8x128xf32> -> vector<8x128xf32>
    %c1_52 = arith.constant 1 : index
    %c0_53 = arith.constant 0 : index
    %c0_54 = arith.constant 0 : index
    %214 = vector.load %arg3[%c1_52, %c0_53, %c0_54] : memref<10x16x1xf32, #tpu.memory_space<vmem>>, vector<1x8x1xf32>
    %215 = vector.shape_cast %214 : vector<1x8x1xf32> to vector<8x1xf32>
    %216 = vector.broadcast %215 : vector<8x1xf32> to vector<8x128xf32>
    %217 = arith.addf %213, %216 : vector<8x128xf32>
    %cst_55 = arith.constant 0.000000e+00 : f32
    %218 = vector.broadcast %cst_55 : f32 to vector<8x128xf32>
    %219 = arith.cmpf ogt, %217, %218 : vector<8x128xf32>
    %cst_56 = arith.constant 0.00999999977 : f32
    %220 = vector.broadcast %cst_56 : f32 to vector<8x128xf32>
    %221 = arith.mulf %220, %217 : vector<8x128xf32>
    %222 = arith.select %219, %217, %221 : vector<8x128xi1>, vector<8x128xf32>
    %223 = vector.broadcast %6 : vector<1x128xf32> to vector<8x128xf32>
    %224 = arith.mulf %222, %223 : vector<8x128xf32>
    %cst_57 = arith.constant dense<0.000000e+00> : vector<8xf32>
    %225 = vector.multi_reduction <add>, %224, %cst_57 [1] : vector<8x128xf32> to vector<8xf32>
    %226 = vector.shape_cast %225 : vector<8xf32> to vector<8x1xf32>
    %cst_58 = arith.constant 1.562500e-02 : f32
    %227 = vector.broadcast %cst_58 : f32 to vector<8x1xf32>
    %228 = arith.mulf %226, %227 : vector<8x1xf32>
    %cst_59 = arith.constant 0.000000e+00 : f32
    %229 = vector.broadcast %cst_59 : f32 to vector<1x1xf32>
    %230 = vector.extract_strided_slice %228 {offsets = [0, 0], sizes = [7, 1], strides = [1, 1]} : vector<8x1xf32> to vector<7x1xf32>
    %231 = tpu.concatenate %229, %230 in 0 : vector<1x1xf32>, vector<7x1xf32> -> vector<8x1xf32>
    %232 = vector.extract_strided_slice %228 {offsets = [1, 0], sizes = [7, 1], strides = [1, 1]} : vector<8x1xf32> to vector<7x1xf32>
    %233 = tpu.concatenate %232, %229 in 0 : vector<7x1xf32>, vector<1x1xf32> -> vector<8x1xf32>
    %c1_60 = arith.constant 1 : index
    %c0_61 = arith.constant 0 : index
    %234 = memref.load %arg4[%c1_60, %c0_61] : memref<10x19xf32, #tpu.memory_space<smem>>
    %235 = vector.broadcast %234 : f32 to vector<8x1xf32>
    %236 = arith.mulf %235, %231 : vector<8x1xf32>
    %c1_62 = arith.constant 1 : index
    %c1_63 = arith.constant 1 : index
    %237 = memref.load %arg4[%c1_62, %c1_63] : memref<10x19xf32, #tpu.memory_space<smem>>
    %238 = vector.broadcast %237 : f32 to vector<8x1xf32>
    %239 = arith.mulf %238, %228 : vector<8x1xf32>
    %240 = arith.addf %236, %239 : vector<8x1xf32>
    %c1_64 = arith.constant 1 : index
    %c2_65 = arith.constant 2 : index
    %241 = memref.load %arg4[%c1_64, %c2_65] : memref<10x19xf32, #tpu.memory_space<smem>>
    %242 = vector.broadcast %241 : f32 to vector<8x1xf32>
    %243 = arith.mulf %242, %233 : vector<8x1xf32>
    %244 = arith.addf %240, %243 : vector<8x1xf32>
    %c1_66 = arith.constant 1 : index
    %c3_67 = arith.constant 3 : index
    %245 = memref.load %arg4[%c1_66, %c3_67] : memref<10x19xf32, #tpu.memory_space<smem>>
    %246 = vector.broadcast %245 : f32 to vector<8x1xf32>
    %247 = arith.addf %244, %246 : vector<8x1xf32>
    %248 = arith.negf %247 : vector<8x1xf32>
    %249 = math.exp %248 : vector<8x1xf32>
    %cst_68 = arith.constant 1.000000e+00 : f32
    %250 = vector.broadcast %cst_68 : f32 to vector<8x1xf32>
    %251 = arith.addf %250, %249 : vector<8x1xf32>
    %252 = arith.divf %250, %251 : vector<8x1xf32>
    %253 = vector.broadcast %252 : vector<8x1xf32> to vector<8x128xf32>
    %254 = arith.mulf %253, %222 : vector<8x128xf32>
    %cst_69 = arith.constant dense<0.000000e+00> : vector<128xf32>
    %255 = vector.multi_reduction <add>, %254, %cst_69 [0] : vector<8x128xf32> to vector<128xf32>
    %256 = vector.shape_cast %255 : vector<128xf32> to vector<1x128xf32>
    %cst_70 = arith.constant 8.000000e+00 : f32
    %257 = vector.broadcast %cst_70 : f32 to vector<1x128xf32>
    %258 = arith.divf %256, %257 : vector<1x128xf32>
    %cst_71 = arith.constant dense<0xFF800000> : vector<128xf32>
    %259 = vector.multi_reduction <maximumf>, %254, %cst_71 [0] : vector<8x128xf32> to vector<128xf32>
    %260 = vector.shape_cast %259 : vector<128xf32> to vector<1x128xf32>
    %cst_72 = arith.constant 0.000000e+00 : f32
    %261 = vector.broadcast %cst_72 : f32 to vector<1x6xf32>
    %262 = tpu.concatenate %261, %258, %261 in 1 : vector<1x6xf32>, vector<1x128xf32>, vector<1x6xf32> -> vector<1x140xf32>
    %263 = tpu.concatenate %261, %260, %261 in 1 : vector<1x6xf32>, vector<1x128xf32>, vector<1x6xf32> -> vector<1x140xf32>
    %c1_73 = arith.constant 1 : index
    %c4_74 = arith.constant 4 : index
    %264 = memref.load %arg4[%c1_73, %c4_74] : memref<10x19xf32, #tpu.memory_space<smem>>
    %265 = vector.extract_strided_slice %262 {offsets = [0, 0], sizes = [1, 128], strides = [1, 1]} : vector<1x140xf32> to vector<1x128xf32>
    %266 = vector.broadcast %264 : f32 to vector<1x128xf32>
    %267 = arith.mulf %266, %265 : vector<1x128xf32>
    %c1_75 = arith.constant 1 : index
    %c5_76 = arith.constant 5 : index
    %268 = memref.load %arg4[%c1_75, %c5_76] : memref<10x19xf32, #tpu.memory_space<smem>>
    %269 = vector.extract_strided_slice %262 {offsets = [0, 2], sizes = [1, 128], strides = [1, 1]} : vector<1x140xf32> to vector<1x128xf32>
    %270 = vector.broadcast %268 : f32 to vector<1x128xf32>
    %271 = arith.mulf %270, %269 : vector<1x128xf32>
    %c1_77 = arith.constant 1 : index
    %c6_78 = arith.constant 6 : index
    %272 = memref.load %arg4[%c1_77, %c6_78] : memref<10x19xf32, #tpu.memory_space<smem>>
    %273 = vector.extract_strided_slice %262 {offsets = [0, 4], sizes = [1, 128], strides = [1, 1]} : vector<1x140xf32> to vector<1x128xf32>
    %274 = vector.broadcast %272 : f32 to vector<1x128xf32>
    %275 = arith.mulf %274, %273 : vector<1x128xf32>
    %c1_79 = arith.constant 1 : index
    %c7_80 = arith.constant 7 : index
    %276 = memref.load %arg4[%c1_79, %c7_80] : memref<10x19xf32, #tpu.memory_space<smem>>
    %277 = vector.extract_strided_slice %262 {offsets = [0, 6], sizes = [1, 128], strides = [1, 1]} : vector<1x140xf32> to vector<1x128xf32>
    %278 = vector.broadcast %276 : f32 to vector<1x128xf32>
    %279 = arith.mulf %278, %277 : vector<1x128xf32>
    %c1_81 = arith.constant 1 : index
    %c8_82 = arith.constant 8 : index
    %280 = memref.load %arg4[%c1_81, %c8_82] : memref<10x19xf32, #tpu.memory_space<smem>>
    %281 = vector.extract_strided_slice %262 {offsets = [0, 8], sizes = [1, 128], strides = [1, 1]} : vector<1x140xf32> to vector<1x128xf32>
    %282 = vector.broadcast %280 : f32 to vector<1x128xf32>
    %283 = arith.mulf %282, %281 : vector<1x128xf32>
    %c1_83 = arith.constant 1 : index
    %c9_84 = arith.constant 9 : index
    %284 = memref.load %arg4[%c1_83, %c9_84] : memref<10x19xf32, #tpu.memory_space<smem>>
    %285 = vector.extract_strided_slice %262 {offsets = [0, 10], sizes = [1, 128], strides = [1, 1]} : vector<1x140xf32> to vector<1x128xf32>
    %286 = vector.broadcast %284 : f32 to vector<1x128xf32>
    %287 = arith.mulf %286, %285 : vector<1x128xf32>
    %c1_85 = arith.constant 1 : index
    %c10_86 = arith.constant 10 : index
    %288 = memref.load %arg4[%c1_85, %c10_86] : memref<10x19xf32, #tpu.memory_space<smem>>
    %289 = vector.extract_strided_slice %262 {offsets = [0, 12], sizes = [1, 128], strides = [1, 1]} : vector<1x140xf32> to vector<1x128xf32>
    %290 = vector.broadcast %288 : f32 to vector<1x128xf32>
    %291 = arith.mulf %290, %289 : vector<1x128xf32>
    %c1_87 = arith.constant 1 : index
    %c11_88 = arith.constant 11 : index
    %292 = memref.load %arg4[%c1_87, %c11_88] : memref<10x19xf32, #tpu.memory_space<smem>>
    %293 = vector.extract_strided_slice %263 {offsets = [0, 0], sizes = [1, 128], strides = [1, 1]} : vector<1x140xf32> to vector<1x128xf32>
    %294 = vector.broadcast %292 : f32 to vector<1x128xf32>
    %295 = arith.mulf %294, %293 : vector<1x128xf32>
    %c1_89 = arith.constant 1 : index
    %c12_90 = arith.constant 12 : index
    %296 = memref.load %arg4[%c1_89, %c12_90] : memref<10x19xf32, #tpu.memory_space<smem>>
    %297 = vector.extract_strided_slice %263 {offsets = [0, 2], sizes = [1, 128], strides = [1, 1]} : vector<1x140xf32> to vector<1x128xf32>
    %298 = vector.broadcast %296 : f32 to vector<1x128xf32>
    %299 = arith.mulf %298, %297 : vector<1x128xf32>
    %c1_91 = arith.constant 1 : index
    %c13_92 = arith.constant 13 : index
    %300 = memref.load %arg4[%c1_91, %c13_92] : memref<10x19xf32, #tpu.memory_space<smem>>
    %301 = vector.extract_strided_slice %263 {offsets = [0, 4], sizes = [1, 128], strides = [1, 1]} : vector<1x140xf32> to vector<1x128xf32>
    %302 = vector.broadcast %300 : f32 to vector<1x128xf32>
    %303 = arith.mulf %302, %301 : vector<1x128xf32>
    %c1_93 = arith.constant 1 : index
    %c14_94 = arith.constant 14 : index
    %304 = memref.load %arg4[%c1_93, %c14_94] : memref<10x19xf32, #tpu.memory_space<smem>>
    %305 = vector.extract_strided_slice %263 {offsets = [0, 6], sizes = [1, 128], strides = [1, 1]} : vector<1x140xf32> to vector<1x128xf32>
    %306 = vector.broadcast %304 : f32 to vector<1x128xf32>
    %307 = arith.mulf %306, %305 : vector<1x128xf32>
    %c1_95 = arith.constant 1 : index
    %c15_96 = arith.constant 15 : index
    %308 = memref.load %arg4[%c1_95, %c15_96] : memref<10x19xf32, #tpu.memory_space<smem>>
    %309 = vector.extract_strided_slice %263 {offsets = [0, 8], sizes = [1, 128], strides = [1, 1]} : vector<1x140xf32> to vector<1x128xf32>
    %310 = vector.broadcast %308 : f32 to vector<1x128xf32>
    %311 = arith.mulf %310, %309 : vector<1x128xf32>
    %c1_97 = arith.constant 1 : index
    %c16_98 = arith.constant 16 : index
    %312 = memref.load %arg4[%c1_97, %c16_98] : memref<10x19xf32, #tpu.memory_space<smem>>
    %313 = vector.extract_strided_slice %263 {offsets = [0, 10], sizes = [1, 128], strides = [1, 1]} : vector<1x140xf32> to vector<1x128xf32>
    %314 = vector.broadcast %312 : f32 to vector<1x128xf32>
    %315 = arith.mulf %314, %313 : vector<1x128xf32>
    %c1_99 = arith.constant 1 : index
    %c17_100 = arith.constant 17 : index
    %316 = memref.load %arg4[%c1_99, %c17_100] : memref<10x19xf32, #tpu.memory_space<smem>>
    %317 = vector.extract_strided_slice %263 {offsets = [0, 12], sizes = [1, 128], strides = [1, 1]} : vector<1x140xf32> to vector<1x128xf32>
    %318 = vector.broadcast %316 : f32 to vector<1x128xf32>
    %319 = arith.mulf %318, %317 : vector<1x128xf32>
    %320 = arith.addf %267, %271 : vector<1x128xf32>
    %321 = arith.addf %275, %279 : vector<1x128xf32>
    %322 = arith.addf %283, %287 : vector<1x128xf32>
    %323 = arith.addf %291, %295 : vector<1x128xf32>
    %324 = arith.addf %299, %303 : vector<1x128xf32>
    %325 = arith.addf %307, %311 : vector<1x128xf32>
    %326 = arith.addf %315, %319 : vector<1x128xf32>
    %327 = arith.addf %320, %321 : vector<1x128xf32>
    %328 = arith.addf %322, %323 : vector<1x128xf32>
    %329 = arith.addf %324, %325 : vector<1x128xf32>
    %330 = arith.addf %327, %328 : vector<1x128xf32>
    %331 = arith.addf %329, %326 : vector<1x128xf32>
    %332 = arith.addf %330, %331 : vector<1x128xf32>
    %c1_101 = arith.constant 1 : index
    %c18_102 = arith.constant 18 : index
    %333 = memref.load %arg4[%c1_101, %c18_102] : memref<10x19xf32, #tpu.memory_space<smem>>
    %334 = vector.broadcast %333 : f32 to vector<1x128xf32>
    %335 = arith.addf %332, %334 : vector<1x128xf32>
    %336 = arith.negf %335 : vector<1x128xf32>
    %337 = math.exp %336 : vector<1x128xf32>
    %cst_103 = arith.constant 1.000000e+00 : f32
    %338 = vector.broadcast %cst_103 : f32 to vector<1x128xf32>
    %339 = arith.addf %338, %337 : vector<1x128xf32>
    %340 = arith.divf %338, %339 : vector<1x128xf32>
    %341 = vector.broadcast %340 : vector<1x128xf32> to vector<8x128xf32>
    %342 = arith.mulf %341, %254 : vector<8x128xf32>
    %343 = vector.extract_strided_slice %342 {offsets = [0, 2], sizes = [8, 126], strides = [1, 1]} : vector<8x128xf32> to vector<8x126xf32>
    %cst_104 = arith.constant 0.000000e+00 : f32
    %344 = vector.broadcast %cst_104 : f32 to vector<8x2xf32>
    %345 = tpu.concatenate %343, %344 in 1 : vector<8x126xf32>, vector<8x2xf32> -> vector<8x128xf32>
    %346 = arith.maximumf %342, %345 : vector<8x128xf32>
    %347 = vector.broadcast %12 : vector<1x128xf32> to vector<8x128xf32>
    %348 = arith.mulf %346, %347 : vector<8x128xf32>
    %cst_105 = arith.constant 0.000000e+00 : f32
    %349 = vector.broadcast %cst_105 : f32 to vector<8x28xf32>
    %cst_106 = arith.constant 0.000000e+00 : f32
    %350 = vector.broadcast %cst_106 : f32 to vector<8x32xf32>
    %351 = tpu.concatenate %349, %348, %350 in 1 : vector<8x28xf32>, vector<8x128xf32>, vector<8x32xf32> -> vector<8x188xf32>
    %352 = vector.extract_strided_slice %351 {offsets = [0, 0], sizes = [8, 128], strides = [1, 1]} : vector<8x188xf32> to vector<8x128xf32>
    %353 = vector.extract_strided_slice %351 {offsets = [0, 4], sizes = [8, 128], strides = [1, 1]} : vector<8x188xf32> to vector<8x128xf32>
    %354 = vector.extract_strided_slice %351 {offsets = [0, 8], sizes = [8, 128], strides = [1, 1]} : vector<8x188xf32> to vector<8x128xf32>
    %355 = vector.extract_strided_slice %351 {offsets = [0, 12], sizes = [8, 128], strides = [1, 1]} : vector<8x188xf32> to vector<8x128xf32>
    %356 = vector.extract_strided_slice %351 {offsets = [0, 16], sizes = [8, 128], strides = [1, 1]} : vector<8x188xf32> to vector<8x128xf32>
    %357 = vector.extract_strided_slice %351 {offsets = [0, 20], sizes = [8, 128], strides = [1, 1]} : vector<8x188xf32> to vector<8x128xf32>
    %358 = vector.extract_strided_slice %351 {offsets = [0, 24], sizes = [8, 128], strides = [1, 1]} : vector<8x188xf32> to vector<8x128xf32>
    %359 = vector.extract_strided_slice %351 {offsets = [0, 28], sizes = [8, 128], strides = [1, 1]} : vector<8x188xf32> to vector<8x128xf32>
    %360 = vector.extract_strided_slice %351 {offsets = [0, 32], sizes = [8, 128], strides = [1, 1]} : vector<8x188xf32> to vector<8x128xf32>
    %361 = vector.extract_strided_slice %351 {offsets = [0, 36], sizes = [8, 128], strides = [1, 1]} : vector<8x188xf32> to vector<8x128xf32>
    %362 = vector.extract_strided_slice %351 {offsets = [0, 40], sizes = [8, 128], strides = [1, 1]} : vector<8x188xf32> to vector<8x128xf32>
    %363 = vector.extract_strided_slice %351 {offsets = [0, 44], sizes = [8, 128], strides = [1, 1]} : vector<8x188xf32> to vector<8x128xf32>
    %364 = vector.extract_strided_slice %351 {offsets = [0, 48], sizes = [8, 128], strides = [1, 1]} : vector<8x188xf32> to vector<8x128xf32>
    %365 = vector.extract_strided_slice %351 {offsets = [0, 52], sizes = [8, 128], strides = [1, 1]} : vector<8x188xf32> to vector<8x128xf32>
    %366 = vector.extract_strided_slice %351 {offsets = [0, 56], sizes = [8, 128], strides = [1, 1]} : vector<8x188xf32> to vector<8x128xf32>
    %367 = vector.extract_strided_slice %351 {offsets = [0, 60], sizes = [8, 128], strides = [1, 1]} : vector<8x188xf32> to vector<8x128xf32>
    %368 = tpu.concatenate %352, %353, %354, %355, %356, %357, %358, %359, %360, %361, %362, %363, %364, %365, %366, %367 in 0 : vector<8x128xf32>, vector<8x128xf32>, vector<8x128xf32>, vector<8x128xf32>, vector<8x128xf32>, vector<8x128xf32>, vector<8x128xf32>, vector<8x128xf32>, vector<8x128xf32>, vector<8x128xf32>, vector<8x128xf32>, vector<8x128xf32>, vector<8x128xf32>, vector<8x128xf32>, vector<8x128xf32>, vector<8x128xf32> -> vector<128x128xf32>
    %c2_107 = arith.constant 2 : index
    %c0_108 = arith.constant 0 : index
    %c0_109 = arith.constant 0 : index
    %369 = vector.load %arg2[%c2_107, %c0_108, %c0_109] : memref<10x16x256xbf16, #tpu.memory_space<vmem>>, vector<1x16x128xbf16>
    %370 = vector.shape_cast %369 : vector<1x16x128xbf16> to vector<16x128xbf16>
    %371 = arith.truncf %368 : vector<128x128xf32> to vector<128x128xbf16>
    %cst_110 = arith.constant dense<0.000000e+00> : vector<16x128xf32>
    %372 = tpu.matmul %370, %371, %cst_110 {dimension_numbers = #tpu.dot_dimension_numbers<[1], [0], [0], [1], [0, 0, 1, 1], [], []>} : vector<16x128xbf16>, vector<128x128xbf16>, vector<16x128xf32> -> vector<16x128xf32>
    %c2_111 = arith.constant 2 : index
    %c0_112 = arith.constant 0 : index
    %c0_113 = arith.constant 0 : index
    %373 = vector.load %arg3[%c2_111, %c0_112, %c0_113] : memref<10x16x1xf32, #tpu.memory_space<vmem>>, vector<1x16x1xf32>
    %374 = vector.shape_cast %373 : vector<1x16x1xf32> to vector<16x1xf32>
    %375 = vector.broadcast %374 : vector<16x1xf32> to vector<16x128xf32>
    %376 = arith.addf %372, %375 : vector<16x128xf32>
    %cst_114 = arith.constant 0.000000e+00 : f32
    %377 = vector.broadcast %cst_114 : f32 to vector<16x128xf32>
    %378 = arith.cmpf ogt, %376, %377 : vector<16x128xf32>
    %cst_115 = arith.constant 0.00999999977 : f32
    %379 = vector.broadcast %cst_115 : f32 to vector<16x128xf32>
    %380 = arith.mulf %379, %376 : vector<16x128xf32>
    %381 = arith.select %378, %376, %380 : vector<16x128xi1>, vector<16x128xf32>
    %382 = vector.broadcast %12 : vector<1x128xf32> to vector<16x128xf32>
    %383 = arith.mulf %381, %382 : vector<16x128xf32>
    %cst_116 = arith.constant dense<0.000000e+00> : vector<16xf32>
    %384 = vector.multi_reduction <add>, %383, %cst_116 [1] : vector<16x128xf32> to vector<16xf32>
    %385 = vector.shape_cast %384 : vector<16xf32> to vector<16x1xf32>
    %cst_117 = arith.constant 3.125000e-02 : f32
    %386 = vector.broadcast %cst_117 : f32 to vector<16x1xf32>
    %387 = arith.mulf %385, %386 : vector<16x1xf32>
    %cst_118 = arith.constant 0.000000e+00 : f32
    %388 = vector.broadcast %cst_118 : f32 to vector<1x1xf32>
    %389 = vector.extract_strided_slice %387 {offsets = [0, 0], sizes = [15, 1], strides = [1, 1]} : vector<16x1xf32> to vector<15x1xf32>
    %390 = tpu.concatenate %388, %389 in 0 : vector<1x1xf32>, vector<15x1xf32> -> vector<16x1xf32>
    %391 = vector.extract_strided_slice %387 {offsets = [1, 0], sizes = [15, 1], strides = [1, 1]} : vector<16x1xf32> to vector<15x1xf32>
    %392 = tpu.concatenate %391, %388 in 0 : vector<15x1xf32>, vector<1x1xf32> -> vector<16x1xf32>
    %c2_119 = arith.constant 2 : index
    %c0_120 = arith.constant 0 : index
    %393 = memref.load %arg4[%c2_119, %c0_120] : memref<10x19xf32, #tpu.memory_space<smem>>
    %394 = vector.broadcast %393 : f32 to vector<16x1xf32>
    %395 = arith.mulf %394, %390 : vector<16x1xf32>
    %c2_121 = arith.constant 2 : index
    %c1_122 = arith.constant 1 : index
    %396 = memref.load %arg4[%c2_121, %c1_122] : memref<10x19xf32, #tpu.memory_space<smem>>
    %397 = vector.broadcast %396 : f32 to vector<16x1xf32>
    %398 = arith.mulf %397, %387 : vector<16x1xf32>
    %399 = arith.addf %395, %398 : vector<16x1xf32>
    %c2_123 = arith.constant 2 : index
    %c2_124 = arith.constant 2 : index
    %400 = memref.load %arg4[%c2_123, %c2_124] : memref<10x19xf32, #tpu.memory_space<smem>>
    %401 = vector.broadcast %400 : f32 to vector<16x1xf32>
    %402 = arith.mulf %401, %392 : vector<16x1xf32>
    %403 = arith.addf %399, %402 : vector<16x1xf32>
    %c2_125 = arith.constant 2 : index
    %c3_126 = arith.constant 3 : index
    %404 = memref.load %arg4[%c2_125, %c3_126] : memref<10x19xf32, #tpu.memory_space<smem>>
    %405 = vector.broadcast %404 : f32 to vector<16x1xf32>
    %406 = arith.addf %403, %405 : vector<16x1xf32>
    %407 = arith.negf %406 : vector<16x1xf32>
    %408 = math.exp %407 : vector<16x1xf32>
    %cst_127 = arith.constant 1.000000e+00 : f32
    %409 = vector.broadcast %cst_127 : f32 to vector<16x1xf32>
    %410 = arith.addf %409, %408 : vector<16x1xf32>
    %411 = arith.divf %409, %410 : vector<16x1xf32>
    %412 = vector.broadcast %411 : vector<16x1xf32> to vector<16x128xf32>
    %413 = arith.mulf %412, %381 : vector<16x128xf32>
    %cst_128 = arith.constant dense<0.000000e+00> : vector<128xf32>
    %414 = vector.multi_reduction <add>, %413, %cst_128 [0] : vector<16x128xf32> to vector<128xf32>
    %415 = vector.shape_cast %414 : vector<128xf32> to vector<1x128xf32>
    %cst_129 = arith.constant 1.600000e+01 : f32
    %416 = vector.broadcast %cst_129 : f32 to vector<1x128xf32>
    %417 = arith.divf %415, %416 : vector<1x128xf32>
    %cst_130 = arith.constant dense<0xFF800000> : vector<128xf32>
    %418 = vector.multi_reduction <maximumf>, %413, %cst_130 [0] : vector<16x128xf32> to vector<128xf32>
    %419 = vector.shape_cast %418 : vector<128xf32> to vector<1x128xf32>
    %cst_131 = arith.constant 0.000000e+00 : f32
    %420 = vector.broadcast %cst_131 : f32 to vector<1x12xf32>
    %421 = tpu.concatenate %420, %417, %420 in 1 : vector<1x12xf32>, vector<1x128xf32>, vector<1x12xf32> -> vector<1x152xf32>
    %422 = tpu.concatenate %420, %419, %420 in 1 : vector<1x12xf32>, vector<1x128xf32>, vector<1x12xf32> -> vector<1x152xf32>
    %c2_132 = arith.constant 2 : index
    %c4_133 = arith.constant 4 : index
    %423 = memref.load %arg4[%c2_132, %c4_133] : memref<10x19xf32, #tpu.memory_space<smem>>
    %424 = vector.extract_strided_slice %421 {offsets = [0, 0], sizes = [1, 128], strides = [1, 1]} : vector<1x152xf32> to vector<1x128xf32>
    %425 = vector.broadcast %423 : f32 to vector<1x128xf32>
    %426 = arith.mulf %425, %424 : vector<1x128xf32>
    %c2_134 = arith.constant 2 : index
    %c5_135 = arith.constant 5 : index
    %427 = memref.load %arg4[%c2_134, %c5_135] : memref<10x19xf32, #tpu.memory_space<smem>>
    %428 = vector.extract_strided_slice %421 {offsets = [0, 4], sizes = [1, 128], strides = [1, 1]} : vector<1x152xf32> to vector<1x128xf32>
    %429 = vector.broadcast %427 : f32 to vector<1x128xf32>
    %430 = arith.mulf %429, %428 : vector<1x128xf32>
    %c2_136 = arith.constant 2 : index
    %c6_137 = arith.constant 6 : index
    %431 = memref.load %arg4[%c2_136, %c6_137] : memref<10x19xf32, #tpu.memory_space<smem>>
    %432 = vector.extract_strided_slice %421 {offsets = [0, 8], sizes = [1, 128], strides = [1, 1]} : vector<1x152xf32> to vector<1x128xf32>
    %433 = vector.broadcast %431 : f32 to vector<1x128xf32>
    %434 = arith.mulf %433, %432 : vector<1x128xf32>
    %c2_138 = arith.constant 2 : index
    %c7_139 = arith.constant 7 : index
    %435 = memref.load %arg4[%c2_138, %c7_139] : memref<10x19xf32, #tpu.memory_space<smem>>
    %436 = vector.extract_strided_slice %421 {offsets = [0, 12], sizes = [1, 128], strides = [1, 1]} : vector<1x152xf32> to vector<1x128xf32>
    %437 = vector.broadcast %435 : f32 to vector<1x128xf32>
    %438 = arith.mulf %437, %436 : vector<1x128xf32>
    %c2_140 = arith.constant 2 : index
    %c8_141 = arith.constant 8 : index
    %439 = memref.load %arg4[%c2_140, %c8_141] : memref<10x19xf32, #tpu.memory_space<smem>>
    %440 = vector.extract_strided_slice %421 {offsets = [0, 16], sizes = [1, 128], strides = [1, 1]} : vector<1x152xf32> to vector<1x128xf32>
    %441 = vector.broadcast %439 : f32 to vector<1x128xf32>
    %442 = arith.mulf %441, %440 : vector<1x128xf32>
    %c2_142 = arith.constant 2 : index
    %c9_143 = arith.constant 9 : index
    %443 = memref.load %arg4[%c2_142, %c9_143] : memref<10x19xf32, #tpu.memory_space<smem>>
    %444 = vector.extract_strided_slice %421 {offsets = [0, 20], sizes = [1, 128], strides = [1, 1]} : vector<1x152xf32> to vector<1x128xf32>
    %445 = vector.broadcast %443 : f32 to vector<1x128xf32>
    %446 = arith.mulf %445, %444 : vector<1x128xf32>
    %c2_144 = arith.constant 2 : index
    %c10_145 = arith.constant 10 : index
    %447 = memref.load %arg4[%c2_144, %c10_145] : memref<10x19xf32, #tpu.memory_space<smem>>
    %448 = vector.extract_strided_slice %421 {offsets = [0, 24], sizes = [1, 128], strides = [1, 1]} : vector<1x152xf32> to vector<1x128xf32>
    %449 = vector.broadcast %447 : f32 to vector<1x128xf32>
    %450 = arith.mulf %449, %448 : vector<1x128xf32>
    %c2_146 = arith.constant 2 : index
    %c11_147 = arith.constant 11 : index
    %451 = memref.load %arg4[%c2_146, %c11_147] : memref<10x19xf32, #tpu.memory_space<smem>>
    %452 = vector.extract_strided_slice %422 {offsets = [0, 0], sizes = [1, 128], strides = [1, 1]} : vector<1x152xf32> to vector<1x128xf32>
    %453 = vector.broadcast %451 : f32 to vector<1x128xf32>
    %454 = arith.mulf %453, %452 : vector<1x128xf32>
    %c2_148 = arith.constant 2 : index
    %c12_149 = arith.constant 12 : index
    %455 = memref.load %arg4[%c2_148, %c12_149] : memref<10x19xf32, #tpu.memory_space<smem>>
    %456 = vector.extract_strided_slice %422 {offsets = [0, 4], sizes = [1, 128], strides = [1, 1]} : vector<1x152xf32> to vector<1x128xf32>
    %457 = vector.broadcast %455 : f32 to vector<1x128xf32>
    %458 = arith.mulf %457, %456 : vector<1x128xf32>
    %c2_150 = arith.constant 2 : index
    %c13_151 = arith.constant 13 : index
    %459 = memref.load %arg4[%c2_150, %c13_151] : memref<10x19xf32, #tpu.memory_space<smem>>
    %460 = vector.extract_strided_slice %422 {offsets = [0, 8], sizes = [1, 128], strides = [1, 1]} : vector<1x152xf32> to vector<1x128xf32>
    %461 = vector.broadcast %459 : f32 to vector<1x128xf32>
    %462 = arith.mulf %461, %460 : vector<1x128xf32>
    %c2_152 = arith.constant 2 : index
    %c14_153 = arith.constant 14 : index
    %463 = memref.load %arg4[%c2_152, %c14_153] : memref<10x19xf32, #tpu.memory_space<smem>>
    %464 = vector.extract_strided_slice %422 {offsets = [0, 12], sizes = [1, 128], strides = [1, 1]} : vector<1x152xf32> to vector<1x128xf32>
    %465 = vector.broadcast %463 : f32 to vector<1x128xf32>
    %466 = arith.mulf %465, %464 : vector<1x128xf32>
    %c2_154 = arith.constant 2 : index
    %c15_155 = arith.constant 15 : index
    %467 = memref.load %arg4[%c2_154, %c15_155] : memref<10x19xf32, #tpu.memory_space<smem>>
    %468 = vector.extract_strided_slice %422 {offsets = [0, 16], sizes = [1, 128], strides = [1, 1]} : vector<1x152xf32> to vector<1x128xf32>
    %469 = vector.broadcast %467 : f32 to vector<1x128xf32>
    %470 = arith.mulf %469, %468 : vector<1x128xf32>
    %c2_156 = arith.constant 2 : index
    %c16_157 = arith.constant 16 : index
    %471 = memref.load %arg4[%c2_156, %c16_157] : memref<10x19xf32, #tpu.memory_space<smem>>
    %472 = vector.extract_strided_slice %422 {offsets = [0, 20], sizes = [1, 128], strides = [1, 1]} : vector<1x152xf32> to vector<1x128xf32>
    %473 = vector.broadcast %471 : f32 to vector<1x128xf32>
    %474 = arith.mulf %473, %472 : vector<1x128xf32>
    %c2_158 = arith.constant 2 : index
    %c17_159 = arith.constant 17 : index
    %475 = memref.load %arg4[%c2_158, %c17_159] : memref<10x19xf32, #tpu.memory_space<smem>>
    %476 = vector.extract_strided_slice %422 {offsets = [0, 24], sizes = [1, 128], strides = [1, 1]} : vector<1x152xf32> to vector<1x128xf32>
    %477 = vector.broadcast %475 : f32 to vector<1x128xf32>
    %478 = arith.mulf %477, %476 : vector<1x128xf32>
    %479 = arith.addf %426, %430 : vector<1x128xf32>
    %480 = arith.addf %434, %438 : vector<1x128xf32>
    %481 = arith.addf %442, %446 : vector<1x128xf32>
    %482 = arith.addf %450, %454 : vector<1x128xf32>
    %483 = arith.addf %458, %462 : vector<1x128xf32>
    %484 = arith.addf %466, %470 : vector<1x128xf32>
    %485 = arith.addf %474, %478 : vector<1x128xf32>
    %486 = arith.addf %479, %480 : vector<1x128xf32>
    %487 = arith.addf %481, %482 : vector<1x128xf32>
    %488 = arith.addf %483, %484 : vector<1x128xf32>
    %489 = arith.addf %486, %487 : vector<1x128xf32>
    %490 = arith.addf %488, %485 : vector<1x128xf32>
    %491 = arith.addf %489, %490 : vector<1x128xf32>
    %c2_160 = arith.constant 2 : index
    %c18_161 = arith.constant 18 : index
    %492 = memref.load %arg4[%c2_160, %c18_161] : memref<10x19xf32, #tpu.memory_space<smem>>
    %493 = vector.broadcast %492 : f32 to vector<1x128xf32>
    %494 = arith.addf %491, %493 : vector<1x128xf32>
    %495 = arith.negf %494 : vector<1x128xf32>
    %496 = math.exp %495 : vector<1x128xf32>
    %cst_162 = arith.constant 1.000000e+00 : f32
    %497 = vector.broadcast %cst_162 : f32 to vector<1x128xf32>
    %498 = arith.addf %497, %496 : vector<1x128xf32>
    %499 = arith.divf %497, %498 : vector<1x128xf32>
    %500 = vector.broadcast %499 : vector<1x128xf32> to vector<16x128xf32>
    %501 = arith.mulf %500, %413 : vector<16x128xf32>
    %502 = vector.extract_strided_slice %501 {offsets = [0, 4], sizes = [16, 124], strides = [1, 1]} : vector<16x128xf32> to vector<16x124xf32>
    %cst_163 = arith.constant 0.000000e+00 : f32
    %503 = vector.broadcast %cst_163 : f32 to vector<16x4xf32>
    %504 = tpu.concatenate %502, %503 in 1 : vector<16x124xf32>, vector<16x4xf32> -> vector<16x128xf32>
    %505 = arith.maximumf %501, %504 : vector<16x128xf32>
    %506 = vector.broadcast %18 : vector<1x128xf32> to vector<16x128xf32>
    %507 = arith.mulf %505, %506 : vector<16x128xf32>
    %cst_164 = arith.constant 0.000000e+00 : f32
    %508 = vector.broadcast %cst_164 : f32 to vector<16x56xf32>
    %cst_165 = arith.constant 0.000000e+00 : f32
    %509 = vector.broadcast %cst_165 : f32 to vector<16x64xf32>
    %510 = tpu.concatenate %508, %507, %509 in 1 : vector<16x56xf32>, vector<16x128xf32>, vector<16x64xf32> -> vector<16x248xf32>
    %511 = vector.extract_strided_slice %510 {offsets = [0, 0], sizes = [16, 128], strides = [1, 1]} : vector<16x248xf32> to vector<16x128xf32>
    %512 = vector.extract_strided_slice %510 {offsets = [0, 8], sizes = [16, 128], strides = [1, 1]} : vector<16x248xf32> to vector<16x128xf32>
    %513 = vector.extract_strided_slice %510 {offsets = [0, 16], sizes = [16, 128], strides = [1, 1]} : vector<16x248xf32> to vector<16x128xf32>
    %514 = vector.extract_strided_slice %510 {offsets = [0, 24], sizes = [16, 128], strides = [1, 1]} : vector<16x248xf32> to vector<16x128xf32>
    %515 = vector.extract_strided_slice %510 {offsets = [0, 32], sizes = [16, 128], strides = [1, 1]} : vector<16x248xf32> to vector<16x128xf32>
    %516 = vector.extract_strided_slice %510 {offsets = [0, 40], sizes = [16, 128], strides = [1, 1]} : vector<16x248xf32> to vector<16x128xf32>
    %517 = vector.extract_strided_slice %510 {offsets = [0, 48], sizes = [16, 128], strides = [1, 1]} : vector<16x248xf32> to vector<16x128xf32>
    %518 = vector.extract_strided_slice %510 {offsets = [0, 56], sizes = [16, 128], strides = [1, 1]} : vector<16x248xf32> to vector<16x128xf32>
    %519 = vector.extract_strided_slice %510 {offsets = [0, 64], sizes = [16, 128], strides = [1, 1]} : vector<16x248xf32> to vector<16x128xf32>
    %520 = vector.extract_strided_slice %510 {offsets = [0, 72], sizes = [16, 128], strides = [1, 1]} : vector<16x248xf32> to vector<16x128xf32>
    %521 = vector.extract_strided_slice %510 {offsets = [0, 80], sizes = [16, 128], strides = [1, 1]} : vector<16x248xf32> to vector<16x128xf32>
    %522 = vector.extract_strided_slice %510 {offsets = [0, 88], sizes = [16, 128], strides = [1, 1]} : vector<16x248xf32> to vector<16x128xf32>
    %523 = vector.extract_strided_slice %510 {offsets = [0, 96], sizes = [16, 128], strides = [1, 1]} : vector<16x248xf32> to vector<16x128xf32>
    %524 = vector.extract_strided_slice %510 {offsets = [0, 104], sizes = [16, 128], strides = [1, 1]} : vector<16x248xf32> to vector<16x128xf32>
    %525 = vector.extract_strided_slice %510 {offsets = [0, 112], sizes = [16, 128], strides = [1, 1]} : vector<16x248xf32> to vector<16x128xf32>
    %526 = vector.extract_strided_slice %510 {offsets = [0, 120], sizes = [16, 128], strides = [1, 1]} : vector<16x248xf32> to vector<16x128xf32>
    %527 = tpu.concatenate %511, %512, %513, %514, %515, %516, %517, %518, %519, %520, %521, %522, %523, %524, %525, %526 in 0 : vector<16x128xf32>, vector<16x128xf32>, vector<16x128xf32>, vector<16x128xf32>, vector<16x128xf32>, vector<16x128xf32>, vector<16x128xf32>, vector<16x128xf32>, vector<16x128xf32>, vector<16x128xf32>, vector<16x128xf32>, vector<16x128xf32>, vector<16x128xf32>, vector<16x128xf32>, vector<16x128xf32>, vector<16x128xf32> -> vector<256x128xf32>
    %c3_166 = arith.constant 3 : index
    %c0_167 = arith.constant 0 : index
    %c0_168 = arith.constant 0 : index
    %528 = vector.load %arg2[%c3_166, %c0_167, %c0_168] : memref<10x16x256xbf16, #tpu.memory_space<vmem>>, vector<1x16x256xbf16>
    %529 = vector.shape_cast %528 : vector<1x16x256xbf16> to vector<16x256xbf16>
    %530 = arith.truncf %527 : vector<256x128xf32> to vector<256x128xbf16>
    %cst_169 = arith.constant dense<0.000000e+00> : vector<16x128xf32>
    %531 = tpu.matmul %529, %530, %cst_169 {dimension_numbers = #tpu.dot_dimension_numbers<[1], [0], [0], [1], [0, 0, 1, 1], [], []>} : vector<16x256xbf16>, vector<256x128xbf16>, vector<16x128xf32> -> vector<16x128xf32>
    %c3_170 = arith.constant 3 : index
    %c0_171 = arith.constant 0 : index
    %c0_172 = arith.constant 0 : index
    %532 = vector.load %arg3[%c3_170, %c0_171, %c0_172] : memref<10x16x1xf32, #tpu.memory_space<vmem>>, vector<1x16x1xf32>
    %533 = vector.shape_cast %532 : vector<1x16x1xf32> to vector<16x1xf32>
    %534 = vector.broadcast %533 : vector<16x1xf32> to vector<16x128xf32>
    %535 = arith.addf %531, %534 : vector<16x128xf32>
    %cst_173 = arith.constant 0.000000e+00 : f32
    %536 = vector.broadcast %cst_173 : f32 to vector<16x128xf32>
    %537 = arith.cmpf ogt, %535, %536 : vector<16x128xf32>
    %cst_174 = arith.constant 0.00999999977 : f32
    %538 = vector.broadcast %cst_174 : f32 to vector<16x128xf32>
    %539 = arith.mulf %538, %535 : vector<16x128xf32>
    %540 = arith.select %537, %535, %539 : vector<16x128xi1>, vector<16x128xf32>
    %541 = vector.broadcast %18 : vector<1x128xf32> to vector<16x128xf32>
    %542 = arith.mulf %540, %541 : vector<16x128xf32>
    %cst_175 = arith.constant dense<0.000000e+00> : vector<16xf32>
    %543 = vector.multi_reduction <add>, %542, %cst_175 [1] : vector<16x128xf32> to vector<16xf32>
    %544 = vector.shape_cast %543 : vector<16xf32> to vector<16x1xf32>
    %cst_176 = arith.constant 6.250000e-02 : f32
    %545 = vector.broadcast %cst_176 : f32 to vector<16x1xf32>
    %546 = arith.mulf %544, %545 : vector<16x1xf32>
    %cst_177 = arith.constant 0.000000e+00 : f32
    %547 = vector.broadcast %cst_177 : f32 to vector<1x1xf32>
    %548 = vector.extract_strided_slice %546 {offsets = [0, 0], sizes = [15, 1], strides = [1, 1]} : vector<16x1xf32> to vector<15x1xf32>
    %549 = tpu.concatenate %547, %548 in 0 : vector<1x1xf32>, vector<15x1xf32> -> vector<16x1xf32>
    %550 = vector.extract_strided_slice %546 {offsets = [1, 0], sizes = [15, 1], strides = [1, 1]} : vector<16x1xf32> to vector<15x1xf32>
    %551 = tpu.concatenate %550, %547 in 0 : vector<15x1xf32>, vector<1x1xf32> -> vector<16x1xf32>
    %c3_178 = arith.constant 3 : index
    %c0_179 = arith.constant 0 : index
    %552 = memref.load %arg4[%c3_178, %c0_179] : memref<10x19xf32, #tpu.memory_space<smem>>
    %553 = vector.broadcast %552 : f32 to vector<16x1xf32>
    %554 = arith.mulf %553, %549 : vector<16x1xf32>
    %c3_180 = arith.constant 3 : index
    %c1_181 = arith.constant 1 : index
    %555 = memref.load %arg4[%c3_180, %c1_181] : memref<10x19xf32, #tpu.memory_space<smem>>
    %556 = vector.broadcast %555 : f32 to vector<16x1xf32>
    %557 = arith.mulf %556, %546 : vector<16x1xf32>
    %558 = arith.addf %554, %557 : vector<16x1xf32>
    %c3_182 = arith.constant 3 : index
    %c2_183 = arith.constant 2 : index
    %559 = memref.load %arg4[%c3_182, %c2_183] : memref<10x19xf32, #tpu.memory_space<smem>>
    %560 = vector.broadcast %559 : f32 to vector<16x1xf32>
    %561 = arith.mulf %560, %551 : vector<16x1xf32>
    %562 = arith.addf %558, %561 : vector<16x1xf32>
    %c3_184 = arith.constant 3 : index
    %c3_185 = arith.constant 3 : index
    %563 = memref.load %arg4[%c3_184, %c3_185] : memref<10x19xf32, #tpu.memory_space<smem>>
    %564 = vector.broadcast %563 : f32 to vector<16x1xf32>
    %565 = arith.addf %562, %564 : vector<16x1xf32>
    %566 = arith.negf %565 : vector<16x1xf32>
    %567 = math.exp %566 : vector<16x1xf32>
    %cst_186 = arith.constant 1.000000e+00 : f32
    %568 = vector.broadcast %cst_186 : f32 to vector<16x1xf32>
    %569 = arith.addf %568, %567 : vector<16x1xf32>
    %570 = arith.divf %568, %569 : vector<16x1xf32>
    %571 = vector.broadcast %570 : vector<16x1xf32> to vector<16x128xf32>
    %572 = arith.mulf %571, %540 : vector<16x128xf32>
    %cst_187 = arith.constant dense<0.000000e+00> : vector<128xf32>
    %573 = vector.multi_reduction <add>, %572, %cst_187 [0] : vector<16x128xf32> to vector<128xf32>
    %574 = vector.shape_cast %573 : vector<128xf32> to vector<1x128xf32>
    %cst_188 = arith.constant 1.600000e+01 : f32
    %575 = vector.broadcast %cst_188 : f32 to vector<1x128xf32>
    %576 = arith.divf %574, %575 : vector<1x128xf32>
    %cst_189 = arith.constant dense<0xFF800000> : vector<128xf32>
    %577 = vector.multi_reduction <maximumf>, %572, %cst_189 [0] : vector<16x128xf32> to vector<128xf32>
    %578 = vector.shape_cast %577 : vector<128xf32> to vector<1x128xf32>
    %cst_190 = arith.constant 0.000000e+00 : f32
    %579 = vector.broadcast %cst_190 : f32 to vector<1x24xf32>
    %580 = tpu.concatenate %579, %576, %579 in 1 : vector<1x24xf32>, vector<1x128xf32>, vector<1x24xf32> -> vector<1x176xf32>
    %581 = tpu.concatenate %579, %578, %579 in 1 : vector<1x24xf32>, vector<1x128xf32>, vector<1x24xf32> -> vector<1x176xf32>
    %c3_191 = arith.constant 3 : index
    %c4_192 = arith.constant 4 : index
    %582 = memref.load %arg4[%c3_191, %c4_192] : memref<10x19xf32, #tpu.memory_space<smem>>
    %583 = vector.extract_strided_slice %580 {offsets = [0, 0], sizes = [1, 128], strides = [1, 1]} : vector<1x176xf32> to vector<1x128xf32>
    %584 = vector.broadcast %582 : f32 to vector<1x128xf32>
    %585 = arith.mulf %584, %583 : vector<1x128xf32>
    %c3_193 = arith.constant 3 : index
    %c5_194 = arith.constant 5 : index
    %586 = memref.load %arg4[%c3_193, %c5_194] : memref<10x19xf32, #tpu.memory_space<smem>>
    %587 = vector.extract_strided_slice %580 {offsets = [0, 8], sizes = [1, 128], strides = [1, 1]} : vector<1x176xf32> to vector<1x128xf32>
    %588 = vector.broadcast %586 : f32 to vector<1x128xf32>
    %589 = arith.mulf %588, %587 : vector<1x128xf32>
    %c3_195 = arith.constant 3 : index
    %c6_196 = arith.constant 6 : index
    %590 = memref.load %arg4[%c3_195, %c6_196] : memref<10x19xf32, #tpu.memory_space<smem>>
    %591 = vector.extract_strided_slice %580 {offsets = [0, 16], sizes = [1, 128], strides = [1, 1]} : vector<1x176xf32> to vector<1x128xf32>
    %592 = vector.broadcast %590 : f32 to vector<1x128xf32>
    %593 = arith.mulf %592, %591 : vector<1x128xf32>
    %c3_197 = arith.constant 3 : index
    %c7_198 = arith.constant 7 : index
    %594 = memref.load %arg4[%c3_197, %c7_198] : memref<10x19xf32, #tpu.memory_space<smem>>
    %595 = vector.extract_strided_slice %580 {offsets = [0, 24], sizes = [1, 128], strides = [1, 1]} : vector<1x176xf32> to vector<1x128xf32>
    %596 = vector.broadcast %594 : f32 to vector<1x128xf32>
    %597 = arith.mulf %596, %595 : vector<1x128xf32>
    %c3_199 = arith.constant 3 : index
    %c8_200 = arith.constant 8 : index
    %598 = memref.load %arg4[%c3_199, %c8_200] : memref<10x19xf32, #tpu.memory_space<smem>>
    %599 = vector.extract_strided_slice %580 {offsets = [0, 32], sizes = [1, 128], strides = [1, 1]} : vector<1x176xf32> to vector<1x128xf32>
    %600 = vector.broadcast %598 : f32 to vector<1x128xf32>
    %601 = arith.mulf %600, %599 : vector<1x128xf32>
    %c3_201 = arith.constant 3 : index
    %c9_202 = arith.constant 9 : index
    %602 = memref.load %arg4[%c3_201, %c9_202] : memref<10x19xf32, #tpu.memory_space<smem>>
    %603 = vector.extract_strided_slice %580 {offsets = [0, 40], sizes = [1, 128], strides = [1, 1]} : vector<1x176xf32> to vector<1x128xf32>
    %604 = vector.broadcast %602 : f32 to vector<1x128xf32>
    %605 = arith.mulf %604, %603 : vector<1x128xf32>
    %c3_203 = arith.constant 3 : index
    %c10_204 = arith.constant 10 : index
    %606 = memref.load %arg4[%c3_203, %c10_204] : memref<10x19xf32, #tpu.memory_space<smem>>
    %607 = vector.extract_strided_slice %580 {offsets = [0, 48], sizes = [1, 128], strides = [1, 1]} : vector<1x176xf32> to vector<1x128xf32>
    %608 = vector.broadcast %606 : f32 to vector<1x128xf32>
    %609 = arith.mulf %608, %607 : vector<1x128xf32>
    %c3_205 = arith.constant 3 : index
    %c11_206 = arith.constant 11 : index
    %610 = memref.load %arg4[%c3_205, %c11_206] : memref<10x19xf32, #tpu.memory_space<smem>>
    %611 = vector.extract_strided_slice %581 {offsets = [0, 0], sizes = [1, 128], strides = [1, 1]} : vector<1x176xf32> to vector<1x128xf32>
    %612 = vector.broadcast %610 : f32 to vector<1x128xf32>
    %613 = arith.mulf %612, %611 : vector<1x128xf32>
    %c3_207 = arith.constant 3 : index
    %c12_208 = arith.constant 12 : index
    %614 = memref.load %arg4[%c3_207, %c12_208] : memref<10x19xf32, #tpu.memory_space<smem>>
    %615 = vector.extract_strided_slice %581 {offsets = [0, 8], sizes = [1, 128], strides = [1, 1]} : vector<1x176xf32> to vector<1x128xf32>
    %616 = vector.broadcast %614 : f32 to vector<1x128xf32>
    %617 = arith.mulf %616, %615 : vector<1x128xf32>
    %c3_209 = arith.constant 3 : index
    %c13_210 = arith.constant 13 : index
    %618 = memref.load %arg4[%c3_209, %c13_210] : memref<10x19xf32, #tpu.memory_space<smem>>
    %619 = vector.extract_strided_slice %581 {offsets = [0, 16], sizes = [1, 128], strides = [1, 1]} : vector<1x176xf32> to vector<1x128xf32>
    %620 = vector.broadcast %618 : f32 to vector<1x128xf32>
    %621 = arith.mulf %620, %619 : vector<1x128xf32>
    %c3_211 = arith.constant 3 : index
    %c14_212 = arith.constant 14 : index
    %622 = memref.load %arg4[%c3_211, %c14_212] : memref<10x19xf32, #tpu.memory_space<smem>>
    %623 = vector.extract_strided_slice %581 {offsets = [0, 24], sizes = [1, 128], strides = [1, 1]} : vector<1x176xf32> to vector<1x128xf32>
    %624 = vector.broadcast %622 : f32 to vector<1x128xf32>
    %625 = arith.mulf %624, %623 : vector<1x128xf32>
    %c3_213 = arith.constant 3 : index
    %c15_214 = arith.constant 15 : index
    %626 = memref.load %arg4[%c3_213, %c15_214] : memref<10x19xf32, #tpu.memory_space<smem>>
    %627 = vector.extract_strided_slice %581 {offsets = [0, 32], sizes = [1, 128], strides = [1, 1]} : vector<1x176xf32> to vector<1x128xf32>
    %628 = vector.broadcast %626 : f32 to vector<1x128xf32>
    %629 = arith.mulf %628, %627 : vector<1x128xf32>
    %c3_215 = arith.constant 3 : index
    %c16_216 = arith.constant 16 : index
    %630 = memref.load %arg4[%c3_215, %c16_216] : memref<10x19xf32, #tpu.memory_space<smem>>
    %631 = vector.extract_strided_slice %581 {offsets = [0, 40], sizes = [1, 128], strides = [1, 1]} : vector<1x176xf32> to vector<1x128xf32>
    %632 = vector.broadcast %630 : f32 to vector<1x128xf32>
    %633 = arith.mulf %632, %631 : vector<1x128xf32>
    %c3_217 = arith.constant 3 : index
    %c17_218 = arith.constant 17 : index
    %634 = memref.load %arg4[%c3_217, %c17_218] : memref<10x19xf32, #tpu.memory_space<smem>>
    %635 = vector.extract_strided_slice %581 {offsets = [0, 48], sizes = [1, 128], strides = [1, 1]} : vector<1x176xf32> to vector<1x128xf32>
    %636 = vector.broadcast %634 : f32 to vector<1x128xf32>
    %637 = arith.mulf %636, %635 : vector<1x128xf32>
    %638 = arith.addf %585, %589 : vector<1x128xf32>
    %639 = arith.addf %593, %597 : vector<1x128xf32>
    %640 = arith.addf %601, %605 : vector<1x128xf32>
    %641 = arith.addf %609, %613 : vector<1x128xf32>
    %642 = arith.addf %617, %621 : vector<1x128xf32>
    %643 = arith.addf %625, %629 : vector<1x128xf32>
    %644 = arith.addf %633, %637 : vector<1x128xf32>
    %645 = arith.addf %638, %639 : vector<1x128xf32>
    %646 = arith.addf %640, %641 : vector<1x128xf32>
    %647 = arith.addf %642, %643 : vector<1x128xf32>
    %648 = arith.addf %645, %646 : vector<1x128xf32>
    %649 = arith.addf %647, %644 : vector<1x128xf32>
    %650 = arith.addf %648, %649 : vector<1x128xf32>
    %c3_219 = arith.constant 3 : index
    %c18_220 = arith.constant 18 : index
    %651 = memref.load %arg4[%c3_219, %c18_220] : memref<10x19xf32, #tpu.memory_space<smem>>
    %652 = vector.broadcast %651 : f32 to vector<1x128xf32>
    %653 = arith.addf %650, %652 : vector<1x128xf32>
    %654 = arith.negf %653 : vector<1x128xf32>
    %655 = math.exp %654 : vector<1x128xf32>
    %cst_221 = arith.constant 1.000000e+00 : f32
    %656 = vector.broadcast %cst_221 : f32 to vector<1x128xf32>
    %657 = arith.addf %656, %655 : vector<1x128xf32>
    %658 = arith.divf %656, %657 : vector<1x128xf32>
    %659 = vector.broadcast %658 : vector<1x128xf32> to vector<16x128xf32>
    %660 = arith.mulf %659, %572 : vector<16x128xf32>
    %661 = vector.extract_strided_slice %660 {offsets = [0, 8], sizes = [16, 120], strides = [1, 1]} : vector<16x128xf32> to vector<16x120xf32>
    %cst_222 = arith.constant 0.000000e+00 : f32
    %662 = vector.broadcast %cst_222 : f32 to vector<16x8xf32>
    %663 = tpu.concatenate %661, %662 in 1 : vector<16x120xf32>, vector<16x8xf32> -> vector<16x128xf32>
    %664 = arith.maximumf %660, %663 : vector<16x128xf32>
    %665 = vector.broadcast %24 : vector<1x128xf32> to vector<16x128xf32>
    %666 = arith.mulf %664, %665 : vector<16x128xf32>
    %cst_223 = arith.constant 0.000000e+00 : f32
    %667 = vector.broadcast %cst_223 : f32 to vector<16x112xf32>
    %cst_224 = arith.constant 0.000000e+00 : f32
    %668 = vector.broadcast %cst_224 : f32 to vector<16x128xf32>
    %669 = tpu.concatenate %667, %666, %668 in 1 : vector<16x112xf32>, vector<16x128xf32>, vector<16x128xf32> -> vector<16x368xf32>
    %670 = vector.extract_strided_slice %669 {offsets = [0, 0], sizes = [16, 128], strides = [1, 1]} : vector<16x368xf32> to vector<16x128xf32>
    %671 = vector.extract_strided_slice %669 {offsets = [0, 16], sizes = [16, 128], strides = [1, 1]} : vector<16x368xf32> to vector<16x128xf32>
    %672 = vector.extract_strided_slice %669 {offsets = [0, 32], sizes = [16, 128], strides = [1, 1]} : vector<16x368xf32> to vector<16x128xf32>
    %673 = vector.extract_strided_slice %669 {offsets = [0, 48], sizes = [16, 128], strides = [1, 1]} : vector<16x368xf32> to vector<16x128xf32>
    %674 = vector.extract_strided_slice %669 {offsets = [0, 64], sizes = [16, 128], strides = [1, 1]} : vector<16x368xf32> to vector<16x128xf32>
    %675 = vector.extract_strided_slice %669 {offsets = [0, 80], sizes = [16, 128], strides = [1, 1]} : vector<16x368xf32> to vector<16x128xf32>
    %676 = vector.extract_strided_slice %669 {offsets = [0, 96], sizes = [16, 128], strides = [1, 1]} : vector<16x368xf32> to vector<16x128xf32>
    %677 = vector.extract_strided_slice %669 {offsets = [0, 112], sizes = [16, 128], strides = [1, 1]} : vector<16x368xf32> to vector<16x128xf32>
    %678 = vector.extract_strided_slice %669 {offsets = [0, 128], sizes = [16, 128], strides = [1, 1]} : vector<16x368xf32> to vector<16x128xf32>
    %679 = vector.extract_strided_slice %669 {offsets = [0, 144], sizes = [16, 128], strides = [1, 1]} : vector<16x368xf32> to vector<16x128xf32>
    %680 = vector.extract_strided_slice %669 {offsets = [0, 160], sizes = [16, 128], strides = [1, 1]} : vector<16x368xf32> to vector<16x128xf32>
    %681 = vector.extract_strided_slice %669 {offsets = [0, 176], sizes = [16, 128], strides = [1, 1]} : vector<16x368xf32> to vector<16x128xf32>
    %682 = vector.extract_strided_slice %669 {offsets = [0, 192], sizes = [16, 128], strides = [1, 1]} : vector<16x368xf32> to vector<16x128xf32>
    %683 = vector.extract_strided_slice %669 {offsets = [0, 208], sizes = [16, 128], strides = [1, 1]} : vector<16x368xf32> to vector<16x128xf32>
    %684 = vector.extract_strided_slice %669 {offsets = [0, 224], sizes = [16, 128], strides = [1, 1]} : vector<16x368xf32> to vector<16x128xf32>
    %685 = vector.extract_strided_slice %669 {offsets = [0, 240], sizes = [16, 128], strides = [1, 1]} : vector<16x368xf32> to vector<16x128xf32>
    %686 = tpu.concatenate %670, %671, %672, %673, %674, %675, %676, %677, %678, %679, %680, %681, %682, %683, %684, %685 in 0 : vector<16x128xf32>, vector<16x128xf32>, vector<16x128xf32>, vector<16x128xf32>, vector<16x128xf32>, vector<16x128xf32>, vector<16x128xf32>, vector<16x128xf32>, vector<16x128xf32>, vector<16x128xf32>, vector<16x128xf32>, vector<16x128xf32>, vector<16x128xf32>, vector<16x128xf32>, vector<16x128xf32>, vector<16x128xf32> -> vector<256x128xf32>
    %c4_225 = arith.constant 4 : index
    %c0_226 = arith.constant 0 : index
    %c0_227 = arith.constant 0 : index
    %687 = vector.load %arg2[%c4_225, %c0_226, %c0_227] : memref<10x16x256xbf16, #tpu.memory_space<vmem>>, vector<1x1x256xbf16>
    %688 = vector.shape_cast %687 : vector<1x1x256xbf16> to vector<1x256xbf16>
    %689 = arith.truncf %686 : vector<256x128xf32> to vector<256x128xbf16>
    %cst_228 = arith.constant dense<0.000000e+00> : vector<1x128xf32>
    %690 = tpu.matmul %688, %689, %cst_228 {dimension_numbers = #tpu.dot_dimension_numbers<[1], [0], [0], [1], [0, 0, 1, 1], [], []>} : vector<1x256xbf16>, vector<256x128xbf16>, vector<1x128xf32> -> vector<1x128xf32>
    %c4_229 = arith.constant 4 : index
    %c0_230 = arith.constant 0 : index
    %c0_231 = arith.constant 0 : index
    %691 = vector.load %arg3[%c4_229, %c0_230, %c0_231] : memref<10x16x1xf32, #tpu.memory_space<vmem>>, vector<1x1x1xf32>
    %692 = vector.shape_cast %691 : vector<1x1x1xf32> to vector<1x1xf32>
    %693 = vector.broadcast %692 : vector<1x1xf32> to vector<1x128xf32>
    %694 = arith.addf %690, %693 : vector<1x128xf32>
    %cst_232 = arith.constant 0.000000e+00 : f32
    %695 = vector.broadcast %cst_232 : f32 to vector<1x128xf32>
    %696 = arith.cmpf ogt, %694, %695 : vector<1x128xf32>
    %cst_233 = arith.constant 0.00999999977 : f32
    %697 = vector.broadcast %cst_233 : f32 to vector<1x128xf32>
    %698 = arith.mulf %697, %694 : vector<1x128xf32>
    %699 = arith.select %696, %694, %698 : vector<1x128xi1>, vector<1x128xf32>
    %700 = arith.mulf %699, %24 : vector<1x128xf32>
    %cst_234 = arith.constant dense<0.000000e+00> : vector<1xf32>
    %701 = vector.multi_reduction <add>, %700, %cst_234 [1] : vector<1x128xf32> to vector<1xf32>
    %702 = vector.shape_cast %701 : vector<1xf32> to vector<1x1xf32>
    %cst_235 = arith.constant 1.250000e-01 : f32
    %703 = vector.broadcast %cst_235 : f32 to vector<1x1xf32>
    %704 = arith.mulf %702, %703 : vector<1x1xf32>
    %c4_236 = arith.constant 4 : index
    %c1_237 = arith.constant 1 : index
    %705 = memref.load %arg4[%c4_236, %c1_237] : memref<10x19xf32, #tpu.memory_space<smem>>
    %706 = vector.broadcast %705 : f32 to vector<1x1xf32>
    %707 = arith.mulf %706, %704 : vector<1x1xf32>
    %c4_238 = arith.constant 4 : index
    %c3_239 = arith.constant 3 : index
    %708 = memref.load %arg4[%c4_238, %c3_239] : memref<10x19xf32, #tpu.memory_space<smem>>
    %709 = vector.broadcast %708 : f32 to vector<1x1xf32>
    %710 = arith.addf %707, %709 : vector<1x1xf32>
    %711 = arith.negf %710 : vector<1x1xf32>
    %712 = math.exp %711 : vector<1x1xf32>
    %cst_240 = arith.constant 1.000000e+00 : f32
    %713 = vector.broadcast %cst_240 : f32 to vector<1x1xf32>
    %714 = arith.addf %713, %712 : vector<1x1xf32>
    %715 = arith.divf %713, %714 : vector<1x1xf32>
    %716 = vector.broadcast %715 : vector<1x1xf32> to vector<1x128xf32>
    %717 = arith.mulf %716, %699 : vector<1x128xf32>
    %cst_241 = arith.constant dense<0.000000e+00> : vector<128xf32>
    %718 = vector.multi_reduction <add>, %717, %cst_241 [0] : vector<1x128xf32> to vector<128xf32>
    %719 = vector.shape_cast %718 : vector<128xf32> to vector<1x128xf32>
    %cst_242 = arith.constant 1.000000e+00 : f32
    %720 = vector.broadcast %cst_242 : f32 to vector<1x128xf32>
    %721 = arith.divf %719, %720 : vector<1x128xf32>
    %cst_243 = arith.constant dense<0xFF800000> : vector<128xf32>
    %722 = vector.multi_reduction <maximumf>, %717, %cst_243 [0] : vector<1x128xf32> to vector<128xf32>
    %723 = vector.shape_cast %722 : vector<128xf32> to vector<1x128xf32>
    %cst_244 = arith.constant 0.000000e+00 : f32
    %724 = vector.broadcast %cst_244 : f32 to vector<1x48xf32>
    %725 = tpu.concatenate %724, %721, %724 in 1 : vector<1x48xf32>, vector<1x128xf32>, vector<1x48xf32> -> vector<1x224xf32>
    %726 = tpu.concatenate %724, %723, %724 in 1 : vector<1x48xf32>, vector<1x128xf32>, vector<1x48xf32> -> vector<1x224xf32>
    %c4_245 = arith.constant 4 : index
    %c4_246 = arith.constant 4 : index
    %727 = memref.load %arg4[%c4_245, %c4_246] : memref<10x19xf32, #tpu.memory_space<smem>>
    %728 = vector.extract_strided_slice %725 {offsets = [0, 0], sizes = [1, 128], strides = [1, 1]} : vector<1x224xf32> to vector<1x128xf32>
    %729 = vector.broadcast %727 : f32 to vector<1x128xf32>
    %730 = arith.mulf %729, %728 : vector<1x128xf32>
    %c4_247 = arith.constant 4 : index
    %c5_248 = arith.constant 5 : index
    %731 = memref.load %arg4[%c4_247, %c5_248] : memref<10x19xf32, #tpu.memory_space<smem>>
    %732 = vector.extract_strided_slice %725 {offsets = [0, 16], sizes = [1, 128], strides = [1, 1]} : vector<1x224xf32> to vector<1x128xf32>
    %733 = vector.broadcast %731 : f32 to vector<1x128xf32>
    %734 = arith.mulf %733, %732 : vector<1x128xf32>
    %c4_249 = arith.constant 4 : index
    %c6_250 = arith.constant 6 : index
    %735 = memref.load %arg4[%c4_249, %c6_250] : memref<10x19xf32, #tpu.memory_space<smem>>
    %736 = vector.extract_strided_slice %725 {offsets = [0, 32], sizes = [1, 128], strides = [1, 1]} : vector<1x224xf32> to vector<1x128xf32>
    %737 = vector.broadcast %735 : f32 to vector<1x128xf32>
    %738 = arith.mulf %737, %736 : vector<1x128xf32>
    %c4_251 = arith.constant 4 : index
    %c7_252 = arith.constant 7 : index
    %739 = memref.load %arg4[%c4_251, %c7_252] : memref<10x19xf32, #tpu.memory_space<smem>>
    %740 = vector.extract_strided_slice %725 {offsets = [0, 48], sizes = [1, 128], strides = [1, 1]} : vector<1x224xf32> to vector<1x128xf32>
    %741 = vector.broadcast %739 : f32 to vector<1x128xf32>
    %742 = arith.mulf %741, %740 : vector<1x128xf32>
    %c4_253 = arith.constant 4 : index
    %c8_254 = arith.constant 8 : index
    %743 = memref.load %arg4[%c4_253, %c8_254] : memref<10x19xf32, #tpu.memory_space<smem>>
    %744 = vector.extract_strided_slice %725 {offsets = [0, 64], sizes = [1, 128], strides = [1, 1]} : vector<1x224xf32> to vector<1x128xf32>
    %745 = vector.broadcast %743 : f32 to vector<1x128xf32>
    %746 = arith.mulf %745, %744 : vector<1x128xf32>
    %c4_255 = arith.constant 4 : index
    %c9_256 = arith.constant 9 : index
    %747 = memref.load %arg4[%c4_255, %c9_256] : memref<10x19xf32, #tpu.memory_space<smem>>
    %748 = vector.extract_strided_slice %725 {offsets = [0, 80], sizes = [1, 128], strides = [1, 1]} : vector<1x224xf32> to vector<1x128xf32>
    %749 = vector.broadcast %747 : f32 to vector<1x128xf32>
    %750 = arith.mulf %749, %748 : vector<1x128xf32>
    %c4_257 = arith.constant 4 : index
    %c10_258 = arith.constant 10 : index
    %751 = memref.load %arg4[%c4_257, %c10_258] : memref<10x19xf32, #tpu.memory_space<smem>>
    %752 = vector.extract_strided_slice %725 {offsets = [0, 96], sizes = [1, 128], strides = [1, 1]} : vector<1x224xf32> to vector<1x128xf32>
    %753 = vector.broadcast %751 : f32 to vector<1x128xf32>
    %754 = arith.mulf %753, %752 : vector<1x128xf32>
    %c4_259 = arith.constant 4 : index
    %c11_260 = arith.constant 11 : index
    %755 = memref.load %arg4[%c4_259, %c11_260] : memref<10x19xf32, #tpu.memory_space<smem>>
    %756 = vector.extract_strided_slice %726 {offsets = [0, 0], sizes = [1, 128], strides = [1, 1]} : vector<1x224xf32> to vector<1x128xf32>
    %757 = vector.broadcast %755 : f32 to vector<1x128xf32>
    %758 = arith.mulf %757, %756 : vector<1x128xf32>
    %c4_261 = arith.constant 4 : index
    %c12_262 = arith.constant 12 : index
    %759 = memref.load %arg4[%c4_261, %c12_262] : memref<10x19xf32, #tpu.memory_space<smem>>
    %760 = vector.extract_strided_slice %726 {offsets = [0, 16], sizes = [1, 128], strides = [1, 1]} : vector<1x224xf32> to vector<1x128xf32>
    %761 = vector.broadcast %759 : f32 to vector<1x128xf32>
    %762 = arith.mulf %761, %760 : vector<1x128xf32>
    %c4_263 = arith.constant 4 : index
    %c13_264 = arith.constant 13 : index
    %763 = memref.load %arg4[%c4_263, %c13_264] : memref<10x19xf32, #tpu.memory_space<smem>>
    %764 = vector.extract_strided_slice %726 {offsets = [0, 32], sizes = [1, 128], strides = [1, 1]} : vector<1x224xf32> to vector<1x128xf32>
    %765 = vector.broadcast %763 : f32 to vector<1x128xf32>
    %766 = arith.mulf %765, %764 : vector<1x128xf32>
    %c4_265 = arith.constant 4 : index
    %c14_266 = arith.constant 14 : index
    %767 = memref.load %arg4[%c4_265, %c14_266] : memref<10x19xf32, #tpu.memory_space<smem>>
    %768 = vector.extract_strided_slice %726 {offsets = [0, 48], sizes = [1, 128], strides = [1, 1]} : vector<1x224xf32> to vector<1x128xf32>
    %769 = vector.broadcast %767 : f32 to vector<1x128xf32>
    %770 = arith.mulf %769, %768 : vector<1x128xf32>
    %c4_267 = arith.constant 4 : index
    %c15_268 = arith.constant 15 : index
    %771 = memref.load %arg4[%c4_267, %c15_268] : memref<10x19xf32, #tpu.memory_space<smem>>
    %772 = vector.extract_strided_slice %726 {offsets = [0, 64], sizes = [1, 128], strides = [1, 1]} : vector<1x224xf32> to vector<1x128xf32>
    %773 = vector.broadcast %771 : f32 to vector<1x128xf32>
    %774 = arith.mulf %773, %772 : vector<1x128xf32>
    %c4_269 = arith.constant 4 : index
    %c16_270 = arith.constant 16 : index
    %775 = memref.load %arg4[%c4_269, %c16_270] : memref<10x19xf32, #tpu.memory_space<smem>>
    %776 = vector.extract_strided_slice %726 {offsets = [0, 80], sizes = [1, 128], strides = [1, 1]} : vector<1x224xf32> to vector<1x128xf32>
    %777 = vector.broadcast %775 : f32 to vector<1x128xf32>
    %778 = arith.mulf %777, %776 : vector<1x128xf32>
    %c4_271 = arith.constant 4 : index
    %c17_272 = arith.constant 17 : index
    %779 = memref.load %arg4[%c4_271, %c17_272] : memref<10x19xf32, #tpu.memory_space<smem>>
    %780 = vector.extract_strided_slice %726 {offsets = [0, 96], sizes = [1, 128], strides = [1, 1]} : vector<1x224xf32> to vector<1x128xf32>
    %781 = vector.broadcast %779 : f32 to vector<1x128xf32>
    %782 = arith.mulf %781, %780 : vector<1x128xf32>
    %783 = arith.addf %730, %734 : vector<1x128xf32>
    %784 = arith.addf %738, %742 : vector<1x128xf32>
    %785 = arith.addf %746, %750 : vector<1x128xf32>
    %786 = arith.addf %754, %758 : vector<1x128xf32>
    %787 = arith.addf %762, %766 : vector<1x128xf32>
    %788 = arith.addf %770, %774 : vector<1x128xf32>
    %789 = arith.addf %778, %782 : vector<1x128xf32>
    %790 = arith.addf %783, %784 : vector<1x128xf32>
    %791 = arith.addf %785, %786 : vector<1x128xf32>
    %792 = arith.addf %787, %788 : vector<1x128xf32>
    %793 = arith.addf %790, %791 : vector<1x128xf32>
    %794 = arith.addf %792, %789 : vector<1x128xf32>
    %795 = arith.addf %793, %794 : vector<1x128xf32>
    %c4_273 = arith.constant 4 : index
    %c18_274 = arith.constant 18 : index
    %796 = memref.load %arg4[%c4_273, %c18_274] : memref<10x19xf32, #tpu.memory_space<smem>>
    %797 = vector.broadcast %796 : f32 to vector<1x128xf32>
    %798 = arith.addf %795, %797 : vector<1x128xf32>
    %799 = arith.negf %798 : vector<1x128xf32>
    %800 = math.exp %799 : vector<1x128xf32>
    %cst_275 = arith.constant 1.000000e+00 : f32
    %801 = vector.broadcast %cst_275 : f32 to vector<1x128xf32>
    %802 = arith.addf %801, %800 : vector<1x128xf32>
    %803 = arith.divf %801, %802 : vector<1x128xf32>
    %804 = arith.mulf %803, %717 : vector<1x128xf32>
    %805 = vector.extract_strided_slice %804 {offsets = [0, 16], sizes = [1, 112], strides = [1, 1]} : vector<1x128xf32> to vector<1x112xf32>
    %cst_276 = arith.constant 0.000000e+00 : f32
    %806 = vector.broadcast %cst_276 : f32 to vector<1x16xf32>
    %807 = tpu.concatenate %805, %806 in 1 : vector<1x112xf32>, vector<1x16xf32> -> vector<1x128xf32>
    %808 = arith.maximumf %804, %807 : vector<1x128xf32>
    %809 = arith.mulf %808, %30 : vector<1x128xf32>
    %cst_277 = arith.constant 0.000000e+00 : f32
    %810 = vector.broadcast %cst_277 : f32 to vector<1x128xf32>
    %cst_278 = arith.constant 0.000000e+00 : f32
    %811 = vector.broadcast %cst_278 : f32 to vector<1x112xf32>
    %812 = tpu.concatenate %810, %809, %811 in 1 : vector<1x128xf32>, vector<1x128xf32>, vector<1x112xf32> -> vector<1x368xf32>
    %813 = vector.extract_strided_slice %812 {offsets = [0, 0], sizes = [1, 128], strides = [1, 1]} : vector<1x368xf32> to vector<1x128xf32>
    %814 = vector.extract_strided_slice %812 {offsets = [0, 16], sizes = [1, 128], strides = [1, 1]} : vector<1x368xf32> to vector<1x128xf32>
    %815 = vector.extract_strided_slice %812 {offsets = [0, 32], sizes = [1, 128], strides = [1, 1]} : vector<1x368xf32> to vector<1x128xf32>
    %816 = vector.extract_strided_slice %812 {offsets = [0, 48], sizes = [1, 128], strides = [1, 1]} : vector<1x368xf32> to vector<1x128xf32>
    %817 = vector.extract_strided_slice %812 {offsets = [0, 64], sizes = [1, 128], strides = [1, 1]} : vector<1x368xf32> to vector<1x128xf32>
    %818 = vector.extract_strided_slice %812 {offsets = [0, 80], sizes = [1, 128], strides = [1, 1]} : vector<1x368xf32> to vector<1x128xf32>
    %819 = vector.extract_strided_slice %812 {offsets = [0, 96], sizes = [1, 128], strides = [1, 1]} : vector<1x368xf32> to vector<1x128xf32>
    %820 = vector.extract_strided_slice %812 {offsets = [0, 112], sizes = [1, 128], strides = [1, 1]} : vector<1x368xf32> to vector<1x128xf32>
    %821 = vector.extract_strided_slice %812 {offsets = [0, 128], sizes = [1, 128], strides = [1, 1]} : vector<1x368xf32> to vector<1x128xf32>
    %822 = vector.extract_strided_slice %812 {offsets = [0, 144], sizes = [1, 128], strides = [1, 1]} : vector<1x368xf32> to vector<1x128xf32>
    %823 = vector.extract_strided_slice %812 {offsets = [0, 160], sizes = [1, 128], strides = [1, 1]} : vector<1x368xf32> to vector<1x128xf32>
    %824 = vector.extract_strided_slice %812 {offsets = [0, 176], sizes = [1, 128], strides = [1, 1]} : vector<1x368xf32> to vector<1x128xf32>
    %825 = vector.extract_strided_slice %812 {offsets = [0, 192], sizes = [1, 128], strides = [1, 1]} : vector<1x368xf32> to vector<1x128xf32>
    %826 = vector.extract_strided_slice %812 {offsets = [0, 208], sizes = [1, 128], strides = [1, 1]} : vector<1x368xf32> to vector<1x128xf32>
    %827 = vector.extract_strided_slice %812 {offsets = [0, 224], sizes = [1, 128], strides = [1, 1]} : vector<1x368xf32> to vector<1x128xf32>
    %828 = vector.extract_strided_slice %812 {offsets = [0, 240], sizes = [1, 128], strides = [1, 1]} : vector<1x368xf32> to vector<1x128xf32>
    %829 = tpu.concatenate %813, %814, %815, %816, %817, %818, %819, %820, %821, %822, %823, %824, %825, %826, %827, %828 in 0 : vector<1x128xf32>, vector<1x128xf32>, vector<1x128xf32>, vector<1x128xf32>, vector<1x128xf32>, vector<1x128xf32>, vector<1x128xf32>, vector<1x128xf32>, vector<1x128xf32>, vector<1x128xf32>, vector<1x128xf32>, vector<1x128xf32>, vector<1x128xf32>, vector<1x128xf32>, vector<1x128xf32>, vector<1x128xf32> -> vector<16x128xf32>
    %c5_279 = arith.constant 5 : index
    %c0_280 = arith.constant 0 : index
    %c0_281 = arith.constant 0 : index
    %830 = vector.load %arg2[%c5_279, %c0_280, %c0_281] : memref<10x16x256xbf16, #tpu.memory_space<vmem>>, vector<1x16x16xbf16>
    %831 = vector.shape_cast %830 : vector<1x16x16xbf16> to vector<16x16xbf16>
    %832 = arith.truncf %829 : vector<16x128xf32> to vector<16x128xbf16>
    %cst_282 = arith.constant dense<0.000000e+00> : vector<16x128xf32>
    %833 = tpu.matmul %831, %832, %cst_282 {dimension_numbers = #tpu.dot_dimension_numbers<[1], [0], [0], [1], [0, 0, 1, 1], [], []>} : vector<16x16xbf16>, vector<16x128xbf16>, vector<16x128xf32> -> vector<16x128xf32>
    %c5_283 = arith.constant 5 : index
    %c0_284 = arith.constant 0 : index
    %c0_285 = arith.constant 0 : index
    %834 = vector.load %arg3[%c5_283, %c0_284, %c0_285] : memref<10x16x1xf32, #tpu.memory_space<vmem>>, vector<1x16x1xf32>
    %835 = vector.shape_cast %834 : vector<1x16x1xf32> to vector<16x1xf32>
    %836 = vector.broadcast %835 : vector<16x1xf32> to vector<16x128xf32>
    %837 = arith.addf %833, %836 : vector<16x128xf32>
    %cst_286 = arith.constant 0.000000e+00 : f32
    %838 = vector.broadcast %cst_286 : f32 to vector<16x128xf32>
    %839 = arith.cmpf ogt, %837, %838 : vector<16x128xf32>
    %cst_287 = arith.constant 0.00999999977 : f32
    %840 = vector.broadcast %cst_287 : f32 to vector<16x128xf32>
    %841 = arith.mulf %840, %837 : vector<16x128xf32>
    %842 = arith.select %839, %837, %841 : vector<16x128xi1>, vector<16x128xf32>
    %843 = vector.broadcast %24 : vector<1x128xf32> to vector<16x128xf32>
    %844 = arith.mulf %842, %843 : vector<16x128xf32>
    %cst_288 = arith.constant dense<0.000000e+00> : vector<16xf32>
    %845 = vector.multi_reduction <add>, %844, %cst_288 [1] : vector<16x128xf32> to vector<16xf32>
    %846 = vector.shape_cast %845 : vector<16xf32> to vector<16x1xf32>
    %cst_289 = arith.constant 1.250000e-01 : f32
    %847 = vector.broadcast %cst_289 : f32 to vector<16x1xf32>
    %848 = arith.mulf %846, %847 : vector<16x1xf32>
    %cst_290 = arith.constant 0.000000e+00 : f32
    %849 = vector.broadcast %cst_290 : f32 to vector<1x1xf32>
    %850 = vector.extract_strided_slice %848 {offsets = [0, 0], sizes = [15, 1], strides = [1, 1]} : vector<16x1xf32> to vector<15x1xf32>
    %851 = tpu.concatenate %849, %850 in 0 : vector<1x1xf32>, vector<15x1xf32> -> vector<16x1xf32>
    %852 = vector.extract_strided_slice %848 {offsets = [1, 0], sizes = [15, 1], strides = [1, 1]} : vector<16x1xf32> to vector<15x1xf32>
    %853 = tpu.concatenate %852, %849 in 0 : vector<15x1xf32>, vector<1x1xf32> -> vector<16x1xf32>
    %c5_291 = arith.constant 5 : index
    %c0_292 = arith.constant 0 : index
    %854 = memref.load %arg4[%c5_291, %c0_292] : memref<10x19xf32, #tpu.memory_space<smem>>
    %855 = vector.broadcast %854 : f32 to vector<16x1xf32>
    %856 = arith.mulf %855, %851 : vector<16x1xf32>
    %c5_293 = arith.constant 5 : index
    %c1_294 = arith.constant 1 : index
    %857 = memref.load %arg4[%c5_293, %c1_294] : memref<10x19xf32, #tpu.memory_space<smem>>
    %858 = vector.broadcast %857 : f32 to vector<16x1xf32>
    %859 = arith.mulf %858, %848 : vector<16x1xf32>
    %860 = arith.addf %856, %859 : vector<16x1xf32>
    %c5_295 = arith.constant 5 : index
    %c2_296 = arith.constant 2 : index
    %861 = memref.load %arg4[%c5_295, %c2_296] : memref<10x19xf32, #tpu.memory_space<smem>>
    %862 = vector.broadcast %861 : f32 to vector<16x1xf32>
    %863 = arith.mulf %862, %853 : vector<16x1xf32>
    %864 = arith.addf %860, %863 : vector<16x1xf32>
    %c5_297 = arith.constant 5 : index
    %c3_298 = arith.constant 3 : index
    %865 = memref.load %arg4[%c5_297, %c3_298] : memref<10x19xf32, #tpu.memory_space<smem>>
    %866 = vector.broadcast %865 : f32 to vector<16x1xf32>
    %867 = arith.addf %864, %866 : vector<16x1xf32>
    %868 = arith.negf %867 : vector<16x1xf32>
    %869 = math.exp %868 : vector<16x1xf32>
    %cst_299 = arith.constant 1.000000e+00 : f32
    %870 = vector.broadcast %cst_299 : f32 to vector<16x1xf32>
    %871 = arith.addf %870, %869 : vector<16x1xf32>
    %872 = arith.divf %870, %871 : vector<16x1xf32>
    %873 = vector.broadcast %872 : vector<16x1xf32> to vector<16x128xf32>
    %874 = arith.mulf %873, %842 : vector<16x128xf32>
    %cst_300 = arith.constant dense<0.000000e+00> : vector<128xf32>
    %875 = vector.multi_reduction <add>, %874, %cst_300 [0] : vector<16x128xf32> to vector<128xf32>
    %876 = vector.shape_cast %875 : vector<128xf32> to vector<1x128xf32>
    %cst_301 = arith.constant 1.600000e+01 : f32
    %877 = vector.broadcast %cst_301 : f32 to vector<1x128xf32>
    %878 = arith.divf %876, %877 : vector<1x128xf32>
    %cst_302 = arith.constant dense<0xFF800000> : vector<128xf32>
    %879 = vector.multi_reduction <maximumf>, %874, %cst_302 [0] : vector<16x128xf32> to vector<128xf32>
    %880 = vector.shape_cast %879 : vector<128xf32> to vector<1x128xf32>
    %cst_303 = arith.constant 0.000000e+00 : f32
    %881 = vector.broadcast %cst_303 : f32 to vector<1x48xf32>
    %882 = tpu.concatenate %881, %878, %881 in 1 : vector<1x48xf32>, vector<1x128xf32>, vector<1x48xf32> -> vector<1x224xf32>
    %883 = tpu.concatenate %881, %880, %881 in 1 : vector<1x48xf32>, vector<1x128xf32>, vector<1x48xf32> -> vector<1x224xf32>
    %c5_304 = arith.constant 5 : index
    %c4_305 = arith.constant 4 : index
    %884 = memref.load %arg4[%c5_304, %c4_305] : memref<10x19xf32, #tpu.memory_space<smem>>
    %885 = vector.extract_strided_slice %882 {offsets = [0, 0], sizes = [1, 128], strides = [1, 1]} : vector<1x224xf32> to vector<1x128xf32>
    %886 = vector.broadcast %884 : f32 to vector<1x128xf32>
    %887 = arith.mulf %886, %885 : vector<1x128xf32>
    %c5_306 = arith.constant 5 : index
    %c5_307 = arith.constant 5 : index
    %888 = memref.load %arg4[%c5_306, %c5_307] : memref<10x19xf32, #tpu.memory_space<smem>>
    %889 = vector.extract_strided_slice %882 {offsets = [0, 16], sizes = [1, 128], strides = [1, 1]} : vector<1x224xf32> to vector<1x128xf32>
    %890 = vector.broadcast %888 : f32 to vector<1x128xf32>
    %891 = arith.mulf %890, %889 : vector<1x128xf32>
    %c5_308 = arith.constant 5 : index
    %c6_309 = arith.constant 6 : index
    %892 = memref.load %arg4[%c5_308, %c6_309] : memref<10x19xf32, #tpu.memory_space<smem>>
    %893 = vector.extract_strided_slice %882 {offsets = [0, 32], sizes = [1, 128], strides = [1, 1]} : vector<1x224xf32> to vector<1x128xf32>
    %894 = vector.broadcast %892 : f32 to vector<1x128xf32>
    %895 = arith.mulf %894, %893 : vector<1x128xf32>
    %c5_310 = arith.constant 5 : index
    %c7_311 = arith.constant 7 : index
    %896 = memref.load %arg4[%c5_310, %c7_311] : memref<10x19xf32, #tpu.memory_space<smem>>
    %897 = vector.extract_strided_slice %882 {offsets = [0, 48], sizes = [1, 128], strides = [1, 1]} : vector<1x224xf32> to vector<1x128xf32>
    %898 = vector.broadcast %896 : f32 to vector<1x128xf32>
    %899 = arith.mulf %898, %897 : vector<1x128xf32>
    %c5_312 = arith.constant 5 : index
    %c8_313 = arith.constant 8 : index
    %900 = memref.load %arg4[%c5_312, %c8_313] : memref<10x19xf32, #tpu.memory_space<smem>>
    %901 = vector.extract_strided_slice %882 {offsets = [0, 64], sizes = [1, 128], strides = [1, 1]} : vector<1x224xf32> to vector<1x128xf32>
    %902 = vector.broadcast %900 : f32 to vector<1x128xf32>
    %903 = arith.mulf %902, %901 : vector<1x128xf32>
    %c5_314 = arith.constant 5 : index
    %c9_315 = arith.constant 9 : index
    %904 = memref.load %arg4[%c5_314, %c9_315] : memref<10x19xf32, #tpu.memory_space<smem>>
    %905 = vector.extract_strided_slice %882 {offsets = [0, 80], sizes = [1, 128], strides = [1, 1]} : vector<1x224xf32> to vector<1x128xf32>
    %906 = vector.broadcast %904 : f32 to vector<1x128xf32>
    %907 = arith.mulf %906, %905 : vector<1x128xf32>
    %c5_316 = arith.constant 5 : index
    %c10_317 = arith.constant 10 : index
    %908 = memref.load %arg4[%c5_316, %c10_317] : memref<10x19xf32, #tpu.memory_space<smem>>
    %909 = vector.extract_strided_slice %882 {offsets = [0, 96], sizes = [1, 128], strides = [1, 1]} : vector<1x224xf32> to vector<1x128xf32>
    %910 = vector.broadcast %908 : f32 to vector<1x128xf32>
    %911 = arith.mulf %910, %909 : vector<1x128xf32>
    %c5_318 = arith.constant 5 : index
    %c11_319 = arith.constant 11 : index
    %912 = memref.load %arg4[%c5_318, %c11_319] : memref<10x19xf32, #tpu.memory_space<smem>>
    %913 = vector.extract_strided_slice %883 {offsets = [0, 0], sizes = [1, 128], strides = [1, 1]} : vector<1x224xf32> to vector<1x128xf32>
    %914 = vector.broadcast %912 : f32 to vector<1x128xf32>
    %915 = arith.mulf %914, %913 : vector<1x128xf32>
    %c5_320 = arith.constant 5 : index
    %c12_321 = arith.constant 12 : index
    %916 = memref.load %arg4[%c5_320, %c12_321] : memref<10x19xf32, #tpu.memory_space<smem>>
    %917 = vector.extract_strided_slice %883 {offsets = [0, 16], sizes = [1, 128], strides = [1, 1]} : vector<1x224xf32> to vector<1x128xf32>
    %918 = vector.broadcast %916 : f32 to vector<1x128xf32>
    %919 = arith.mulf %918, %917 : vector<1x128xf32>
    %c5_322 = arith.constant 5 : index
    %c13_323 = arith.constant 13 : index
    %920 = memref.load %arg4[%c5_322, %c13_323] : memref<10x19xf32, #tpu.memory_space<smem>>
    %921 = vector.extract_strided_slice %883 {offsets = [0, 32], sizes = [1, 128], strides = [1, 1]} : vector<1x224xf32> to vector<1x128xf32>
    %922 = vector.broadcast %920 : f32 to vector<1x128xf32>
    %923 = arith.mulf %922, %921 : vector<1x128xf32>
    %c5_324 = arith.constant 5 : index
    %c14_325 = arith.constant 14 : index
    %924 = memref.load %arg4[%c5_324, %c14_325] : memref<10x19xf32, #tpu.memory_space<smem>>
    %925 = vector.extract_strided_slice %883 {offsets = [0, 48], sizes = [1, 128], strides = [1, 1]} : vector<1x224xf32> to vector<1x128xf32>
    %926 = vector.broadcast %924 : f32 to vector<1x128xf32>
    %927 = arith.mulf %926, %925 : vector<1x128xf32>
    %c5_326 = arith.constant 5 : index
    %c15_327 = arith.constant 15 : index
    %928 = memref.load %arg4[%c5_326, %c15_327] : memref<10x19xf32, #tpu.memory_space<smem>>
    %929 = vector.extract_strided_slice %883 {offsets = [0, 64], sizes = [1, 128], strides = [1, 1]} : vector<1x224xf32> to vector<1x128xf32>
    %930 = vector.broadcast %928 : f32 to vector<1x128xf32>
    %931 = arith.mulf %930, %929 : vector<1x128xf32>
    %c5_328 = arith.constant 5 : index
    %c16_329 = arith.constant 16 : index
    %932 = memref.load %arg4[%c5_328, %c16_329] : memref<10x19xf32, #tpu.memory_space<smem>>
    %933 = vector.extract_strided_slice %883 {offsets = [0, 80], sizes = [1, 128], strides = [1, 1]} : vector<1x224xf32> to vector<1x128xf32>
    %934 = vector.broadcast %932 : f32 to vector<1x128xf32>
    %935 = arith.mulf %934, %933 : vector<1x128xf32>
    %c5_330 = arith.constant 5 : index
    %c17_331 = arith.constant 17 : index
    %936 = memref.load %arg4[%c5_330, %c17_331] : memref<10x19xf32, #tpu.memory_space<smem>>
    %937 = vector.extract_strided_slice %883 {offsets = [0, 96], sizes = [1, 128], strides = [1, 1]} : vector<1x224xf32> to vector<1x128xf32>
    %938 = vector.broadcast %936 : f32 to vector<1x128xf32>
    %939 = arith.mulf %938, %937 : vector<1x128xf32>
    %940 = arith.addf %887, %891 : vector<1x128xf32>
    %941 = arith.addf %895, %899 : vector<1x128xf32>
    %942 = arith.addf %903, %907 : vector<1x128xf32>
    %943 = arith.addf %911, %915 : vector<1x128xf32>
    %944 = arith.addf %919, %923 : vector<1x128xf32>
    %945 = arith.addf %927, %931 : vector<1x128xf32>
    %946 = arith.addf %935, %939 : vector<1x128xf32>
    %947 = arith.addf %940, %941 : vector<1x128xf32>
    %948 = arith.addf %942, %943 : vector<1x128xf32>
    %949 = arith.addf %944, %945 : vector<1x128xf32>
    %950 = arith.addf %947, %948 : vector<1x128xf32>
    %951 = arith.addf %949, %946 : vector<1x128xf32>
    %952 = arith.addf %950, %951 : vector<1x128xf32>
    %c5_332 = arith.constant 5 : index
    %c18_333 = arith.constant 18 : index
    %953 = memref.load %arg4[%c5_332, %c18_333] : memref<10x19xf32, #tpu.memory_space<smem>>
    %954 = vector.broadcast %953 : f32 to vector<1x128xf32>
    %955 = arith.addf %952, %954 : vector<1x128xf32>
    %956 = arith.negf %955 : vector<1x128xf32>
    %957 = math.exp %956 : vector<1x128xf32>
    %cst_334 = arith.constant 1.000000e+00 : f32
    %958 = vector.broadcast %cst_334 : f32 to vector<1x128xf32>
    %959 = arith.addf %958, %957 : vector<1x128xf32>
    %960 = arith.divf %958, %959 : vector<1x128xf32>
    %961 = vector.broadcast %960 : vector<1x128xf32> to vector<16x128xf32>
    %962 = arith.mulf %961, %874 : vector<16x128xf32>
    %963 = vector.broadcast %24 : vector<1x128xf32> to vector<16x128xf32>
    %964 = arith.mulf %962, %963 : vector<16x128xf32>
    %965 = arith.addf %964, %666 : vector<16x128xf32>
    %cst_335 = arith.constant 0.000000e+00 : f32
    %966 = vector.broadcast %cst_335 : f32 to vector<16x64xf32>
    %cst_336 = arith.constant 0.000000e+00 : f32
    %967 = vector.broadcast %cst_336 : f32 to vector<16x56xf32>
    %968 = tpu.concatenate %966, %965, %967 in 1 : vector<16x64xf32>, vector<16x128xf32>, vector<16x56xf32> -> vector<16x248xf32>
    %969 = vector.extract_strided_slice %968 {offsets = [0, 0], sizes = [16, 128], strides = [1, 1]} : vector<16x248xf32> to vector<16x128xf32>
    %970 = vector.extract_strided_slice %968 {offsets = [0, 8], sizes = [16, 128], strides = [1, 1]} : vector<16x248xf32> to vector<16x128xf32>
    %971 = vector.extract_strided_slice %968 {offsets = [0, 16], sizes = [16, 128], strides = [1, 1]} : vector<16x248xf32> to vector<16x128xf32>
    %972 = vector.extract_strided_slice %968 {offsets = [0, 24], sizes = [16, 128], strides = [1, 1]} : vector<16x248xf32> to vector<16x128xf32>
    %973 = vector.extract_strided_slice %968 {offsets = [0, 32], sizes = [16, 128], strides = [1, 1]} : vector<16x248xf32> to vector<16x128xf32>
    %974 = vector.extract_strided_slice %968 {offsets = [0, 40], sizes = [16, 128], strides = [1, 1]} : vector<16x248xf32> to vector<16x128xf32>
    %975 = vector.extract_strided_slice %968 {offsets = [0, 48], sizes = [16, 128], strides = [1, 1]} : vector<16x248xf32> to vector<16x128xf32>
    %976 = vector.extract_strided_slice %968 {offsets = [0, 56], sizes = [16, 128], strides = [1, 1]} : vector<16x248xf32> to vector<16x128xf32>
    %977 = vector.extract_strided_slice %968 {offsets = [0, 64], sizes = [16, 128], strides = [1, 1]} : vector<16x248xf32> to vector<16x128xf32>
    %978 = vector.extract_strided_slice %968 {offsets = [0, 72], sizes = [16, 128], strides = [1, 1]} : vector<16x248xf32> to vector<16x128xf32>
    %979 = vector.extract_strided_slice %968 {offsets = [0, 80], sizes = [16, 128], strides = [1, 1]} : vector<16x248xf32> to vector<16x128xf32>
    %980 = vector.extract_strided_slice %968 {offsets = [0, 88], sizes = [16, 128], strides = [1, 1]} : vector<16x248xf32> to vector<16x128xf32>
    %981 = vector.extract_strided_slice %968 {offsets = [0, 96], sizes = [16, 128], strides = [1, 1]} : vector<16x248xf32> to vector<16x128xf32>
    %982 = vector.extract_strided_slice %968 {offsets = [0, 104], sizes = [16, 128], strides = [1, 1]} : vector<16x248xf32> to vector<16x128xf32>
    %983 = vector.extract_strided_slice %968 {offsets = [0, 112], sizes = [16, 128], strides = [1, 1]} : vector<16x248xf32> to vector<16x128xf32>
    %984 = vector.extract_strided_slice %968 {offsets = [0, 120], sizes = [16, 128], strides = [1, 1]} : vector<16x248xf32> to vector<16x128xf32>
    %985 = tpu.concatenate %969, %970, %971, %972, %973, %974, %975, %976, %977, %978, %979, %980, %981, %982, %983, %984 in 0 : vector<16x128xf32>, vector<16x128xf32>, vector<16x128xf32>, vector<16x128xf32>, vector<16x128xf32>, vector<16x128xf32>, vector<16x128xf32>, vector<16x128xf32>, vector<16x128xf32>, vector<16x128xf32>, vector<16x128xf32>, vector<16x128xf32>, vector<16x128xf32>, vector<16x128xf32>, vector<16x128xf32>, vector<16x128xf32> -> vector<256x128xf32>
    %c6_337 = arith.constant 6 : index
    %c0_338 = arith.constant 0 : index
    %c0_339 = arith.constant 0 : index
    %986 = vector.load %arg2[%c6_337, %c0_338, %c0_339] : memref<10x16x256xbf16, #tpu.memory_space<vmem>>, vector<1x16x256xbf16>
    %987 = vector.shape_cast %986 : vector<1x16x256xbf16> to vector<16x256xbf16>
    %988 = arith.truncf %985 : vector<256x128xf32> to vector<256x128xbf16>
    %cst_340 = arith.constant dense<0.000000e+00> : vector<16x128xf32>
    %989 = tpu.matmul %987, %988, %cst_340 {dimension_numbers = #tpu.dot_dimension_numbers<[1], [0], [0], [1], [0, 0, 1, 1], [], []>} : vector<16x256xbf16>, vector<256x128xbf16>, vector<16x128xf32> -> vector<16x128xf32>
    %c6_341 = arith.constant 6 : index
    %c0_342 = arith.constant 0 : index
    %c0_343 = arith.constant 0 : index
    %990 = vector.load %arg3[%c6_341, %c0_342, %c0_343] : memref<10x16x1xf32, #tpu.memory_space<vmem>>, vector<1x16x1xf32>
    %991 = vector.shape_cast %990 : vector<1x16x1xf32> to vector<16x1xf32>
    %992 = vector.broadcast %991 : vector<16x1xf32> to vector<16x128xf32>
    %993 = arith.addf %989, %992 : vector<16x128xf32>
    %cst_344 = arith.constant 0.000000e+00 : f32
    %994 = vector.broadcast %cst_344 : f32 to vector<16x128xf32>
    %995 = arith.cmpf ogt, %993, %994 : vector<16x128xf32>
    %cst_345 = arith.constant 0.00999999977 : f32
    %996 = vector.broadcast %cst_345 : f32 to vector<16x128xf32>
    %997 = arith.mulf %996, %993 : vector<16x128xf32>
    %998 = arith.select %995, %993, %997 : vector<16x128xi1>, vector<16x128xf32>
    %999 = vector.broadcast %18 : vector<1x128xf32> to vector<16x128xf32>
    %1000 = arith.mulf %998, %999 : vector<16x128xf32>
    %cst_346 = arith.constant dense<0.000000e+00> : vector<16xf32>
    %1001 = vector.multi_reduction <add>, %1000, %cst_346 [1] : vector<16x128xf32> to vector<16xf32>
    %1002 = vector.shape_cast %1001 : vector<16xf32> to vector<16x1xf32>
    %cst_347 = arith.constant 6.250000e-02 : f32
    %1003 = vector.broadcast %cst_347 : f32 to vector<16x1xf32>
    %1004 = arith.mulf %1002, %1003 : vector<16x1xf32>
    %cst_348 = arith.constant 0.000000e+00 : f32
    %1005 = vector.broadcast %cst_348 : f32 to vector<1x1xf32>
    %1006 = vector.extract_strided_slice %1004 {offsets = [0, 0], sizes = [15, 1], strides = [1, 1]} : vector<16x1xf32> to vector<15x1xf32>
    %1007 = tpu.concatenate %1005, %1006 in 0 : vector<1x1xf32>, vector<15x1xf32> -> vector<16x1xf32>
    %1008 = vector.extract_strided_slice %1004 {offsets = [1, 0], sizes = [15, 1], strides = [1, 1]} : vector<16x1xf32> to vector<15x1xf32>
    %1009 = tpu.concatenate %1008, %1005 in 0 : vector<15x1xf32>, vector<1x1xf32> -> vector<16x1xf32>
    %c6_349 = arith.constant 6 : index
    %c0_350 = arith.constant 0 : index
    %1010 = memref.load %arg4[%c6_349, %c0_350] : memref<10x19xf32, #tpu.memory_space<smem>>
    %1011 = vector.broadcast %1010 : f32 to vector<16x1xf32>
    %1012 = arith.mulf %1011, %1007 : vector<16x1xf32>
    %c6_351 = arith.constant 6 : index
    %c1_352 = arith.constant 1 : index
    %1013 = memref.load %arg4[%c6_351, %c1_352] : memref<10x19xf32, #tpu.memory_space<smem>>
    %1014 = vector.broadcast %1013 : f32 to vector<16x1xf32>
    %1015 = arith.mulf %1014, %1004 : vector<16x1xf32>
    %1016 = arith.addf %1012, %1015 : vector<16x1xf32>
    %c6_353 = arith.constant 6 : index
    %c2_354 = arith.constant 2 : index
    %1017 = memref.load %arg4[%c6_353, %c2_354] : memref<10x19xf32, #tpu.memory_space<smem>>
    %1018 = vector.broadcast %1017 : f32 to vector<16x1xf32>
    %1019 = arith.mulf %1018, %1009 : vector<16x1xf32>
    %1020 = arith.addf %1016, %1019 : vector<16x1xf32>
    %c6_355 = arith.constant 6 : index
    %c3_356 = arith.constant 3 : index
    %1021 = memref.load %arg4[%c6_355, %c3_356] : memref<10x19xf32, #tpu.memory_space<smem>>
    %1022 = vector.broadcast %1021 : f32 to vector<16x1xf32>
    %1023 = arith.addf %1020, %1022 : vector<16x1xf32>
    %1024 = arith.negf %1023 : vector<16x1xf32>
    %1025 = math.exp %1024 : vector<16x1xf32>
    %cst_357 = arith.constant 1.000000e+00 : f32
    %1026 = vector.broadcast %cst_357 : f32 to vector<16x1xf32>
    %1027 = arith.addf %1026, %1025 : vector<16x1xf32>
    %1028 = arith.divf %1026, %1027 : vector<16x1xf32>
    %1029 = vector.broadcast %1028 : vector<16x1xf32> to vector<16x128xf32>
    %1030 = arith.mulf %1029, %998 : vector<16x128xf32>
    %cst_358 = arith.constant dense<0.000000e+00> : vector<128xf32>
    %1031 = vector.multi_reduction <add>, %1030, %cst_358 [0] : vector<16x128xf32> to vector<128xf32>
    %1032 = vector.shape_cast %1031 : vector<128xf32> to vector<1x128xf32>
    %cst_359 = arith.constant 1.600000e+01 : f32
    %1033 = vector.broadcast %cst_359 : f32 to vector<1x128xf32>
    %1034 = arith.divf %1032, %1033 : vector<1x128xf32>
    %cst_360 = arith.constant dense<0xFF800000> : vector<128xf32>
    %1035 = vector.multi_reduction <maximumf>, %1030, %cst_360 [0] : vector<16x128xf32> to vector<128xf32>
    %1036 = vector.shape_cast %1035 : vector<128xf32> to vector<1x128xf32>
    %cst_361 = arith.constant 0.000000e+00 : f32
    %1037 = vector.broadcast %cst_361 : f32 to vector<1x24xf32>
    %1038 = tpu.concatenate %1037, %1034, %1037 in 1 : vector<1x24xf32>, vector<1x128xf32>, vector<1x24xf32> -> vector<1x176xf32>
    %1039 = tpu.concatenate %1037, %1036, %1037 in 1 : vector<1x24xf32>, vector<1x128xf32>, vector<1x24xf32> -> vector<1x176xf32>
    %c6_362 = arith.constant 6 : index
    %c4_363 = arith.constant 4 : index
    %1040 = memref.load %arg4[%c6_362, %c4_363] : memref<10x19xf32, #tpu.memory_space<smem>>
    %1041 = vector.extract_strided_slice %1038 {offsets = [0, 0], sizes = [1, 128], strides = [1, 1]} : vector<1x176xf32> to vector<1x128xf32>
    %1042 = vector.broadcast %1040 : f32 to vector<1x128xf32>
    %1043 = arith.mulf %1042, %1041 : vector<1x128xf32>
    %c6_364 = arith.constant 6 : index
    %c5_365 = arith.constant 5 : index
    %1044 = memref.load %arg4[%c6_364, %c5_365] : memref<10x19xf32, #tpu.memory_space<smem>>
    %1045 = vector.extract_strided_slice %1038 {offsets = [0, 8], sizes = [1, 128], strides = [1, 1]} : vector<1x176xf32> to vector<1x128xf32>
    %1046 = vector.broadcast %1044 : f32 to vector<1x128xf32>
    %1047 = arith.mulf %1046, %1045 : vector<1x128xf32>
    %c6_366 = arith.constant 6 : index
    %c6_367 = arith.constant 6 : index
    %1048 = memref.load %arg4[%c6_366, %c6_367] : memref<10x19xf32, #tpu.memory_space<smem>>
    %1049 = vector.extract_strided_slice %1038 {offsets = [0, 16], sizes = [1, 128], strides = [1, 1]} : vector<1x176xf32> to vector<1x128xf32>
    %1050 = vector.broadcast %1048 : f32 to vector<1x128xf32>
    %1051 = arith.mulf %1050, %1049 : vector<1x128xf32>
    %c6_368 = arith.constant 6 : index
    %c7_369 = arith.constant 7 : index
    %1052 = memref.load %arg4[%c6_368, %c7_369] : memref<10x19xf32, #tpu.memory_space<smem>>
    %1053 = vector.extract_strided_slice %1038 {offsets = [0, 24], sizes = [1, 128], strides = [1, 1]} : vector<1x176xf32> to vector<1x128xf32>
    %1054 = vector.broadcast %1052 : f32 to vector<1x128xf32>
    %1055 = arith.mulf %1054, %1053 : vector<1x128xf32>
    %c6_370 = arith.constant 6 : index
    %c8_371 = arith.constant 8 : index
    %1056 = memref.load %arg4[%c6_370, %c8_371] : memref<10x19xf32, #tpu.memory_space<smem>>
    %1057 = vector.extract_strided_slice %1038 {offsets = [0, 32], sizes = [1, 128], strides = [1, 1]} : vector<1x176xf32> to vector<1x128xf32>
    %1058 = vector.broadcast %1056 : f32 to vector<1x128xf32>
    %1059 = arith.mulf %1058, %1057 : vector<1x128xf32>
    %c6_372 = arith.constant 6 : index
    %c9_373 = arith.constant 9 : index
    %1060 = memref.load %arg4[%c6_372, %c9_373] : memref<10x19xf32, #tpu.memory_space<smem>>
    %1061 = vector.extract_strided_slice %1038 {offsets = [0, 40], sizes = [1, 128], strides = [1, 1]} : vector<1x176xf32> to vector<1x128xf32>
    %1062 = vector.broadcast %1060 : f32 to vector<1x128xf32>
    %1063 = arith.mulf %1062, %1061 : vector<1x128xf32>
    %c6_374 = arith.constant 6 : index
    %c10_375 = arith.constant 10 : index
    %1064 = memref.load %arg4[%c6_374, %c10_375] : memref<10x19xf32, #tpu.memory_space<smem>>
    %1065 = vector.extract_strided_slice %1038 {offsets = [0, 48], sizes = [1, 128], strides = [1, 1]} : vector<1x176xf32> to vector<1x128xf32>
    %1066 = vector.broadcast %1064 : f32 to vector<1x128xf32>
    %1067 = arith.mulf %1066, %1065 : vector<1x128xf32>
    %c6_376 = arith.constant 6 : index
    %c11_377 = arith.constant 11 : index
    %1068 = memref.load %arg4[%c6_376, %c11_377] : memref<10x19xf32, #tpu.memory_space<smem>>
    %1069 = vector.extract_strided_slice %1039 {offsets = [0, 0], sizes = [1, 128], strides = [1, 1]} : vector<1x176xf32> to vector<1x128xf32>
    %1070 = vector.broadcast %1068 : f32 to vector<1x128xf32>
    %1071 = arith.mulf %1070, %1069 : vector<1x128xf32>
    %c6_378 = arith.constant 6 : index
    %c12_379 = arith.constant 12 : index
    %1072 = memref.load %arg4[%c6_378, %c12_379] : memref<10x19xf32, #tpu.memory_space<smem>>
    %1073 = vector.extract_strided_slice %1039 {offsets = [0, 8], sizes = [1, 128], strides = [1, 1]} : vector<1x176xf32> to vector<1x128xf32>
    %1074 = vector.broadcast %1072 : f32 to vector<1x128xf32>
    %1075 = arith.mulf %1074, %1073 : vector<1x128xf32>
    %c6_380 = arith.constant 6 : index
    %c13_381 = arith.constant 13 : index
    %1076 = memref.load %arg4[%c6_380, %c13_381] : memref<10x19xf32, #tpu.memory_space<smem>>
    %1077 = vector.extract_strided_slice %1039 {offsets = [0, 16], sizes = [1, 128], strides = [1, 1]} : vector<1x176xf32> to vector<1x128xf32>
    %1078 = vector.broadcast %1076 : f32 to vector<1x128xf32>
    %1079 = arith.mulf %1078, %1077 : vector<1x128xf32>
    %c6_382 = arith.constant 6 : index
    %c14_383 = arith.constant 14 : index
    %1080 = memref.load %arg4[%c6_382, %c14_383] : memref<10x19xf32, #tpu.memory_space<smem>>
    %1081 = vector.extract_strided_slice %1039 {offsets = [0, 24], sizes = [1, 128], strides = [1, 1]} : vector<1x176xf32> to vector<1x128xf32>
    %1082 = vector.broadcast %1080 : f32 to vector<1x128xf32>
    %1083 = arith.mulf %1082, %1081 : vector<1x128xf32>
    %c6_384 = arith.constant 6 : index
    %c15_385 = arith.constant 15 : index
    %1084 = memref.load %arg4[%c6_384, %c15_385] : memref<10x19xf32, #tpu.memory_space<smem>>
    %1085 = vector.extract_strided_slice %1039 {offsets = [0, 32], sizes = [1, 128], strides = [1, 1]} : vector<1x176xf32> to vector<1x128xf32>
    %1086 = vector.broadcast %1084 : f32 to vector<1x128xf32>
    %1087 = arith.mulf %1086, %1085 : vector<1x128xf32>
    %c6_386 = arith.constant 6 : index
    %c16_387 = arith.constant 16 : index
    %1088 = memref.load %arg4[%c6_386, %c16_387] : memref<10x19xf32, #tpu.memory_space<smem>>
    %1089 = vector.extract_strided_slice %1039 {offsets = [0, 40], sizes = [1, 128], strides = [1, 1]} : vector<1x176xf32> to vector<1x128xf32>
    %1090 = vector.broadcast %1088 : f32 to vector<1x128xf32>
    %1091 = arith.mulf %1090, %1089 : vector<1x128xf32>
    %c6_388 = arith.constant 6 : index
    %c17_389 = arith.constant 17 : index
    %1092 = memref.load %arg4[%c6_388, %c17_389] : memref<10x19xf32, #tpu.memory_space<smem>>
    %1093 = vector.extract_strided_slice %1039 {offsets = [0, 48], sizes = [1, 128], strides = [1, 1]} : vector<1x176xf32> to vector<1x128xf32>
    %1094 = vector.broadcast %1092 : f32 to vector<1x128xf32>
    %1095 = arith.mulf %1094, %1093 : vector<1x128xf32>
    %1096 = arith.addf %1043, %1047 : vector<1x128xf32>
    %1097 = arith.addf %1051, %1055 : vector<1x128xf32>
    %1098 = arith.addf %1059, %1063 : vector<1x128xf32>
    %1099 = arith.addf %1067, %1071 : vector<1x128xf32>
    %1100 = arith.addf %1075, %1079 : vector<1x128xf32>
    %1101 = arith.addf %1083, %1087 : vector<1x128xf32>
    %1102 = arith.addf %1091, %1095 : vector<1x128xf32>
    %1103 = arith.addf %1096, %1097 : vector<1x128xf32>
    %1104 = arith.addf %1098, %1099 : vector<1x128xf32>
    %1105 = arith.addf %1100, %1101 : vector<1x128xf32>
    %1106 = arith.addf %1103, %1104 : vector<1x128xf32>
    %1107 = arith.addf %1105, %1102 : vector<1x128xf32>
    %1108 = arith.addf %1106, %1107 : vector<1x128xf32>
    %c6_390 = arith.constant 6 : index
    %c18_391 = arith.constant 18 : index
    %1109 = memref.load %arg4[%c6_390, %c18_391] : memref<10x19xf32, #tpu.memory_space<smem>>
    %1110 = vector.broadcast %1109 : f32 to vector<1x128xf32>
    %1111 = arith.addf %1108, %1110 : vector<1x128xf32>
    %1112 = arith.negf %1111 : vector<1x128xf32>
    %1113 = math.exp %1112 : vector<1x128xf32>
    %cst_392 = arith.constant 1.000000e+00 : f32
    %1114 = vector.broadcast %cst_392 : f32 to vector<1x128xf32>
    %1115 = arith.addf %1114, %1113 : vector<1x128xf32>
    %1116 = arith.divf %1114, %1115 : vector<1x128xf32>
    %1117 = vector.broadcast %1116 : vector<1x128xf32> to vector<16x128xf32>
    %1118 = arith.mulf %1117, %1030 : vector<16x128xf32>
    %1119 = vector.broadcast %18 : vector<1x128xf32> to vector<16x128xf32>
    %1120 = arith.mulf %1118, %1119 : vector<16x128xf32>
    %1121 = arith.addf %1120, %507 : vector<16x128xf32>
    %cst_393 = arith.constant 0.000000e+00 : f32
    %1122 = vector.broadcast %cst_393 : f32 to vector<16x32xf32>
    %cst_394 = arith.constant 0.000000e+00 : f32
    %1123 = vector.broadcast %cst_394 : f32 to vector<16x28xf32>
    %1124 = tpu.concatenate %1122, %1121, %1123 in 1 : vector<16x32xf32>, vector<16x128xf32>, vector<16x28xf32> -> vector<16x188xf32>
    %1125 = vector.extract_strided_slice %1124 {offsets = [0, 0], sizes = [16, 128], strides = [1, 1]} : vector<16x188xf32> to vector<16x128xf32>
    %1126 = vector.extract_strided_slice %1124 {offsets = [0, 4], sizes = [16, 128], strides = [1, 1]} : vector<16x188xf32> to vector<16x128xf32>
    %1127 = vector.extract_strided_slice %1124 {offsets = [0, 8], sizes = [16, 128], strides = [1, 1]} : vector<16x188xf32> to vector<16x128xf32>
    %1128 = vector.extract_strided_slice %1124 {offsets = [0, 12], sizes = [16, 128], strides = [1, 1]} : vector<16x188xf32> to vector<16x128xf32>
    %1129 = vector.extract_strided_slice %1124 {offsets = [0, 16], sizes = [16, 128], strides = [1, 1]} : vector<16x188xf32> to vector<16x128xf32>
    %1130 = vector.extract_strided_slice %1124 {offsets = [0, 20], sizes = [16, 128], strides = [1, 1]} : vector<16x188xf32> to vector<16x128xf32>
    %1131 = vector.extract_strided_slice %1124 {offsets = [0, 24], sizes = [16, 128], strides = [1, 1]} : vector<16x188xf32> to vector<16x128xf32>
    %1132 = vector.extract_strided_slice %1124 {offsets = [0, 28], sizes = [16, 128], strides = [1, 1]} : vector<16x188xf32> to vector<16x128xf32>
    %1133 = vector.extract_strided_slice %1124 {offsets = [0, 32], sizes = [16, 128], strides = [1, 1]} : vector<16x188xf32> to vector<16x128xf32>
    %1134 = vector.extract_strided_slice %1124 {offsets = [0, 36], sizes = [16, 128], strides = [1, 1]} : vector<16x188xf32> to vector<16x128xf32>
    %1135 = vector.extract_strided_slice %1124 {offsets = [0, 40], sizes = [16, 128], strides = [1, 1]} : vector<16x188xf32> to vector<16x128xf32>
    %1136 = vector.extract_strided_slice %1124 {offsets = [0, 44], sizes = [16, 128], strides = [1, 1]} : vector<16x188xf32> to vector<16x128xf32>
    %1137 = vector.extract_strided_slice %1124 {offsets = [0, 48], sizes = [16, 128], strides = [1, 1]} : vector<16x188xf32> to vector<16x128xf32>
    %1138 = vector.extract_strided_slice %1124 {offsets = [0, 52], sizes = [16, 128], strides = [1, 1]} : vector<16x188xf32> to vector<16x128xf32>
    %1139 = vector.extract_strided_slice %1124 {offsets = [0, 56], sizes = [16, 128], strides = [1, 1]} : vector<16x188xf32> to vector<16x128xf32>
    %1140 = vector.extract_strided_slice %1124 {offsets = [0, 60], sizes = [16, 128], strides = [1, 1]} : vector<16x188xf32> to vector<16x128xf32>
    %1141 = tpu.concatenate %1125, %1126, %1127, %1128, %1129, %1130, %1131, %1132, %1133, %1134, %1135, %1136, %1137, %1138, %1139, %1140 in 0 : vector<16x128xf32>, vector<16x128xf32>, vector<16x128xf32>, vector<16x128xf32>, vector<16x128xf32>, vector<16x128xf32>, vector<16x128xf32>, vector<16x128xf32>, vector<16x128xf32>, vector<16x128xf32>, vector<16x128xf32>, vector<16x128xf32>, vector<16x128xf32>, vector<16x128xf32>, vector<16x128xf32>, vector<16x128xf32> -> vector<256x128xf32>
    %c7_395 = arith.constant 7 : index
    %c0_396 = arith.constant 0 : index
    %c0_397 = arith.constant 0 : index
    %1142 = vector.load %arg2[%c7_395, %c0_396, %c0_397] : memref<10x16x256xbf16, #tpu.memory_space<vmem>>, vector<1x8x256xbf16>
    %1143 = vector.shape_cast %1142 : vector<1x8x256xbf16> to vector<8x256xbf16>
    %1144 = arith.truncf %1141 : vector<256x128xf32> to vector<256x128xbf16>
    %cst_398 = arith.constant dense<0.000000e+00> : vector<8x128xf32>
    %1145 = tpu.matmul %1143, %1144, %cst_398 {dimension_numbers = #tpu.dot_dimension_numbers<[1], [0], [0], [1], [0, 0, 1, 1], [], []>} : vector<8x256xbf16>, vector<256x128xbf16>, vector<8x128xf32> -> vector<8x128xf32>
    %c7_399 = arith.constant 7 : index
    %c0_400 = arith.constant 0 : index
    %c0_401 = arith.constant 0 : index
    %1146 = vector.load %arg3[%c7_399, %c0_400, %c0_401] : memref<10x16x1xf32, #tpu.memory_space<vmem>>, vector<1x8x1xf32>
    %1147 = vector.shape_cast %1146 : vector<1x8x1xf32> to vector<8x1xf32>
    %1148 = vector.broadcast %1147 : vector<8x1xf32> to vector<8x128xf32>
    %1149 = arith.addf %1145, %1148 : vector<8x128xf32>
    %cst_402 = arith.constant 0.000000e+00 : f32
    %1150 = vector.broadcast %cst_402 : f32 to vector<8x128xf32>
    %1151 = arith.cmpf ogt, %1149, %1150 : vector<8x128xf32>
    %cst_403 = arith.constant 0.00999999977 : f32
    %1152 = vector.broadcast %cst_403 : f32 to vector<8x128xf32>
    %1153 = arith.mulf %1152, %1149 : vector<8x128xf32>
    %1154 = arith.select %1151, %1149, %1153 : vector<8x128xi1>, vector<8x128xf32>
    %1155 = vector.broadcast %12 : vector<1x128xf32> to vector<8x128xf32>
    %1156 = arith.mulf %1154, %1155 : vector<8x128xf32>
    %cst_404 = arith.constant dense<0.000000e+00> : vector<8xf32>
    %1157 = vector.multi_reduction <add>, %1156, %cst_404 [1] : vector<8x128xf32> to vector<8xf32>
    %1158 = vector.shape_cast %1157 : vector<8xf32> to vector<8x1xf32>
    %cst_405 = arith.constant 3.125000e-02 : f32
    %1159 = vector.broadcast %cst_405 : f32 to vector<8x1xf32>
    %1160 = arith.mulf %1158, %1159 : vector<8x1xf32>
    %cst_406 = arith.constant 0.000000e+00 : f32
    %1161 = vector.broadcast %cst_406 : f32 to vector<1x1xf32>
    %1162 = vector.extract_strided_slice %1160 {offsets = [0, 0], sizes = [7, 1], strides = [1, 1]} : vector<8x1xf32> to vector<7x1xf32>
    %1163 = tpu.concatenate %1161, %1162 in 0 : vector<1x1xf32>, vector<7x1xf32> -> vector<8x1xf32>
    %1164 = vector.extract_strided_slice %1160 {offsets = [1, 0], sizes = [7, 1], strides = [1, 1]} : vector<8x1xf32> to vector<7x1xf32>
    %1165 = tpu.concatenate %1164, %1161 in 0 : vector<7x1xf32>, vector<1x1xf32> -> vector<8x1xf32>
    %c7_407 = arith.constant 7 : index
    %c0_408 = arith.constant 0 : index
    %1166 = memref.load %arg4[%c7_407, %c0_408] : memref<10x19xf32, #tpu.memory_space<smem>>
    %1167 = vector.broadcast %1166 : f32 to vector<8x1xf32>
    %1168 = arith.mulf %1167, %1163 : vector<8x1xf32>
    %c7_409 = arith.constant 7 : index
    %c1_410 = arith.constant 1 : index
    %1169 = memref.load %arg4[%c7_409, %c1_410] : memref<10x19xf32, #tpu.memory_space<smem>>
    %1170 = vector.broadcast %1169 : f32 to vector<8x1xf32>
    %1171 = arith.mulf %1170, %1160 : vector<8x1xf32>
    %1172 = arith.addf %1168, %1171 : vector<8x1xf32>
    %c7_411 = arith.constant 7 : index
    %c2_412 = arith.constant 2 : index
    %1173 = memref.load %arg4[%c7_411, %c2_412] : memref<10x19xf32, #tpu.memory_space<smem>>
    %1174 = vector.broadcast %1173 : f32 to vector<8x1xf32>
    %1175 = arith.mulf %1174, %1165 : vector<8x1xf32>
    %1176 = arith.addf %1172, %1175 : vector<8x1xf32>
    %c7_413 = arith.constant 7 : index
    %c3_414 = arith.constant 3 : index
    %1177 = memref.load %arg4[%c7_413, %c3_414] : memref<10x19xf32, #tpu.memory_space<smem>>
    %1178 = vector.broadcast %1177 : f32 to vector<8x1xf32>
    %1179 = arith.addf %1176, %1178 : vector<8x1xf32>
    %1180 = arith.negf %1179 : vector<8x1xf32>
    %1181 = math.exp %1180 : vector<8x1xf32>
    %cst_415 = arith.constant 1.000000e+00 : f32
    %1182 = vector.broadcast %cst_415 : f32 to vector<8x1xf32>
    %1183 = arith.addf %1182, %1181 : vector<8x1xf32>
    %1184 = arith.divf %1182, %1183 : vector<8x1xf32>
    %1185 = vector.broadcast %1184 : vector<8x1xf32> to vector<8x128xf32>
    %1186 = arith.mulf %1185, %1154 : vector<8x128xf32>
    %cst_416 = arith.constant dense<0.000000e+00> : vector<128xf32>
    %1187 = vector.multi_reduction <add>, %1186, %cst_416 [0] : vector<8x128xf32> to vector<128xf32>
    %1188 = vector.shape_cast %1187 : vector<128xf32> to vector<1x128xf32>
    %cst_417 = arith.constant 8.000000e+00 : f32
    %1189 = vector.broadcast %cst_417 : f32 to vector<1x128xf32>
    %1190 = arith.divf %1188, %1189 : vector<1x128xf32>
    %cst_418 = arith.constant dense<0xFF800000> : vector<128xf32>
    %1191 = vector.multi_reduction <maximumf>, %1186, %cst_418 [0] : vector<8x128xf32> to vector<128xf32>
    %1192 = vector.shape_cast %1191 : vector<128xf32> to vector<1x128xf32>
    %cst_419 = arith.constant 0.000000e+00 : f32
    %1193 = vector.broadcast %cst_419 : f32 to vector<1x12xf32>
    %1194 = tpu.concatenate %1193, %1190, %1193 in 1 : vector<1x12xf32>, vector<1x128xf32>, vector<1x12xf32> -> vector<1x152xf32>
    %1195 = tpu.concatenate %1193, %1192, %1193 in 1 : vector<1x12xf32>, vector<1x128xf32>, vector<1x12xf32> -> vector<1x152xf32>
    %c7_420 = arith.constant 7 : index
    %c4_421 = arith.constant 4 : index
    %1196 = memref.load %arg4[%c7_420, %c4_421] : memref<10x19xf32, #tpu.memory_space<smem>>
    %1197 = vector.extract_strided_slice %1194 {offsets = [0, 0], sizes = [1, 128], strides = [1, 1]} : vector<1x152xf32> to vector<1x128xf32>
    %1198 = vector.broadcast %1196 : f32 to vector<1x128xf32>
    %1199 = arith.mulf %1198, %1197 : vector<1x128xf32>
    %c7_422 = arith.constant 7 : index
    %c5_423 = arith.constant 5 : index
    %1200 = memref.load %arg4[%c7_422, %c5_423] : memref<10x19xf32, #tpu.memory_space<smem>>
    %1201 = vector.extract_strided_slice %1194 {offsets = [0, 4], sizes = [1, 128], strides = [1, 1]} : vector<1x152xf32> to vector<1x128xf32>
    %1202 = vector.broadcast %1200 : f32 to vector<1x128xf32>
    %1203 = arith.mulf %1202, %1201 : vector<1x128xf32>
    %c7_424 = arith.constant 7 : index
    %c6_425 = arith.constant 6 : index
    %1204 = memref.load %arg4[%c7_424, %c6_425] : memref<10x19xf32, #tpu.memory_space<smem>>
    %1205 = vector.extract_strided_slice %1194 {offsets = [0, 8], sizes = [1, 128], strides = [1, 1]} : vector<1x152xf32> to vector<1x128xf32>
    %1206 = vector.broadcast %1204 : f32 to vector<1x128xf32>
    %1207 = arith.mulf %1206, %1205 : vector<1x128xf32>
    %c7_426 = arith.constant 7 : index
    %c7_427 = arith.constant 7 : index
    %1208 = memref.load %arg4[%c7_426, %c7_427] : memref<10x19xf32, #tpu.memory_space<smem>>
    %1209 = vector.extract_strided_slice %1194 {offsets = [0, 12], sizes = [1, 128], strides = [1, 1]} : vector<1x152xf32> to vector<1x128xf32>
    %1210 = vector.broadcast %1208 : f32 to vector<1x128xf32>
    %1211 = arith.mulf %1210, %1209 : vector<1x128xf32>
    %c7_428 = arith.constant 7 : index
    %c8_429 = arith.constant 8 : index
    %1212 = memref.load %arg4[%c7_428, %c8_429] : memref<10x19xf32, #tpu.memory_space<smem>>
    %1213 = vector.extract_strided_slice %1194 {offsets = [0, 16], sizes = [1, 128], strides = [1, 1]} : vector<1x152xf32> to vector<1x128xf32>
    %1214 = vector.broadcast %1212 : f32 to vector<1x128xf32>
    %1215 = arith.mulf %1214, %1213 : vector<1x128xf32>
    %c7_430 = arith.constant 7 : index
    %c9_431 = arith.constant 9 : index
    %1216 = memref.load %arg4[%c7_430, %c9_431] : memref<10x19xf32, #tpu.memory_space<smem>>
    %1217 = vector.extract_strided_slice %1194 {offsets = [0, 20], sizes = [1, 128], strides = [1, 1]} : vector<1x152xf32> to vector<1x128xf32>
    %1218 = vector.broadcast %1216 : f32 to vector<1x128xf32>
    %1219 = arith.mulf %1218, %1217 : vector<1x128xf32>
    %c7_432 = arith.constant 7 : index
    %c10_433 = arith.constant 10 : index
    %1220 = memref.load %arg4[%c7_432, %c10_433] : memref<10x19xf32, #tpu.memory_space<smem>>
    %1221 = vector.extract_strided_slice %1194 {offsets = [0, 24], sizes = [1, 128], strides = [1, 1]} : vector<1x152xf32> to vector<1x128xf32>
    %1222 = vector.broadcast %1220 : f32 to vector<1x128xf32>
    %1223 = arith.mulf %1222, %1221 : vector<1x128xf32>
    %c7_434 = arith.constant 7 : index
    %c11_435 = arith.constant 11 : index
    %1224 = memref.load %arg4[%c7_434, %c11_435] : memref<10x19xf32, #tpu.memory_space<smem>>
    %1225 = vector.extract_strided_slice %1195 {offsets = [0, 0], sizes = [1, 128], strides = [1, 1]} : vector<1x152xf32> to vector<1x128xf32>
    %1226 = vector.broadcast %1224 : f32 to vector<1x128xf32>
    %1227 = arith.mulf %1226, %1225 : vector<1x128xf32>
    %c7_436 = arith.constant 7 : index
    %c12_437 = arith.constant 12 : index
    %1228 = memref.load %arg4[%c7_436, %c12_437] : memref<10x19xf32, #tpu.memory_space<smem>>
    %1229 = vector.extract_strided_slice %1195 {offsets = [0, 4], sizes = [1, 128], strides = [1, 1]} : vector<1x152xf32> to vector<1x128xf32>
    %1230 = vector.broadcast %1228 : f32 to vector<1x128xf32>
    %1231 = arith.mulf %1230, %1229 : vector<1x128xf32>
    %c7_438 = arith.constant 7 : index
    %c13_439 = arith.constant 13 : index
    %1232 = memref.load %arg4[%c7_438, %c13_439] : memref<10x19xf32, #tpu.memory_space<smem>>
    %1233 = vector.extract_strided_slice %1195 {offsets = [0, 8], sizes = [1, 128], strides = [1, 1]} : vector<1x152xf32> to vector<1x128xf32>
    %1234 = vector.broadcast %1232 : f32 to vector<1x128xf32>
    %1235 = arith.mulf %1234, %1233 : vector<1x128xf32>
    %c7_440 = arith.constant 7 : index
    %c14_441 = arith.constant 14 : index
    %1236 = memref.load %arg4[%c7_440, %c14_441] : memref<10x19xf32, #tpu.memory_space<smem>>
    %1237 = vector.extract_strided_slice %1195 {offsets = [0, 12], sizes = [1, 128], strides = [1, 1]} : vector<1x152xf32> to vector<1x128xf32>
    %1238 = vector.broadcast %1236 : f32 to vector<1x128xf32>
    %1239 = arith.mulf %1238, %1237 : vector<1x128xf32>
    %c7_442 = arith.constant 7 : index
    %c15_443 = arith.constant 15 : index
    %1240 = memref.load %arg4[%c7_442, %c15_443] : memref<10x19xf32, #tpu.memory_space<smem>>
    %1241 = vector.extract_strided_slice %1195 {offsets = [0, 16], sizes = [1, 128], strides = [1, 1]} : vector<1x152xf32> to vector<1x128xf32>
    %1242 = vector.broadcast %1240 : f32 to vector<1x128xf32>
    %1243 = arith.mulf %1242, %1241 : vector<1x128xf32>
    %c7_444 = arith.constant 7 : index
    %c16_445 = arith.constant 16 : index
    %1244 = memref.load %arg4[%c7_444, %c16_445] : memref<10x19xf32, #tpu.memory_space<smem>>
    %1245 = vector.extract_strided_slice %1195 {offsets = [0, 20], sizes = [1, 128], strides = [1, 1]} : vector<1x152xf32> to vector<1x128xf32>
    %1246 = vector.broadcast %1244 : f32 to vector<1x128xf32>
    %1247 = arith.mulf %1246, %1245 : vector<1x128xf32>
    %c7_446 = arith.constant 7 : index
    %c17_447 = arith.constant 17 : index
    %1248 = memref.load %arg4[%c7_446, %c17_447] : memref<10x19xf32, #tpu.memory_space<smem>>
    %1249 = vector.extract_strided_slice %1195 {offsets = [0, 24], sizes = [1, 128], strides = [1, 1]} : vector<1x152xf32> to vector<1x128xf32>
    %1250 = vector.broadcast %1248 : f32 to vector<1x128xf32>
    %1251 = arith.mulf %1250, %1249 : vector<1x128xf32>
    %1252 = arith.addf %1199, %1203 : vector<1x128xf32>
    %1253 = arith.addf %1207, %1211 : vector<1x128xf32>
    %1254 = arith.addf %1215, %1219 : vector<1x128xf32>
    %1255 = arith.addf %1223, %1227 : vector<1x128xf32>
    %1256 = arith.addf %1231, %1235 : vector<1x128xf32>
    %1257 = arith.addf %1239, %1243 : vector<1x128xf32>
    %1258 = arith.addf %1247, %1251 : vector<1x128xf32>
    %1259 = arith.addf %1252, %1253 : vector<1x128xf32>
    %1260 = arith.addf %1254, %1255 : vector<1x128xf32>
    %1261 = arith.addf %1256, %1257 : vector<1x128xf32>
    %1262 = arith.addf %1259, %1260 : vector<1x128xf32>
    %1263 = arith.addf %1261, %1258 : vector<1x128xf32>
    %1264 = arith.addf %1262, %1263 : vector<1x128xf32>
    %c7_448 = arith.constant 7 : index
    %c18_449 = arith.constant 18 : index
    %1265 = memref.load %arg4[%c7_448, %c18_449] : memref<10x19xf32, #tpu.memory_space<smem>>
    %1266 = vector.broadcast %1265 : f32 to vector<1x128xf32>
    %1267 = arith.addf %1264, %1266 : vector<1x128xf32>
    %1268 = arith.negf %1267 : vector<1x128xf32>
    %1269 = math.exp %1268 : vector<1x128xf32>
    %cst_450 = arith.constant 1.000000e+00 : f32
    %1270 = vector.broadcast %cst_450 : f32 to vector<1x128xf32>
    %1271 = arith.addf %1270, %1269 : vector<1x128xf32>
    %1272 = arith.divf %1270, %1271 : vector<1x128xf32>
    %1273 = vector.broadcast %1272 : vector<1x128xf32> to vector<8x128xf32>
    %1274 = arith.mulf %1273, %1186 : vector<8x128xf32>
    %1275 = vector.broadcast %12 : vector<1x128xf32> to vector<8x128xf32>
    %1276 = arith.mulf %1274, %1275 : vector<8x128xf32>
    %1277 = arith.addf %1276, %348 : vector<8x128xf32>
    %cst_451 = arith.constant 0.000000e+00 : f32
    %1278 = vector.broadcast %cst_451 : f32 to vector<8x16xf32>
    %cst_452 = arith.constant 0.000000e+00 : f32
    %1279 = vector.broadcast %cst_452 : f32 to vector<8x14xf32>
    %1280 = tpu.concatenate %1278, %1277, %1279 in 1 : vector<8x16xf32>, vector<8x128xf32>, vector<8x14xf32> -> vector<8x158xf32>
    %1281 = vector.extract_strided_slice %1280 {offsets = [0, 0], sizes = [8, 128], strides = [1, 1]} : vector<8x158xf32> to vector<8x128xf32>
    %1282 = vector.extract_strided_slice %1280 {offsets = [0, 2], sizes = [8, 128], strides = [1, 1]} : vector<8x158xf32> to vector<8x128xf32>
    %1283 = vector.extract_strided_slice %1280 {offsets = [0, 4], sizes = [8, 128], strides = [1, 1]} : vector<8x158xf32> to vector<8x128xf32>
    %1284 = vector.extract_strided_slice %1280 {offsets = [0, 6], sizes = [8, 128], strides = [1, 1]} : vector<8x158xf32> to vector<8x128xf32>
    %1285 = vector.extract_strided_slice %1280 {offsets = [0, 8], sizes = [8, 128], strides = [1, 1]} : vector<8x158xf32> to vector<8x128xf32>
    %1286 = vector.extract_strided_slice %1280 {offsets = [0, 10], sizes = [8, 128], strides = [1, 1]} : vector<8x158xf32> to vector<8x128xf32>
    %1287 = vector.extract_strided_slice %1280 {offsets = [0, 12], sizes = [8, 128], strides = [1, 1]} : vector<8x158xf32> to vector<8x128xf32>
    %1288 = vector.extract_strided_slice %1280 {offsets = [0, 14], sizes = [8, 128], strides = [1, 1]} : vector<8x158xf32> to vector<8x128xf32>
    %1289 = vector.extract_strided_slice %1280 {offsets = [0, 16], sizes = [8, 128], strides = [1, 1]} : vector<8x158xf32> to vector<8x128xf32>
    %1290 = vector.extract_strided_slice %1280 {offsets = [0, 18], sizes = [8, 128], strides = [1, 1]} : vector<8x158xf32> to vector<8x128xf32>
    %1291 = vector.extract_strided_slice %1280 {offsets = [0, 20], sizes = [8, 128], strides = [1, 1]} : vector<8x158xf32> to vector<8x128xf32>
    %1292 = vector.extract_strided_slice %1280 {offsets = [0, 22], sizes = [8, 128], strides = [1, 1]} : vector<8x158xf32> to vector<8x128xf32>
    %1293 = vector.extract_strided_slice %1280 {offsets = [0, 24], sizes = [8, 128], strides = [1, 1]} : vector<8x158xf32> to vector<8x128xf32>
    %1294 = vector.extract_strided_slice %1280 {offsets = [0, 26], sizes = [8, 128], strides = [1, 1]} : vector<8x158xf32> to vector<8x128xf32>
    %1295 = vector.extract_strided_slice %1280 {offsets = [0, 28], sizes = [8, 128], strides = [1, 1]} : vector<8x158xf32> to vector<8x128xf32>
    %1296 = vector.extract_strided_slice %1280 {offsets = [0, 30], sizes = [8, 128], strides = [1, 1]} : vector<8x158xf32> to vector<8x128xf32>
    %1297 = tpu.concatenate %1281, %1282, %1283, %1284, %1285, %1286, %1287, %1288, %1289, %1290, %1291, %1292, %1293, %1294, %1295, %1296 in 0 : vector<8x128xf32>, vector<8x128xf32>, vector<8x128xf32>, vector<8x128xf32>, vector<8x128xf32>, vector<8x128xf32>, vector<8x128xf32>, vector<8x128xf32>, vector<8x128xf32>, vector<8x128xf32>, vector<8x128xf32>, vector<8x128xf32>, vector<8x128xf32>, vector<8x128xf32>, vector<8x128xf32>, vector<8x128xf32> -> vector<128x128xf32>
    %c8_453 = arith.constant 8 : index
    %c0_454 = arith.constant 0 : index
    %c0_455 = arith.constant 0 : index
    %1298 = vector.load %arg2[%c8_453, %c0_454, %c0_455] : memref<10x16x256xbf16, #tpu.memory_space<vmem>>, vector<1x4x128xbf16>
    %1299 = vector.shape_cast %1298 : vector<1x4x128xbf16> to vector<4x128xbf16>
    %1300 = arith.truncf %1297 : vector<128x128xf32> to vector<128x128xbf16>
    %cst_456 = arith.constant dense<0.000000e+00> : vector<4x128xf32>
    %1301 = tpu.matmul %1299, %1300, %cst_456 {dimension_numbers = #tpu.dot_dimension_numbers<[1], [0], [0], [1], [0, 0, 1, 1], [], []>} : vector<4x128xbf16>, vector<128x128xbf16>, vector<4x128xf32> -> vector<4x128xf32>
    %c8_457 = arith.constant 8 : index
    %c0_458 = arith.constant 0 : index
    %c0_459 = arith.constant 0 : index
    %1302 = vector.load %arg3[%c8_457, %c0_458, %c0_459] : memref<10x16x1xf32, #tpu.memory_space<vmem>>, vector<1x4x1xf32>
    %1303 = vector.shape_cast %1302 : vector<1x4x1xf32> to vector<4x1xf32>
    %1304 = vector.broadcast %1303 : vector<4x1xf32> to vector<4x128xf32>
    %1305 = arith.addf %1301, %1304 : vector<4x128xf32>
    %cst_460 = arith.constant 0.000000e+00 : f32
    %1306 = vector.broadcast %cst_460 : f32 to vector<4x128xf32>
    %1307 = arith.cmpf ogt, %1305, %1306 : vector<4x128xf32>
    %cst_461 = arith.constant 0.00999999977 : f32
    %1308 = vector.broadcast %cst_461 : f32 to vector<4x128xf32>
    %1309 = arith.mulf %1308, %1305 : vector<4x128xf32>
    %1310 = arith.select %1307, %1305, %1309 : vector<4x128xi1>, vector<4x128xf32>
    %1311 = vector.broadcast %6 : vector<1x128xf32> to vector<4x128xf32>
    %1312 = arith.mulf %1310, %1311 : vector<4x128xf32>
    %cst_462 = arith.constant dense<0.000000e+00> : vector<4xf32>
    %1313 = vector.multi_reduction <add>, %1312, %cst_462 [1] : vector<4x128xf32> to vector<4xf32>
    %1314 = vector.shape_cast %1313 : vector<4xf32> to vector<4x1xf32>
    %cst_463 = arith.constant 1.562500e-02 : f32
    %1315 = vector.broadcast %cst_463 : f32 to vector<4x1xf32>
    %1316 = arith.mulf %1314, %1315 : vector<4x1xf32>
    %cst_464 = arith.constant 0.000000e+00 : f32
    %1317 = vector.broadcast %cst_464 : f32 to vector<1x1xf32>
    %1318 = vector.extract_strided_slice %1316 {offsets = [0, 0], sizes = [3, 1], strides = [1, 1]} : vector<4x1xf32> to vector<3x1xf32>
    %1319 = tpu.concatenate %1317, %1318 in 0 : vector<1x1xf32>, vector<3x1xf32> -> vector<4x1xf32>
    %1320 = vector.extract_strided_slice %1316 {offsets = [1, 0], sizes = [3, 1], strides = [1, 1]} : vector<4x1xf32> to vector<3x1xf32>
    %1321 = tpu.concatenate %1320, %1317 in 0 : vector<3x1xf32>, vector<1x1xf32> -> vector<4x1xf32>
    %c8_465 = arith.constant 8 : index
    %c0_466 = arith.constant 0 : index
    %1322 = memref.load %arg4[%c8_465, %c0_466] : memref<10x19xf32, #tpu.memory_space<smem>>
    %1323 = vector.broadcast %1322 : f32 to vector<4x1xf32>
    %1324 = arith.mulf %1323, %1319 : vector<4x1xf32>
    %c8_467 = arith.constant 8 : index
    %c1_468 = arith.constant 1 : index
    %1325 = memref.load %arg4[%c8_467, %c1_468] : memref<10x19xf32, #tpu.memory_space<smem>>
    %1326 = vector.broadcast %1325 : f32 to vector<4x1xf32>
    %1327 = arith.mulf %1326, %1316 : vector<4x1xf32>
    %1328 = arith.addf %1324, %1327 : vector<4x1xf32>
    %c8_469 = arith.constant 8 : index
    %c2_470 = arith.constant 2 : index
    %1329 = memref.load %arg4[%c8_469, %c2_470] : memref<10x19xf32, #tpu.memory_space<smem>>
    %1330 = vector.broadcast %1329 : f32 to vector<4x1xf32>
    %1331 = arith.mulf %1330, %1321 : vector<4x1xf32>
    %1332 = arith.addf %1328, %1331 : vector<4x1xf32>
    %c8_471 = arith.constant 8 : index
    %c3_472 = arith.constant 3 : index
    %1333 = memref.load %arg4[%c8_471, %c3_472] : memref<10x19xf32, #tpu.memory_space<smem>>
    %1334 = vector.broadcast %1333 : f32 to vector<4x1xf32>
    %1335 = arith.addf %1332, %1334 : vector<4x1xf32>
    %1336 = arith.negf %1335 : vector<4x1xf32>
    %1337 = math.exp %1336 : vector<4x1xf32>
    %cst_473 = arith.constant 1.000000e+00 : f32
    %1338 = vector.broadcast %cst_473 : f32 to vector<4x1xf32>
    %1339 = arith.addf %1338, %1337 : vector<4x1xf32>
    %1340 = arith.divf %1338, %1339 : vector<4x1xf32>
    %1341 = vector.broadcast %1340 : vector<4x1xf32> to vector<4x128xf32>
    %1342 = arith.mulf %1341, %1310 : vector<4x128xf32>
    %cst_474 = arith.constant dense<0.000000e+00> : vector<128xf32>
    %1343 = vector.multi_reduction <add>, %1342, %cst_474 [0] : vector<4x128xf32> to vector<128xf32>
    %1344 = vector.shape_cast %1343 : vector<128xf32> to vector<1x128xf32>
    %cst_475 = arith.constant 4.000000e+00 : f32
    %1345 = vector.broadcast %cst_475 : f32 to vector<1x128xf32>
    %1346 = arith.divf %1344, %1345 : vector<1x128xf32>
    %cst_476 = arith.constant dense<0xFF800000> : vector<128xf32>
    %1347 = vector.multi_reduction <maximumf>, %1342, %cst_476 [0] : vector<4x128xf32> to vector<128xf32>
    %1348 = vector.shape_cast %1347 : vector<128xf32> to vector<1x128xf32>
    %cst_477 = arith.constant 0.000000e+00 : f32
    %1349 = vector.broadcast %cst_477 : f32 to vector<1x6xf32>
    %1350 = tpu.concatenate %1349, %1346, %1349 in 1 : vector<1x6xf32>, vector<1x128xf32>, vector<1x6xf32> -> vector<1x140xf32>
    %1351 = tpu.concatenate %1349, %1348, %1349 in 1 : vector<1x6xf32>, vector<1x128xf32>, vector<1x6xf32> -> vector<1x140xf32>
    %c8_478 = arith.constant 8 : index
    %c4_479 = arith.constant 4 : index
    %1352 = memref.load %arg4[%c8_478, %c4_479] : memref<10x19xf32, #tpu.memory_space<smem>>
    %1353 = vector.extract_strided_slice %1350 {offsets = [0, 0], sizes = [1, 128], strides = [1, 1]} : vector<1x140xf32> to vector<1x128xf32>
    %1354 = vector.broadcast %1352 : f32 to vector<1x128xf32>
    %1355 = arith.mulf %1354, %1353 : vector<1x128xf32>
    %c8_480 = arith.constant 8 : index
    %c5_481 = arith.constant 5 : index
    %1356 = memref.load %arg4[%c8_480, %c5_481] : memref<10x19xf32, #tpu.memory_space<smem>>
    %1357 = vector.extract_strided_slice %1350 {offsets = [0, 2], sizes = [1, 128], strides = [1, 1]} : vector<1x140xf32> to vector<1x128xf32>
    %1358 = vector.broadcast %1356 : f32 to vector<1x128xf32>
    %1359 = arith.mulf %1358, %1357 : vector<1x128xf32>
    %c8_482 = arith.constant 8 : index
    %c6_483 = arith.constant 6 : index
    %1360 = memref.load %arg4[%c8_482, %c6_483] : memref<10x19xf32, #tpu.memory_space<smem>>
    %1361 = vector.extract_strided_slice %1350 {offsets = [0, 4], sizes = [1, 128], strides = [1, 1]} : vector<1x140xf32> to vector<1x128xf32>
    %1362 = vector.broadcast %1360 : f32 to vector<1x128xf32>
    %1363 = arith.mulf %1362, %1361 : vector<1x128xf32>
    %c8_484 = arith.constant 8 : index
    %c7_485 = arith.constant 7 : index
    %1364 = memref.load %arg4[%c8_484, %c7_485] : memref<10x19xf32, #tpu.memory_space<smem>>
    %1365 = vector.extract_strided_slice %1350 {offsets = [0, 6], sizes = [1, 128], strides = [1, 1]} : vector<1x140xf32> to vector<1x128xf32>
    %1366 = vector.broadcast %1364 : f32 to vector<1x128xf32>
    %1367 = arith.mulf %1366, %1365 : vector<1x128xf32>
    %c8_486 = arith.constant 8 : index
    %c8_487 = arith.constant 8 : index
    %1368 = memref.load %arg4[%c8_486, %c8_487] : memref<10x19xf32, #tpu.memory_space<smem>>
    %1369 = vector.extract_strided_slice %1350 {offsets = [0, 8], sizes = [1, 128], strides = [1, 1]} : vector<1x140xf32> to vector<1x128xf32>
    %1370 = vector.broadcast %1368 : f32 to vector<1x128xf32>
    %1371 = arith.mulf %1370, %1369 : vector<1x128xf32>
    %c8_488 = arith.constant 8 : index
    %c9_489 = arith.constant 9 : index
    %1372 = memref.load %arg4[%c8_488, %c9_489] : memref<10x19xf32, #tpu.memory_space<smem>>
    %1373 = vector.extract_strided_slice %1350 {offsets = [0, 10], sizes = [1, 128], strides = [1, 1]} : vector<1x140xf32> to vector<1x128xf32>
    %1374 = vector.broadcast %1372 : f32 to vector<1x128xf32>
    %1375 = arith.mulf %1374, %1373 : vector<1x128xf32>
    %c8_490 = arith.constant 8 : index
    %c10_491 = arith.constant 10 : index
    %1376 = memref.load %arg4[%c8_490, %c10_491] : memref<10x19xf32, #tpu.memory_space<smem>>
    %1377 = vector.extract_strided_slice %1350 {offsets = [0, 12], sizes = [1, 128], strides = [1, 1]} : vector<1x140xf32> to vector<1x128xf32>
    %1378 = vector.broadcast %1376 : f32 to vector<1x128xf32>
    %1379 = arith.mulf %1378, %1377 : vector<1x128xf32>
    %c8_492 = arith.constant 8 : index
    %c11_493 = arith.constant 11 : index
    %1380 = memref.load %arg4[%c8_492, %c11_493] : memref<10x19xf32, #tpu.memory_space<smem>>
    %1381 = vector.extract_strided_slice %1351 {offsets = [0, 0], sizes = [1, 128], strides = [1, 1]} : vector<1x140xf32> to vector<1x128xf32>
    %1382 = vector.broadcast %1380 : f32 to vector<1x128xf32>
    %1383 = arith.mulf %1382, %1381 : vector<1x128xf32>
    %c8_494 = arith.constant 8 : index
    %c12_495 = arith.constant 12 : index
    %1384 = memref.load %arg4[%c8_494, %c12_495] : memref<10x19xf32, #tpu.memory_space<smem>>
    %1385 = vector.extract_strided_slice %1351 {offsets = [0, 2], sizes = [1, 128], strides = [1, 1]} : vector<1x140xf32> to vector<1x128xf32>
    %1386 = vector.broadcast %1384 : f32 to vector<1x128xf32>
    %1387 = arith.mulf %1386, %1385 : vector<1x128xf32>
    %c8_496 = arith.constant 8 : index
    %c13_497 = arith.constant 13 : index
    %1388 = memref.load %arg4[%c8_496, %c13_497] : memref<10x19xf32, #tpu.memory_space<smem>>
    %1389 = vector.extract_strided_slice %1351 {offsets = [0, 4], sizes = [1, 128], strides = [1, 1]} : vector<1x140xf32> to vector<1x128xf32>
    %1390 = vector.broadcast %1388 : f32 to vector<1x128xf32>
    %1391 = arith.mulf %1390, %1389 : vector<1x128xf32>
    %c8_498 = arith.constant 8 : index
    %c14_499 = arith.constant 14 : index
    %1392 = memref.load %arg4[%c8_498, %c14_499] : memref<10x19xf32, #tpu.memory_space<smem>>
    %1393 = vector.extract_strided_slice %1351 {offsets = [0, 6], sizes = [1, 128], strides = [1, 1]} : vector<1x140xf32> to vector<1x128xf32>
    %1394 = vector.broadcast %1392 : f32 to vector<1x128xf32>
    %1395 = arith.mulf %1394, %1393 : vector<1x128xf32>
    %c8_500 = arith.constant 8 : index
    %c15_501 = arith.constant 15 : index
    %1396 = memref.load %arg4[%c8_500, %c15_501] : memref<10x19xf32, #tpu.memory_space<smem>>
    %1397 = vector.extract_strided_slice %1351 {offsets = [0, 8], sizes = [1, 128], strides = [1, 1]} : vector<1x140xf32> to vector<1x128xf32>
    %1398 = vector.broadcast %1396 : f32 to vector<1x128xf32>
    %1399 = arith.mulf %1398, %1397 : vector<1x128xf32>
    %c8_502 = arith.constant 8 : index
    %c16_503 = arith.constant 16 : index
    %1400 = memref.load %arg4[%c8_502, %c16_503] : memref<10x19xf32, #tpu.memory_space<smem>>
    %1401 = vector.extract_strided_slice %1351 {offsets = [0, 10], sizes = [1, 128], strides = [1, 1]} : vector<1x140xf32> to vector<1x128xf32>
    %1402 = vector.broadcast %1400 : f32 to vector<1x128xf32>
    %1403 = arith.mulf %1402, %1401 : vector<1x128xf32>
    %c8_504 = arith.constant 8 : index
    %c17_505 = arith.constant 17 : index
    %1404 = memref.load %arg4[%c8_504, %c17_505] : memref<10x19xf32, #tpu.memory_space<smem>>
    %1405 = vector.extract_strided_slice %1351 {offsets = [0, 12], sizes = [1, 128], strides = [1, 1]} : vector<1x140xf32> to vector<1x128xf32>
    %1406 = vector.broadcast %1404 : f32 to vector<1x128xf32>
    %1407 = arith.mulf %1406, %1405 : vector<1x128xf32>
    %1408 = arith.addf %1355, %1359 : vector<1x128xf32>
    %1409 = arith.addf %1363, %1367 : vector<1x128xf32>
    %1410 = arith.addf %1371, %1375 : vector<1x128xf32>
    %1411 = arith.addf %1379, %1383 : vector<1x128xf32>
    %1412 = arith.addf %1387, %1391 : vector<1x128xf32>
    %1413 = arith.addf %1395, %1399 : vector<1x128xf32>
    %1414 = arith.addf %1403, %1407 : vector<1x128xf32>
    %1415 = arith.addf %1408, %1409 : vector<1x128xf32>
    %1416 = arith.addf %1410, %1411 : vector<1x128xf32>
    %1417 = arith.addf %1412, %1413 : vector<1x128xf32>
    %1418 = arith.addf %1415, %1416 : vector<1x128xf32>
    %1419 = arith.addf %1417, %1414 : vector<1x128xf32>
    %1420 = arith.addf %1418, %1419 : vector<1x128xf32>
    %c8_506 = arith.constant 8 : index
    %c18_507 = arith.constant 18 : index
    %1421 = memref.load %arg4[%c8_506, %c18_507] : memref<10x19xf32, #tpu.memory_space<smem>>
    %1422 = vector.broadcast %1421 : f32 to vector<1x128xf32>
    %1423 = arith.addf %1420, %1422 : vector<1x128xf32>
    %1424 = arith.negf %1423 : vector<1x128xf32>
    %1425 = math.exp %1424 : vector<1x128xf32>
    %cst_508 = arith.constant 1.000000e+00 : f32
    %1426 = vector.broadcast %cst_508 : f32 to vector<1x128xf32>
    %1427 = arith.addf %1426, %1425 : vector<1x128xf32>
    %1428 = arith.divf %1426, %1427 : vector<1x128xf32>
    %1429 = vector.broadcast %1428 : vector<1x128xf32> to vector<4x128xf32>
    %1430 = arith.mulf %1429, %1342 : vector<4x128xf32>
    %1431 = vector.broadcast %6 : vector<1x128xf32> to vector<4x128xf32>
    %1432 = arith.mulf %1430, %1431 : vector<4x128xf32>
    %1433 = arith.addf %1432, %189 : vector<4x128xf32>
    %cst_509 = arith.constant 0.000000e+00 : f32
    %1434 = vector.broadcast %cst_509 : f32 to vector<4x8xf32>
    %cst_510 = arith.constant 0.000000e+00 : f32
    %1435 = vector.broadcast %cst_510 : f32 to vector<4x7xf32>
    %1436 = tpu.concatenate %1434, %1433, %1435 in 1 : vector<4x8xf32>, vector<4x128xf32>, vector<4x7xf32> -> vector<4x143xf32>
    %1437 = vector.extract_strided_slice %1436 {offsets = [0, 0], sizes = [4, 128], strides = [1, 1]} : vector<4x143xf32> to vector<4x128xf32>
    %1438 = vector.extract_strided_slice %1436 {offsets = [0, 1], sizes = [4, 128], strides = [1, 1]} : vector<4x143xf32> to vector<4x128xf32>
    %1439 = vector.extract_strided_slice %1436 {offsets = [0, 2], sizes = [4, 128], strides = [1, 1]} : vector<4x143xf32> to vector<4x128xf32>
    %1440 = vector.extract_strided_slice %1436 {offsets = [0, 3], sizes = [4, 128], strides = [1, 1]} : vector<4x143xf32> to vector<4x128xf32>
    %1441 = vector.extract_strided_slice %1436 {offsets = [0, 4], sizes = [4, 128], strides = [1, 1]} : vector<4x143xf32> to vector<4x128xf32>
    %1442 = vector.extract_strided_slice %1436 {offsets = [0, 5], sizes = [4, 128], strides = [1, 1]} : vector<4x143xf32> to vector<4x128xf32>
    %1443 = vector.extract_strided_slice %1436 {offsets = [0, 6], sizes = [4, 128], strides = [1, 1]} : vector<4x143xf32> to vector<4x128xf32>
    %1444 = vector.extract_strided_slice %1436 {offsets = [0, 7], sizes = [4, 128], strides = [1, 1]} : vector<4x143xf32> to vector<4x128xf32>
    %1445 = vector.extract_strided_slice %1436 {offsets = [0, 8], sizes = [4, 128], strides = [1, 1]} : vector<4x143xf32> to vector<4x128xf32>
    %1446 = vector.extract_strided_slice %1436 {offsets = [0, 9], sizes = [4, 128], strides = [1, 1]} : vector<4x143xf32> to vector<4x128xf32>
    %1447 = vector.extract_strided_slice %1436 {offsets = [0, 10], sizes = [4, 128], strides = [1, 1]} : vector<4x143xf32> to vector<4x128xf32>
    %1448 = vector.extract_strided_slice %1436 {offsets = [0, 11], sizes = [4, 128], strides = [1, 1]} : vector<4x143xf32> to vector<4x128xf32>
    %1449 = vector.extract_strided_slice %1436 {offsets = [0, 12], sizes = [4, 128], strides = [1, 1]} : vector<4x143xf32> to vector<4x128xf32>
    %1450 = vector.extract_strided_slice %1436 {offsets = [0, 13], sizes = [4, 128], strides = [1, 1]} : vector<4x143xf32> to vector<4x128xf32>
    %1451 = vector.extract_strided_slice %1436 {offsets = [0, 14], sizes = [4, 128], strides = [1, 1]} : vector<4x143xf32> to vector<4x128xf32>
    %1452 = vector.extract_strided_slice %1436 {offsets = [0, 15], sizes = [4, 128], strides = [1, 1]} : vector<4x143xf32> to vector<4x128xf32>
    %1453 = tpu.concatenate %1437, %1438, %1439, %1440, %1441, %1442, %1443, %1444, %1445, %1446, %1447, %1448, %1449, %1450, %1451, %1452 in 0 : vector<4x128xf32>, vector<4x128xf32>, vector<4x128xf32>, vector<4x128xf32>, vector<4x128xf32>, vector<4x128xf32>, vector<4x128xf32>, vector<4x128xf32>, vector<4x128xf32>, vector<4x128xf32>, vector<4x128xf32>, vector<4x128xf32>, vector<4x128xf32>, vector<4x128xf32>, vector<4x128xf32>, vector<4x128xf32> -> vector<64x128xf32>
    %c9_511 = arith.constant 9 : index
    %c0_512 = arith.constant 0 : index
    %c0_513 = arith.constant 0 : index
    %1454 = vector.load %arg2[%c9_511, %c0_512, %c0_513] : memref<10x16x256xbf16, #tpu.memory_space<vmem>>, vector<1x1x64xbf16>
    %1455 = vector.shape_cast %1454 : vector<1x1x64xbf16> to vector<1x64xbf16>
    %1456 = arith.truncf %1453 : vector<64x128xf32> to vector<64x128xbf16>
    %cst_514 = arith.constant dense<0.000000e+00> : vector<1x128xf32>
    %1457 = tpu.matmul %1455, %1456, %cst_514 {dimension_numbers = #tpu.dot_dimension_numbers<[1], [0], [0], [1], [0, 0, 1, 1], [], []>} : vector<1x64xbf16>, vector<64x128xbf16>, vector<1x128xf32> -> vector<1x128xf32>
    %c9_515 = arith.constant 9 : index
    %c0_516 = arith.constant 0 : index
    %c0_517 = arith.constant 0 : index
    %1458 = vector.load %arg3[%c9_515, %c0_516, %c0_517] : memref<10x16x1xf32, #tpu.memory_space<vmem>>, vector<1x1x1xf32>
    %1459 = vector.shape_cast %1458 : vector<1x1x1xf32> to vector<1x1xf32>
    %1460 = vector.broadcast %1459 : vector<1x1xf32> to vector<1x128xf32>
    %1461 = arith.addf %1457, %1460 : vector<1x128xf32>
    %cst_518 = arith.constant dense<0.000000e+00> : vector<1xf32>
    %1462 = vector.multi_reduction <add>, %1461, %cst_518 [1] : vector<1x128xf32> to vector<1xf32>
    %1463 = vector.shape_cast %1462 : vector<1xf32> to vector<1x1xf32>
    %cst_519 = arith.constant 1.280000e+02 : f32
    %1464 = vector.broadcast %cst_519 : f32 to vector<1x1xf32>
    %1465 = arith.divf %1463, %1464 : vector<1x1xf32>
    %c9_520 = arith.constant 9 : index
    %c1_521 = arith.constant 1 : index
    %1466 = memref.load %arg4[%c9_520, %c1_521] : memref<10x19xf32, #tpu.memory_space<smem>>
    %1467 = vector.broadcast %1466 : f32 to vector<1x1xf32>
    %1468 = arith.mulf %1467, %1465 : vector<1x1xf32>
    %c9_522 = arith.constant 9 : index
    %c3_523 = arith.constant 3 : index
    %1469 = memref.load %arg4[%c9_522, %c3_523] : memref<10x19xf32, #tpu.memory_space<smem>>
    %1470 = vector.broadcast %1469 : f32 to vector<1x1xf32>
    %1471 = arith.addf %1468, %1470 : vector<1x1xf32>
    %1472 = arith.negf %1471 : vector<1x1xf32>
    %1473 = math.exp %1472 : vector<1x1xf32>
    %cst_524 = arith.constant 1.000000e+00 : f32
    %1474 = vector.broadcast %cst_524 : f32 to vector<1x1xf32>
    %1475 = arith.addf %1474, %1473 : vector<1x1xf32>
    %1476 = arith.divf %1474, %1475 : vector<1x1xf32>
    %1477 = vector.broadcast %1476 : vector<1x1xf32> to vector<1x128xf32>
    %1478 = arith.mulf %1477, %1461 : vector<1x128xf32>
    %cst_525 = arith.constant dense<0.000000e+00> : vector<128xf32>
    %1479 = vector.multi_reduction <add>, %1478, %cst_525 [0] : vector<1x128xf32> to vector<128xf32>
    %1480 = vector.shape_cast %1479 : vector<128xf32> to vector<1x128xf32>
    %cst_526 = arith.constant 1.000000e+00 : f32
    %1481 = vector.broadcast %cst_526 : f32 to vector<1x128xf32>
    %1482 = arith.divf %1480, %1481 : vector<1x128xf32>
    %cst_527 = arith.constant dense<0xFF800000> : vector<128xf32>
    %1483 = vector.multi_reduction <maximumf>, %1478, %cst_527 [0] : vector<1x128xf32> to vector<128xf32>
    %1484 = vector.shape_cast %1483 : vector<128xf32> to vector<1x128xf32>
    %cst_528 = arith.constant 0.000000e+00 : f32
    %1485 = vector.broadcast %cst_528 : f32 to vector<1x3xf32>
    %1486 = tpu.concatenate %1485, %1482, %1485 in 1 : vector<1x3xf32>, vector<1x128xf32>, vector<1x3xf32> -> vector<1x134xf32>
    %1487 = tpu.concatenate %1485, %1484, %1485 in 1 : vector<1x3xf32>, vector<1x128xf32>, vector<1x3xf32> -> vector<1x134xf32>
    %c9_529 = arith.constant 9 : index
    %c4_530 = arith.constant 4 : index
    %1488 = memref.load %arg4[%c9_529, %c4_530] : memref<10x19xf32, #tpu.memory_space<smem>>
    %1489 = vector.extract_strided_slice %1486 {offsets = [0, 0], sizes = [1, 128], strides = [1, 1]} : vector<1x134xf32> to vector<1x128xf32>
    %1490 = vector.broadcast %1488 : f32 to vector<1x128xf32>
    %1491 = arith.mulf %1490, %1489 : vector<1x128xf32>
    %c9_531 = arith.constant 9 : index
    %c5_532 = arith.constant 5 : index
    %1492 = memref.load %arg4[%c9_531, %c5_532] : memref<10x19xf32, #tpu.memory_space<smem>>
    %1493 = vector.extract_strided_slice %1486 {offsets = [0, 1], sizes = [1, 128], strides = [1, 1]} : vector<1x134xf32> to vector<1x128xf32>
    %1494 = vector.broadcast %1492 : f32 to vector<1x128xf32>
    %1495 = arith.mulf %1494, %1493 : vector<1x128xf32>
    %c9_533 = arith.constant 9 : index
    %c6_534 = arith.constant 6 : index
    %1496 = memref.load %arg4[%c9_533, %c6_534] : memref<10x19xf32, #tpu.memory_space<smem>>
    %1497 = vector.extract_strided_slice %1486 {offsets = [0, 2], sizes = [1, 128], strides = [1, 1]} : vector<1x134xf32> to vector<1x128xf32>
    %1498 = vector.broadcast %1496 : f32 to vector<1x128xf32>
    %1499 = arith.mulf %1498, %1497 : vector<1x128xf32>
    %c9_535 = arith.constant 9 : index
    %c7_536 = arith.constant 7 : index
    %1500 = memref.load %arg4[%c9_535, %c7_536] : memref<10x19xf32, #tpu.memory_space<smem>>
    %1501 = vector.extract_strided_slice %1486 {offsets = [0, 3], sizes = [1, 128], strides = [1, 1]} : vector<1x134xf32> to vector<1x128xf32>
    %1502 = vector.broadcast %1500 : f32 to vector<1x128xf32>
    %1503 = arith.mulf %1502, %1501 : vector<1x128xf32>
    %c9_537 = arith.constant 9 : index
    %c8_538 = arith.constant 8 : index
    %1504 = memref.load %arg4[%c9_537, %c8_538] : memref<10x19xf32, #tpu.memory_space<smem>>
    %1505 = vector.extract_strided_slice %1486 {offsets = [0, 4], sizes = [1, 128], strides = [1, 1]} : vector<1x134xf32> to vector<1x128xf32>
    %1506 = vector.broadcast %1504 : f32 to vector<1x128xf32>
    %1507 = arith.mulf %1506, %1505 : vector<1x128xf32>
    %c9_539 = arith.constant 9 : index
    %c9_540 = arith.constant 9 : index
    %1508 = memref.load %arg4[%c9_539, %c9_540] : memref<10x19xf32, #tpu.memory_space<smem>>
    %1509 = vector.extract_strided_slice %1486 {offsets = [0, 5], sizes = [1, 128], strides = [1, 1]} : vector<1x134xf32> to vector<1x128xf32>
    %1510 = vector.broadcast %1508 : f32 to vector<1x128xf32>
    %1511 = arith.mulf %1510, %1509 : vector<1x128xf32>
    %c9_541 = arith.constant 9 : index
    %c10_542 = arith.constant 10 : index
    %1512 = memref.load %arg4[%c9_541, %c10_542] : memref<10x19xf32, #tpu.memory_space<smem>>
    %1513 = vector.extract_strided_slice %1486 {offsets = [0, 6], sizes = [1, 128], strides = [1, 1]} : vector<1x134xf32> to vector<1x128xf32>
    %1514 = vector.broadcast %1512 : f32 to vector<1x128xf32>
    %1515 = arith.mulf %1514, %1513 : vector<1x128xf32>
    %c9_543 = arith.constant 9 : index
    %c11_544 = arith.constant 11 : index
    %1516 = memref.load %arg4[%c9_543, %c11_544] : memref<10x19xf32, #tpu.memory_space<smem>>
    %1517 = vector.extract_strided_slice %1487 {offsets = [0, 0], sizes = [1, 128], strides = [1, 1]} : vector<1x134xf32> to vector<1x128xf32>
    %1518 = vector.broadcast %1516 : f32 to vector<1x128xf32>
    %1519 = arith.mulf %1518, %1517 : vector<1x128xf32>
    %c9_545 = arith.constant 9 : index
    %c12_546 = arith.constant 12 : index
    %1520 = memref.load %arg4[%c9_545, %c12_546] : memref<10x19xf32, #tpu.memory_space<smem>>
    %1521 = vector.extract_strided_slice %1487 {offsets = [0, 1], sizes = [1, 128], strides = [1, 1]} : vector<1x134xf32> to vector<1x128xf32>
    %1522 = vector.broadcast %1520 : f32 to vector<1x128xf32>
    %1523 = arith.mulf %1522, %1521 : vector<1x128xf32>
    %c9_547 = arith.constant 9 : index
    %c13_548 = arith.constant 13 : index
    %1524 = memref.load %arg4[%c9_547, %c13_548] : memref<10x19xf32, #tpu.memory_space<smem>>
    %1525 = vector.extract_strided_slice %1487 {offsets = [0, 2], sizes = [1, 128], strides = [1, 1]} : vector<1x134xf32> to vector<1x128xf32>
    %1526 = vector.broadcast %1524 : f32 to vector<1x128xf32>
    %1527 = arith.mulf %1526, %1525 : vector<1x128xf32>
    %c9_549 = arith.constant 9 : index
    %c14_550 = arith.constant 14 : index
    %1528 = memref.load %arg4[%c9_549, %c14_550] : memref<10x19xf32, #tpu.memory_space<smem>>
    %1529 = vector.extract_strided_slice %1487 {offsets = [0, 3], sizes = [1, 128], strides = [1, 1]} : vector<1x134xf32> to vector<1x128xf32>
    %1530 = vector.broadcast %1528 : f32 to vector<1x128xf32>
    %1531 = arith.mulf %1530, %1529 : vector<1x128xf32>
    %c9_551 = arith.constant 9 : index
    %c15_552 = arith.constant 15 : index
    %1532 = memref.load %arg4[%c9_551, %c15_552] : memref<10x19xf32, #tpu.memory_space<smem>>
    %1533 = vector.extract_strided_slice %1487 {offsets = [0, 4], sizes = [1, 128], strides = [1, 1]} : vector<1x134xf32> to vector<1x128xf32>
    %1534 = vector.broadcast %1532 : f32 to vector<1x128xf32>
    %1535 = arith.mulf %1534, %1533 : vector<1x128xf32>
    %c9_553 = arith.constant 9 : index
    %c16_554 = arith.constant 16 : index
    %1536 = memref.load %arg4[%c9_553, %c16_554] : memref<10x19xf32, #tpu.memory_space<smem>>
    %1537 = vector.extract_strided_slice %1487 {offsets = [0, 5], sizes = [1, 128], strides = [1, 1]} : vector<1x134xf32> to vector<1x128xf32>
    %1538 = vector.broadcast %1536 : f32 to vector<1x128xf32>
    %1539 = arith.mulf %1538, %1537 : vector<1x128xf32>
    %c9_555 = arith.constant 9 : index
    %c17_556 = arith.constant 17 : index
    %1540 = memref.load %arg4[%c9_555, %c17_556] : memref<10x19xf32, #tpu.memory_space<smem>>
    %1541 = vector.extract_strided_slice %1487 {offsets = [0, 6], sizes = [1, 128], strides = [1, 1]} : vector<1x134xf32> to vector<1x128xf32>
    %1542 = vector.broadcast %1540 : f32 to vector<1x128xf32>
    %1543 = arith.mulf %1542, %1541 : vector<1x128xf32>
    %1544 = arith.addf %1491, %1495 : vector<1x128xf32>
    %1545 = arith.addf %1499, %1503 : vector<1x128xf32>
    %1546 = arith.addf %1507, %1511 : vector<1x128xf32>
    %1547 = arith.addf %1515, %1519 : vector<1x128xf32>
    %1548 = arith.addf %1523, %1527 : vector<1x128xf32>
    %1549 = arith.addf %1531, %1535 : vector<1x128xf32>
    %1550 = arith.addf %1539, %1543 : vector<1x128xf32>
    %1551 = arith.addf %1544, %1545 : vector<1x128xf32>
    %1552 = arith.addf %1546, %1547 : vector<1x128xf32>
    %1553 = arith.addf %1548, %1549 : vector<1x128xf32>
    %1554 = arith.addf %1551, %1552 : vector<1x128xf32>
    %1555 = arith.addf %1553, %1550 : vector<1x128xf32>
    %1556 = arith.addf %1554, %1555 : vector<1x128xf32>
    %c9_557 = arith.constant 9 : index
    %c18_558 = arith.constant 18 : index
    %1557 = memref.load %arg4[%c9_557, %c18_558] : memref<10x19xf32, #tpu.memory_space<smem>>
    %1558 = vector.broadcast %1557 : f32 to vector<1x128xf32>
    %1559 = arith.addf %1556, %1558 : vector<1x128xf32>
    %1560 = arith.negf %1559 : vector<1x128xf32>
    %1561 = math.exp %1560 : vector<1x128xf32>
    %cst_559 = arith.constant 1.000000e+00 : f32
    %1562 = vector.broadcast %cst_559 : f32 to vector<1x128xf32>
    %1563 = arith.addf %1562, %1561 : vector<1x128xf32>
    %1564 = arith.divf %1562, %1563 : vector<1x128xf32>
    %1565 = arith.mulf %1564, %1478 : vector<1x128xf32>
    %c0_560 = arith.constant 0 : index
    %c0_561 = arith.constant 0 : index
    %c0_562 = arith.constant 0 : index
    %1566 = vector.load %arg5[%c0_560, %c0_561, %c0_562] : memref<1x1x128xf32, #tpu.memory_space<vmem>>, vector<1x1x128xf32>
    %1567 = vector.shape_cast %1566 : vector<1x1x128xf32> to vector<1x128xf32>
    %1568 = vector.shape_cast %1565 : vector<1x128xf32> to vector<1x1x128xf32>
    tpu.vector_store %arg5[%c0_560, %c0_561, %c0_562], %1568 {strides = array<i32>} : memref<1x1x128xf32, #tpu.memory_space<vmem>>, vector<1x1x128xf32>,
    return
  }
  func.func @transform_0(%arg0: i32) -> (i32, i32, i32) {
    %c0_i32 = arith.constant 0 : i32
    %c0_i32_0 = arith.constant 0 : i32
    %c0_i32_1 = arith.constant 0 : i32
    return %arg0, %c0_i32, %c0_i32_0 : i32, i32, i32
  }
  func.func @transform_1(%arg0: i32) -> (i32, i32, i32) {
    %c0_i32 = arith.constant 0 : i32
    %c0_i32_0 = arith.constant 0 : i32
    %c0_i32_1 = arith.constant 0 : i32
    %c0_i32_2 = arith.constant 0 : i32
    return %c0_i32, %c0_i32_0, %c0_i32_1 : i32, i32, i32
  }
  func.func @transform_2(%arg0: i32) -> (i32, i32, i32) {
    %c0_i32 = arith.constant 0 : i32
    %c0_i32_0 = arith.constant 0 : i32
    %c0_i32_1 = arith.constant 0 : i32
    %c0_i32_2 = arith.constant 0 : i32
    return %c0_i32, %c0_i32_0, %c0_i32_1 : i32, i32, i32
  }
  func.func @transform_3(%arg0: i32) -> (i32, i32) {
    %c0_i32 = arith.constant 0 : i32
    %c0_i32_0 = arith.constant 0 : i32
    %c0_i32_1 = arith.constant 0 : i32
    return %c0_i32, %c0_i32_0 : i32, i32
  }
  func.func @transform_4(%arg0: i32) -> (i32, i32, i32) {
    %c0_i32 = arith.constant 0 : i32
    %c0_i32_0 = arith.constant 0 : i32
    %c0_i32_1 = arith.constant 0 : i32
    return %arg0, %c0_i32, %c0_i32_0 : i32, i32, i32
  }
}

</mosaic_0001>

<bundles_post_ra>
// kernel: attention_skip_dae2_forward.1
= control target key start
LH: loop header
LB: loop body
LE: loop exit
PB: predicated region body
PF: predicated region fallthrough
CT: control target
= control target key end

     0   :  { %9 = vsyncpa [#allocation4], 0  ;;  %s8674_s0 = inlined_call_operand.vmem [shape: f32[2,1,128], index: 0, kind: input, shape index: {}]   ;;  %s8675_s1 = inlined_call_operand.vmem [shape: bf16[10,16,256], index: 1, kind: input, shape index: {}]   ;;  %s8676_s2 = inlined_call_operand.vmem [shape: f32[10,16,1], index: 2, kind: input, shape index: {}]   ;;  %s8677_s3 = inlined_call_operand.vmem [shape: f32[10,19], index: 3, kind: input, shape index: {}]   ;;  %s8678_s4 = inlined_call_operand.hbm [shape: f32[2,1,128], index: 4, kind: output, shape index: {}]  }
   0x1   :  { %10 = vsyncpa [#allocation3], 0 }
   0x2   :  { %12 = vsyncpa [#allocation3 + $0x1], 0  ;;  %s6881_s15 = smov 0   ;;  %s6883_s16 = smov 0  }
   0x3   :  { %s6885_s17 = smov 0   ;;  %s6887_s18 = smov 0  }
   0x4 LB: > { %s6902_s19 = sadd.s32 4294967295, %s6799_s18   ;;  %s5243_s20 = sadd.s32 4294967294, %s6799_s18   ;;  %s6799_s18 = sphi %s6887_s18, %s8981_s18   ;;  %s6795_s17 = sphi %s6885_s17, %s8980_s17   ;;  %s6791_s16 = sphi %s6883_s16, %s8979_s16   ;;  %s6787_s15 = sphi %s6881_s15, %s8978_s15  }
   0x5   : > { %s6906_s21 = sadd.s32 1, %s6799_s18   ;;  %s114_s22 = sadd.s32 1, %s6795_s17 }
   0x6   : > { %s111_s23 = ssub.s32 %s6799_s18, %s6906_s21  ;;  %p124_p0 = scmp.ne.s32.totalorder %s6795_s17, %s6791_s16 }
   0x7   : > { %p112_p1 = scmp.eq.s32.totalorder %s111_s23, 0  ;;  %p125_p2 = scmp.eq.s32.totalorder %s6902_s19, 1 }
   0x8   : > { %p130_p3 = scmp.ne.s32.totalorder %s6791_s16, %s6787_s15  ;;  %p131_p4 = scmp.eq.s32.totalorder %s5243_s20, 1 }
   0x9   : > { %s6917_s24 = scalar_select %p112_p1, %s6795_s17, %s114_s22  }
   0xa   : > { %p6919_p5 = por %p125_p2, %p124_p0  ;;  %p6923_p6 = por %p131_p4, %p130_p3 }
   0xb   : > { %p5244_p7 = scmp.ge.s32.totalorder %s6799_s18, 1  ;;  %p138_p8 = scmp.lt.s32.totalorder %s6799_s18, 3 }
   0xc   : > { %p5570_p9 = scmp.eq.s32.totalorder %s6902_s19, 0  ;;  %s155_s29 = sshll.u32 %s8677_s3, 4  ;;  %s156_s29 = int_to_ptr.vmem [resolvable:$true] %s155_s29 }
   0xd   : > { %p139_p10 = pnand %p5244_p7, %p138_p8  ;;  %s6801_s30 = smov [#allocation2]  }
   0xe   : > { %s6802_s5 = smov 128   ;;  %s6803_s6 = smov 8  }
   0xf   : > { %p5562_p11 = pneg %p139_p10  ;;  %177 = sbr.rel (%p139_p10) target bundleno = 12523 (0x30eb), region = 36 }
  0x11   : > { %p5563_p12 = pnand %p5570_p9, %p5562_p11 }
  0x13   : > { %5565 = dma.vmem_to_smem (!%p5563_p12), %s156_s29, 256, %s6801_s30, [#allocation4], %s6802_s5, %s6802_s5, %s6803_s6  }
  0x14   : > { %6778 = dma.done.wait (%p5570_p9), [#allocation4], 256  }
  0x15   : > { %6780 = vsyncadd (%p5570_p9), [#allocation4], 4294967040 }
  0x16   : > { %184 = sfence }
  0x17   : > { %p202_p13 = scmp.lt.s32.totalorder %s6902_s19, 1  ;;  %s6804_s11 = smov 7   ;;  %vm234_vm0 = vcmask 56320   ;;  %v381_v33 = vld [vmem:[%s8676_s2] sm:$0xf]  ;;  %v6820_v34 = vmov 0  }
  0x18   : > { %s6805_s12 = smov 120   ;;  %s8723_s13 = smov 126   ;;  %5735 = vset.pattern.permute.xlu1 %v6820_v34  ;;  %5736 = vset.pattern.permute.xlu0 %v6820_v34  ;;  %vm8733_vm1 = vcmask 1031168   ;;  %vm8704_vm2 = vcmask 1039360   ;;  %vm306_vm3 = vcmask 982016   ;;  %vm8681_vm4 = vcmask 973824  }
  0x19   : > { %s203_s7 = scalar_select %p202_p13, %s6902_s19, 1  ;;  %6117 = vset.pattern.permute.xlu2 %v6820_v34  ;;  %vm358_vm5 = vcmask 1040384   ;;  %vm8679_vm6 = vcmask 1022976   ;;  %vm8684_vm7 = vcmask 965632   ;;  %vm8680_vm8 = vcmask 957440  }
  0x1a   : > { %s8697_s14 = smov 127   ;;  %s8702_s20 = smov 119   ;;  %vm8683_vm9 = vcmask 1041408   ;;  %vm8741_vm10 = vcmask 949248   ;;  %vm8696_vm11 = vcmask 1042432   ;;  %vm8682_vm12 = vcmask 1006592  }
  0x1b   : > { %s204_s10 = scalar_lea.vmem %s8674_s0, %s203_s7  ;;  %s8713_s22 = smov 118   ;;  %vm8762_vm13 = vcmask 1014784   ;;  %vm8735_vm14 = vcmask 1043456   ;;  %vm8708_vm15 = vcmask 998400  }
  0x1c   : > { %v6613_v0 = vld [vmem:[%s204_s10] ss:$0 sm:$0xff]  ;;  %s8688_s23 = smov 125   ;;  %s8692_s27 = smov 117  }
  0x1d   : > { %231 = vrot.lane.b32.xlu0 %v6613_v0, %s6804_s11  ;;  %s8747_s28 = smov 124   ;;  %s8749_s29 = smov 116  }
  0x1e   : > { %s8689_s30 = smov 123   ;;  %s8701_s5 = smov 115  }
  0x1f   : > { %s8709_s6 = smov 122   ;;  %s8711_s7 = smov 114  }
  0x20   : > { %s8699_s8 = smov 121   ;;  %s8700_s9 = smov 113  }
  0x21   : > { %s425_s10 = sld [smem:[#allocation2]] }
  0x22   : > { %s5255_s11 = sld [smem:[#allocation2 + $0x1]] }
  0x8f   : > { %v232_v1 = vpop.permute.xlu0 %231 }
  0x90   : > { %v6938_v2 = vsel %vm234_vm0, 0.0, %v232_v1  ;;  %v236_v3 = vsel %vm234_vm0, %v232_v1, 0.0  ;;  %vm8685_vm0 = vcmask 941056  }
  0x91   : > { %v5660_v4 = vpack.i.bf16 %v236_v3, %v6938_v2  ;;  %v248_v5 = vrot.slane %v6938_v2, 6  ;;  %v249_v6 = vrot.slane %v236_v3, 6  ;;  %v239_v7 = vrot.slane %v6938_v2, 7 }
  0x92   : > { %v240_v8 = vrot.slane %v236_v3, 7  ;;  %v257_v11 = vrot.slane %v6938_v2, 5  ;;  %v258_v12 = vrot.slane %v236_v3, 5  ;;  %v266_v14 = vrot.slane %v6938_v2, 4 }
  0x93   : > { %5661 = vrot.lane.b32.xlu1 %v5660_v4, %s6805_s12  ;;  %v5675_v9 = vpack.i.bf16 %v249_v6, %v248_v5  ;;  %v267_v15 = vrot.slane %v236_v3, 4  ;;  %v275_v17 = vrot.slane %v6938_v2, 3  ;;  %v276_v18 = vrot.slane %v236_v3, 3 }
  0x94   : > { %v5665_v10 = vpack.i.bf16 %v240_v8, %v239_v7  ;;  %v5685_v13 = vpack.i.bf16 %v258_v12, %v257_v11  ;;  %v284_v19 = vrot.slane %v6938_v2, 2  ;;  %v285_v20 = vrot.slane %v236_v3, 2 }
  0x95   : > { %5676 = vrot.lane.b32.xlu2 %v5675_v9, %s8723_s13  ;;  %v5695_v16 = vpack.i.bf16 %v267_v15, %v266_v14  ;;  %v5705_v21 = vpack.i.bf16 %v276_v18, %v275_v17  ;;  %v293_v23 = vrot.slane %v6938_v2, 1  ;;  %v294_v24 = vrot.slane %v236_v3, 1 }
  0x96   : > { %5666 = vrot.lane.b32.xlu0 %v5665_v10, %s8697_s14  ;;  %v5715_v22 = vpack.i.bf16 %v285_v20, %v284_v19 }
  0x97   : > { %v5725_v25 = vpack.i.bf16 %v294_v24, %v293_v23 }
  0x9b   : > { %5671 = vrot.lane.b32.xlu1 %v5665_v10, %s8702_s20  ;;  %s8745_s20 = smov 12  }
  0x9d   : > { %5681 = vrot.lane.b32.xlu2 %v5675_v9, %s8713_s22 }
  0x9e   : > { %5686 = vrot.lane.b32.xlu0 %v5685_v13, %s8688_s23  ;;  %s5256_s23 = sld [smem:[#allocation2 + $0x2]] }
  0xa3   : > { %5691 = vrot.lane.b32.xlu1 %v5685_v13, %s8692_s27  ;;  %s5262_s27 = sld [smem:[#allocation2 + $0x7]] }
  0xa5   : > { %5696 = vrot.lane.b32.xlu2 %v5695_v16, %s8747_s28 }
  0xa6   : > { %5701 = vrot.lane.b32.xlu0 %v5695_v16, %s8749_s29 }
  0xab   : > { %5706 = vrot.lane.b32.xlu1 %v5705_v21, %s8689_s30  ;;  %s5257_s30 = sld [smem:[#allocation2 + $0x3]] }
  0xad   : > { %5711 = vrot.lane.b32.xlu2 %v5705_v21, %s8701_s5  ;;  %s8725_s5 = smov 106  }
  0xae   : > { %5716 = vrot.lane.b32.xlu0 %v5715_v22, %s8709_s6 }
  0xb3   : > { %5721 = vrot.lane.b32.xlu1 %v5715_v22, %s8711_s7 }
  0xb5   : > { %5726 = vrot.lane.b32.xlu2 %v5725_v25, %s8699_s8  ;;  %s8715_s8 = smov 102  }
  0xb6   : > { %5731 = vrot.lane.b32.xlu0 %v5725_v25, %s8700_s9  ;;  %s8726_s9 = smov 98  }
  0xbb   : > { %384 = vperm.xlu1 %5735, %v381_v33  }
  0xef   : > { %v5677_v26 = vpop.permute.xlu2 %5676 }
  0xf0   : > { %v5679_v40 = vunpack.i.h.bf16 %v5677_v26  ;;  %v5678_v41 = vunpack.i.l.bf16 %v5677_v26 }
  0xf2   : > { %v255_v54 = vsel %vm8733_vm1, %v5678_v41, %v5679_v40 }
  0xf7   : > { %v5682_v28 = vpop.permute.xlu2 %5681 }
  0xf8   : > { %v5684_v45 = vunpack.i.h.bf16 %v5682_v28  ;;  %v5683_v50 = vunpack.i.l.bf16 %v5682_v28 }
  0xfa   : > { %v321_v62 = vsel %vm8684_vm7, %v5683_v50, %v5684_v45  ;;  %vm8744_vm7 = vcmask 1046528  }
  0xff   : > { %v6963_v31 = vpop.permute.xlu2 %5696 }
 0x100   : > { %v5699_v3 = vunpack.i.h.bf16 %v6963_v31  ;;  %v5698_v4 = vunpack.i.l.bf16 %v6963_v31 }
 0x102   : > { %v273_v15 = vsel %vm8762_vm13, %v5698_v4, %v5699_v3  ;;  %v437_v4 = vstv %s5257_s30  ;;  %s5270_s30 = sld [smem:[#allocation2 + $0xf]] }
 0x105   : > { %v5662_v27 = vpop.permute.xlu1 %5661 }
 0x106   : > { %v5664_v43 = vunpack.i.h.bf16 %v5662_v27  ;;  %v5663_v44 = vunpack.i.l.bf16 %v5662_v27 }
 0x107   : > { %v5712_v46 = vpop.permute.xlu2 %5711 }
 0x108   : > { %v5667_v29 = vpop.permute.xlu0 %5666  ;;  %v307_v55 = vsel %vm306_vm3, %v5663_v44, %v5664_v43  ;;  %v5714_v12 = vunpack.i.h.bf16 %v5712_v46  ;;  %v5713_v13 = vunpack.i.l.bf16 %v5712_v46 }
 0x109   : > { %v5669_v36 = vunpack.i.h.bf16 %v5667_v29  ;;  %v5668_v37 = vunpack.i.l.bf16 %v5667_v29 }
 0x10a   : > { %v342_v26 = vsel %vm8685_vm0, %v5713_v13, %v5714_v12  ;;  %vm8705_vm0 = vcmask 130048  }
 0x10b   : > { %v246_v47 = vsel %vm8704_vm2, %v5668_v37, %v5669_v36 }
 0x10c   : > { %v359_v56 = vsel %vm358_vm5, %v6938_v2, %v246_v47  ;;  %v6821_v47 = vmov 128.0  }
 0x10d   : > { %v5672_v30 = vpop.permute.xlu1 %5671  ;;  %v361_v5 = vsel %vm8683_vm9, %v359_v56, %v255_v54  ;;  %6614 = vrcp.f32 %v6821_v47  ;;  %v426_v56 = vstv %s425_s10  ;;  %s5266_s10 = sld [smem:[#allocation2 + $0xb]] }
 0x10e   : > { %v5674_v38 = vunpack.i.h.bf16 %v5672_v30  ;;  %v5673_v39 = vunpack.i.l.bf16 %v5672_v30 }
 0x10f   : > { %v5727_v16 = vpop.permute.xlu2 %5726 }
 0x110   : > { %v5687_v32 = vpop.permute.xlu0 %5686  ;;  %v314_v51 = vsel %vm8681_vm4, %v5673_v39, %v5674_v38  ;;  %vm8690_vm4 = vcmask 1045504   ;;  %v5729_v24 = vunpack.i.h.bf16 %v5727_v16  ;;  %v5728_v25 = vunpack.i.l.bf16 %v5727_v16  ;;  %v379_v39 = vld [vmem:[%s8675_s1] sm:$0x3] }
 0x111   : > { %v5689_v48 = vunpack.i.h.bf16 %v5687_v32  ;;  %v5688_v49 = vunpack.i.l.bf16 %v5687_v32  ;;  %v372_v58 = vsel %vm358_vm5, %v307_v55, %v314_v51 }
 0x112   : > { %v373_v7 = vsel %vm8683_vm9, %v372_v58, %v321_v62  ;;  %vm8687_vm9 = vcmask 924672  }
 0x113   : > { %v264_v59 = vsel %vm8679_vm6, %v5688_v49, %v5689_v48  ;;  %vm8691_vm6 = vcmask 1044480   ;;  %v6615_v48 = vpop.eup %6614 }
 0x114   : > { %v363_v6 = vsel %vm8696_vm11, %v361_v5, %v264_v59  ;;  %v411_v49 = vmul.f32 128.0, %v6615_v48 }
 0x115   : > { %v5692_v35 = vpop.permute.xlu1 %5691  ;;  %v365_v18 = vsel %vm8735_vm14, %v363_v6, %v273_v15 }
 0x116   : > { %v5694_v52 = vunpack.i.h.bf16 %v5692_v35  ;;  %v5693_v53 = vunpack.i.l.bf16 %v5692_v35  ;;  %v412_v50 = vsub.f32 1.0, %v411_v49  ;;  %v527_v49 = vstv %s5266_s10  ;;  %s5269_s10 = sld [smem:[#allocation2 + $0xe]] }
 0x118   : > { %v5702_v42 = vpop.permute.xlu0 %5701  ;;  %v328_v63 = vsel %vm8680_vm8, %v5693_v53, %v5694_v52  ;;  %vm8716_vm8 = vcmask 932864   ;;  %v413_v51 = vmul.f32 %v6615_v48, %v412_v50 }
 0x119   : > { %v5704_v60 = vunpack.i.h.bf16 %v5702_v42  ;;  %v5703_v61 = vunpack.i.l.bf16 %v5702_v42  ;;  %v374_v11 = vsel %vm8696_vm11, %v373_v7, %v328_v63 }
 0x11a   : > { %v414_v52 = vadd.f32 %v6615_v48, %v413_v51  ;;  %v511_v51 = vstv %s5262_s27  ;;  %s5264_s27 = sld [smem:[#allocation2 + $0x9]] }
 0x11b   : > { %v335_v8 = vsel %vm8741_vm10, %v5703_v61, %v5704_v60  ;;  %v433_v60 = vstv %s5256_s23  ;;  %s8693_s23 = smov 3  }
 0x11c   : > { %v375_v19 = vsel %vm8735_vm14, %v374_v11, %v335_v8 }
 0x11d   : > { %v5707_v57 = vpop.permute.xlu1 %5706  ;;  %v376_v29 = vsel %vm8691_vm6, %v375_v19, %v342_v26  ;;  %v6822_v19 = vmov 4.0  }
 0x11e   : > { %v5709_v0 = vunpack.i.h.bf16 %v5707_v57  ;;  %v5708_v1 = vunpack.i.l.bf16 %v5707_v57  ;;  %v429_v57 = vstv %s5255_s11  ;;  %s5272_s11 = sld [smem:[#allocation2 + $0x11]] }
 0x120   : > { %v5717_v2 = vpop.permute.xlu0 %5716  ;;  %v282_v14 = vsel %vm8682_vm12, %v5708_v1, %v5709_v0  ;;  %vm8686_vm12 = vcmask 990208  }
 0x121   : > { %v5719_v9 = vunpack.i.h.bf16 %v5717_v2  ;;  %v5718_v10 = vunpack.i.l.bf16 %v5717_v2  ;;  %v367_v23 = vsel %vm8691_vm6, %v365_v18, %v282_v14  ;;  %v300_v34 = vsel %vm8686_vm12, %v5728_v25, %v5729_v24 }
 0x123   : > { %v291_v22 = vsel %vm8708_vm15, %v5718_v10, %v5719_v9 }
 0x124   : > { %v369_v32 = vsel %vm8690_vm4, %v367_v23, %v291_v22  ;;  %v550_v50 = vstv %s5272_s11  ;;  %s5265_s11 = sld [smem:[#allocation2 + $0xa]] }
 0x125   : > { %v5722_v17 = vpop.permute.xlu1 %5721  ;;  %v371_v36 = vsel %vm8744_vm7, %v369_v32, %v300_v34 }
 0x126   : > { %v5724_v20 = vunpack.i.h.bf16 %v5722_v17  ;;  %v5723_v21 = vunpack.i.l.bf16 %v5722_v17 }
 0x128   : > { %v5732_v27 = vpop.permute.xlu0 %5731  ;;  %v349_v28 = vsel %vm8716_vm8, %v5723_v21, %v5724_v20 }
 0x129   : > { %v5734_v30 = vunpack.i.h.bf16 %v5732_v27  ;;  %v5733_v31 = vunpack.i.l.bf16 %v5732_v27  ;;  %v377_v33 = vsel %vm8690_vm4, %v376_v29, %v349_v28 }
 0x12b   : > { %v356_v35 = vsel %vm8687_vm9, %v5733_v31, %v5734_v30  ;;  %vm415_vm9 = vweird.f32 %v6615_v48 }
 0x12c   : > { %v378_v37 = vsel %vm8744_vm7, %v377_v33, %v356_v35  ;;  %v7005_v53 = vsel %vm415_vm9, %v6615_v48, %v414_v52 }
 0x12d   : > { %v380_v38 = vpack.c.bf16 %v378_v37, %v371_v36  ;;  %v385_v40 = vpop.permute.xlu1 %384 }
 0x12f   : > { %398 = vmatpush.bf16.msra.mxu3 %v380_v38 }
 0x132   : > { %5254 = vmatmul.msk.bf16.vlgmr.msra.gmra.mxu3 %vm8705_vm0, %v379_v39  ;;  %vm8742_vm0 = vcmask 883712  }
 0x1b5   : > { %v400_v41 = vpop.f32.mrf.mxu3 }
 0x1b6   : > { %v401_v42 = vadd.f32 %v400_v41, %v385_v40 }
 0x1b8   : > { %v405_v43 = vmul.f32 0.01, %v401_v42  ;;  %vm404_vm12 = vcmp.gt.f32.partialorder %v401_v42, 0.0 }
 0x1ba   : > { %v406_v44 = vsel %vm404_vm12, %v401_v42, %v405_v43  ;;  %v542_v43 = vstv %s5270_s30  ;;  %s5268_s30 = sld [smem:[#allocation2 + $0xd]] }
 0x1bb   : > { %v407_v45 = vsel %vm8735_vm14, %v406_v44, 0.0 }
 0x1bc   : > { %408 = vadd.xlane.f32.xlu2 %v407_v45 }
 0x1bd   : > { %v402_v46 = vpop.f32.mrf.mxu3 }
 0x22f   : > { %v409_v54 = vpop.xlane.xlu2 %408 }
 0x230   : > { %v417_v55 = vmul.f32 %v7005_v53, %v409_v54 }
 0x232   : > { %v419_v58 = vrot.slane %v417_v55, 7  ;;  %v422_v59 = vrot.slane %v417_v55, 1  ;;  %v430_v0 = vmul.f32 %v429_v57, %v417_v55 }
 0x234   : > { %v421_v61 = vsel %vm358_vm5, 0.0, %v419_v58  ;;  %v424_v62 = vsel %vm8696_vm11, %v422_v59, 0.0  ;;  %v534_v58 = vstv %s5268_s30  ;;  %s5271_s30 = sld [smem:[#allocation2 + $0x10]] }
 0x235   : > { %v427_v63 = vmul.f32 %v426_v56, %v421_v61  ;;  %v434_v3 = vmul.f32 %v433_v60, %v424_v62 }
 0x237   : > { %v431_v1 = vadd.f32 %v430_v0, %v427_v63  ;;  %v519_v0 = vstv %s5264_s27  ;;  %s5261_s27 = sld [smem:[#allocation2 + $0x6]] }
 0x239   : > { %v435_v2 = vadd.f32 %v434_v3, %v431_v1 }
 0x23b   : > { %v438_v5 = vadd.f32 %v437_v4, %v435_v2  ;;  %v538_v4 = vstv %s5269_s10  ;;  %s5260_s10 = sld [smem:[#allocation2 + $0x5]] }
 0x23d   : > { %v5258_v6 = vmul.f32 -1.442695, %v438_v5 }
 0x23f   : > { %6616 = vpow2.f32 %v5258_v6 }
 0x245   : > { %v6617_v7 = vpop.eup %6616 }
 0x246   : > { %v442_v8 = vadd.f32 1.0, %v6617_v7 }
 0x248   : > { %6618 = vrcp.f32 %v442_v8  ;;  %v454_v12 = vand.u32 2147483648, %v442_v8  ;;  %v452_v14 = vand.u32 2147483647, %v442_v8  ;;  %vm448_vm12 = vweird.f32 %v442_v8 }
 0x249   : > { %6620 = vrcp.f32 %v6822_v19 }
 0x24a   : > { %v455_v16 = vor.u32 1.1754944e-38, %v454_v12  ;;  %vm453_vm6 = vcmp.eq.f32.partialorder %v452_v14, 8.507059e+37 }
 0x24e   : > { %v6619_v9 = vpop.eup %6618 }
 0x24f   : > { %v444_v10 = vmul.f32 %v6619_v9, %v442_v8  ;;  %vm449_vm9 = vweird.f32 %v6619_v9  ;;  %v6621_v20 = vpop.eup %6620 }
 0x250   : > { %vm450_vm4 = vmor %vm448_vm12, %vm449_vm9  ;;  %v472_v25 = vmul.f32 4.0, %v6621_v20 }
 0x251   : > { %v445_v11 = vsub.f32 1.0, %v444_v10 }
 0x252   : > { %v473_v30 = vsub.f32 1.0, %v472_v25 }
 0x253   : > { %v446_v13 = vmul.f32 %v6619_v9, %v445_v11 }
 0x254   : > { %v474_v35 = vmul.f32 %v6621_v20, %v473_v30 }
 0x255   : > { %v447_v15 = vadd.f32 %v6619_v9, %v446_v13 }
 0x256   : > { %v475_v39 = vadd.f32 %v6621_v20, %v474_v35 }
 0x257   : > { %v451_v17 = vsel %vm450_vm4, %v6619_v9, %v447_v15  ;;  %vm476_vm4 = vweird.f32 %v6621_v20  ;;  %v523_v9 = vstv %s5265_s11  ;;  %s5263_s11 = sld [smem:[#allocation2 + $0x8]] }
 0x258   : > { %v456_v18 = vsel %vm453_vm6, %v455_v16, %v451_v17  ;;  %v7017_v41 = vsel %vm476_vm4, %v6621_v20, %v475_v39  ;;  %vm8695_vm6 = vcmask 23552   ;;  %v546_v16 = vstv %s5271_s30  ;;  %s5267_s30 = sld [smem:[#allocation2 + $0xc]] }
 0x259   : > { %460 = vperm.xlu0 %5736, %v456_v18  }
 0x2cb   : > { %v461_v21 = vpop.permute.xlu0 %460 }
 0x2cc   : > { %v7010_v22 = vmul.f32 %v461_v21, %v406_v44 }
 0x2ce   : > { %v464_v23 = vsel %vm8735_vm14, %v7010_v22, 0.0  ;;  %v479_v24 = vsel %vm8735_vm14, %v7010_v22, -inf }
 0x2cf   : > { %v465_v26 = vrot.slane %v464_v23, 4  ;;  %v480_v27 = vrot.slane %v479_v24, 4 }
 0x2d1   : > { %v466_v28 = vadd.f32 %v465_v26, %v464_v23  ;;  %v481_v29 = vmax.f32 %v479_v24, %v480_v27  ;;  %v507_v27 = vstv %s5261_s27  ;;  %s5259_s27 = sld [smem:[#allocation2 + $0x4]] }
 0x2d3   : > { %v467_v31 = vrot.slane %v466_v28, 2  ;;  %v482_v32 = vrot.slane %v481_v29, 2 }
 0x2d5   : > { %v483_v33 = vmax.f32 %v481_v29, %v482_v32  ;;  %v468_v34 = vadd.f32 %v467_v31, %v466_v28  ;;  %v503_v28 = vstv %s5260_s10  ;;  %s5273_s10 = sld [smem:[#allocation2 + $0x12]] }
 0x2d7   : > { %v484_v36 = vrot.slane %v483_v33, 1  ;;  %v469_v38 = vrot.slane %v468_v34, 1 }
 0x2d9   : > { %v485_v37 = vmax.f32 %v483_v33, %v484_v36  ;;  %v470_v40 = vadd.f32 %v469_v38, %v468_v34 }
 0x2db   : > { %494 = vrot.lane.b32.xlu1 %v485_v37, %s8693_s23  ;;  %v478_v42 = vmul.f32 %v7017_v41, %v470_v40 }
 0x2e3   : > { %487 = vrot.lane.b32.xlu1 %v478_v42, %s8693_s23  ;;  %s8721_s23 = smov 6   ;;  %v515_v42 = vstv %s5263_s11  ;;  %s6826_s11 = smov 14  }
 0x34d   : > { %v495_v44 = vpop.permute.xlu1 %494 }
 0x34e   : > { %v7022_v45 = vsel %vm8695_vm6, 0.0, %v495_v44  ;;  %v7025_v46 = vsel %vm8695_vm6, %v495_v44, 0.0 }
 0x34f   : > { %v543_v47 = vmul.f32 %v542_v43, %v7022_v45  ;;  %v544_v48 = vmul.f32 %v542_v43, %v7025_v46  ;;  %v528_v55 = vmul.f32 %v527_v49, %v7022_v45  ;;  %v551_v56 = vmul.f32 %v550_v50, %v7022_v45 }
 0x350   : > { %v552_v59 = vmul.f32 %v550_v50, %v7025_v46  ;;  %v536_v60 = vmul.f32 %v534_v58, %v7025_v46  ;;  %v535_v62 = vmul.f32 %v534_v58, %v7022_v45  ;;  %v539_v6 = vmul.f32 %v538_v4, %v7022_v45 }
 0x351   : > { %603 = vrot.lane.b32.xlu0 %v543_v47, %s8697_s14  ;;  %605 = vrot.lane.b32.xlu1 %v544_v48, %s8697_s14  ;;  %v540_v17 = vmul.f32 %v538_v4, %v7025_v46  ;;  %v548_v18 = vmul.f32 %v546_v16, %v7025_v46  ;;  %v547_v21 = vmul.f32 %v546_v16, %v7022_v45 }
 0x355   : > { %v488_v52 = vpop.permute.xlu1 %487 }
 0x356   : > { %v7032_v54 = vsel %vm8695_vm6, %v488_v52, 0.0  ;;  %v7045_v61 = vsel %vm8695_vm6, 0.0, %v488_v52 }
 0x357   : > { %v513_v57 = vmul.f32 %v511_v51, %v7032_v54  ;;  %v512_v63 = vmul.f32 %v511_v51, %v7045_v61  ;;  %v520_v1 = vmul.f32 %v519_v0, %v7045_v61  ;;  %v521_v3 = vmul.f32 %v519_v0, %v7032_v54 }
 0x358   : > { %v524_v10 = vmul.f32 %v523_v9, %v7045_v61  ;;  %v525_v11 = vmul.f32 %v523_v9, %v7032_v54  ;;  %v508_v30 = vmul.f32 %v507_v27, %v7045_v61  ;;  %v504_v33 = vmul.f32 %v503_v28, %v7045_v61 }
 0x359   : > { %585 = vrot.lane.b32.xlu0 %v528_v55, %s8721_s23  ;;  %614 = vrot.lane.b32.xlu1 %v551_v56, %s8697_s14  ;;  %v505_v35 = vmul.f32 %v503_v28, %v7032_v54  ;;  %v509_v36 = vmul.f32 %v507_v27, %v7032_v54  ;;  %v517_v43 = vmul.f32 %v515_v42, %v7032_v54 }
 0x35a   : > { %566 = vrot.lane.b32.xlu2 %v513_v57, %s8697_s14  ;;  %v516_v47 = vmul.f32 %v515_v42, %v7045_v61  ;;  %v530_v57 = vstv %s5267_s30  ;;  %s6827_s30 = smov 112  }
 0x35b   : > { %v532_v54 = vmul.f32 %v530_v57, %v7025_v46 }
 0x361   : > { %616 = vrot.lane.b32.xlu0 %v552_v59, %s8697_s14  ;;  %594 = vrot.lane.b32.xlu1 %v536_v60, %s8697_s14  ;;  %v531_v60 = vmul.f32 %v530_v57, %v7022_v45 }
 0x369   : > { %592 = vrot.lane.b32.xlu0 %v535_v62, %s8697_s14  ;;  %564 = vrot.lane.b32.xlu1 %v512_v63, %s8697_s14 }
 0x371   : > { %575 = vrot.lane.b32.xlu0 %v520_v1, %s8697_s14  ;;  %577 = vrot.lane.b32.xlu1 %v521_v3, %s8697_s14 }
 0x3b4   : > { %v567_v29 = vpop.permute.xlu2 %566 }
 0x3b5   : > { %v572_v37 = vadd.f32 %v567_v29, %v509_v36 }
 0x3c3   : > { %v604_v2 = vpop.permute.xlu0 %603  ;;  %v606_v5 = vpop.permute.xlu1 %605 }
 0x3c4   : > { %v607_v7 = vsel %vm8704_vm2, %v604_v2, %v606_v5  ;;  %v611_v23 = vadd.f32 %v606_v5, %v540_v17 }
 0x3c5   : > { %v610_v8 = vadd.f32 %v607_v7, %v539_v6 }
 0x3c7   : > { %645 = vrot.lane.b32.xlu2 %v610_v8, %s8723_s13 }
 0x3cb   : > { %v586_v12 = vpop.permute.xlu0 %585  ;;  %v615_v13 = vpop.permute.xlu1 %614 }
 0x3cc   : > { %v588_v14 = vadd.f32 %v586_v12, %v524_v10  ;;  %v589_v15 = vadd.f32 %v586_v12, %v525_v11  ;;  %v500_v11 = vstv %s5259_s27  ;;  %s8755_s27 = smov 100  }
 0x3ce   : > { %634 = vrot.lane.b32.xlu0 %v588_v14, %s8723_s13  ;;  %636 = vrot.lane.b32.xlu1 %v589_v15, %s8723_s13  ;;  %v501_v14 = vmul.f32 %v500_v11, %v7045_v61 }
 0x3d3   : > { %v617_v19 = vpop.permute.xlu0 %616  ;;  %v595_v20 = vpop.permute.xlu1 %594 }
 0x3d4   : > { %v618_v24 = vsel %vm8704_vm2, %v615_v13, %v617_v19  ;;  %v622_v25 = vadd.f32 %v617_v19, %v548_v18  ;;  %v600_v62 = vadd.f32 %v595_v20, %v532_v54 }
 0x3d5   : > { %v621_v26 = vadd.f32 %v618_v24, %v547_v21  ;;  %v684_v24 = vstv %s5273_s10  ;;  %s8759_s10 = smov 104  }
 0x3d6   : > { %647 = vrot.lane.b32.xlu0 %v611_v23, %s8723_s13  ;;  %667 = vrot.lane.b32.xlu2 %v622_v25, %s8747_s28 }
 0x3d7   : > { %665 = vrot.lane.b32.xlu1 %v621_v26, %s8747_s28 }
 0x3db   : > { %v565_v31 = vpop.permute.xlu1 %564  ;;  %v593_v38 = vpop.permute.xlu0 %592 }
 0x3dc   : > { %v568_v32 = vsel %vm8704_vm2, %v565_v31, %v567_v29  ;;  %v596_v59 = vsel %vm8704_vm2, %v593_v38, %v595_v20 }
 0x3dd   : > { %v571_v34 = vadd.f32 %v568_v32, %v508_v30  ;;  %v599_v63 = vadd.f32 %v596_v59, %v531_v60 }
 0x3de   : > { %555 = vrot.lane.b32.xlu0 %v504_v33, %s8697_s14 }
 0x3df   : > { %557 = vrot.lane.b32.xlu1 %v505_v35, %s8697_s14  ;;  %625 = vrot.lane.b32.xlu2 %v571_v34, %s8723_s13 }
 0x3e3   : > { %v576_v39 = vpop.permute.xlu0 %575  ;;  %v578_v40 = vpop.permute.xlu1 %577 }
 0x3e4   : > { %v579_v44 = vsel %vm8704_vm2, %v576_v39, %v578_v40  ;;  %v583_v48 = vadd.f32 %v578_v40, %v517_v43  ;;  %v206_v43 = vlaneseq }
 0x3e5   : > { %v582_v49 = vadd.f32 %v579_v44, %v516_v47 }
 0x3e6   : > { %627 = vrot.lane.b32.xlu0 %v572_v37, %s8723_s13  ;;  %v7098_v44 = vand.u32 127, %v206_v43 }
 0x3e8   : > { %v208_v47 = vand.u32 1, %v7098_v44 }
 0x3ea   : > { %vm209_vm11 = vcmp.eq.s32.totalorder %v208_v47, 0 }
 0x421   : > { %v646_v52 = vpop.permute.xlu2 %645 }
 0x430   : > { %v668_v1 = vpop.permute.xlu2 %667 }
 0x439   : > { %v626_v45 = vpop.permute.xlu2 %625 }
 0x440   : > { %v635_v50 = vpop.permute.xlu0 %634  ;;  %v637_v51 = vpop.permute.xlu1 %636 }
 0x441   : > { %v638_v55 = vsel %vm8733_vm1, %v635_v50, %v637_v51  ;;  %v642_v56 = vadd.f32 %v637_v51, %v583_v48  ;;  %v6825_v50 = vmov 0.0  }
 0x442   : > { %v641_v58 = vadd.f32 %v638_v55, %v582_v49  ;;  %v7103_v51 = vsel %vm209_vm11, 1.0, %v6825_v50  ;;  %vm8706_vm11 = vcmask 850944  }
 0x443   : > { %658 = vrot.lane.b32.xlu2 %v642_v56, %s8747_s28 }
 0x444   : > { %656 = vrot.lane.b32.xlu1 %v641_v58, %s8747_s28 }
 0x448   : > { %v648_v0 = vpop.permute.xlu0 %647 }
 0x449   : > { %v649_v3 = vsel %vm8733_vm1, %v646_v52, %v648_v0  ;;  %v653_v4 = vadd.f32 %v648_v0, %v600_v62  ;;  %v666_v2 = vpop.permute.xlu1 %665  ;;  %v5276_v62 = vld [vmem:[%s8676_s2 + $0x10] sm:$0xff] }
 0x44a   : > { %v652_v5 = vadd.f32 %v649_v3, %v599_v63  ;;  %v669_v6 = vsel %vm8762_vm13, %v666_v2, %v668_v1 }
 0x44b   : > { %v673_v7 = vadd.f32 %v668_v1, %v653_v4 }
 0x44c   : > { %v672_v8 = vadd.f32 %v669_v6, %v652_v5 }
 0x44d   : > { %678 = vrot.lane.b32.xlu1 %v673_v7, %s8697_s14 }
 0x44e   : > { %676 = vrot.lane.b32.xlu0 %v672_v8, %s8697_s14 }
 0x450   : > { %v556_v46 = vpop.permute.xlu0 %555 }
 0x451   : > { %v558_v9 = vpop.permute.xlu1 %557 }
 0x452   : > { %v559_v13 = vsel %vm8704_vm2, %v556_v46, %v558_v9 }
 0x453   : > { %v561_v16 = vadd.f32 %v559_v13, %v501_v14 }
 0x458   : > { %v628_v12 = vpop.permute.xlu0 %627 }
 0x459   : > { %v629_v15 = vsel %vm8733_vm1, %v626_v45, %v628_v12 }
 0x45a   : > { %v631_v19 = vadd.f32 %v629_v15, %v561_v16 }
 0x49d   : > { %v659_v17 = vpop.permute.xlu2 %658 }
 0x4b6   : > { %v657_v10 = vpop.permute.xlu1 %656 }
 0x4b7   : > { %v660_v18 = vsel %vm8762_vm13, %v657_v10, %v659_v17 }
 0x4b8   : > { %v662_v21 = vadd.f32 %v660_v18, %v631_v19 }
 0x4bf   : > { %v679_v20 = vpop.permute.xlu1 %678 }
 0x4c0   : > { %v677_v23 = vpop.permute.xlu0 %676 }
 0x4c1   : > { %v680_v25 = vsel %vm8704_vm2, %v677_v23, %v679_v20 }
 0x4c2   : > { %v682_v26 = vadd.f32 %v680_v25, %v662_v21 }
 0x4c4   : > { %v685_v27 = vadd.f32 %v684_v24, %v682_v26 }
 0x4c6   : > { %v5274_v28 = vmul.f32 -1.442695, %v685_v27 }
 0x4c8   : > { %6622 = vpow2.f32 %v5274_v28 }
 0x4ce   : > { %v6623_v29 = vpop.eup %6622 }
 0x4cf   : > { %v689_v30 = vadd.f32 1.0, %v6623_v29 }
 0x4d1   : > { %6624 = vrcp.f32 %v689_v30  ;;  %v701_v33 = vand.u32 2147483648, %v689_v30  ;;  %v699_v35 = vand.u32 2147483647, %v689_v30  ;;  %vm695_vm12 = vweird.f32 %v689_v30 }
 0x4d3   : > { %v702_v37 = vor.u32 1.1754944e-38, %v701_v33  ;;  %vm700_vm6 = vcmp.eq.f32.partialorder %v699_v35, 8.507059e+37 }
 0x4d7   : > { %v6625_v61 = vpop.eup %6624 }
 0x4d8   : > { %v691_v31 = vmul.f32 %v6625_v61, %v689_v30  ;;  %vm696_vm9 = vweird.f32 %v6625_v61 }
 0x4d9   : > { %vm697_vm4 = vmor %vm695_vm12, %vm696_vm9  ;;  %vm8718_vm9 = vcmask 834560   ;;  %vm8743_vm12 = vcmask 818176  }
 0x4da   : > { %v692_v32 = vsub.f32 1.0, %v691_v31 }
 0x4dc   : > { %v693_v34 = vmul.f32 %v6625_v61, %v692_v32 }
 0x4de   : > { %v694_v36 = vadd.f32 %v6625_v61, %v693_v34 }
 0x4e0   : > { %v698_v38 = vsel %vm697_vm4, %v6625_v61, %v694_v36  ;;  %vm8720_vm4 = vcmask 801792  }
 0x4e1   : > { %v703_v39 = vsel %vm700_vm6, %v702_v37, %v698_v38  ;;  %vm718_vm6 = vcmask 113664  }
 0x4e2   : > { %v705_v40 = vperm.slane %v703_v39, 0 }
 0x4e4   : > { %v706_v42 = vmul.f32 %v705_v40, %v7010_v22 }
 0x4e6   : > { %708 = vrot.lane.b32.xlu2 %v706_v42, %s8697_s14  ;;  %s8703_s14 = smov 110  }
 0x540   : > { %v709_v48 = vpop.permute.xlu2 %708 }
 0x541   : > { %v711_v49 = vsel %vm8704_vm2, %v709_v48, 0.0  ;;  %vm771_vm2 = vcmask 916480  }
 0x542   : > { %v712_v52 = vmax.f32 %v706_v42, %v711_v49 }
 0x544   : > { %v7106_v55 = vmul.f32 %v7103_v51, %v712_v52 }
 0x546   : > { %715 = vrot.lane.b32.xlu0 %v7106_v55, %s6826_s11  ;;  %s8751_s11 = smov 108  }
 0x5b8   : > { %v716_v22 = vpop.permute.xlu0 %715 }
 0x5b9   : > { %v7109_v56 = vsel %vm718_vm6, 0.0, %v716_v22  ;;  %v720_v57 = vsel %vm718_vm6, %v716_v22, 0.0  ;;  %vm8707_vm6 = vcmask 900096  }
 0x5ba   : > { %v5747_v58 = vpack.i.bf16 %v720_v57, %v7109_v56  ;;  %v723_v54 = vrot.slane %v7109_v56, 4  ;;  %v724_v59 = vrot.slane %v720_v57, 4 }
 0x5bc   : > { %5748 = vrot.lane.b32.xlu2 %v5747_v58, %s6827_s30  ;;  %5743 = vrot.lane.b32.xlu0 %v5747_v58, %s8755_s27  ;;  %v5777_v60 = vpack.i.bf16 %v724_v59, %v723_v54 }
 0x5bd   : > { %5738 = vrot.lane.b32.xlu1 %v5747_v58, %s8759_s10 }
 0x5c4   : > { %5763 = vrot.lane.b32.xlu2 %v5747_v58, %s8749_s29  ;;  %5758 = vrot.lane.b32.xlu0 %v5747_v58, %s6805_s12 }
 0x5c5   : > { %5753 = vrot.lane.b32.xlu1 %v5747_v58, %s8751_s11 }
 0x5cc   : > { %5778 = vrot.lane.b32.xlu0 %v5777_v60, %s8703_s14  ;;  %5768 = vrot.lane.b32.xlu2 %v5777_v60, %s8715_s8  ;;  %s5281_s8 = sld [smem:[#allocation2 + $0x83]] }
 0x5cd   : > { %5773 = vrot.lane.b32.xlu1 %v5777_v60, %s8726_s9  ;;  %s5292_s14 = sld [smem:[#allocation2 + $0x8d]] }
 0x5ce   : > { %s5312_s9 = sld [smem:[#allocation2 + $0x101]] }
 0x5d4   : > { %5793 = vrot.lane.b32.xlu0 %v5777_v60, %s8711_s7  ;;  %5783 = vrot.lane.b32.xlu2 %v5777_v60, %s8725_s5  ;;  %s5279_s7 = sld [smem:[#allocation2 + $0x81]]  ;;  %s6845_s5 = smov 96  }
 0x5d5   : > { %5788 = vrot.lane.b32.xlu1 %v5777_v60, %s8713_s22  ;;  %s5280_s22 = sld [smem:[#allocation2 + $0x82]] }
 0x5dc   : > { %5808 = vrot.lane.b32.xlu0 %v5777_v60, %s8709_s6  ;;  %5803 = vrot.lane.b32.xlu2 %v5747_v58, %s8747_s28  ;;  %s5278_s6 = sld [smem:[#allocation2 + $0x80]] }
 0x5dd   : > { %5798 = vrot.lane.b32.xlu1 %v5777_v60, %s8723_s13 }
 0x5e5   : > { %841 = vperm.xlu1 %5735, %v5276_v62  }
 0x616   : > { %v5749_v63 = vpop.permute.xlu2 %5748 }
 0x617   : > { %v5751_v8 = vunpack.i.h.bf16 %v5749_v63  ;;  %v5750_v45 = vunpack.i.l.bf16 %v5749_v63 }
 0x619   : > { %v772_v31 = vsel %vm771_vm2, %v5750_v45, %v5751_v8 }
 0x61e   : > { %v5764_v0 = vpop.permute.xlu2 %5763 }
 0x61f   : > { %v5766_v33 = vunpack.i.h.bf16 %v5764_v0  ;;  %v5765_v34 = vunpack.i.l.bf16 %v5764_v0 }
 0x621   : > { %v759_v22 = vsel %vm8741_vm10, %v5765_v34, %v5766_v33 }
 0x626   : > { %v5769_v4 = vpop.permute.xlu2 %5768 }
 0x627   : > { %v5771_v46 = vunpack.i.h.bf16 %v5769_v4  ;;  %v5770_v9 = vunpack.i.l.bf16 %v5769_v4 }
 0x629   : > { %v807_v24 = vsel %vm8718_vm9, %v5770_v9, %v5771_v46 }
 0x62e   : > { %v5744_v1 = vpop.permute.xlu0 %5743  ;;  %v5784_v12 = vpop.permute.xlu2 %5783 }
 0x62f   : > { %v5739_v3 = vpop.permute.xlu1 %5738  ;;  %v5746_v10 = vunpack.i.h.bf16 %v5744_v1  ;;  %v5745_v11 = vunpack.i.l.bf16 %v5744_v1  ;;  %v5786_v23 = vunpack.i.h.bf16 %v5784_v12  ;;  %v5785_v25 = vunpack.i.l.bf16 %v5784_v12  ;;  %v5275_v12 = vld [vmem:[%s8675_s1 + $0x10] sm:$0xf] }
 0x630   : > { %v5741_v6 = vunpack.i.h.bf16 %v5739_v3  ;;  %v5740_v7 = vunpack.i.l.bf16 %v5739_v3 }
 0x631   : > { %v814_v26 = vsel %vm8743_vm12, %v5745_v11, %v5746_v10 }
 0x632   : > { %v800_v17 = vsel %vm8706_vm11, %v5740_v7, %v5741_v6  ;;  %vm8717_vm11 = vcmask 867328  }
 0x633   : > { %v829_v29 = vsel %vm8735_vm14, %v800_v17, %v807_v24  ;;  %v793_v39 = vsel %vm8717_vm11, %v5785_v25, %v5786_v23  ;;  %v879_v23 = vstv %s5279_s7  ;;  %s5290_s7 = sld [smem:[#allocation2 + $0x8b]] }
 0x636   : > { %v5759_v2 = vpop.permute.xlu0 %5758  ;;  %v5804_v58 = vpop.permute.xlu2 %5803 }
 0x637   : > { %v5754_v5 = vpop.permute.xlu1 %5753  ;;  %v5761_v36 = vunpack.i.h.bf16 %v5759_v2  ;;  %v5760_v37 = vunpack.i.l.bf16 %v5759_v2  ;;  %v5806_v0 = vunpack.i.h.bf16 %v5804_v58  ;;  %v5805_v1 = vunpack.i.l.bf16 %v5804_v58 }
 0x638   : > { %v5756_v18 = vunpack.i.h.bf16 %v5754_v5  ;;  %v5755_v19 = vunpack.i.l.bf16 %v5754_v5 }
 0x639   : > { %v747_v54 = vsel %vm306_vm3, %v5760_v37, %v5761_v36  ;;  %v735_v8 = vsel %vm8762_vm13, %v5805_v1, %v5806_v0 }
 0x63a   : > { %v786_v32 = vsel %vm8742_vm0, %v5755_v19, %v5756_v18 }
 0x63b   : > { %v828_v47 = vsel %vm8735_vm14, %v786_v32, %v793_v39  ;;  %v887_v32 = vstv %s5281_s8  ;;  %s5296_s8 = sld [smem:[#allocation2 + $0x91]] }
 0x63e   : > { %v5779_v13 = vpop.permute.xlu0 %5778 }
 0x63f   : > { %v5781_v14 = vunpack.i.h.bf16 %v5779_v13  ;;  %v5780_v15 = vunpack.i.l.bf16 %v5779_v13  ;;  %v5774_v16 = vpop.permute.xlu1 %5773 }
 0x640   : > { %v5776_v20 = vunpack.i.h.bf16 %v5774_v16  ;;  %v5775_v21 = vunpack.i.l.bf16 %v5774_v16 }
 0x641   : > { %v779_v28 = vsel %vm8707_vm6, %v5780_v15, %v5781_v14  ;;  %vm8773_vm6 = vcmask 965632  }
 0x642   : > { %v821_v27 = vsel %vm8720_vm4, %v5775_v21, %v5776_v20  ;;  %v827_v35 = vsel %vm8735_vm14, %v772_v31, %v779_v28  ;;  %v876_v21 = vstv %s5278_s6  ;;  %s7172_s6 = sld [smem:[#allocation2 + $0x89]] }
 0x643   : > { %v830_v30 = vsel %vm8735_vm14, %v814_v26, %v821_v27  ;;  %v835_v52 = vpack.c.bf16 %v828_v47, %v827_v35  ;;  %v883_v26 = vstv %s5280_s22  ;;  %s5294_s22 = sld [smem:[#allocation2 + $0x8f]] }
 0x644   : > { %v836_v61 = vpack.c.bf16 %v830_v30, %v829_v29 }
 0x646   : > { %852 = vmatpush.bf16.msra.mxu1 %v836_v61  ;;  %v5794_v38 = vpop.permute.xlu0 %5793 }
 0x647   : > { %v5796_v40 = vunpack.i.h.bf16 %v5794_v38  ;;  %v5795_v42 = vunpack.i.l.bf16 %v5794_v38  ;;  %v5789_v43 = vpop.permute.xlu1 %5788 }
 0x648   : > { %v5791_v48 = vunpack.i.h.bf16 %v5789_v43  ;;  %v5790_v49 = vunpack.i.l.bf16 %v5789_v43 }
 0x649   : > { %v765_v57 = vsel %vm8716_vm8, %v5795_v42, %v5796_v40 }
 0x64a   : > { %853 = vmatpush.bf16.msra.mxu1 %v835_v52  ;;  %v753_v59 = vsel %vm8773_vm6, %v5790_v49, %v5791_v48  ;;  %v826_v60 = vsel %vm8735_vm14, %v759_v22, %v765_v57  ;;  %vm8736_vm6 = vcmask 523264   ;;  %v6835_v57 = vmov 8.0  }
 0x64b   : > { %v825_v62 = vsel %vm8735_vm14, %v747_v54, %v753_v59 }
 0x64c   : > { %v834_v63 = vpack.c.bf16 %v826_v60, %v825_v62 }
 0x64e   : > { %854 = vmatpush.bf16.msra.mxu1 %v834_v63  ;;  %v5809_v3 = vpop.permute.xlu0 %5808 }
 0x64f   : > { %v5811_v4 = vunpack.i.h.bf16 %v5809_v3  ;;  %v5810_v2 = vunpack.i.l.bf16 %v5809_v3  ;;  %v5799_v5 = vpop.permute.xlu1 %5798 }
 0x650   : > { %v5801_v6 = vunpack.i.h.bf16 %v5799_v5  ;;  %v5800_v7 = vunpack.i.l.bf16 %v5799_v5 }
 0x651   : > { %v741_v46 = vsel %vm8708_vm15, %v5810_v2, %v5811_v4 }
 0x652   : > { %v729_v9 = vsel %vm8733_vm1, %v5800_v7, %v5801_v6  ;;  %v824_v45 = vsel %vm8735_vm14, %v735_v8, %v741_v46 }
 0x653   : > { %v823_v10 = vsel %vm8735_vm14, %v7109_v56, %v729_v9  ;;  %vm8738_vm14 = vcmask 752640  }
 0x654   : > { %v833_v11 = vpack.c.bf16 %v824_v45, %v823_v10 }
 0x656   : > { %855 = vmatpush.bf16.msra.mxu1 %v833_v11 }
 0x657   : > { %v842_v13 = vpop.permute.xlu1 %841 }
 0x659   : > { %5277 = vmatmul.msk.bf16.vlgmr.msra.gmra.mxu1 %vm8736_vm6, %v5275_v12  ;;  %v990_v12 = vstv %s5294_s22  ;;  %s5286_s22 = sld [smem:[#allocation2 + $0x87]]  ;;  %vm1217_vm6 = vcmask 785408  }
 0x6d6   : > { %v857_v14 = vpop.f32.mrf.mxu1 }
 0x6d7   : > { %v858_v15 = vadd.f32 %v857_v14, %v842_v13 }
 0x6d9   : > { %v862_v16 = vmul.f32 0.01, %v858_v15  ;;  %vm861_vm15 = vcmp.gt.f32.partialorder %v858_v15, 0.0 }
 0x6db   : > { %v863_v17 = vsel %vm861_vm15, %v858_v15, %v862_v16  ;;  %v967_v16 = vstv %s7172_s6  ;;  %s5293_s6 = sld [smem:[#allocation2 + $0x8e]] }
 0x6dc   : > { %v864_v18 = vmul.f32 %v7103_v51, %v863_v17 }
 0x6de   : > { %v859_v19 = vpop.f32.mrf.mxu1  ;;  %865 = vadd.xlane.f32.xlu2 %v864_v18 }
 0x751   : > { %v866_v56 = vpop.xlane.xlu2 %865 }
 0x752   : > { %v867_v20 = vmul.f32 0.015625, %v866_v56 }
 0x754   : > { %v869_v24 = vrot.slane %v867_v20, 7  ;;  %v872_v25 = vrot.slane %v867_v20, 1  ;;  %v880_v30 = vmul.f32 %v879_v23, %v867_v20  ;;  %v998_v23 = vstv %s5296_s8  ;;  %s7206_s8 = sld [smem:[#allocation2 + $0x85]] }
 0x756   : > { %v871_v27 = vsel %vm358_vm5, 0.0, %v869_v24  ;;  %v874_v28 = vsel %vm8744_vm7, %v872_v25, 0.0 }
 0x757   : > { %v877_v29 = vmul.f32 %v876_v21, %v871_v27  ;;  %v884_v31 = vmul.f32 %v883_v26, %v874_v28  ;;  %v975_v21 = vstv %s5290_s7  ;;  %v982_v26 = vstv %s5292_s14  ;;  %s5289_s7 = sld [smem:[#allocation2 + $0x8a]] }
 0x758   : > { %s5295_s14 = sld [smem:[#allocation2 + $0x90]] }
 0x759   : > { %v881_v61 = vadd.f32 %v880_v30, %v877_v29  ;;  %v959_v29 = vstv %s5286_s22  ;;  %s5285_s22 = sld [smem:[#allocation2 + $0x86]] }
 0x75b   : > { %v885_v33 = vadd.f32 %v884_v31, %v881_v61 }
 0x75d   : > { %v888_v34 = vadd.f32 %v887_v32, %v885_v33 }
 0x75f   : > { %v5282_v35 = vmul.f32 -1.442695, %v888_v34  ;;  %v986_v34 = vstv %s5293_s6  ;;  %s5287_s6 = sld [smem:[#allocation2 + $0x88]] }
 0x761   : > { %6626 = vpow2.f32 %v5282_v35 }
 0x767   : > { %v6627_v36 = vpop.eup %6626 }
 0x768   : > { %v892_v37 = vadd.f32 1.0, %v6627_v36 }
 0x76a   : > { %6628 = vrcp.f32 %v892_v37  ;;  %v904_v42 = vand.u32 2147483648, %v892_v37  ;;  %v902_v47 = vand.u32 2147483647, %v892_v37  ;;  %vm898_vm8 = vweird.f32 %v892_v37 }
 0x76b   : > { %6630 = vrcp.f32 %v6835_v57  ;;  %v994_v57 = vstv %s5295_s14  ;;  %s5297_s14 = sld [smem:[#allocation2 + $0x92]] }
 0x76c   : > { %v905_v49 = vor.u32 1.1754944e-38, %v904_v42  ;;  %vm903_vm9 = vcmp.eq.f32.partialorder %v902_v47, 8.507059e+37 }
 0x770   : > { %v6629_v38 = vpop.eup %6628 }
 0x771   : > { %v894_v39 = vmul.f32 %v6629_v38, %v892_v37  ;;  %vm899_vm15 = vweird.f32 %v6629_v38  ;;  %v6631_v58 = vpop.eup %6630 }
 0x772   : > { %vm900_vm11 = vmor %vm898_vm8, %vm899_vm15  ;;  %v921_v54 = vmul.f32 8.0, %v6631_v58  ;;  %vm925_vm8 = vweird.f32 %v6631_v58 }
 0x773   : > { %v895_v40 = vsub.f32 1.0, %v894_v39  ;;  %v971_v39 = vstv %s5289_s7  ;;  %s5291_s7 = sld [smem:[#allocation2 + $0x8c]] }
 0x774   : > { %v922_v60 = vsub.f32 1.0, %v921_v54 }
 0x775   : > { %v896_v43 = vmul.f32 %v6629_v38, %v895_v40 }
 0x776   : > { %v923_v0 = vmul.f32 %v6631_v58, %v922_v60 }
 0x777   : > { %v897_v48 = vadd.f32 %v6629_v38, %v896_v43  ;;  %v951_v43 = vstv %s7206_s8  ;;  %s5283_s8 = sld [smem:[#allocation2 + $0x84]] }
 0x778   : > { %v924_v5 = vadd.f32 %v6631_v58, %v923_v0 }
 0x779   : > { %v901_v52 = vsel %vm900_vm11, %v6629_v38, %v897_v48  ;;  %vm8719_vm11 = vcmask 48128  }
 0x77a   : > { %v906_v22 = vsel %vm903_vm9, %v905_v49, %v901_v52  ;;  %v7167_v9 = vsel %vm925_vm8, %v6631_v58, %v924_v5 }
 0x77b   : > { %910 = vperm.xlu0 %5736, %v906_v22  }
 0x7ed   : > { %v911_v59 = vpop.permute.xlu0 %910 }
 0x7ee   : > { %v7162_v62 = vmul.f32 %v911_v59, %v863_v17 }
 0x7f0   : > { %v914_v63 = vrot.slane %v7162_v62, 4 }
 0x7f2   : > { %v915_v1 = vadd.f32 %v914_v63, %v7162_v62  ;;  %v929_v3 = vmax.f32 %v7162_v62, %v914_v63 }
 0x7f4   : > { %v930_v4 = vrot.slane %v929_v3, 2  ;;  %v916_v2 = vrot.slane %v915_v1, 2 }
 0x7f6   : > { %v931_v6 = vmax.f32 %v929_v3, %v930_v4  ;;  %v917_v7 = vadd.f32 %v916_v2, %v915_v1 }
 0x7f8   : > { %v932_v8 = vrot.slane %v931_v6, 1  ;;  %v918_v46 = vrot.slane %v917_v7, 1 }
 0x7fa   : > { %v933_v45 = vmax.f32 %v931_v6, %v932_v8  ;;  %v919_v10 = vadd.f32 %v918_v46, %v917_v7  ;;  %v955_v7 = vstv %s5285_s22  ;;  %s6837_s22 = smov 28  }
 0x7fc   : > { %942 = vrot.lane.b32.xlu1 %v933_v45, %s8721_s23  ;;  %v927_v11 = vmul.f32 %v7167_v9, %v919_v10 }
 0x7fe   : > { %935 = vrot.lane.b32.xlu0 %v927_v11, %s8721_s23  ;;  %s8731_s23 = smov 76  }
 0x86e   : > { %v943_v13 = vpop.permute.xlu1 %942 }
 0x86f   : > { %v7175_v14 = vsel %vm8719_vm11, 0.0, %v943_v13  ;;  %v7178_v15 = vsel %vm8719_vm11, %v943_v13, 0.0 }
 0x870   : > { %v936_v17 = vpop.permute.xlu0 %935  ;;  %v991_v18 = vmul.f32 %v990_v12, %v7175_v14  ;;  %v992_v19 = vmul.f32 %v990_v12, %v7178_v15  ;;  %v976_v24 = vmul.f32 %v975_v21, %v7175_v14  ;;  %v999_v25 = vmul.f32 %v998_v23, %v7175_v14 }
 0x871   : > { %v7184_v56 = vsel %vm8719_vm11, 0.0, %v936_v17  ;;  %v1000_v27 = vmul.f32 %v998_v23, %v7178_v15  ;;  %v984_v28 = vmul.f32 %v982_v26, %v7178_v15  ;;  %v983_v30 = vmul.f32 %v982_v26, %v7175_v14 }
 0x872   : > { %1051 = vrot.lane.b32.xlu1 %v991_v18, %s8723_s13  ;;  %1053 = vrot.lane.b32.xlu0 %v992_v19, %s8723_s13  ;;  %v968_v20 = vmul.f32 %v967_v16, %v7184_v56  ;;  %v960_v61 = vmul.f32 %v959_v29, %v7184_v56  ;;  %v940_v31 = vsel %vm8719_vm11, %v936_v17, 0.0  ;;  %v988_v35 = vmul.f32 %v986_v34, %v7178_v15 }
 0x873   : > { %v961_v32 = vmul.f32 %v959_v29, %v940_v31  ;;  %v969_v33 = vmul.f32 %v967_v16, %v940_v31  ;;  %v972_v40 = vmul.f32 %v971_v39, %v7184_v56  ;;  %v973_v42 = vmul.f32 %v971_v39, %v940_v31 }
 0x874   : > { %1023 = vrot.lane.b32.xlu2 %v968_v20, %s8723_s13  ;;  %v952_v52 = vmul.f32 %v951_v43, %v7184_v56  ;;  %v987_v54 = vmul.f32 %v986_v34, %v7175_v14  ;;  %v995_v60 = vmul.f32 %v994_v57, %v7175_v14  ;;  %v996_v4 = vmul.f32 %v994_v57, %v7178_v15 }
 0x875   : > { %v953_v6 = vmul.f32 %v951_v43, %v940_v31  ;;  %v957_v8 = vmul.f32 %v955_v7, %v940_v31  ;;  %v956_v10 = vmul.f32 %v955_v7, %v7184_v56  ;;  %v963_v17 = vstv %s5287_s6  ;;  %s6838_s6 = smov 80  }
 0x876   : > { %v965_v19 = vmul.f32 %v963_v17, %v940_v31  ;;  %v964_v21 = vmul.f32 %v963_v17, %v7184_v56 }
 0x87a   : > { %1033 = vrot.lane.b32.xlu1 %v976_v24, %s8745_s20  ;;  %1062 = vrot.lane.b32.xlu0 %v999_v25, %s8723_s13 }
 0x882   : > { %1064 = vrot.lane.b32.xlu1 %v1000_v27, %s8723_s13  ;;  %1042 = vrot.lane.b32.xlu0 %v984_v28, %s8723_s13 }
 0x88a   : > { %1040 = vrot.lane.b32.xlu1 %v983_v30, %s8723_s13  ;;  %1012 = vrot.lane.b32.xlu0 %v960_v61, %s8723_s13  ;;  %v978_v30 = vstv %s5291_s7  ;;  %s8753_s7 = smov 68  }
 0x88b   : > { %v980_v31 = vmul.f32 %v978_v30, %v7178_v15 }
 0x892   : > { %1014 = vrot.lane.b32.xlu1 %v961_v32, %s8723_s13  ;;  %1025 = vrot.lane.b32.xlu0 %v969_v33, %s8723_s13  ;;  %v979_v33 = vmul.f32 %v978_v30, %v7175_v14 }
 0x8ce   : > { %v1024_v18 = vpop.permute.xlu2 %1023 }
 0x8e4   : > { %v1052_v36 = vpop.permute.xlu1 %1051  ;;  %v1054_v37 = vpop.permute.xlu0 %1053 }
 0x8e5   : > { %v1059_v38 = vadd.f32 %v1054_v37, %v988_v35  ;;  %v1055_v58 = vsel %vm8733_vm1, %v1052_v36, %v1054_v37 }
 0x8e6   : > { %v1058_v0 = vadd.f32 %v1055_v58, %v987_v54 }
 0x8e7   : > { %1095 = vrot.lane.b32.xlu2 %v1059_v38, %s8747_s28 }
 0x8ec   : > { %v1034_v47 = vpop.permute.xlu1 %1033  ;;  %v1063_v22 = vpop.permute.xlu0 %1062 }
 0x8ed   : > { %v1036_v48 = vadd.f32 %v1034_v47, %v972_v40  ;;  %v1037_v49 = vadd.f32 %v1034_v47, %v973_v42 }
 0x8ef   : > { %1082 = vrot.lane.b32.xlu1 %v1036_v48, %s8747_s28  ;;  %1084 = vrot.lane.b32.xlu0 %v1037_v49, %s8747_s28 }
 0x8f0   : > { %1003 = vrot.lane.b32.xlu2 %v952_v52, %s8723_s13  ;;  %v948_v52 = vstv %s5283_s8  ;;  %s6840_s8 = smov 72  }
 0x8f1   : > { %v949_v54 = vmul.f32 %v948_v52, %v7184_v56 }
 0x8f4   : > { %v1065_v59 = vpop.permute.xlu1 %1064  ;;  %v1043_v3 = vpop.permute.xlu0 %1042 }
 0x8f5   : > { %v1066_v63 = vsel %vm8733_vm1, %v1063_v22, %v1065_v59  ;;  %v1070_v5 = vadd.f32 %v1065_v59, %v996_v4  ;;  %v1048_v35 = vadd.f32 %v1043_v3, %v980_v31 }
 0x8f6   : > { %v1069_v1 = vadd.f32 %v1066_v63, %v995_v60 }
 0x8f7   : > { %1093 = vrot.lane.b32.xlu1 %v1058_v0, %s8747_s28 }
 0x8f8   : > { %1113 = vrot.lane.b32.xlu0 %v1069_v1, %s6805_s12 }
 0x8fc   : > { %v1041_v2 = vpop.permute.xlu1 %1040  ;;  %v1013_v46 = vpop.permute.xlu0 %1012 }
 0x8fd   : > { %v1044_v32 = vsel %vm8733_vm1, %v1041_v2, %v1043_v3 }
 0x8fe   : > { %v1047_v37 = vadd.f32 %v1044_v32, %v979_v33  ;;  %v5302_v33 = vld [vmem:[%s8676_s2 + $0x28] sm:$0xff] }
 0x8ff   : > { %1115 = vrot.lane.b32.xlu1 %v1070_v5, %s6805_s12  ;;  %v1132_v5 = vstv %s5297_s14  ;;  %s8727_s14 = smov 84  }
 0x900   : > { %1005 = vrot.lane.b32.xlu0 %v953_v6, %s8723_s13 }
 0x904   : > { %v1015_v45 = vpop.permute.xlu1 %1014  ;;  %v1026_v16 = vpop.permute.xlu0 %1025 }
 0x905   : > { %v1016_v11 = vsel %vm8733_vm1, %v1013_v46, %v1015_v45  ;;  %v1020_v12 = vadd.f32 %v1015_v45, %v957_v8  ;;  %v1027_v20 = vsel %vm8733_vm1, %v1024_v18, %v1026_v16  ;;  %v1031_v23 = vadd.f32 %v1026_v16, %v965_v19 }
 0x906   : > { %v1019_v13 = vadd.f32 %v1016_v11, %v956_v10  ;;  %v1030_v25 = vadd.f32 %v1027_v20, %v964_v21 }
 0x907   : > { %1075 = vrot.lane.b32.xlu2 %v1020_v12, %s8747_s28 }
 0x908   : > { %1073 = vrot.lane.b32.xlu1 %v1019_v13, %s8747_s28 }
 0x941   : > { %v1096_v34 = vpop.permute.xlu2 %1095 }
 0x942   : > { %v1101_v38 = vadd.f32 %v1096_v34, %v1048_v35 }
 0x94a   : > { %v1004_v15 = vpop.permute.xlu2 %1003 }
 0x961   : > { %v1083_v24 = vpop.permute.xlu1 %1082  ;;  %v1085_v26 = vpop.permute.xlu0 %1084 }
 0x962   : > { %v1086_v27 = vsel %vm8762_vm13, %v1083_v24, %v1085_v26  ;;  %v1090_v28 = vadd.f32 %v1085_v26, %v1031_v23  ;;  %v1076_v22 = vpop.permute.xlu2 %1075 }
 0x963   : > { %v1089_v29 = vadd.f32 %v1086_v27, %v1030_v25  ;;  %v212_v25 = vand.u32 3, %v7098_v44 }
 0x964   : > { %1106 = vrot.lane.b32.xlu1 %v1090_v28, %s6805_s12 }
 0x965   : > { %1104 = vrot.lane.b32.xlu0 %v1089_v29, %s6805_s12  ;;  %vm213_vm4 = vcmp.eq.s32.totalorder %v212_v25, 0 }
 0x966   : > { %v7250_v28 = vsel %vm213_vm4, 1.0, %v6825_v50  ;;  %vm8734_vm4 = vcmask 556032  }
 0x969   : > { %v1094_v61 = vpop.permute.xlu1 %1093 }
 0x96a   : > { %v1097_v36 = vsel %vm8762_vm13, %v1094_v61, %v1096_v34  ;;  %v1114_v40 = vpop.permute.xlu0 %1113  ;;  %v5301_v34 = vld [vmem:[%s8676_s2 + $0x20] sm:$0xff] }
 0x96b   : > { %v1100_v39 = vadd.f32 %v1097_v36, %v1047_v37 }
 0x971   : > { %v1116_v42 = vpop.permute.xlu1 %1115 }
 0x972   : > { %v1117_v43 = vsel %vm306_vm3, %v1114_v40, %v1116_v42  ;;  %v1121_v47 = vadd.f32 %v1116_v42, %v1101_v38  ;;  %v1006_v14 = vpop.permute.xlu0 %1005 }
 0x973   : > { %v1120_v48 = vadd.f32 %v1117_v43, %v1100_v39  ;;  %v1007_v58 = vsel %vm8733_vm1, %v1004_v15, %v1006_v14 }
 0x974   : > { %1126 = vrot.lane.b32.xlu0 %v1121_v47, %s8723_s13  ;;  %v1009_v63 = vadd.f32 %v1007_v58, %v949_v54 }
 0x975   : > { %1124 = vrot.lane.b32.xlu2 %v1120_v48, %s8723_s13 }
 0x97a   : > { %v1074_v49 = vpop.permute.xlu1 %1073 }
 0x97b   : > { %v1077_v60 = vsel %vm8762_vm13, %v1074_v49, %v1076_v22 }
 0x97c   : > { %v1079_v1 = vadd.f32 %v1077_v60, %v1009_v63 }
 0x9cf   : > { %v1125_v3 = vpop.permute.xlu2 %1124 }
 0x9d6   : > { %v1107_v59 = vpop.permute.xlu1 %1106 }
 0x9d7   : > { %v1105_v57 = vpop.permute.xlu0 %1104 }
 0x9d8   : > { %v1108_v0 = vsel %vm306_vm3, %v1105_v57, %v1107_v59 }
 0x9d9   : > { %v1110_v4 = vadd.f32 %v1108_v0, %v1079_v1 }
 0x9e6   : > { %v1127_v2 = vpop.permute.xlu0 %1126 }
 0x9e7   : > { %v1128_v6 = vsel %vm8733_vm1, %v1125_v3, %v1127_v2 }
 0x9e8   : > { %v1130_v7 = vadd.f32 %v1128_v6, %v1110_v4 }
 0x9ea   : > { %v1133_v8 = vadd.f32 %v1132_v5, %v1130_v7 }
 0x9ec   : > { %v5298_v46 = vmul.f32 -1.442695, %v1133_v8 }
 0x9ee   : > { %6632 = vpow2.f32 %v5298_v46 }
 0x9f4   : > { %v6633_v45 = vpop.eup %6632 }
 0x9f5   : > { %v1137_v10 = vadd.f32 1.0, %v6633_v45 }
 0x9f7   : > { %6634 = vrcp.f32 %v1137_v10  ;;  %v1149_v13 = vand.u32 2147483648, %v1137_v10  ;;  %v1147_v17 = vand.u32 2147483647, %v1137_v10  ;;  %vm1143_vm15 = vweird.f32 %v1137_v10 }
 0x9f9   : > { %v1150_v19 = vor.u32 1.1754944e-38, %v1149_v13  ;;  %vm1148_vm11 = vcmp.eq.f32.partialorder %v1147_v17, 8.507059e+37 }
 0x9fd   : > { %v6635_v56 = vpop.eup %6634 }
 0x9fe   : > { %v1139_v11 = vmul.f32 %v6635_v56, %v1137_v10  ;;  %vm1144_vm9 = vweird.f32 %v6635_v56 }
 0x9ff   : > { %vm1145_vm8 = vmor %vm1143_vm15, %vm1144_vm9  ;;  %vm8766_vm9 = vcmask 588800   ;;  %vm1245_vm15 = vcmask 654336  }
 0xa00   : > { %v1140_v12 = vsub.f32 1.0, %v1139_v11 }
 0xa02   : > { %v1141_v16 = vmul.f32 %v6635_v56, %v1140_v12 }
 0xa04   : > { %v1142_v18 = vadd.f32 %v6635_v56, %v1141_v16 }
 0xa06   : > { %v1146_v20 = vsel %vm1145_vm8, %v6635_v56, %v1142_v18  ;;  %vm8739_vm8 = vcmask 621568  }
 0xa07   : > { %v1151_v21 = vsel %vm1148_vm11, %v1150_v19, %v1146_v20  ;;  %vm1166_vm11 = vcmask 228352  }
 0xa08   : > { %v1153_v23 = vperm.slane %v1151_v21, 0 }
 0xa0a   : > { %v1154_v24 = vmul.f32 %v1153_v23, %v7162_v62 }
 0xa0c   : > { %1156 = vrot.lane.b32.xlu1 %v1154_v24, %s8723_s13  ;;  %s8729_s13 = smov 92  }
 0xa7e   : > { %v1157_v26 = vpop.permute.xlu1 %1156 }
 0xa7f   : > { %v1159_v27 = vsel %vm8733_vm1, %v1157_v26, 0.0  ;;  %vm8765_vm1 = vcmask 719872  }
 0xa80   : > { %v1160_v29 = vmax.f32 %v1154_v24, %v1159_v27 }
 0xa82   : > { %v7253_v30 = vmul.f32 %v7250_v28, %v1160_v29 }
 0xa84   : > { %1163 = vrot.lane.b32.xlu2 %v7253_v30, %s6837_s22  ;;  %s6842_s22 = smov 88  }
 0xade   : > { %v7256_v62 = vpop.permute.xlu2 %1163 }
 0xadf   : > { %v1167_v61 = vsel %vm1166_vm11, 0.0, %v7256_v62  ;;  %v1168_v31 = vsel %vm1166_vm11, %v7256_v62, 0.0 }
 0xae0   : > { %v5822_v32 = vpack.i.bf16 %v1168_v31, %v1167_v61 }
 0xae2   : > { %5823 = vrot.lane.b32.xlu2 %v5822_v32, %s6838_s6  ;;  %5818 = vrot.lane.b32.xlu1 %v5822_v32, %s8753_s7  ;;  %s5353_s7 = sld [smem:[#allocation2 + $0x183]] }
 0xae3   : > { %5813 = vrot.lane.b32.xlu0 %v5822_v32, %s6840_s8 }
 0xaea   : > { %5838 = vrot.lane.b32.xlu2 %v5822_v32, %s8727_s14  ;;  %5833 = vrot.lane.b32.xlu1 %v5822_v32, %s6842_s22  ;;  %s5314_s14 = sld [smem:[#allocation2 + $0x103]] }
 0xaeb   : > { %5828 = vrot.lane.b32.xlu0 %v5822_v32, %s8731_s23  ;;  %s5313_s23 = sld [smem:[#allocation2 + $0x102]] }
 0xaf2   : > { %5853 = vrot.lane.b32.xlu2 %v5822_v32, %s8759_s10  ;;  %5848 = vrot.lane.b32.xlu1 %v5822_v32, %s8729_s13  ;;  %s5311_s13 = sld [smem:[#allocation2 + $0x100]] }
 0xaf3   : > { %5843 = vrot.lane.b32.xlu0 %v5822_v32, %s6845_s5 }
 0xafa   : > { %5868 = vrot.lane.b32.xlu2 %v5822_v32, %s8751_s11  ;;  %5863 = vrot.lane.b32.xlu1 %v5822_v32, %s6827_s30  ;;  %s6855_s11 = smov 64  }
 0xafb   : > { %5858 = vrot.lane.b32.xlu0 %v5822_v32, %s8755_s27  ;;  %s5351_s27 = sld [smem:[#allocation2 + $0x181]] }
 0xb02   : > { %5883 = vrot.lane.b32.xlu2 %v5822_v32, %s8747_s28  ;;  %5878 = vrot.lane.b32.xlu1 %v5822_v32, %s8749_s29  ;;  %s6854_s29 = smov 48  }
 0xb03   : > { %5873 = vrot.lane.b32.xlu0 %v5822_v32, %s6805_s12 }
 0xb0a   : > { %1290 = vperm.xlu1 %5735, %v5302_v33  }
 0xb0b   : > { %1285 = vperm.xlu0 %5736, %v5301_v34  }
 0xb3c   : > { %v5824_v35 = vpop.permute.xlu2 %5823 }
 0xb3d   : > { %v5826_v14 = vunpack.i.h.bf16 %v5824_v35  ;;  %v5825_v49 = vunpack.i.l.bf16 %v5824_v35 }
 0xb3f   : > { %v1246_v1 = vsel %vm1245_vm15, %v5825_v49, %v5826_v14 }
 0xb44   : > { %v5839_v37 = vpop.permute.xlu2 %5838 }
 0xb45   : > { %v5841_v63 = vunpack.i.h.bf16 %v5839_v37  ;;  %v5840_v0 = vunpack.i.l.bf16 %v5839_v37 }
 0xb4c   : > { %v5854_v60 = vpop.permute.xlu2 %5853 }
 0xb4d   : > { %v5856_v17 = vunpack.i.h.bf16 %v5854_v60  ;;  %v5855_v18 = vunpack.i.l.bf16 %v5854_v60 }
 0xb54   : > { %v5819_v36 = vpop.permute.xlu1 %5818  ;;  %v5869_v13 = vpop.permute.xlu2 %5868 }
 0xb55   : > { %v5821_v38 = vunpack.i.h.bf16 %v5819_v36  ;;  %v5820_v39 = vunpack.i.l.bf16 %v5819_v36  ;;  %v5814_v40 = vpop.permute.xlu0 %5813  ;;  %v5871_v26 = vunpack.i.h.bf16 %v5869_v13  ;;  %v5870_v27 = vunpack.i.l.bf16 %v5869_v13 }
 0xb56   : > { %v5816_v42 = vunpack.i.h.bf16 %v5814_v40  ;;  %v5815_v43 = vunpack.i.l.bf16 %v5814_v40 }
 0xb57   : > { %v1267_v47 = vsel %vm8734_vm4, %v5820_v39, %v5821_v38  ;;  %vm8737_vm4 = vcmask 687104   ;;  %v1199_v35 = vsel %vm8742_vm0, %v5870_v27, %v5871_v26 }
 0xb58   : > { %v1260_v48 = vsel %vm8766_vm9, %v5815_v43, %v5816_v42  ;;  %v1239_v6 = vsel %vm8737_vm4, %v5840_v0, %v5841_v63  ;;  %vm8774_vm4 = vcmask 850944  }
 0xb59   : > { %v1279_v15 = vpack.c.bf16 %v1267_v47, %v1260_v48  ;;  %v1205_v29 = vsel %vm8774_vm4, %v5855_v18, %v5856_v17  ;;  %vm5307_vm4 = vmneg %vm1166_vm11  ;;  %v1352_v17 = vstv %s5313_s23  ;;  %s5326_s23 = sld [smem:[#allocation2 + $0x10d]] }
 0xb5b   : > { %1299 = vmatpush.bf16.msra.mxu2 %v1279_v15 }
 0xb5c   : > { %v5834_v52 = vpop.permute.xlu1 %5833  ;;  %v5884_v33 = vpop.permute.xlu2 %5883 }
 0xb5d   : > { %v5829_v22 = vpop.permute.xlu0 %5828  ;;  %v5836_v57 = vunpack.i.h.bf16 %v5834_v52  ;;  %v5835_v58 = vunpack.i.l.bf16 %v5834_v52  ;;  %v5886_v40 = vunpack.i.h.bf16 %v5884_v33  ;;  %v5885_v42 = vunpack.i.l.bf16 %v5884_v33  ;;  %v5305_v52 = vld [vmem:[%s8675_s1 + $0x20] sm:$0xf] }
 0xb5e   : > { %v5831_v54 = vunpack.i.h.bf16 %v5829_v22  ;;  %v5830_v59 = vunpack.i.l.bf16 %v5829_v22  ;;  %v5550_v22 = vld [vmem:[%s8675_s1 + $0x24] sm:$0xf0] }
 0xb5f   : > { %v1232_v2 = vsel %vm8765_vm1, %v5835_v58, %v5836_v57  ;;  %v1175_v49 = vsel %vm8762_vm13, %v5885_v42, %v5886_v40  ;;  %v5306_v58 = vor.u32 %v5550_v22, %v5305_v52 }
 0xb60   : > { %v1253_v3 = vsel %vm8739_vm8, %v5830_v59, %v5831_v54  ;;  %v1277_v45 = vpack.c.bf16 %v1239_v6, %v1232_v2  ;;  %v5309_v57 = vpack.c.bf16 %v1175_v49, %v7256_v62 }
 0xb61   : > { %v1278_v4 = vpack.c.bf16 %v1253_v3, %v1246_v1 }
 0xb63   : > { %1300 = vmatpush.bf16.msra.mxu2 %v1278_v4 }
 0xb64   : > { %v5849_v5 = vpop.permute.xlu1 %5848 }
 0xb65   : > { %v5851_v7 = vunpack.i.h.bf16 %v5849_v5  ;;  %v5850_v8 = vunpack.i.l.bf16 %v5849_v5  ;;  %v5844_v46 = vpop.permute.xlu0 %5843 }
 0xb66   : > { %v5846_v10 = vunpack.i.h.bf16 %v5844_v46  ;;  %v5845_v56 = vunpack.i.l.bf16 %v5844_v46 }
 0xb67   : > { %1301 = vmatpush.bf16.msra.mxu2 %v1277_v45  ;;  %v1225_v11 = vsel %vm8738_vm14, %v5850_v8, %v5851_v7  ;;  %vm8740_vm14 = vmmov 1   ;;  %v1342_v45 = vstv %s5311_s13  ;;  %s5328_s13 = sld [smem:[#allocation2 + $0x10f]] }
 0xb68   : > { %v1218_v12 = vsel %vm1217_vm6, %v5845_v56, %v5846_v10  ;;  %vm5308_vm8 = vmpackc.low %vm8740_vm14, %vm5307_vm4 }
 0xb69   : > { %v1276_v16 = vpack.c.bf16 %v1225_v11, %v1218_v12  ;;  %v1346_v11 = vstv %s5312_s9  ;;  %s7334_s9 = sld [smem:[#allocation2 + $0x111]] }
 0xb6b   : > { %1302 = vmatpush.bf16.msra.mxu2 %v1276_v16 }
 0xb6c   : > { %v5864_v19 = vpop.permute.xlu1 %5863 }
 0xb6d   : > { %v5859_v20 = vpop.permute.xlu0 %5858  ;;  %v5866_v21 = vunpack.i.h.bf16 %v5864_v19  ;;  %v5865_v23 = vunpack.i.l.bf16 %v5864_v19 }
 0xb6e   : > { %v5861_v24 = vunpack.i.h.bf16 %v5859_v20  ;;  %v5860_v25 = vunpack.i.l.bf16 %v5859_v20 }
 0xb6f   : > { %v1193_v32 = vsel %vm771_vm2, %v5865_v23, %v5866_v21 }
 0xb70   : > { %v1211_v61 = vsel %vm8743_vm12, %v5860_v25, %v5861_v24  ;;  %v1274_v39 = vpack.c.bf16 %v1199_v35, %v1193_v32 }
 0xb71   : > { %v1275_v31 = vpack.c.bf16 %v1211_v61, %v1205_v29  ;;  %v1358_v61 = vstv %s5314_s14  ;;  %s5324_s14 = sld [smem:[#allocation2 + $0x10b]] }
 0xb73   : > { %1303 = vmatpush.bf16.msra.mxu2 %v1275_v31 }
 0xb74   : > { %v5879_v34 = vpop.permute.xlu1 %5878 }
 0xb75   : > { %v5881_v36 = vunpack.i.h.bf16 %v5879_v34  ;;  %v5880_v37 = vunpack.i.l.bf16 %v5879_v34  ;;  %v5874_v38 = vpop.permute.xlu0 %5873 }
 0xb76   : > { %v5876_v43 = vunpack.i.h.bf16 %v5874_v38  ;;  %v5875_v47 = vunpack.i.l.bf16 %v5874_v38 }
 0xb77   : > { %1304 = vmatpush.bf16.msra.mxu2 %v1274_v39  ;;  %v1187_v48 = vsel %vm8741_vm10, %v5880_v37, %v5881_v36 }
 0xb78   : > { %v1181_v15 = vsel %vm306_vm3, %v5875_v47, %v5876_v43 }
 0xb79   : > { %v1273_v14 = vpack.c.bf16 %v1187_v48, %v1181_v15 }
 0xb7b   : > { %1305 = vmatpush.bf16.msra.mxu2 %v1273_v14 }
 0xb7c   : > { %v1291_v3 = vpop.permute.xlu1 %1290 }
 0xb7d   : > { %v1286_v54 = vpop.permute.xlu0 %1285 }
 0xb7f   : > { %5310 = vmatpush.bf16.msk.msra.mxu2 %vm5308_vm8, %v5309_v57 }
 0xb82   : > { %1307 = vmatmul.bf16.vlgmr.msra.gmra.mxu2 %v5306_v58 }
 0xc05   : > { %v1308_v59 = vpop.f32.mrf.mxu2 }
 0xc06   : > { %v1309_v60 = vadd.f32 %v1308_v59, %v1286_v54 }
 0xc08   : > { %v1315_v63 = vmul.f32 0.01, %v1309_v60  ;;  %vm1313_vm11 = vcmp.gt.f32.partialorder %v1309_v60, 0.0 }
 0xc0a   : > { %v7307_v0 = vsel %vm1313_vm11, %v1309_v60, %v1315_v63 }
 0xc0b   : > { %v1319_v1 = vmul.f32 %v7250_v28, %v7307_v0 }
 0xc0d   : > { %v1310_v4 = vpop.f32.mrf.mxu2  ;;  %1321 = vadd.xlane.f32.xlu2 %v1319_v1 }
 0xc0e   : > { %v1311_v2 = vadd.f32 %v1310_v4, %v1291_v3 }
 0xc10   : > { %v1316_v5 = vmul.f32 0.01, %v1311_v2  ;;  %vm1314_vm4 = vcmp.gt.f32.partialorder %v1311_v2, 0.0 }
 0xc12   : > { %v7311_v62 = vsel %vm1314_vm4, %v1311_v2, %v1316_v5 }
 0xc13   : > { %v1320_v6 = vmul.f32 %v7250_v28, %v7311_v62 }
 0xc15   : > { %1323 = vadd.xlane.f32.xlu0 %v1320_v6 }
 0xc80   : > { %v1322_v7 = vpop.xlane.xlu2 %1321 }
 0xc81   : > { %v1325_v8 = vmul.f32 0.03125, %v1322_v7 }
 0xc83   : > { %v1329_v46 = vrot.slane %v1325_v8, 7  ;;  %v1335_v16 = vrot.slane %v1325_v8, 1  ;;  %v1347_v20 = vmul.f32 %v1346_v11, %v1325_v8 }
 0xc85   : > { %v1334_v10 = vsel %vm358_vm5, 0.0, %v1329_v46 }
 0xc86   : > { %v1343_v13 = vmul.f32 %v1342_v45, %v1334_v10 }
 0xc88   : > { %v1324_v56 = vpop.xlane.xlu0 %1323  ;;  %v1349_v25 = vadd.f32 %v1347_v20, %v1343_v13 }
 0xc89   : > { %v1326_v12 = vmul.f32 0.03125, %v1324_v56 }
 0xc8b   : > { %v1330_v18 = vrot.slane %v1326_v12, 7  ;;  %v1336_v19 = vrot.slane %v1326_v12, 1  ;;  %v1348_v27 = vmul.f32 %v1346_v11, %v1326_v12 }
 0xc8d   : > { %v1331_v21 = vsel %vm358_vm5, %v1329_v46, %v1330_v18  ;;  %v1337_v23 = vsel %vm8744_vm7, %v1335_v16, %v1336_v19  ;;  %v1340_v24 = vsel %vm8744_vm7, %v1336_v19, 0.0  ;;  %v6847_v46 = vmov 16.0  }
 0xc8e   : > { %v1344_v26 = vmul.f32 %v1342_v45, %v1331_v21  ;;  %v1353_v29 = vmul.f32 %v1352_v17, %v1337_v23  ;;  %v1354_v32 = vmul.f32 %v1352_v17, %v1340_v24 }
 0xc90   : > { %v1350_v31 = vadd.f32 %v1348_v27, %v1344_v26  ;;  %v1355_v33 = vadd.f32 %v1353_v29, %v1349_v25 }
 0xc92   : > { %v1356_v34 = vadd.f32 %v1354_v32, %v1350_v31  ;;  %v1359_v35 = vadd.f32 %v1358_v61, %v1355_v33 }
 0xc94   : > { %v1360_v36 = vadd.f32 %v1358_v61, %v1356_v34  ;;  %v5315_v37 = vmul.f32 -1.442695, %v1359_v35  ;;  %v1489_v34 = vstv %s5328_s13  ;;  %v1497_v35 = vstv %s7334_s9  ;;  %s5320_s13 = sld [smem:[#allocation2 + $0x107]] }
 0xc95   : > { %s5322_s9 = sld [smem:[#allocation2 + $0x109]] }
 0xc96   : > { %6636 = vpow2.f32 %v5315_v37  ;;  %v5316_v38 = vmul.f32 -1.442695, %v1360_v36 }
 0xc98   : > { %6638 = vpow2.f32 %v5316_v38 }
 0xc9c   : > { %v6637_v39 = vpop.eup %6636 }
 0xc9d   : > { %v1367_v40 = vadd.f32 1.0, %v6637_v39 }
 0xc9e   : > { %v6639_v42 = vpop.eup %6638 }
 0xc9f   : > { %v1368_v43 = vadd.f32 1.0, %v6639_v42  ;;  %6640 = vrcp.f32 %v1367_v40  ;;  %v1380_v52 = vand.u32 2147483648, %v1367_v40  ;;  %v1378_v57 = vand.u32 2147483647, %v1367_v40 }
 0xca0   : > { %vm1374_vm11 = vweird.f32 %v1367_v40 }
 0xca1   : > { %6642 = vrcp.f32 %v1368_v43  ;;  %v1381_v60 = vor.u32 1.1754944e-38, %v1380_v52  ;;  %vm1379_vm14 = vcmp.eq.f32.partialorder %v1378_v57, 8.507059e+37  ;;  %v1395_v4 = vand.u32 2147483648, %v1368_v43 }
 0xca2   : > { %vm1389_vm0 = vweird.f32 %v1368_v43  ;;  %v1393_v2 = vand.u32 2147483647, %v1368_v43  ;;  %6644 = vrcp.f32 %v6847_v46  ;;  %v1458_v57 = vstv %s5320_s13  ;;  %s5329_s13 = sld [smem:[#allocation2 + $0x110]] }
 0xca3   : > { %v1396_v6 = vor.u32 1.1754944e-38, %v1395_v4 }
 0xca4   : > { %vm1394_vm7 = vcmp.eq.f32.partialorder %v1393_v2, 8.507059e+37 }
 0xca5   : > { %v6641_v47 = vpop.eup %6640 }
 0xca6   : > { %v1370_v48 = vmul.f32 %v6641_v47, %v1367_v40  ;;  %vm1375_vm8 = vweird.f32 %v6641_v47 }
 0xca7   : > { %v6643_v15 = vpop.eup %6642  ;;  %vm1376_vm4 = vmor %vm1374_vm11, %vm1375_vm8 }
 0xca8   : > { %v1371_v14 = vsub.f32 1.0, %v1370_v48  ;;  %v1385_v49 = vmul.f32 %v6643_v15, %v1368_v43  ;;  %vm1390_vm10 = vweird.f32 %v6643_v15  ;;  %v6645_v10 = vpop.eup %6644  ;;  %v1481_v43 = vstv %s5326_s23  ;;  %s5327_s23 = sld [smem:[#allocation2 + $0x10e]] }
 0xca9   : > { %vm1391_vm12 = vmor %vm1389_vm0, %vm1390_vm10  ;;  %v1419_v16 = vmul.f32 16.0, %v6645_v10  ;;  %vm8761_vm10 = vcmask 97280  }
 0xcaa   : > { %v1372_v22 = vmul.f32 %v6641_v47, %v1371_v14  ;;  %v1386_v58 = vsub.f32 1.0, %v1385_v49 }
 0xcab   : > { %v1420_v21 = vsub.f32 1.0, %v1419_v16  ;;  %v1493_v16 = vstv %s5329_s13  ;;  %s5325_s13 = sld [smem:[#allocation2 + $0x10c]] }
 0xcac   : > { %v1373_v54 = vadd.f32 %v6641_v47, %v1372_v22  ;;  %v1387_v59 = vmul.f32 %v6643_v15, %v1386_v58  ;;  %v1466_v58 = vstv %s5322_s9  ;;  %s5319_s9 = sld [smem:[#allocation2 + $0x106]] }
 0xcad   : > { %v1421_v26 = vmul.f32 %v6645_v10, %v1420_v21 }
 0xcae   : > { %v1377_v63 = vsel %vm1376_vm4, %v6641_v47, %v1373_v54  ;;  %v1388_v3 = vadd.f32 %v6643_v15, %v1387_v59  ;;  %v1474_v47 = vstv %s5324_s14  ;;  %s5323_s14 = sld [smem:[#allocation2 + $0x10a]]  ;;  %vm8763_vm4 = vcmask 457728  }
 0xcaf   : > { %v1382_v1 = vsel %vm1379_vm14, %v1381_v60, %v1377_v63  ;;  %v1422_v61 = vadd.f32 %v6645_v10, %v1421_v26 }
 0xcb0   : > { %1401 = vperm.xlu1 %5735, %v1382_v1   ;;  %v1392_v5 = vsel %vm1391_vm12, %v6643_v15, %v1388_v3  ;;  %v1485_v3 = vstv %s5327_s23  ;;  %s5318_s23 = sld [smem:[#allocation2 + $0x105]] }
 0xcb1   : > { %v1397_v7 = vsel %vm1394_vm7, %v1396_v6, %v1392_v5  ;;  %vm1423_vm7 = vweird.f32 %v6645_v10 }
 0xcb2   : > { %v7330_v32 = vsel %vm1423_vm7, %v6645_v10, %v1422_v61  ;;  %vm8767_vm7 = vcmask 64512  }
 0xcb8   : > { %1406 = vperm.xlu1 %5735, %v1397_v7  }
 0xd22   : > { %v1402_v8 = vpop.permute.xlu1 %1401 }
 0xd23   : > { %v7320_v56 = vmul.f32 %v1402_v8, %v7307_v0  ;;  %v1470_v8 = vstv %s5323_s14  ;;  %s5321_s14 = sld [smem:[#allocation2 + $0x108]] }
 0xd2a   : > { %v1407_v45 = vpop.permute.xlu1 %1406 }
 0xd2b   : > { %v7323_v11 = vmul.f32 %v1407_v45, %v7311_v62 }
 0xd2d   : > { %v1411_v12 = vadd.f32 %v7323_v11, %v7320_v56  ;;  %v1426_v13 = vmax.f32 %v7320_v56, %v7323_v11 }
 0xd2f   : > { %v1412_v17 = vrot.slane %v1411_v12, 4  ;;  %v1427_v18 = vrot.slane %v1426_v13, 4 }
 0xd31   : > { %v1413_v19 = vadd.f32 %v1412_v17, %v1411_v12  ;;  %v1428_v20 = vmax.f32 %v1426_v13, %v1427_v18 }
 0xd33   : > { %v1429_v23 = vrot.slane %v1428_v20, 2  ;;  %v1414_v24 = vrot.slane %v1413_v19, 2 }
 0xd35   : > { %v1430_v25 = vmax.f32 %v1428_v20, %v1429_v23  ;;  %v1415_v0 = vadd.f32 %v1414_v24, %v1413_v19 }
 0xd37   : > { %v1431_v27 = vrot.slane %v1430_v25, 1  ;;  %v1416_v29 = vrot.slane %v1415_v0, 1 }
 0xd39   : > { %v1432_v62 = vmax.f32 %v1430_v25, %v1431_v27  ;;  %v1417_v31 = vadd.f32 %v1416_v29, %v1415_v0  ;;  %v1454_v27 = vstv %s5319_s9  ;;  %s5317_s9 = sld [smem:[#allocation2 + $0x104]] }
 0xd3b   : > { %1441 = vrot.lane.b32.xlu1 %v1432_v62, %s8745_s20  ;;  %v1425_v33 = vmul.f32 %v7330_v32, %v1417_v31  ;;  %v1450_v62 = vstv %s5318_s23  ;;  %s5331_s23 = sld [smem:[#allocation2 + $0x112]] }
 0xd43   : > { %1434 = vrot.lane.b32.xlu1 %v1425_v33, %s8745_s20  ;;  %s6848_s20 = smov 24  }
 0xdad   : > { %v1442_v36 = vpop.permute.xlu1 %1441 }
 0xdae   : > { %v7338_v37 = vsel %vm8761_vm10, 0.0, %v1442_v36  ;;  %v7341_v38 = vsel %vm8761_vm10, %v1442_v36, 0.0 }
 0xdaf   : > { %v1491_v39 = vmul.f32 %v1489_v34, %v7341_v38  ;;  %v1498_v40 = vmul.f32 %v1497_v35, %v7338_v37  ;;  %v1490_v42 = vmul.f32 %v1489_v34, %v7338_v37  ;;  %v1483_v48 = vmul.f32 %v1481_v43, %v7341_v38 }
 0xdb0   : > { %v1482_v15 = vmul.f32 %v1481_v43, %v7338_v37  ;;  %v1475_v14 = vmul.f32 %v1474_v47, %v7338_v37  ;;  %v1499_v60 = vmul.f32 %v1497_v35, %v7341_v38  ;;  %v1486_v2 = vmul.f32 %v1485_v3, %v7338_v37 }
 0xdb1   : > { %1552 = vrot.lane.b32.xlu2 %v1491_v39, %s8747_s28  ;;  %1561 = vrot.lane.b32.xlu0 %v1498_v40, %s8747_s28  ;;  %v1487_v18 = vmul.f32 %v1485_v3, %v7341_v38  ;;  %v1495_v19 = vmul.f32 %v1493_v16, %v7341_v38  ;;  %v1494_v23 = vmul.f32 %v1493_v16, %v7338_v37  ;;  %v1477_v3 = vstv %s5325_s13  ;;  %s8770_s13 = smov 8  }
 0xdb2   : > { %1550 = vrot.lane.b32.xlu1 %v1490_v42, %s8747_s28  ;;  %v1462_v42 = vstv %s5321_s14  ;;  %s8768_s14 = smov 56  }
 0xdb5   : > { %v1435_v49 = vpop.permute.xlu1 %1434 }
 0xdb6   : > { %v7356_v52 = vsel %vm8761_vm10, 0.0, %v1435_v49  ;;  %v7359_v22 = vsel %vm8761_vm10, %v1435_v49, 0.0  ;;  %vm1802_vm10 = vcmask 392192  }
 0xdb7   : > { %v1460_v54 = vmul.f32 %v1458_v57, %v7359_v22  ;;  %v1467_v59 = vmul.f32 %v1466_v58, %v7356_v52  ;;  %v1459_v63 = vmul.f32 %v1458_v57, %v7356_v52  ;;  %v1468_v1 = vmul.f32 %v1466_v58, %v7359_v22 }
 0xdb8   : > { %v1471_v46 = vmul.f32 %v1470_v8, %v7356_v52  ;;  %v1472_v45 = vmul.f32 %v1470_v8, %v7359_v22  ;;  %v1455_v61 = vmul.f32 %v1454_v27, %v7356_v52  ;;  %v1451_v34 = vmul.f32 %v1450_v62, %v7356_v52 }
 0xdb9   : > { %1541 = vrot.lane.b32.xlu0 %v1483_v48, %s8747_s28  ;;  %1539 = vrot.lane.b32.xlu2 %v1482_v15, %s8747_s28  ;;  %v1452_v36 = vmul.f32 %v1450_v62, %v7359_v22  ;;  %v1456_v39 = vmul.f32 %v1454_v27, %v7359_v22  ;;  %v1464_v47 = vmul.f32 %v1462_v42, %v7359_v22 }
 0xdba   : > { %1532 = vrot.lane.b32.xlu1 %v1475_v14, %s6848_s20  ;;  %v1479_v22 = vmul.f32 %v1477_v3, %v7341_v38 }
 0xdc1   : > { %1513 = vrot.lane.b32.xlu2 %v1460_v54, %s8747_s28  ;;  %1522 = vrot.lane.b32.xlu0 %v1467_v59, %s8747_s28  ;;  %v1463_v54 = vmul.f32 %v1462_v42, %v7356_v52 }
 0xdc2   : > { %1563 = vrot.lane.b32.xlu1 %v1499_v60, %s8747_s28 }
 0xdca   : > { %1511 = vrot.lane.b32.xlu1 %v1459_v63, %s8747_s28 }
 0xdd2   : > { %1524 = vrot.lane.b32.xlu1 %v1468_v1, %s8747_s28 }
 0xe0b   : > { %v1553_v4 = vpop.permute.xlu2 %1552 }
 0xe0c   : > { %v1558_v24 = vadd.f32 %v1553_v4, %v1487_v18 }
 0xe13   : > { %v1540_v17 = vpop.permute.xlu2 %1539 }
 0xe1b   : > { %v1514_v29 = vpop.permute.xlu2 %1513 }
 0xe1c   : > { %v1519_v40 = vadd.f32 %v1514_v29, %v1456_v39 }
 0xe23   : > { %v1562_v20 = vpop.permute.xlu0 %1561 }
 0xe24   : > { %v1551_v5 = vpop.permute.xlu1 %1550 }
 0xe25   : > { %v1554_v6 = vsel %vm8762_vm13, %v1551_v5, %v1553_v4  ;;  %v1478_v5 = vmul.f32 %v1477_v3, %v7338_v37  ;;  %v216_v3 = vand.u32 7, %v7098_v44 }
 0xe26   : > { %v1557_v7 = vadd.f32 %v1554_v6, %v1486_v2 }
 0xe27   : > { %vm217_vm11 = vcmp.eq.s32.totalorder %v216_v3, 0 }
 0xe28   : > { %1592 = vrot.lane.b32.xlu0 %v1557_v7, %s6805_s12 }
 0xe2b   : > { %v1542_v49 = vpop.permute.xlu0 %1541 }
 0xe2c   : > { %v1533_v10 = vpop.permute.xlu1 %1532  ;;  %v1543_v2 = vsel %vm8762_vm13, %v1540_v17, %v1542_v49  ;;  %v1547_v6 = vadd.f32 %v1542_v49, %v1479_v22 }
 0xe2d   : > { %v1535_v12 = vadd.f32 %v1533_v10, %v1471_v46  ;;  %v1536_v13 = vadd.f32 %v1533_v10, %v1472_v45  ;;  %v1546_v7 = vadd.f32 %v1543_v2, %v1478_v5  ;;  %v7418_v2 = vsel %vm217_vm11, 1.0, %v6825_v50 }
 0xe2e   : > { %vm1841_vm11 = vcmask 195584  }
 0xe2f   : > { %1583 = vrot.lane.b32.xlu2 %v1536_v13, %s6805_s12  ;;  %1581 = vrot.lane.b32.xlu1 %v1535_v12, %s6805_s12 }
 0xe33   : > { %v1523_v57 = vpop.permute.xlu0 %1522 }
 0xe34   : > { %v1564_v21 = vpop.permute.xlu1 %1563 }
 0xe35   : > { %v1565_v25 = vsel %vm8762_vm13, %v1562_v20, %v1564_v21  ;;  %v1569_v0 = vadd.f32 %v1564_v21, %v1495_v19  ;;  %v1447_v21 = vstv %s5317_s9  ;;  %s6851_s9 = smov 16  }
 0xe36   : > { %v1568_v26 = vadd.f32 %v1565_v25, %v1494_v23  ;;  %v1448_v25 = vmul.f32 %v1447_v21, %v7356_v52  ;;  %v5335_v21 = vld [vmem:[%s8676_s2 + $0x30] sm:$0xff] }
 0xe37   : > { %1594 = vrot.lane.b32.xlu1 %v1558_v24, %s6805_s12  ;;  %1614 = vrot.lane.b32.xlu0 %v1569_v0, %s6827_s30 }
 0xe38   : > { %1612 = vrot.lane.b32.xlu2 %v1568_v26, %s6827_s30 }
 0xe3c   : > { %v1512_v31 = vpop.permute.xlu1 %1511 }
 0xe3d   : > { %v1515_v33 = vsel %vm8762_vm13, %v1512_v31, %v1514_v29 }
 0xe3e   : > { %v1518_v35 = vadd.f32 %v1515_v33, %v1455_v61 }
 0xe3f   : > { %1502 = vrot.lane.b32.xlu1 %v1451_v34, %s8747_s28  ;;  %v1631_v34 = vstv %s5331_s23  ;;  %s6852_s23 = smov 32  }
 0xe40   : > { %1504 = vrot.lane.b32.xlu2 %v1452_v36, %s8747_s28  ;;  %1572 = vrot.lane.b32.xlu0 %v1518_v35, %s6805_s12 }
 0xe44   : > { %v1525_v43 = vpop.permute.xlu1 %1524 }
 0xe45   : > { %v1530_v48 = vadd.f32 %v1525_v43, %v1464_v47  ;;  %v1526_v58 = vsel %vm8762_vm13, %v1523_v57, %v1525_v43 }
 0xe46   : > { %v1529_v59 = vadd.f32 %v1526_v58, %v1463_v54 }
 0xe47   : > { %1574 = vrot.lane.b32.xlu1 %v1519_v40, %s6805_s12 }
 0xe89   : > { %v1584_v15 = vpop.permute.xlu2 %1583 }
 0xe8a   : > { %v1589_v14 = vadd.f32 %v1584_v15, %v1530_v48 }
 0xe8c   : > { %1605 = vrot.lane.b32.xlu0 %v1589_v14, %s6827_s30 }
 0xe92   : > { %v1613_v12 = vpop.permute.xlu2 %1612 }
 0xe9a   : > { %v1593_v60 = vpop.permute.xlu0 %1592  ;;  %v1505_v38 = vpop.permute.xlu2 %1504 }
 0xea1   : > { %v1582_v63 = vpop.permute.xlu1 %1581 }
 0xea2   : > { %v1585_v1 = vsel %vm306_vm3, %v1582_v63, %v1584_v15 }
 0xea3   : > { %v1588_v4 = vadd.f32 %v1585_v1, %v1529_v59 }
 0xea5   : > { %1603 = vrot.lane.b32.xlu2 %v1588_v4, %s6827_s30 }
 0xea9   : > { %v1615_v8 = vpop.permute.xlu0 %1614  ;;  %v1595_v46 = vpop.permute.xlu1 %1594 }
 0xeaa   : > { %v1596_v45 = vsel %vm306_vm3, %v1593_v60, %v1595_v46  ;;  %v1600_v10 = vadd.f32 %v1595_v46, %v1547_v6  ;;  %v1616_v16 = vsel %vm771_vm2, %v1613_v12, %v1615_v8 }
 0xeab   : > { %v1599_v13 = vadd.f32 %v1596_v45, %v1546_v7 }
 0xeac   : > { %v1620_v18 = vadd.f32 %v1615_v8, %v1600_v10 }
 0xead   : > { %v1619_v19 = vadd.f32 %v1616_v16, %v1599_v13 }
 0xeae   : > { %1625 = vrot.lane.b32.xlu2 %v1620_v18, %s8747_s28 }
 0xeaf   : > { %1623 = vrot.lane.b32.xlu1 %v1619_v19, %s8747_s28 }
 0xeb1   : > { %v1503_v17 = vpop.permute.xlu1 %1502 }
 0xeb2   : > { %v1573_v37 = vpop.permute.xlu0 %1572  ;;  %v1506_v24 = vsel %vm8762_vm13, %v1503_v17, %v1505_v38 }
 0xeb3   : > { %v1508_v27 = vadd.f32 %v1506_v24, %v1448_v25 }
 0xeb9   : > { %v1575_v23 = vpop.permute.xlu1 %1574 }
 0xeba   : > { %v1576_v26 = vsel %vm306_vm3, %v1573_v37, %v1575_v23 }
 0xebb   : > { %v1578_v29 = vadd.f32 %v1576_v26, %v1508_v27 }
 0xefe   : > { %v1606_v0 = vpop.permute.xlu0 %1605 }
 0xeff   : > { %v1604_v20 = vpop.permute.xlu2 %1603 }
 0xf00   : > { %v1607_v62 = vsel %vm771_vm2, %v1604_v20, %v1606_v0  ;;  %v5336_v20 = vld [vmem:[%s8676_s2 + $0x38] sm:$0xff] }
 0xf01   : > { %v1609_v61 = vadd.f32 %v1607_v62, %v1578_v29 }
 0xf08   : > { %v1626_v31 = vpop.permute.xlu2 %1625 }
 0xf21   : > { %v1624_v33 = vpop.permute.xlu1 %1623 }
 0xf22   : > { %v1627_v35 = vsel %vm8762_vm13, %v1624_v33, %v1626_v31 }
 0xf23   : > { %v1629_v36 = vadd.f32 %v1627_v35, %v1609_v61 }
 0xf25   : > { %v1632_v39 = vadd.f32 %v1631_v34, %v1629_v36 }
 0xf27   : > { %v5332_v40 = vmul.f32 -1.442695, %v1632_v39 }
 0xf29   : > { %6646 = vpow2.f32 %v5332_v40 }
 0xf2f   : > { %v6647_v42 = vpop.eup %6646 }
 0xf30   : > { %v1636_v43 = vadd.f32 1.0, %v6647_v42 }
 0xf32   : > { %6648 = vrcp.f32 %v1636_v43  ;;  %v1648_v15 = vand.u32 2147483648, %v1636_v43  ;;  %v1646_v49 = vand.u32 2147483647, %v1636_v43  ;;  %vm1642_vm0 = vweird.f32 %v1636_v43 }
 0xf34   : > { %v1649_v58 = vor.u32 1.1754944e-38, %v1648_v15  ;;  %vm1647_vm8 = vcmp.eq.f32.partialorder %v1646_v49, 8.507059e+37 }
 0xf38   : > { %v6649_v52 = vpop.eup %6648 }
 0xf39   : > { %v1638_v47 = vmul.f32 %v6649_v52, %v1636_v43  ;;  %vm1643_vm14 = vweird.f32 %v6649_v52 }
 0xf3a   : > { %vm1644_vm12 = vmor %vm1642_vm0, %vm1643_vm14  ;;  %vm8775_vm14 = vcmask 130048  }
 0xf3b   : > { %v1639_v48 = vsub.f32 1.0, %v1638_v47  ;;  %vm8776_vm0 = vmmov %vm8775_vm14 }
 0xf3d   : > { %v1640_v14 = vmul.f32 %v6649_v52, %v1639_v48 }
 0xf3f   : > { %v1641_v57 = vadd.f32 %v6649_v52, %v1640_v14 }
 0xf41   : > { %v1645_v54 = vsel %vm1644_vm12, %v6649_v52, %v1641_v57  ;;  %vm8777_vm12 = vcmask 850944  }
 0xf42   : > { %v1650_v59 = vsel %vm1647_vm8, %v1649_v58, %v1645_v54  ;;  %vm8778_vm8 = vmmov %vm8777_vm12 }
 0xf43   : > { %v1652_v60 = vperm.slane %v1650_v59, 0 }
 0xf45   : > { %v1654_v63 = vmul.f32 %v1652_v60, %v7323_v11  ;;  %v1653_v1 = vmul.f32 %v1652_v60, %v7320_v56 }
 0xf47   : > { %1659 = vrot.lane.b32.xlu1 %v1654_v63, %s8747_s28  ;;  %1657 = vrot.lane.b32.xlu0 %v1653_v1, %s8747_s28  ;;  %s8757_s28 = smov 40  }
 0xfb9   : > { %v1660_v4 = vpop.permute.xlu1 %1659  ;;  %v1658_v22 = vpop.permute.xlu0 %1657 }
 0xfba   : > { %v1664_v5 = vsel %vm8762_vm13, %v1660_v4, 0.0  ;;  %v1663_v6 = vsel %vm8762_vm13, %v1658_v22, 0.0 }
 0xfbb   : > { %v1666_v7 = vmax.f32 %v1654_v63, %v1664_v5  ;;  %v1665_v11 = vmax.f32 %v1653_v1, %v1663_v6 }
 0xfbd   : > { %v7423_v56 = vmul.f32 %v7418_v2, %v1666_v7  ;;  %v7426_v8 = vmul.f32 %v7418_v2, %v1665_v11 }
 0xfbf   : > { %v5887_v46 = vpack.i.bf16 %v7423_v56, %v7426_v8 }
 0xfc1   : > { %5888 = vrot.lane.b32.xlu2 %v5887_v46, %s8768_s14 }
0x101b   : > { %v5889_v45 = vpop.permute.xlu2 %5888 }
0x101c   : > { %v7431_v10 = vunpack.i.h.bf16 %v5889_v45  ;;  %v7433_v12 = vunpack.i.l.bf16 %v5889_v45 }
0x101e   : > { %v1679_v13 = vsel %vm8763_vm4, 0.0, %v7431_v10  ;;  %v1681_v16 = vsel %vm8763_vm4, %v7431_v10, 0.0  ;;  %v1678_v18 = vsel %vm8763_vm4, 0.0, %v7433_v12  ;;  %v1680_v19 = vsel %vm8763_vm4, %v7433_v12, 0.0 }
0x101f   : > { %v5897_v38 = vpack.i.bf16 %v1681_v16, %v1679_v13  ;;  %v5902_v17 = vpack.i.bf16 %v1680_v19, %v1678_v18  ;;  %v5348_v37 = vpack.c.bf16 %v7431_v10, %v7433_v12 }
0x1021   : > { %5898 = vrot.lane.b32.xlu1 %v5897_v38, %s6840_s8  ;;  %5903 = vrot.lane.b32.xlu2 %v5902_v17, %s6838_s6 }
0x1022   : > { %5893 = vrot.lane.b32.xlu0 %v5902_v17, %s6840_s8 }
0x1029   : > { %5913 = vrot.lane.b32.xlu1 %v5902_v17, %s6842_s22  ;;  %5918 = vrot.lane.b32.xlu2 %v5897_v38, %s6842_s22 }
0x102a   : > { %5908 = vrot.lane.b32.xlu0 %v5897_v38, %s6838_s6 }
0x1031   : > { %5928 = vrot.lane.b32.xlu1 %v5897_v38, %s8770_s13  ;;  %5933 = vrot.lane.b32.xlu2 %v5902_v17, %s6845_s5 }
0x1032   : > { %5923 = vrot.lane.b32.xlu0 %v5902_v17, %s8770_s13 }
0x1039   : > { %5943 = vrot.lane.b32.xlu1 %v5902_v17, %s6851_s9  ;;  %5948 = vrot.lane.b32.xlu2 %v5897_v38, %s6851_s9 }
0x103a   : > { %5938 = vrot.lane.b32.xlu0 %v5897_v38, %s6845_s5 }
0x1041   : > { %5958 = vrot.lane.b32.xlu1 %v5897_v38, %s8759_s10  ;;  %5963 = vrot.lane.b32.xlu2 %v5902_v17, %s6848_s20 }
0x1042   : > { %5953 = vrot.lane.b32.xlu0 %v5902_v17, %s8759_s10  ;;  %s5352_s10 = sld [smem:[#allocation2 + $0x182]] }
0x1049   : > { %5973 = vrot.lane.b32.xlu1 %v5902_v17, %s6827_s30  ;;  %5978 = vrot.lane.b32.xlu2 %v5897_v38, %s6827_s30 }
0x104a   : > { %5968 = vrot.lane.b32.xlu0 %v5897_v38, %s6848_s20 }
0x1051   : > { %5988 = vrot.lane.b32.xlu1 %v5897_v38, %s6852_s23  ;;  %5993 = vrot.lane.b32.xlu2 %v5902_v17, %s6805_s12 }
0x1052   : > { %5983 = vrot.lane.b32.xlu0 %v5902_v17, %s6852_s23 }
0x1059   : > { %6003 = vrot.lane.b32.xlu1 %v5902_v17, %s8757_s28  ;;  %6008 = vrot.lane.b32.xlu2 %v5897_v38, %s8757_s28  ;;  %s5350_s28 = sld [smem:[#allocation2 + $0x180]] }
0x105a   : > { %5998 = vrot.lane.b32.xlu0 %v5897_v38, %s6805_s12 }
0x1061   : > { %6018 = vrot.lane.b32.xlu1 %v5897_v38, %s6854_s29  ;;  %6023 = vrot.lane.b32.xlu2 %v5902_v17, %s8768_s14 }
0x1062   : > { %6013 = vrot.lane.b32.xlu0 %v5902_v17, %s6854_s29 }
0x1069   : > { %6033 = vrot.lane.b32.xlu1 %v5902_v17, %s6855_s11  ;;  %6038 = vrot.lane.b32.xlu2 %v5897_v38, %s6855_s11 }
0x106a   : > { %6028 = vrot.lane.b32.xlu0 %v5897_v38, %s8768_s14  ;;  %s5423_s14 = sld [smem:[#allocation2 + $0x28b]] }
0x1071   : > { %1900 = vperm.xlu1 %5735, %v5336_v20  }
0x1072   : > { %1895 = vperm.xlu0 %5736, %v5335_v21  }
0x107b   : > { %v5904_v23 = vpop.permute.xlu2 %5903 }
0x107c   : > { %v5906_v35 = vunpack.i.h.bf16 %v5904_v23  ;;  %v5905_v36 = vunpack.i.l.bf16 %v5904_v23 }
0x107e   : > { %v1754_v49 = vsel %vm1245_vm15, %v5905_v36, %v5906_v35 }
0x1083   : > { %v5919_v24 = vpop.permute.xlu2 %5918 }
0x1084   : > { %v5921_v48 = vunpack.i.h.bf16 %v5919_v24  ;;  %v5920_v15 = vunpack.i.l.bf16 %v5919_v24 }
0x1086   : > { %v1743_v60 = vsel %vm8765_vm1, %v5920_v15, %v5921_v48 }
0x108b   : > { %v5934_v62 = vpop.permute.xlu2 %5933 }
0x108c   : > { %v5936_v16 = vunpack.i.h.bf16 %v5934_v62  ;;  %v5935_v18 = vunpack.i.l.bf16 %v5934_v62 }
0x1093   : > { %v5899_v25 = vpop.permute.xlu1 %5898  ;;  %v5949_v14 = vpop.permute.xlu2 %5948 }
0x1094   : > { %v5901_v0 = vunpack.i.h.bf16 %v5899_v25  ;;  %v5900_v26 = vunpack.i.l.bf16 %v5899_v25  ;;  %v5894_v27 = vpop.permute.xlu0 %5893  ;;  %v5951_v45 = vunpack.i.h.bf16 %v5949_v14  ;;  %v5950_v13 = vunpack.i.l.bf16 %v5949_v14 }
0x1095   : > { %v5896_v29 = vunpack.i.h.bf16 %v5894_v27  ;;  %v5895_v61 = vunpack.i.l.bf16 %v5894_v27 }
0x1096   : > { %v1767_v31 = vsel %vm8766_vm9, %v5900_v26, %v5901_v0  ;;  %v1855_v25 = vsel %vm8776_vm0, %v5950_v13, %v5951_v45  ;;  %v1730_v0 = vsel %vm1217_vm6, %v5935_v18, %v5936_v16  ;;  %vm8764_vm0 = vcmask 326656  }
0x1097   : > { %v1766_v33 = vsel %vm8766_vm9, %v5895_v61, %v5896_v29 }
0x1098   : > { %v1881_v34 = vpack.c.bf16 %v1767_v31, %v1766_v33 }
0x109a   : > { %1913 = vmatpush.bf16.msrb.mxu3 %v1881_v34 }
0x109b   : > { %v5914_v39 = vpop.permute.xlu1 %5913  ;;  %v5964_v46 = vpop.permute.xlu2 %5963 }
0x109c   : > { %v5909_v40 = vpop.permute.xlu0 %5908  ;;  %v5916_v42 = vunpack.i.h.bf16 %v5914_v39  ;;  %v5915_v43 = vunpack.i.l.bf16 %v5914_v39  ;;  %v5965_v48 = vunpack.i.l.bf16 %v5964_v46 }
0x109d   : > { %v5911_v52 = vunpack.i.h.bf16 %v5909_v40  ;;  %v5910_v47 = vunpack.i.l.bf16 %v5909_v40 }
0x109e   : > { %v1742_v54 = vsel %vm8765_vm1, %v5915_v43, %v5916_v42 }
0x109f   : > { %v1755_v57 = vsel %vm1245_vm15, %v5910_v47, %v5911_v52  ;;  %v1879_v4 = vpack.c.bf16 %v1743_v60, %v1742_v54  ;;  %v5966_v47 = vunpack.i.h.bf16 %v5964_v46 }
0x10a0   : > { %v1880_v58 = vpack.c.bf16 %v1755_v57, %v1754_v49 }
0x10a2   : > { %1914 = vmatpush.bf16.msrb.mxu3 %v1880_v58 }
0x10a3   : > { %v5929_v59 = vpop.permute.xlu1 %5928  ;;  %v5979_v61 = vpop.permute.xlu2 %5978 }
0x10a4   : > { %v5931_v63 = vunpack.i.h.bf16 %v5929_v59  ;;  %v5930_v1 = vunpack.i.l.bf16 %v5929_v59  ;;  %v5924_v3 = vpop.permute.xlu0 %5923  ;;  %v5981_v43 = vunpack.i.h.bf16 %v5979_v61  ;;  %v5980_v52 = vunpack.i.l.bf16 %v5979_v61 }
0x10a5   : > { %v5926_v22 = vunpack.i.h.bf16 %v5924_v3  ;;  %v5925_v5 = vunpack.i.l.bf16 %v5924_v3  ;;  %v1842_v3 = vsel %vm1841_vm11, %v5965_v48, %v5966_v47 }
0x10a6   : > { %1915 = vmatpush.bf16.msrb.mxu3 %v1879_v4  ;;  %v1868_v6 = vsel %vm8767_vm7, %v5930_v1, %v5931_v63  ;;  %v1707_v63 = vsel %vm771_vm2, %v5980_v52, %v5981_v43 }
0x10a7   : > { %v1867_v7 = vsel %vm8767_vm7, %v5925_v5, %v5926_v22 }
0x10a8   : > { %v1889_v11 = vpack.c.bf16 %v1868_v6, %v1867_v7 }
0x10aa   : > { %1927 = vmatpush.bf16.msra.mxu0 %v1889_v11 }
0x10ab   : > { %v5944_v19 = vpop.permute.xlu1 %5943  ;;  %v5994_v58 = vpop.permute.xlu2 %5993 }
0x10ac   : > { %v5946_v38 = vunpack.i.h.bf16 %v5944_v19  ;;  %v5945_v17 = vunpack.i.l.bf16 %v5944_v19  ;;  %v5939_v20 = vpop.permute.xlu0 %5938 }
0x10ad   : > { %v5941_v21 = vunpack.i.h.bf16 %v5939_v20  ;;  %v5940_v23 = vunpack.i.l.bf16 %v5939_v20  ;;  %v5996_v20 = vunpack.i.h.bf16 %v5994_v58 }
0x10ae   : > { %v1854_v24 = vsel %vm8775_vm14, %v5945_v17, %v5946_v38  ;;  %vm1828_vm14 = vcmask 261120  }
0x10af   : > { %v1731_v26 = vsel %vm1217_vm6, %v5940_v23, %v5941_v21  ;;  %v1888_v27 = vpack.c.bf16 %v1855_v25, %v1854_v24  ;;  %v5995_v21 = vunpack.i.l.bf16 %v5994_v58 }
0x10b0   : > { %v1878_v29 = vpack.c.bf16 %v1731_v26, %v1730_v0 }
0x10b1   : > { %1928 = vmatpush.bf16.msra.mxu0 %v1888_v27 }
0x10b2   : > { %1916 = vmatpush.bf16.msrb.mxu3 %v1878_v29 }
0x10b3   : > { %v5959_v62 = vpop.permute.xlu1 %5958  ;;  %v6009_v16 = vpop.permute.xlu2 %6008 }
0x10b4   : > { %v5961_v31 = vunpack.i.h.bf16 %v5959_v62  ;;  %v5960_v33 = vunpack.i.l.bf16 %v5959_v62  ;;  %v5954_v34 = vpop.permute.xlu0 %5953  ;;  %v6011_v38 = vunpack.i.h.bf16 %v6009_v16  ;;  %v6010_v17 = vunpack.i.l.bf16 %v6009_v16 }
0x10b5   : > { %v5956_v35 = vunpack.i.h.bf16 %v5954_v34  ;;  %v5955_v36 = vunpack.i.l.bf16 %v5954_v34  ;;  %v1694_v62 = vsel %vm306_vm3, %v5995_v21, %v5996_v20 }
0x10b6   : > { %v1719_v39 = vsel %vm8777_vm12, %v5960_v33, %v5961_v31  ;;  %v1817_v61 = vsel %vm8764_vm0, %v6010_v17, %v6011_v38  ;;  %vm7506_vm12 = vmneg %vm8763_vm4 }
0x10b7   : > { %v1718_v40 = vsel %vm8778_vm8, %v5955_v36, %v5956_v35  ;;  %vm5347_vm8 = vmpackc.low %vm7506_vm12, %vm7506_vm12  ;;  %vm8781_vm12 = vcmask 523264  }
0x10b8   : > { %v1877_v42 = vpack.c.bf16 %v1719_v39, %v1718_v40  ;;  %v5339_v39 = vld [vmem:[%s8675_s1 + $0x30] sm:$0xf]  ;;  %v5552_v40 = vld [vmem:[%s8675_s1 + $0x34] sm:$0xf0] }
0x10ba   : > { %1917 = vmatpush.bf16.msrb.mxu3 %v1877_v42 }
0x10bb   : > { %v5974_v15 = vpop.permute.xlu1 %5973  ;;  %v6024_v36 = vpop.permute.xlu2 %6023 }
0x10bc   : > { %v5976_v14 = vunpack.i.h.bf16 %v5974_v15  ;;  %v5975_v49 = vunpack.i.l.bf16 %v5974_v15  ;;  %v5969_v57 = vpop.permute.xlu0 %5968 }
0x10bd   : > { %v5971_v54 = vunpack.i.h.bf16 %v5969_v57  ;;  %v5970_v59 = vunpack.i.l.bf16 %v5969_v57 }
0x10be   : > { %v1706_v60 = vsel %vm771_vm2, %v5975_v49, %v5976_v14  ;;  %v5340_v14 = vor.u32 %v5552_v40, %v5339_v39  ;;  %v1970_v39 = vstv %s5350_s28  ;;  %s5367_s28 = sld [smem:[#allocation2 + $0x18f]] }
0x10bf   : > { %v1876_v1 = vpack.c.bf16 %v1707_v63, %v1706_v60  ;;  %v1843_v4 = vsel %vm1841_vm11, %v5970_v59, %v5971_v54  ;;  %v6026_v54 = vunpack.i.h.bf16 %v6024_v36  ;;  %v6025_v59 = vunpack.i.l.bf16 %v6024_v36 }
0x10c0   : > { %v1887_v22 = vpack.c.bf16 %v1843_v4, %v1842_v3 }
0x10c1   : > { %1918 = vmatpush.bf16.msrb.mxu3 %v1876_v1  ;;  %v1790_v10 = vsel %vm8763_vm4, %v6025_v59, %v6026_v54 }
0x10c2   : > { %1929 = vmatpush.bf16.msra.mxu0 %v1887_v22 }
0x10c3   : > { %v5989_v5 = vpop.permute.xlu1 %5988  ;;  %v6039_v63 = vpop.permute.xlu2 %6038 }
0x10c4   : > { %v5991_v6 = vunpack.i.h.bf16 %v5989_v5  ;;  %v5990_v7 = vunpack.i.l.bf16 %v5989_v5  ;;  %v5984_v11 = vpop.permute.xlu0 %5983 }
0x10c5   : > { %v5986_v46 = vunpack.i.h.bf16 %v5984_v11  ;;  %v5985_v45 = vunpack.i.l.bf16 %v5984_v11 }
0x10c6   : > { %v1830_v13 = vsel %vm1828_vm14, %v5990_v7, %v5991_v6  ;;  %v6041_v6 = vunpack.i.h.bf16 %v6039_v63  ;;  %v6040_v7 = vunpack.i.l.bf16 %v6039_v63 }
0x10c7   : > { %v1829_v18 = vsel %vm1828_vm14, %v5985_v45, %v5986_v46  ;;  %v5551_v46 = vld [vmem:[%s8675_s1 + $0x34] sm:$0xf]  ;;  %v5341_v45 = vld [vmem:[%s8675_s1 + $0x38] sm:$0xf0] }
0x10c8   : > { %v1886_v19 = vpack.c.bf16 %v1830_v13, %v1829_v18  ;;  %v5344_v18 = vor.u32 %v5551_v46, %v5341_v45 }
0x10ca   : > { %1930 = vmatpush.bf16.msra.mxu0 %v1886_v19 }
0x10cb   : > { %v6004_v23 = vpop.permute.xlu1 %6003 }
0x10cc   : > { %v6006_v24 = vunpack.i.h.bf16 %v6004_v23  ;;  %v6005_v25 = vunpack.i.l.bf16 %v6004_v23  ;;  %v5999_v0 = vpop.permute.xlu0 %5998 }
0x10cd   : > { %v6001_v26 = vunpack.i.h.bf16 %v5999_v0  ;;  %v6000_v27 = vunpack.i.l.bf16 %v5999_v0 }
0x10ce   : > { %v1816_v29 = vsel %vm8764_vm0, %v6005_v25, %v6006_v24 }
0x10cf   : > { %v1695_v31 = vsel %vm306_vm3, %v6000_v27, %v6001_v26  ;;  %v1885_v33 = vpack.c.bf16 %v1817_v61, %v1816_v29 }
0x10d0   : > { %v1875_v34 = vpack.c.bf16 %v1695_v31, %v1694_v62 }
0x10d1   : > { %1931 = vmatpush.bf16.msra.mxu0 %v1885_v33 }
0x10d2   : > { %1919 = vmatpush.bf16.msrb.mxu3 %v1875_v34 }
0x10d3   : > { %v6019_v42 = vpop.permute.xlu1 %6018 }
0x10d4   : > { %v6021_v43 = vunpack.i.h.bf16 %v6019_v42  ;;  %v6020_v52 = vunpack.i.l.bf16 %v6019_v42  ;;  %v6014_v47 = vpop.permute.xlu0 %6013 }
0x10d5   : > { %v6016_v48 = vunpack.i.h.bf16 %v6014_v47  ;;  %v6015_v15 = vunpack.i.l.bf16 %v6014_v47 }
0x10d6   : > { %5349 = vmatpush.bf16.msk.msrb.mxu3 %vm5347_vm8, %v5348_v37  ;;  %v1804_v49 = vsel %vm1802_vm10, %v6020_v52, %v6021_v43  ;;  %vm8782_vm8 = vmmov %vm8781_vm12  ;;  %v1974_v43 = vstv %s5351_s27  ;;  %s5363_s27 = sld [smem:[#allocation2 + $0x18b]] }
0x10d7   : > { %v1803_v57 = vsel %vm1802_vm10, %v6015_v15, %v6016_v48  ;;  %v1779_v13 = vsel %vm8782_vm8, %v6040_v7, %v6041_v6  ;;  %v1980_v15 = vstv %s5352_s10  ;;  %s5365_s10 = sld [smem:[#allocation2 + $0x18d]] }
0x10d8   : > { %v1884_v58 = vpack.c.bf16 %v1804_v49, %v1803_v57 }
0x10d9   : > { %1921 = vmatmul.bf16.vlgmr.msrb.gmra.mxu3 %v5340_v14 }
0x10da   : > { %1932 = vmatpush.bf16.msra.mxu0 %v1884_v58 }
0x10db   : > { %v6034_v60 = vpop.permute.xlu1 %6033 }
0x10dc   : > { %v6029_v1 = vpop.permute.xlu0 %6028  ;;  %v6036_v3 = vunpack.i.h.bf16 %v6034_v60  ;;  %v6035_v4 = vunpack.i.l.bf16 %v6034_v60 }
0x10dd   : > { %v6031_v22 = vunpack.i.h.bf16 %v6029_v1  ;;  %v6030_v5 = vunpack.i.l.bf16 %v6029_v1 }
0x10de   : > { %v1778_v11 = vsel %vm8781_vm12, %v6035_v4, %v6036_v3  ;;  %v1986_v4 = vstv %s5353_s7  ;;  %s5369_s7 = sld [smem:[#allocation2 + $0x191]] }
0x10df   : > { %v1791_v12 = vsel %vm8763_vm4, %v6030_v5, %v6031_v22  ;;  %v1882_v16 = vpack.c.bf16 %v1779_v13, %v1778_v11 }
0x10e0   : > { %v1883_v37 = vpack.c.bf16 %v1791_v12, %v1790_v10 }
0x10e2   : > { %1933 = vmatpush.bf16.msra.mxu0 %v1883_v37 }
0x10e3   : > { %v1901_v0 = vpop.permute.xlu1 %1900 }
0x10e4   : > { %v1896_v38 = vpop.permute.xlu0 %1895 }
0x10e6   : > { %1934 = vmatpush.bf16.msra.mxu0 %v1882_v16 }
0x10e9   : > { %1935 = vmatmul.bf16.vlgmr.msra.gmra.mxu0 %v5344_v18 }
0x115c   : > { %v1922_v19 = vpop.f32.mrf.mxu3 }
0x115d   : > { %v1923_v17 = vadd.f32 %v1922_v19, %v1896_v38 }
0x1164   : > { %v1924_v24 = vpop.f32.mrf.mxu3 }
0x1165   : > { %v1925_v27 = vadd.f32 %v1924_v24, %v1901_v0 }
0x1166   : > { %v1936_v20 = vpop.f32.mrf.mxu0 }
0x1167   : > { %v1937_v21 = vadd.f32 %v1936_v20, %v1923_v17 }
0x1169   : > { %vm1941_vm12 = vcmp.gt.f32.partialorder %v1937_v21, 0.0  ;;  %v1943_v23 = vmul.f32 0.01, %v1937_v21 }
0x116b   : > { %v7534_v25 = vsel %vm1941_vm12, %v1937_v21, %v1943_v23  ;;  %vm8783_vm12 = vcmask 1046528  }
0x116c   : > { %v1947_v26 = vmul.f32 %v7418_v2, %v7534_v25 }
0x116e   : > { %v1938_v29 = vpop.f32.mrf.mxu0  ;;  %1949 = vadd.xlane.f32.xlu2 %v1947_v26 }
0x116f   : > { %v1939_v61 = vadd.f32 %v1938_v29, %v1925_v27 }
0x1171   : > { %vm1942_vm8 = vcmp.gt.f32.partialorder %v1939_v61, 0.0  ;;  %v1944_v62 = vmul.f32 0.01, %v1939_v61 }
0x1173   : > { %v7538_v31 = vsel %vm1942_vm8, %v1939_v61, %v1944_v62  ;;  %vm8784_vm8 = vmmov %vm8783_vm12 }
0x1174   : > { %v1948_v33 = vmul.f32 %v7418_v2, %v7538_v31 }
0x1176   : > { %1951 = vadd.xlane.f32.xlu0 %v1948_v33 }
0x11e1   : > { %v1950_v34 = vpop.xlane.xlu2 %1949 }
0x11e2   : > { %v1953_v35 = vmul.f32 0.0625, %v1950_v34 }
0x11e4   : > { %v1957_v36 = vrot.slane %v1953_v35, 7  ;;  %v1963_v48 = vrot.slane %v1953_v35, 1  ;;  %v1975_v57 = vmul.f32 %v1974_v43, %v1953_v35 }
0x11e6   : > { %v1962_v40 = vsel %vm358_vm5, 0.0, %v1957_v36 }
0x11e7   : > { %v1971_v47 = vmul.f32 %v1970_v39, %v1962_v40 }
0x11e9   : > { %v1952_v42 = vpop.xlane.xlu0 %1951  ;;  %v1977_v60 = vadd.f32 %v1975_v57, %v1971_v47 }
0x11ea   : > { %v1954_v52 = vmul.f32 0.0625, %v1952_v42 }
0x11ec   : > { %v1958_v14 = vrot.slane %v1954_v52, 7  ;;  %v1964_v49 = vrot.slane %v1954_v52, 1  ;;  %v1976_v1 = vmul.f32 %v1974_v43, %v1954_v52 }
0x11ee   : > { %v1959_v58 = vsel %vm358_vm5, %v1957_v36, %v1958_v14  ;;  %v1965_v54 = vsel %vm8783_vm12, %v1963_v48, %v1964_v49  ;;  %v1968_v59 = vsel %vm8784_vm8, %v1964_v49, 0.0 }
0x11ef   : > { %v1972_v63 = vmul.f32 %v1970_v39, %v1959_v58  ;;  %v1981_v3 = vmul.f32 %v1980_v15, %v1965_v54  ;;  %v1982_v5 = vmul.f32 %v1980_v15, %v1968_v59 }
0x11f1   : > { %v1978_v22 = vadd.f32 %v1976_v1, %v1972_v63  ;;  %v1983_v6 = vadd.f32 %v1981_v3, %v1977_v60 }
0x11f3   : > { %v1984_v7 = vadd.f32 %v1982_v5, %v1978_v22  ;;  %v1987_v10 = vadd.f32 %v1986_v4, %v1983_v6  ;;  %v2109_v22 = vstv %s5367_s28  ;;  %v2094_v5 = vstv %s5363_s27  ;;  %s5359_s28 = sld [smem:[#allocation2 + $0x187]] }
0x11f4   : > { %s5361_s27 = sld [smem:[#allocation2 + $0x189]] }
0x11f5   : > { %v1988_v12 = vadd.f32 %v1986_v4, %v1984_v7  ;;  %v5354_v37 = vmul.f32 -1.442695, %v1987_v10 }
0x11f7   : > { %6650 = vpow2.f32 %v5354_v37  ;;  %v5355_v11 = vmul.f32 -1.442695, %v1988_v12 }
0x11f9   : > { %6652 = vpow2.f32 %v5355_v11 }
0x11fd   : > { %v6651_v46 = vpop.eup %6650 }
0x11fe   : > { %v1995_v45 = vadd.f32 1.0, %v6651_v46  ;;  %v2101_v46 = vstv %s5365_s10  ;;  %s5362_s10 = sld [smem:[#allocation2 + $0x18a]] }
0x11ff   : > { %v6653_v13 = vpop.eup %6652 }
0x1200   : > { %v1996_v16 = vadd.f32 1.0, %v6653_v13  ;;  %6654 = vrcp.f32 %v1995_v45  ;;  %v2008_v21 = vand.u32 2147483648, %v1995_v45  ;;  %v2006_v24 = vand.u32 2147483647, %v1995_v45 }
0x1201   : > { %vm2002_vm8 = vweird.f32 %v1995_v45 }
0x1202   : > { %6656 = vrcp.f32 %v1996_v16  ;;  %v2009_v29 = vor.u32 1.1754944e-38, %v2008_v21  ;;  %vm2007_vm4 = vcmp.eq.f32.partialorder %v2006_v24, 8.507059e+37  ;;  %v2023_v34 = vand.u32 2147483648, %v1996_v16 }
0x1203   : > { %vm2017_vm1 = vweird.f32 %v1996_v16  ;;  %v2021_v35 = vand.u32 2147483647, %v1996_v16  ;;  %v2086_v21 = vstv %s5361_s27  ;;  %s5357_s27 = sld [smem:[#allocation2 + $0x185]] }
0x1204   : > { %v2024_v39 = vor.u32 1.1754944e-38, %v2023_v34 }
0x1205   : > { %vm2022_vm7 = vcmp.eq.f32.partialorder %v2021_v35, 8.507059e+37 }
0x1206   : > { %v6655_v18 = vpop.eup %6654 }
0x1207   : > { %v1998_v19 = vmul.f32 %v6655_v18, %v1995_v45  ;;  %vm2003_vm12 = vweird.f32 %v6655_v18  ;;  %v2117_v45 = vstv %s5369_s7  ;;  %s5366_s7 = sld [smem:[#allocation2 + $0x18e]] }
0x1208   : > { %v6657_v38 = vpop.eup %6656  ;;  %vm2004_vm13 = vmor %vm2002_vm8, %vm2003_vm12 }
0x1209   : > { %v1999_v17 = vsub.f32 1.0, %v1998_v19  ;;  %v2013_v20 = vmul.f32 %v6657_v38, %v1996_v16  ;;  %vm2018_vm0 = vweird.f32 %v6657_v38 }
0x120a   : > { %vm2019_vm9 = vmor %vm2017_vm1, %vm2018_vm0  ;;  %vm8785_vm0 = vcmask 130048  }
0x120b   : > { %v2000_v23 = vmul.f32 %v6655_v18, %v1999_v17  ;;  %v2014_v0 = vsub.f32 1.0, %v2013_v20  ;;  %v2078_v20 = vstv %s5359_s28  ;;  %s5368_s28 = sld [smem:[#allocation2 + $0x190]]  ;;  %vm8786_vm12 = vmmov %vm8785_vm0 }
0x120c   : > { %vm8787_vm8 = vmmov %vm8785_vm0 }
0x120d   : > { %v2001_v26 = vadd.f32 %v6655_v18, %v2000_v23  ;;  %v2015_v27 = vmul.f32 %v6657_v38, %v2014_v0 }
0x120f   : > { %v2005_v61 = vsel %vm2004_vm13, %v6655_v18, %v2001_v26  ;;  %v2016_v33 = vadd.f32 %v6657_v38, %v2015_v27 }
0x1210   : > { %v2010_v62 = vsel %vm2007_vm4, %v2009_v29, %v2005_v61  ;;  %v2090_v29 = vstv %s5362_s10  ;;  %v2105_v61 = vstv %s5366_s7  ;;  %s5358_s10 = sld [smem:[#allocation2 + $0x186]] }
0x1211   : > { %2029 = vperm.xlu1 %5735, %v2010_v62   ;;  %v2020_v36 = vsel %vm2019_vm9, %v6657_v38, %v2016_v33  ;;  %s5360_s7 = sld [smem:[#allocation2 + $0x188]] }
0x1212   : > { %v2025_v40 = vsel %vm2022_vm7, %v2024_v39, %v2020_v36 }
0x1219   : > { %2034 = vperm.xlu1 %5735, %v2025_v40  }
0x1283   : > { %v2030_v42 = vpop.permute.xlu1 %2029 }
0x1284   : > { %v7547_v52 = vmul.f32 %v2030_v42, %v7534_v25 }
0x128b   : > { %v2035_v43 = vpop.permute.xlu1 %2034 }
0x128c   : > { %v7550_v47 = vmul.f32 %v2035_v43, %v7538_v31 }
0x128e   : > { %v2039_v48 = vadd.f32 %v7550_v47, %v7547_v52  ;;  %v2047_v15 = vmax.f32 %v7547_v52, %v7550_v47 }
0x1290   : > { %v2040_v14 = vrot.slane %v2039_v48, 4  ;;  %v2048_v49 = vrot.slane %v2047_v15, 4 }
0x1292   : > { %v2041_v57 = vadd.f32 %v2040_v14, %v2039_v48  ;;  %v2049_v58 = vmax.f32 %v2047_v15, %v2048_v49 }
0x1294   : > { %v2042_v54 = vrot.slane %v2041_v57, 2  ;;  %v2050_v59 = vrot.slane %v2049_v58, 2 }
0x1296   : > { %v2043_v60 = vadd.f32 %v2042_v54, %v2041_v57  ;;  %v2051_v63 = vmax.f32 %v2049_v58, %v2050_v59  ;;  %v2113_v58 = vstv %s5368_s28  ;;  %v2070_v54 = vstv %s5357_s27  ;;  %s5364_s28 = sld [smem:[#allocation2 + $0x18c]] }
0x1297   : > { %s5356_s27 = sld [smem:[#allocation2 + $0x184]] }
0x1298   : > { %v2052_v1 = vrot.slane %v2051_v63, 1  ;;  %v2044_v3 = vrot.slane %v2043_v60, 1 }
0x129a   : > { %v2053_v25 = vmax.f32 %v2051_v63, %v2052_v1  ;;  %v2045_v31 = vadd.f32 %v2044_v3, %v2043_v60 }
0x129c   : > { %2061 = vrot.lane.b32.xlu1 %v2053_v25, %s6848_s20  ;;  %v2046_v4 = vmul.f32 %v2045_v31, %v7330_v32 }
0x12a4   : > { %2055 = vrot.lane.b32.xlu1 %v2046_v4, %s6848_s20  ;;  %v2074_v4 = vstv %s5358_s10  ;;  %s5370_s10 = sld [smem:[#allocation2 + $0x192]] }
0x130e   : > { %v2062_v6 = vpop.permute.xlu1 %2061 }
0x130f   : > { %v7560_v7 = vsel %vm1841_vm11, 0.0, %v2062_v6  ;;  %v7563_v10 = vsel %vm1841_vm11, %v2062_v6, 0.0 }
0x1310   : > { %v2111_v12 = vmul.f32 %v2109_v22, %v7563_v10  ;;  %v2095_v37 = vmul.f32 %v2094_v5, %v7560_v7  ;;  %v2110_v11 = vmul.f32 %v2109_v22, %v7560_v7  ;;  %v2103_v13 = vmul.f32 %v2101_v46, %v7563_v10 }
0x1311   : > { %v2102_v16 = vmul.f32 %v2101_v46, %v7560_v7  ;;  %v2118_v18 = vmul.f32 %v2117_v45, %v7560_v7  ;;  %v2119_v0 = vmul.f32 %v2117_v45, %v7563_v10  ;;  %v2106_v40 = vmul.f32 %v2105_v61, %v7560_v7 }
0x1312   : > { %2172 = vrot.lane.b32.xlu2 %v2111_v12, %s6805_s12  ;;  %2152 = vrot.lane.b32.xlu0 %v2095_v37, %s6854_s29  ;;  %v2107_v15 = vmul.f32 %v2105_v61, %v7563_v10  ;;  %v2115_v59 = vmul.f32 %v2113_v58, %v7563_v10  ;;  %v2114_v60 = vmul.f32 %v2113_v58, %v7560_v7 }
0x1313   : > { %2170 = vrot.lane.b32.xlu1 %v2110_v11, %s6805_s12 }
0x1316   : > { %v2056_v19 = vpop.permute.xlu1 %2055 }
0x1317   : > { %v7578_v38 = vsel %vm1841_vm11, 0.0, %v2056_v19  ;;  %v7581_v17 = vsel %vm1841_vm11, %v2056_v19, 0.0  ;;  %v2082_v19 = vstv %s5360_s7  ;;  %s5382_s7 = sld [smem:[#allocation2 + $0x201]] }
0x1318   : > { %v2080_v23 = vmul.f32 %v2078_v20, %v7581_v17  ;;  %v2087_v24 = vmul.f32 %v2086_v21, %v7578_v38  ;;  %v2079_v26 = vmul.f32 %v2078_v20, %v7578_v38  ;;  %v2088_v27 = vmul.f32 %v2086_v21, %v7581_v17 }
0x1319   : > { %v2091_v62 = vmul.f32 %v2090_v29, %v7578_v38  ;;  %v2092_v33 = vmul.f32 %v2090_v29, %v7581_v17  ;;  %v2071_v1 = vmul.f32 %v2070_v54, %v7578_v38  ;;  %v2076_v5 = vmul.f32 %v2074_v4, %v7581_v17 }
0x131a   : > { %2161 = vrot.lane.b32.xlu2 %v2103_v13, %s6805_s12  ;;  %2159 = vrot.lane.b32.xlu0 %v2102_v16, %s6805_s12  ;;  %v2075_v12 = vmul.f32 %v2074_v4, %v7578_v38  ;;  %v2072_v45 = vmul.f32 %v2070_v54, %v7581_v17  ;;  %v2084_v20 = vmul.f32 %v2082_v19, %v7581_v17 }
0x131b   : > { %2181 = vrot.lane.b32.xlu1 %v2118_v18, %s6805_s12 }
0x1322   : > { %2133 = vrot.lane.b32.xlu0 %v2080_v23, %s6805_s12  ;;  %2142 = vrot.lane.b32.xlu2 %v2087_v24, %s6805_s12  ;;  %v2083_v23 = vmul.f32 %v2082_v19, %v7578_v38 }
0x1323   : > { %2183 = vrot.lane.b32.xlu1 %v2119_v0, %s6805_s12 }
0x132b   : > { %2131 = vrot.lane.b32.xlu1 %v2079_v26, %s6805_s12 }
0x1333   : > { %2144 = vrot.lane.b32.xlu1 %v2088_v27, %s6805_s12 }
0x136c   : > { %v2173_v35 = vpop.permute.xlu2 %2172 }
0x136d   : > { %v2178_v14 = vadd.f32 %v2173_v35, %v2107_v15 }
0x1374   : > { %v2162_v13 = vpop.permute.xlu2 %2161 }
0x137c   : > { %v2143_v18 = vpop.permute.xlu2 %2142 }
0x1384   : > { %v2153_v34 = vpop.permute.xlu0 %2152 }
0x1385   : > { %v2155_v36 = vadd.f32 %v2153_v34, %v2091_v62  ;;  %v2156_v39 = vadd.f32 %v2153_v34, %v2092_v33  ;;  %v2171_v42 = vpop.permute.xlu1 %2170  ;;  %v2097_v62 = vstv %s5364_s28  ;;  %s5383_s28 = sld [smem:[#allocation2 + $0x203]] }
0x1386   : > { %v2174_v43 = vsel %vm306_vm3, %v2171_v42, %v2173_v35  ;;  %v2099_v17 = vmul.f32 %v2097_v62, %v7563_v10 }
0x1387   : > { %v2177_v48 = vadd.f32 %v2174_v43, %v2106_v40  ;;  %2203 = vrot.lane.b32.xlu0 %v2156_v39, %s6827_s30  ;;  %2201 = vrot.lane.b32.xlu1 %v2155_v36, %s6827_s30 }
0x1388   : > { %v2167_v35 = vadd.f32 %v2162_v13, %v2099_v17 }
0x1389   : > { %2212 = vrot.lane.b32.xlu2 %v2177_v48, %s6827_s30  ;;  %v2098_v48 = vmul.f32 %v2097_v62, %v7560_v7 }
0x138c   : > { %v2160_v57 = vpop.permute.xlu0 %2159 }
0x138d   : > { %v2182_v49 = vpop.permute.xlu1 %2181  ;;  %v2163_v43 = vsel %vm306_vm3, %v2160_v57, %v2162_v13 }
0x138f   : > { %2214 = vrot.lane.b32.xlu1 %v2178_v14, %s6827_s30  ;;  %v2166_v14 = vadd.f32 %v2163_v43, %v2098_v48 }
0x1394   : > { %v2134_v22 = vpop.permute.xlu0 %2133 }
0x1395   : > { %v2184_v63 = vpop.permute.xlu1 %2183  ;;  %v2139_v6 = vadd.f32 %v2134_v22, %v2076_v5 }
0x1396   : > { %v2185_v25 = vsel %vm306_vm3, %v2182_v49, %v2184_v63  ;;  %v2189_v3 = vadd.f32 %v2184_v63, %v2115_v59 }
0x1397   : > { %v2188_v31 = vadd.f32 %v2185_v25, %v2114_v60  ;;  %2122 = vrot.lane.b32.xlu1 %v2071_v1, %s6805_s12  ;;  %v2067_v1 = vstv %s5356_s27  ;;  %s7728_s27 = sld [smem:[#allocation2 + $0x209]] }
0x1398   : > { %2234 = vrot.lane.b32.xlu2 %v2189_v3, %s6845_s5  ;;  %v2068_v7 = vmul.f32 %v2067_v1, %v7578_v38 }
0x1399   : > { %2232 = vrot.lane.b32.xlu0 %v2188_v31, %s6845_s5 }
0x139d   : > { %v2132_v37 = vpop.permute.xlu1 %2131 }
0x139e   : > { %v2135_v11 = vsel %vm306_vm3, %v2132_v37, %v2134_v22 }
0x139f   : > { %v2138_v46 = vadd.f32 %v2135_v11, %v2075_v12  ;;  %2194 = vrot.lane.b32.xlu1 %v2139_v6, %s6827_s30 }
0x13a1   : > { %2124 = vrot.lane.b32.xlu0 %v2072_v45, %s6805_s12  ;;  %2192 = vrot.lane.b32.xlu2 %v2138_v46, %s6827_s30  ;;  %v2251_v46 = vstv %s5370_s10  ;;  %s5396_s10 = sld [smem:[#allocation2 + $0x20f]] }
0x13a5   : > { %v2145_v16 = vpop.permute.xlu1 %2144 }
0x13a6   : > { %v2146_v21 = vsel %vm306_vm3, %v2143_v18, %v2145_v16  ;;  %v2150_v24 = vadd.f32 %v2145_v16, %v2084_v20 }
0x13a7   : > { %v2149_v0 = vadd.f32 %v2146_v21, %v2083_v23 }
0x13e3   : > { %v2213_v33 = vpop.permute.xlu2 %2212 }
0x13f2   : > { %v2235_v40 = vpop.permute.xlu2 %2234 }
0x13f9   : > { %v2204_v26 = vpop.permute.xlu0 %2203  ;;  %v2202_v27 = vpop.permute.xlu1 %2201 }
0x13fa   : > { %v2209_v29 = vadd.f32 %v2204_v26, %v2150_v24  ;;  %v2205_v61 = vsel %vm771_vm2, %v2202_v27, %v2204_v26 }
0x13fb   : > { %v2208_v34 = vadd.f32 %v2205_v61, %v2149_v0  ;;  %v2193_v63 = vpop.permute.xlu2 %2192 }
0x13fc   : > { %2225 = vrot.lane.b32.xlu2 %v2209_v29, %s6845_s5 }
0x13fd   : > { %2223 = vrot.lane.b32.xlu0 %v2208_v34, %s6845_s5 }
0x1401   : > { %v2215_v36 = vpop.permute.xlu1 %2214 }
0x1402   : > { %v2220_v39 = vadd.f32 %v2215_v36, %v2167_v35  ;;  %v2216_v15 = vsel %vm771_vm2, %v2213_v33, %v2215_v36  ;;  %v220_v35 = vand.u32 15, %v7098_v44 }
0x1403   : > { %v2219_v49 = vadd.f32 %v2216_v15, %v2166_v14 }
0x1404   : > { %v2240_v42 = vadd.f32 %v2235_v40, %v2220_v39  ;;  %vm221_vm7 = vcmp.eq.s32.totalorder %v220_v35, 0 }
0x1405   : > { %v7641_v43 = vsel %vm221_vm7, 1.0, %v6825_v50 }
0x1406   : > { %2245 = vrot.lane.b32.xlu0 %v2240_v42, %s6805_s12 }
0x1409   : > { %v2123_v10 = vpop.permute.xlu1 %2122 }
0x140b   : > { %v2233_v58 = vpop.permute.xlu0 %2232 }
0x140c   : > { %v2236_v54 = vsel %vm1217_vm6, %v2233_v58, %v2235_v40 }
0x140d   : > { %v2239_v59 = vadd.f32 %v2236_v54, %v2219_v49 }
0x140f   : > { %2243 = vrot.lane.b32.xlu1 %v2239_v59, %s6805_s12 }
0x1411   : > { %v2195_v3 = vpop.permute.xlu1 %2194 }
0x1412   : > { %v2196_v22 = vsel %vm771_vm2, %v2193_v63, %v2195_v3 }
0x1413   : > { %v2125_v60 = vpop.permute.xlu0 %2124 }
0x1414   : > { %v2126_v25 = vsel %vm306_vm3, %v2123_v10, %v2125_v60 }
0x1415   : > { %v2128_v31 = vadd.f32 %v2126_v25, %v2068_v7 }
0x1417   : > { %v2198_v6 = vadd.f32 %v2196_v22, %v2128_v31 }
0x1456   : > { %v2226_v4 = vpop.permute.xlu2 %2225 }
0x146f   : > { %v2224_v57 = vpop.permute.xlu0 %2223 }
0x1470   : > { %v2227_v5 = vsel %vm1217_vm6, %v2224_v57, %v2226_v4 }
0x1471   : > { %v2229_v12 = vadd.f32 %v2227_v5, %v2198_v6 }
0x1478   : > { %v2246_v37 = vpop.permute.xlu0 %2245 }
0x1481   : > { %v2244_v11 = vpop.permute.xlu1 %2243 }
0x1482   : > { %v2247_v45 = vsel %vm306_vm3, %v2244_v11, %v2246_v37 }
0x1483   : > { %v2249_v13 = vadd.f32 %v2247_v45, %v2229_v12 }
0x1485   : > { %v2252_v16 = vadd.f32 %v2251_v46, %v2249_v13 }
0x1487   : > { %v5371_v18 = vmul.f32 -1.442695, %v2252_v16 }
0x1489   : > { %6658 = vpow2.f32 %v5371_v18 }
0x148f   : > { %v6659_v19 = vpop.eup %6658 }
0x1490   : > { %v2256_v38 = vadd.f32 1.0, %v6659_v19 }
0x1492   : > { %6660 = vrcp.f32 %v2256_v38  ;;  %v2268_v24 = vand.u32 2147483648, %v2256_v38  ;;  %v2266_v26 = vand.u32 2147483647, %v2256_v38  ;;  %vm2262_vm13 = vweird.f32 %v2256_v38 }
0x1494   : > { %v2269_v29 = vor.u32 1.1754944e-38, %v2268_v24  ;;  %vm2267_vm4 = vcmp.eq.f32.partialorder %v2266_v26, 8.507059e+37 }
0x1498   : > { %v6661_v20 = vpop.eup %6660 }
0x1499   : > { %v2258_v21 = vmul.f32 %v6661_v20, %v2256_v38  ;;  %vm2263_vm1 = vweird.f32 %v6661_v20 }
0x149a   : > { %vm2264_vm9 = vmor %vm2262_vm13, %vm2263_vm1  ;;  %vm8789_vm13 = vcmask 523264  }
0x149b   : > { %v2259_v23 = vsub.f32 1.0, %v2258_v21  ;;  %vm8788_vm1 = vmmov %vm8785_vm0 }
0x149d   : > { %v2260_v0 = vmul.f32 %v6661_v20, %v2259_v23 }
0x149f   : > { %v2261_v27 = vadd.f32 %v6661_v20, %v2260_v0 }
0x14a1   : > { %v2265_v61 = vsel %vm2264_vm9, %v6661_v20, %v2261_v27  ;;  %vm8790_vm9 = vmmov %vm8789_vm13 }
0x14a2   : > { %v2270_v62 = vsel %vm2267_vm4, %v2269_v29, %v2265_v61  ;;  %vm8791_vm4 = vmmov %vm8790_vm9 }
0x14a3   : > { %v2272_v33 = vperm.slane %v2270_v62, 0  ;;  %vm8792_vm7 = vmmov %vm8791_vm4 }
0x14a5   : > { %v2274_v34 = vmul.f32 %v2272_v33, %v7550_v47  ;;  %v2273_v17 = vmul.f32 %v2272_v33, %v7547_v52 }
0x14a7   : > { %2279 = vrot.lane.b32.xlu1 %v2274_v34, %s6805_s12  ;;  %2277 = vrot.lane.b32.xlu2 %v2273_v17, %s6805_s12 }
0x1501   : > { %v2278_v36 = vpop.permute.xlu2 %2277 }
0x1502   : > { %v2283_v39 = vsel %vm306_vm3, %v2278_v36, 0.0 }
0x1503   : > { %v2285_v40 = vmax.f32 %v2273_v17, %v2283_v39 }
0x1505   : > { %v7645_v52 = vmul.f32 %v7641_v43, %v2285_v40 }
0x1519   : > { %v2280_v42 = vpop.permute.xlu1 %2279 }
0x151a   : > { %v2284_v48 = vsel %vm306_vm3, %v2280_v42, 0.0 }
0x151b   : > { %v2286_v47 = vmax.f32 %v2274_v34, %v2284_v48 }
0x151d   : > { %v7648_v15 = vmul.f32 %v7641_v43, %v2286_v47 }
0x151f   : > { %v6042_v14 = vpack.i.bf16 %v7648_v15, %v7645_v52 }
0x1521   : > { %6043 = vrot.lane.b32.xlu0 %v6042_v14, %s6827_s30 }
0x1593   : > { %v6044_v49 = vpop.permute.xlu0 %6043 }
0x1594   : > { %v6046_v58 = vunpack.i.h.bf16 %v6044_v49  ;;  %v6045_v54 = vunpack.i.l.bf16 %v6044_v49 }
0x1596   : > { %v2300_v59 = vsel %vm771_vm2, %v6046_v58, 0.0  ;;  %v2297_v10 = vsel %vm771_vm2, 0.0, %v6045_v54  ;;  %v2299_v60 = vsel %vm771_vm2, %v6045_v54, 0.0  ;;  %v7660_v57 = vpack.c.bf16 %v6046_v58, %v6045_v54 }
0x1597   : > { %v6057_v63 = vpack.i.bf16 %v2300_v59, %v2299_v60  ;;  %v6052_v1 = vpack.i.bf16 %v2297_v10, %v6825_v50  ;;  %v2298_v25 = vsel %vm771_vm2, 0.0, %v6046_v58 }
0x1599   : > { %6058 = vrot.lane.b32.xlu0 %v6057_v63, %s6852_s23  ;;  %6048 = vrot.lane.b32.xlu2 %v6057_v63, %s6851_s9 }
0x159a   : > { %6053 = vrot.lane.b32.xlu1 %v6052_v1, %s6851_s9 }
0x15a1   : > { %6068 = vrot.lane.b32.xlu0 %v6057_v63, %s6854_s29  ;;  %2381 = vrot.lane.b32.xlu2 %v2298_v25, %s6851_s9 }
0x15a2   : > { %6063 = vrot.lane.b32.xlu1 %v6052_v1, %s6852_s23 }
0x15a9   : > { %6078 = vrot.lane.b32.xlu0 %v6057_v63, %s6855_s11  ;;  %2369 = vrot.lane.b32.xlu2 %v2298_v25, %s6852_s23 }
0x15aa   : > { %6073 = vrot.lane.b32.xlu1 %v6052_v1, %s6854_s29 }
0x15b1   : > { %6088 = vrot.lane.b32.xlu0 %v6057_v63, %s6838_s6  ;;  %2357 = vrot.lane.b32.xlu2 %v2298_v25, %s6854_s29 }
0x15b2   : > { %6083 = vrot.lane.b32.xlu1 %v6052_v1, %s6855_s11 }
0x15b9   : > { %6098 = vrot.lane.b32.xlu0 %v6057_v63, %s6845_s5  ;;  %2345 = vrot.lane.b32.xlu2 %v2298_v25, %s6855_s11 }
0x15ba   : > { %6093 = vrot.lane.b32.xlu1 %v6052_v1, %s6838_s6 }
0x15c1   : > { %6108 = vrot.lane.b32.xlu0 %v6057_v63, %s6827_s30  ;;  %2333 = vrot.lane.b32.xlu2 %v2298_v25, %s6838_s6 }
0x15c2   : > { %6103 = vrot.lane.b32.xlu1 %v6052_v1, %s6845_s5 }
0x15c9   : > { %2309 = vrot.lane.b32.xlu0 %v2298_v25, %s6827_s30  ;;  %2321 = vrot.lane.b32.xlu2 %v2298_v25, %s6845_s5 }
0x15ca   : > { %6113 = vrot.lane.b32.xlu1 %v6052_v1, %s6827_s30 }
0x15f3   : > { %v6049_v3 = vpop.permute.xlu2 %6048 }
0x15f4   : > { %v6051_v22 = vunpack.i.h.bf16 %v6049_v3  ;;  %v6050_v5 = vunpack.i.l.bf16 %v6049_v3 }
0x15fb   : > { %v2382_v7 = vpop.permute.xlu2 %2381 }
0x15fc   : > { %v2386_v11 = vsel %vm8785_vm0, %v2382_v7, %v6051_v22  ;;  %vm5374_vm0 = vmneg %vm771_vm2 }
0x1603   : > { %v2370_v37 = vpop.permute.xlu2 %2369 }
0x160b   : > { %v6059_v31 = vpop.permute.xlu0 %6058  ;;  %v2358_v61 = vpop.permute.xlu2 %2357 }
0x160c   : > { %v6054_v4 = vpop.permute.xlu1 %6053  ;;  %v6061_v19 = vunpack.i.h.bf16 %v6059_v31  ;;  %v6060_v21 = vunpack.i.l.bf16 %v6059_v31 }
0x160d   : > { %v6056_v6 = vunpack.i.h.bf16 %v6054_v4  ;;  %v6055_v12 = vunpack.i.l.bf16 %v6054_v4 }
0x160e   : > { %v2374_v26 = vsel %vm1828_vm14, %v2370_v37, %v6061_v19 }
0x160f   : > { %v2385_v46 = vsel %vm8786_vm12, %v6056_v6, %v6050_v5  ;;  %v2428_v45 = vsel %vm8787_vm8, %v6050_v5, %v6055_v12  ;;  %v2429_v13 = vsel %vm8788_vm1, %v6051_v22, %v6055_v12  ;;  %v5373_v6 = vld [vmem:[%s8676_s2 + $0x40] sm:$0x1]  ;;  %vm5376_vm12 = vmpackc.low %vm5374_vm0, %vm5374_vm0  ;;  %vm8793_vm0 = vcmask 523264  }
0x1610   : > { %v2441_v16 = vpack.c.bf16 %v2386_v11, %v2385_v46  ;;  %v2449_v18 = vpack.c.bf16 %v2429_v13, %v2428_v45  ;;  %2454 = vperm.xlu2 %6117, %v5373_v6   ;;  %vm5379_vm8 = vmpackc.low %vm771_vm2, %vm771_vm2 }
0x1612   : > { %2464 = vmatpush.bf16.msrb.mxu1 %v2441_v16  ;;  %2477 = vmatpush.bf16.msrb.mxu2 %v2449_v18 }
0x1613   : > { %v6069_v38 = vpop.permute.xlu0 %6068  ;;  %v2346_v54 = vpop.permute.xlu2 %2345 }
0x1614   : > { %v6064_v20 = vpop.permute.xlu1 %6063  ;;  %v6071_v34 = vunpack.i.h.bf16 %v6069_v38  ;;  %v6070_v36 = vunpack.i.l.bf16 %v6069_v38 }
0x1615   : > { %v6066_v23 = vunpack.i.h.bf16 %v6064_v20  ;;  %v6065_v24 = vunpack.i.l.bf16 %v6064_v20 }
0x1616   : > { %v2362_v48 = vsel %vm1802_vm10, %v2358_v61, %v6071_v34 }
0x1617   : > { %v2373_v0 = vsel %vm1828_vm14, %v6066_v23, %v6060_v21  ;;  %v2422_v27 = vsel %vm1828_vm14, %v6060_v21, %v6065_v24  ;;  %v2423_v29 = vsel %vm1828_vm14, %v6061_v19, %v6065_v24 }
0x1618   : > { %v2440_v62 = vpack.c.bf16 %v2374_v26, %v2373_v0  ;;  %v2448_v33 = vpack.c.bf16 %v2423_v29, %v2422_v27 }
0x161a   : > { %2465 = vmatpush.bf16.msrb.mxu1 %v2440_v62  ;;  %2478 = vmatpush.bf16.msrb.mxu2 %v2448_v33 }
0x161b   : > { %v6079_v17 = vpop.permute.xlu0 %6078  ;;  %v2334_v11 = vpop.permute.xlu2 %2333 }
0x161c   : > { %v6074_v35 = vpop.permute.xlu1 %6073  ;;  %v6081_v59 = vunpack.i.h.bf16 %v6079_v17  ;;  %v6080_v63 = vunpack.i.l.bf16 %v6079_v17 }
0x161d   : > { %v6076_v39 = vunpack.i.h.bf16 %v6074_v35  ;;  %v6075_v40 = vunpack.i.l.bf16 %v6074_v35 }
0x161e   : > { %v2350_v7 = vsel %vm8790_vm9, %v2346_v54, %v6081_v59 }
0x161f   : > { %v2361_v42 = vsel %vm1802_vm10, %v6076_v39, %v6070_v36  ;;  %v2416_v47 = vsel %vm1802_vm10, %v6070_v36, %v6075_v40  ;;  %v2417_v14 = vsel %vm1802_vm10, %v6071_v34, %v6075_v40 }
0x1620   : > { %v2439_v49 = vpack.c.bf16 %v2362_v48, %v2361_v42  ;;  %v2447_v58 = vpack.c.bf16 %v2417_v14, %v2416_v47 }
0x1622   : > { %2466 = vmatpush.bf16.msrb.mxu1 %v2439_v49  ;;  %2479 = vmatpush.bf16.msrb.mxu2 %v2447_v58  ;;  %v5372_v58 = vld [vmem:[%s8675_s1 + $0x40] sm:$0x11] }
0x1623   : > { %v6089_v10 = vpop.permute.xlu0 %6088  ;;  %v2322_v62 = vpop.permute.xlu2 %2321 }
0x1624   : > { %v6084_v60 = vpop.permute.xlu1 %6083  ;;  %v6091_v12 = vunpack.i.h.bf16 %v6089_v10  ;;  %v6090_v45 = vunpack.i.l.bf16 %v6089_v10 }
0x1625   : > { %v6086_v1 = vunpack.i.h.bf16 %v6084_v60  ;;  %v6085_v25 = vunpack.i.l.bf16 %v6084_v60 }
0x1626   : > { %v2338_v19 = vsel %vm1245_vm15, %v2334_v11, %v6091_v12 }
0x1627   : > { %v2349_v3 = vsel %vm8789_vm13, %v6086_v1, %v6080_v63  ;;  %v2410_v31 = vsel %vm8791_vm4, %v6080_v63, %v6085_v25  ;;  %v2411_v4 = vsel %vm8792_vm7, %v6081_v59, %v6085_v25  ;;  %v2458_v25 = vunpack.c.l.b16 %v5372_v58 }
0x1628   : > { %v2438_v22 = vpack.c.bf16 %v2350_v7, %v2349_v3  ;;  %v2446_v5 = vpack.c.bf16 %v2411_v4, %v2410_v31  ;;  %v2459_v3 = vunpack.c.h.b16 %v5372_v58 }
0x1629   : > { %v2460_v7 = vpack.c.b16 %v2458_v25, %v2458_v25 }
0x162a   : > { %2467 = vmatpush.bf16.msrb.mxu1 %v2438_v22  ;;  %2480 = vmatpush.bf16.msrb.mxu2 %v2446_v5  ;;  %v2461_v31 = vpack.c.b16 %v2459_v3, %v2459_v3 }
0x162b   : > { %v6099_v37 = vpop.permute.xlu0 %6098 }
0x162c   : > { %v6094_v46 = vpop.permute.xlu1 %6093  ;;  %v6101_v24 = vunpack.i.h.bf16 %v6099_v37  ;;  %v6100_v27 = vunpack.i.l.bf16 %v6099_v37 }
0x162d   : > { %v6096_v13 = vunpack.i.h.bf16 %v6094_v46  ;;  %v6095_v16 = vunpack.i.l.bf16 %v6094_v46 }
0x162e   : > { %v2326_v34 = vsel %vm1217_vm6, %v2322_v62, %v6101_v24 }
0x162f   : > { %v2337_v18 = vsel %vm1245_vm15, %v6096_v13, %v6090_v45  ;;  %v2404_v38 = vsel %vm1245_vm15, %v6090_v45, %v6095_v16  ;;  %v2405_v20 = vsel %vm1245_vm15, %v6091_v12, %v6095_v16 }
0x1630   : > { %v2437_v21 = vpack.c.bf16 %v2338_v19, %v2337_v18  ;;  %v2445_v23 = vpack.c.bf16 %v2405_v20, %v2404_v38  ;;  %v2502_v38 = vstv %s5383_s28  ;;  %s5392_s28 = sld [smem:[#allocation2 + $0x20b]] }
0x1632   : > { %2468 = vmatpush.bf16.msrb.mxu1 %v2437_v21  ;;  %2481 = vmatpush.bf16.msrb.mxu2 %v2445_v23 }
0x1633   : > { %v6109_v0 = vpop.permute.xlu0 %6108 }
0x1634   : > { %v6104_v26 = vpop.permute.xlu1 %6103  ;;  %v6111_v48 = vunpack.i.h.bf16 %v6109_v0  ;;  %v6110_v47 = vunpack.i.l.bf16 %v6109_v0 }
0x1635   : > { %v6106_v29 = vunpack.i.h.bf16 %v6104_v26  ;;  %v6105_v61 = vunpack.i.l.bf16 %v6104_v26 }
0x1637   : > { %v2325_v33 = vsel %vm1217_vm6, %v6106_v29, %v6100_v27  ;;  %v2398_v17 = vsel %vm1217_vm6, %v6100_v27, %v6105_v61  ;;  %v2399_v35 = vsel %vm1217_vm6, %v6101_v24, %v6105_v61 }
0x1638   : > { %v2436_v36 = vpack.c.bf16 %v2326_v34, %v2325_v33  ;;  %v2444_v39 = vpack.c.bf16 %v2399_v35, %v2398_v17 }
0x163a   : > { %2469 = vmatpush.bf16.msrb.mxu1 %v2436_v36  ;;  %2482 = vmatpush.bf16.msrb.mxu2 %v2444_v39 }
0x163b   : > { %v2310_v40 = vpop.permute.xlu0 %2309 }
0x163c   : > { %v6114_v42 = vpop.permute.xlu1 %6113  ;;  %v2314_v54 = vsel %vm771_vm2, %v2310_v40, %v6111_v48  ;;  %v2557_v40 = vstv %s7728_s27  ;;  %s5388_s27 = sld [smem:[#allocation2 + $0x207]] }
0x163d   : > { %v6116_v14 = vunpack.i.h.bf16 %v6114_v42  ;;  %v6115_v49 = vunpack.i.l.bf16 %v6114_v42 }
0x163f   : > { %v2313_v59 = vsel %vm771_vm2, %v6116_v14, %v6110_v47  ;;  %v2392_v10 = vsel %vm771_vm2, %v6110_v47, %v6115_v49  ;;  %v2393_v60 = vsel %vm771_vm2, %v6111_v48, %v6115_v49  ;;  %v2580_v14 = vstv %s5396_s10  ;;  %s5394_s10 = sld [smem:[#allocation2 + $0x20d]] }
0x1640   : > { %v2435_v63 = vpack.c.bf16 %v2314_v54, %v2313_v59  ;;  %v2443_v1 = vpack.c.bf16 %v2393_v60, %v2392_v10 }
0x1642   : > { %2470 = vmatpush.bf16.msrb.mxu1 %v2435_v63  ;;  %2483 = vmatpush.bf16.msrb.mxu2 %v2443_v1  ;;  %v2565_v63 = vstv %s5392_s28  ;;  %s5395_s28 = sld [smem:[#allocation2 + $0x20e]] }
0x1646   : > { %5378 = vmatpush.bf16.msk.msrb.mxu1 %vm5376_vm12, %v7660_v57  ;;  %5381 = vmatpush.bf16.msk.msrb.mxu2 %vm5379_vm8, %v7660_v57  ;;  %v2499_v57 = vstv %s5382_s7  ;;  %s5398_s7 = sld [smem:[#allocation2 + $0x211]]  ;;  %vm8794_vm12 = vmmov %vm8793_vm0 }
0x1649   : > { %2472 = vmatmul.bf16.vlgmr.msrb.gmra.mxu1 %v2460_v7  ;;  %2485 = vmatmul.bf16.vlgmr.msrb.gmra.mxu2 %v2461_v31  ;;  %v2549_v7 = vstv %s5388_s27  ;;  %s5397_s27 = sld [smem:[#allocation2 + $0x210]] }
0x164c   : > { %v2588_v60 = vstv %s5398_s7  ;;  %s5391_s7 = sld [smem:[#allocation2 + $0x20a]] }
0x166a   : > { %v2455_v22 = vpop.permute.xlu2 %2454 }
0x16c6   : > { %v2473_v4 = vpop.f32.mrf.mxu1 }
0x16c7   : > { %v2474_v5 = vadd.f32 %v2473_v4, %v2455_v22 }
0x16cc   : > { %v2486_v6 = vpop.f32.mrf.mxu2 }
0x16cd   : > { %v2487_v12 = vadd.f32 %v2486_v6, %v2474_v5  ;;  %v2572_v6 = vstv %s5394_s10  ;;  %s5386_s10 = sld [smem:[#allocation2 + $0x205]] }
0x16ce   : > { %v2475_v37 = vpop.f32.mrf.mxu1 }
0x16cf   : > { %vm2490_vm1 = vcmp.gt.f32.partialorder %v2487_v12, 0.0  ;;  %v2491_v11 = vmul.f32 0.01, %v2487_v12 }
0x16d1   : > { %v2492_v46 = vsel %vm2490_vm1, %v2487_v12, %v2491_v11 }
0x16d2   : > { %v2493_v45 = vmul.f32 %v7641_v43, %v2492_v46 }
0x16d4   : > { %v2488_v13 = vpop.f32.mrf.mxu2  ;;  %v2494_v16 = vsel %vm358_vm5, %v2493_v45, 0.0 }
0x16d5   : > { %2495 = vadd.xlane.f32.xlu1 %v2494_v16 }
0x1748   : > { %v2496_v18 = vpop.xlane.xlu1 %2495 }
0x1749   : > { %v2497_v19 = vmul.f32 0.125, %v2496_v18 }
0x174b   : > { %v2500_v20 = vmul.f32 %v2499_v57, %v2497_v19 }
0x174d   : > { %v2503_v21 = vadd.f32 %v2502_v38, %v2500_v20  ;;  %v2576_v38 = vstv %s5395_s28  ;;  %v2584_v20 = vstv %s5397_s27  ;;  %s5389_s28 = sld [smem:[#allocation2 + $0x208]] }
0x174e   : > { %s5393_s27 = sld [smem:[#allocation2 + $0x20c]] }
0x174f   : > { %v5384_v23 = vmul.f32 -1.442695, %v2503_v21 }
0x1751   : > { %6662 = vpow2.f32 %v5384_v23 }
0x1757   : > { %v6663_v24 = vpop.eup %6662 }
0x1758   : > { %v2507_v0 = vadd.f32 1.0, %v6663_v24 }
0x175a   : > { %6664 = vrcp.f32 %v2507_v0  ;;  %v2519_v61 = vand.u32 2147483648, %v2507_v0  ;;  %v2517_v33 = vand.u32 2147483647, %v2507_v0  ;;  %vm2513_vm9 = vweird.f32 %v2507_v0 }
0x175c   : > { %v2520_v17 = vor.u32 1.1754944e-38, %v2519_v61  ;;  %vm2518_vm7 = vcmp.eq.f32.partialorder %v2517_v33, 8.507059e+37 }
0x1760   : > { %v6665_v26 = vpop.eup %6664 }
0x1761   : > { %v2509_v27 = vmul.f32 %v6665_v26, %v2507_v0  ;;  %vm2514_vm13 = vweird.f32 %v6665_v26 }
0x1762   : > { %vm2515_vm4 = vmor %vm2513_vm9, %vm2514_vm13 }
0x1763   : > { %v2510_v29 = vsub.f32 1.0, %v2509_v27 }
0x1765   : > { %v2511_v62 = vmul.f32 %v6665_v26, %v2510_v29 }
0x1767   : > { %v2512_v34 = vadd.f32 %v6665_v26, %v2511_v62 }
0x1769   : > { %v2516_v35 = vsel %vm2515_vm4, %v6665_v26, %v2512_v34  ;;  %v2541_v34 = vstv %s5386_s10  ;;  %s5385_s10 = sld [smem:[#allocation2 + $0x204]] }
0x176a   : > { %v2521_v36 = vsel %vm2518_vm7, %v2520_v17, %v2516_v35  ;;  %vm8795_vm7 = vcmask 1041408  }
0x176b   : > { %v7722_v39 = vmul.f32 %v2521_v36, %v2492_v46  ;;  %v2561_v46 = vstv %s5391_s7  ;;  %s5387_s7 = sld [smem:[#allocation2 + $0x206]] }
0x176d   : > { %2526 = vrot.lane.b32.xlu2 %v7722_v39, %s6854_s29  ;;  %2532 = vrot.lane.b32.xlu0 %v7722_v39, %s6854_s29 }
0x17c7   : > { %v2527_v42 = vpop.permute.xlu2 %2526 }
0x17c8   : > { %v7732_v48 = vsel %vm1802_vm10, %v2527_v42, 0.0  ;;  %v7751_v3 = vsel %vm1802_vm10, 0.0, %v2527_v42 }
0x17c9   : > { %v2559_v47 = vmul.f32 %v2557_v40, %v7732_v48  ;;  %v2550_v31 = vmul.f32 %v2549_v7, %v7751_v3  ;;  %v2558_v22 = vmul.f32 %v2557_v40, %v7751_v3  ;;  %v2551_v5 = vmul.f32 %v2549_v7, %v7732_v48 }
0x17ca   : > { %v2562_v13 = vmul.f32 %v2561_v46, %v7751_v3  ;;  %v2563_v16 = vmul.f32 %v2561_v46, %v7732_v48  ;;  %v2542_v36 = vmul.f32 %v2541_v34, %v7751_v3  ;;  %v2543_v40 = vmul.f32 %v2541_v34, %v7732_v48 }
0x17cb   : > { %2615 = vrot.lane.b32.xlu1 %v2559_v47, %s6827_s30  ;;  %v2545_v47 = vstv %s5387_s7  ;;  %v2553_v7 = vstv %s5389_s28  ;;  %s5399_s7 = sld [smem:[#allocation2 + $0x212]] }
0x17cc   : > { %s5410_s28 = sld [smem:[#allocation2 + $0x280]] }
0x17df   : > { %v2533_v49 = vpop.permute.xlu0 %2532 }
0x17e0   : > { %v7737_v58 = vsel %vm1802_vm10, 0.0, %v2533_v49  ;;  %v7740_v54 = vsel %vm1802_vm10, %v2533_v49, 0.0 }
0x17e1   : > { %v2582_v59 = vmul.f32 %v2580_v14, %v7740_v54  ;;  %v2581_v10 = vmul.f32 %v2580_v14, %v7737_v58  ;;  %v2589_v1 = vmul.f32 %v2588_v60, %v7737_v58  ;;  %v2566_v25 = vmul.f32 %v2565_v63, %v7737_v58 }
0x17e2   : > { %v2590_v4 = vmul.f32 %v2588_v60, %v7740_v54  ;;  %v2574_v12 = vmul.f32 %v2572_v6, %v7740_v54  ;;  %v2573_v37 = vmul.f32 %v2572_v6, %v7737_v58  ;;  %v2578_v23 = vmul.f32 %v2576_v38, %v7740_v54 }
0x17e3   : > { %2643 = vrot.lane.b32.xlu2 %v2582_v59, %s6827_s30  ;;  %2641 = vrot.lane.b32.xlu0 %v2581_v10, %s6827_s30  ;;  %v2577_v24 = vmul.f32 %v2576_v38, %v7737_v58  ;;  %v2585_v26 = vmul.f32 %v2584_v20, %v7737_v58  ;;  %v2586_v17 = vmul.f32 %v2584_v20, %v7740_v54 }
0x17e4   : > { %v2546_v59 = vmul.f32 %v2545_v47, %v7751_v3  ;;  %v2547_v10 = vmul.f32 %v2545_v47, %v7732_v48 }
0x17eb   : > { %2652 = vrot.lane.b32.xlu2 %v2589_v1, %s6827_s30  ;;  %2623 = vrot.lane.b32.xlu0 %v2566_v25, %s6845_s5 }
0x17f3   : > { %2602 = vrot.lane.b32.xlu2 %v2550_v31, %s6827_s30  ;;  %2654 = vrot.lane.b32.xlu0 %v2590_v4, %s6827_s30  ;;  %v2555_v4 = vmul.f32 %v2553_v7, %v7732_v48 }
0x17fb   : > { %2613 = vrot.lane.b32.xlu2 %v2558_v22, %s6827_s30  ;;  %2604 = vrot.lane.b32.xlu0 %v2551_v5, %s6827_s30 }
0x1803   : > { %2632 = vrot.lane.b32.xlu2 %v2574_v12, %s6827_s30  ;;  %2630 = vrot.lane.b32.xlu0 %v2573_v37, %s6827_s30 }
0x183d   : > { %v2644_v45 = vpop.permute.xlu2 %2643  ;;  %v2616_v31 = vpop.permute.xlu1 %2615 }
0x183e   : > { %v2649_v29 = vadd.f32 %v2644_v45, %v2578_v23  ;;  %v2621_v22 = vadd.f32 %v2616_v31, %v2555_v4 }
0x1845   : > { %v2653_v0 = vpop.permute.xlu2 %2652 }
0x184d   : > { %v2603_v14 = vpop.permute.xlu2 %2602 }
0x1855   : > { %v2642_v11 = vpop.permute.xlu0 %2641  ;;  %v2614_v1 = vpop.permute.xlu2 %2613 }
0x1856   : > { %v2645_v21 = vsel %vm771_vm2, %v2642_v11, %v2644_v45  ;;  %v2617_v37 = vsel %vm771_vm2, %v2614_v1, %v2616_v31  ;;  %v2554_v11 = vmul.f32 %v2553_v7, %v7751_v3 }
0x1857   : > { %v2648_v61 = vadd.f32 %v2645_v21, %v2577_v24 }
0x1858   : > { %v2620_v46 = vadd.f32 %v2617_v37, %v2554_v11 }
0x185d   : > { %v2624_v57 = vpop.permute.xlu0 %2623  ;;  %v2633_v25 = vpop.permute.xlu2 %2632 }
0x185e   : > { %v2626_v18 = vadd.f32 %v2624_v57, %v2562_v13  ;;  %v2627_v19 = vadd.f32 %v2624_v57, %v2563_v16  ;;  %v2568_v57 = vstv %s5393_s27  ;;  %s5411_s27 = sld [smem:[#allocation2 + $0x281]] }
0x185f   : > { %v2569_v38 = vmul.f32 %v2568_v57, %v7737_v58 }
0x1860   : > { %2674 = vrot.lane.b32.xlu2 %v2627_v19, %s6845_s5  ;;  %2672 = vrot.lane.b32.xlu0 %v2626_v18, %s6845_s5  ;;  %v2570_v18 = vmul.f32 %v2568_v57, %v7740_v54 }
0x1862   : > { %v2638_v21 = vadd.f32 %v2633_v25, %v2570_v18 }
0x1865   : > { %v2655_v27 = vpop.permute.xlu0 %2654 }
0x1866   : > { %v2656_v62 = vsel %vm771_vm2, %v2653_v0, %v2655_v27  ;;  %v2660_v35 = vadd.f32 %v2655_v27, %v2586_v17  ;;  %v2538_v17 = vstv %s5385_s10  ;;  %s5412_s10 = sld [smem:[#allocation2 + $0x282]] }
0x1867   : > { %v2659_v33 = vadd.f32 %v2656_v62, %v2585_v26 }
0x1868   : > { %2685 = vrot.lane.b32.xlu2 %v2649_v29, %s6845_s5  ;;  %2683 = vrot.lane.b32.xlu0 %v2648_v61, %s6845_s5 }
0x1869   : > { %2703 = vrot.lane.b32.xlu1 %v2659_v33, %s6855_s11 }
0x186d   : > { %v2605_v42 = vpop.permute.xlu0 %2604 }
0x186e   : > { %v2606_v49 = vsel %vm771_vm2, %v2603_v14, %v2605_v42  ;;  %v2610_v63 = vadd.f32 %v2605_v42, %v2547_v10  ;;  %v2539_v42 = vmul.f32 %v2538_v17, %v7751_v3 }
0x186f   : > { %v2609_v60 = vadd.f32 %v2606_v49, %v2546_v59 }
0x1870   : > { %2593 = vrot.lane.b32.xlu2 %v2542_v36, %s6827_s30  ;;  %2705 = vrot.lane.b32.xlu0 %v2660_v35, %s6855_s11 }
0x1871   : > { %2595 = vrot.lane.b32.xlu1 %v2543_v40, %s6827_s30 }
0x1875   : > { %v2631_v12 = vpop.permute.xlu0 %2630 }
0x1876   : > { %v2634_v19 = vsel %vm771_vm2, %v2631_v12, %v2633_v25  ;;  %v2722_v25 = vstv %s5399_s7  ;;  %s5413_s7 = sld [smem:[#allocation2 + $0x283]] }
0x1877   : > { %v2637_v24 = vadd.f32 %v2634_v19, %v2569_v38  ;;  %v224_v19 = vand.u32 31, %v7098_v44 }
0x1878   : > { %2665 = vrot.lane.b32.xlu2 %v2610_v63, %s6845_s5  ;;  %2663 = vrot.lane.b32.xlu0 %v2609_v60, %s6845_s5 }
0x1879   : > { %vm225_vm4 = vcmp.eq.s32.totalorder %v224_v19, 0 }
0x18ba   : > { %v2675_v5 = vpop.permute.xlu2 %2674 }
0x18bb   : > { %v2680_v6 = vadd.f32 %v2675_v5, %v2621_v22 }
0x18bd   : > { %2696 = vrot.lane.b32.xlu0 %v2680_v6, %s6855_s11 }
0x18c2   : > { %v2686_v20 = vpop.permute.xlu2 %2685 }
0x18c3   : > { %v2691_v0 = vadd.f32 %v2686_v20, %v2638_v21 }
0x18ca   : > { %v2594_v54 = vpop.permute.xlu2 %2593 }
0x18d2   : > { %v2673_v45 = vpop.permute.xlu0 %2672  ;;  %v2666_v35 = vpop.permute.xlu2 %2665 }
0x18d3   : > { %v2676_v13 = vsel %vm1217_vm6, %v2673_v45, %v2675_v5 }
0x18d4   : > { %v2679_v16 = vadd.f32 %v2676_v13, %v2620_v46 }
0x18d6   : > { %2694 = vrot.lane.b32.xlu1 %v2679_v16, %s6855_s11 }
0x18da   : > { %v2684_v48 = vpop.permute.xlu0 %2683 }
0x18db   : > { %v2687_v23 = vsel %vm1217_vm6, %v2684_v48, %v2686_v20  ;;  %v2704_v27 = vpop.permute.xlu1 %2703  ;;  %v5253_v20 = vsel %vm225_vm4, 1.0, %v6825_v50 }
0x18dc   : > { %v2690_v26 = vadd.f32 %v2687_v23, %v2637_v24 }
0x18e2   : > { %v2706_v29 = vpop.permute.xlu0 %2705 }
0x18e3   : > { %v2707_v61 = vsel %vm8793_vm0, %v2704_v27, %v2706_v29  ;;  %v2711_v62 = vadd.f32 %v2706_v29, %v2691_v0  ;;  %v2596_v58 = vpop.permute.xlu1 %2595  ;;  %v2768_v0 = vrot.slane %v6825_v50, 5  ;;  %v2752_v27 = vrot.slane %v6825_v50, 7  ;;  %vm8796_vm0 = vmmov %vm8795_vm7 }
0x18e4   : > { %v2710_v33 = vadd.f32 %v2707_v61, %v2690_v26  ;;  %v2597_v40 = vsel %vm771_vm2, %v2594_v54, %v2596_v58  ;;  %v2760_v26 = vrot.slane %v6825_v50, 6  ;;  %v2792_v54 = vrot.slane %v6825_v50, 2 }
0x18e5   : > { %2716 = vrot.lane.b32.xlu1 %v2711_v62, %s6827_s30  ;;  %v2599_v14 = vadd.f32 %v2597_v40, %v2539_v42 }
0x18e6   : > { %2714 = vrot.lane.b32.xlu2 %v2710_v33, %s6827_s30 }
0x18ea   : > { %v2664_v34 = vpop.permute.xlu0 %2663 }
0x18eb   : > { %v2667_v47 = vsel %vm1217_vm6, %v2664_v34, %v2666_v35  ;;  %v2784_v34 = vrot.slane %v6825_v50, 3  ;;  %v2776_v35 = vrot.slane %v6825_v50, 4 }
0x18ec   : > { %v2669_v10 = vadd.f32 %v2667_v47, %v2599_v14  ;;  %v2800_v14 = vrot.slane %v6825_v50, 1 }
0x192f   : > { %v2697_v49 = vpop.permute.xlu0 %2696 }
0x1940   : > { %v2715_v60 = vpop.permute.xlu2 %2714 }
0x1948   : > { %v2695_v36 = vpop.permute.xlu1 %2694 }
0x1949   : > { %v2698_v59 = vsel %vm8794_vm12, %v2695_v36, %v2697_v49  ;;  %vm8797_vm12 = vcmask 1042432  }
0x194a   : > { %v2700_v63 = vadd.f32 %v2698_v59, %v2669_v10  ;;  %v5404_v59 = vld [vmem:[%s8676_s2 + $0x58] sm:$0xff]  ;;  %v5403_v10 = vld [vmem:[%s8676_s2 + $0x50] sm:$0xff] }
0x1957   : > { %v2717_v1 = vpop.permute.xlu1 %2716 }
0x1958   : > { %v2718_v7 = vsel %vm771_vm2, %v2715_v60, %v2717_v1 }
0x1959   : > { %v2720_v31 = vadd.f32 %v2718_v7, %v2700_v63 }
0x195b   : > { %v2723_v4 = vadd.f32 %v2722_v25, %v2720_v31 }
0x195d   : > { %v5400_v22 = vmul.f32 -1.442695, %v2723_v4 }
0x195f   : > { %6666 = vpow2.f32 %v5400_v22 }
0x1965   : > { %v6667_v5 = vpop.eup %6666 }
0x1966   : > { %v2727_v6 = vadd.f32 1.0, %v6667_v5 }
0x1968   : > { %6668 = vrcp.f32 %v2727_v6  ;;  %v2739_v11 = vand.u32 2147483648, %v2727_v6  ;;  %v2737_v45 = vand.u32 2147483647, %v2727_v6  ;;  %vm2733_vm1 = vweird.f32 %v2727_v6 }
0x196a   : > { %v2740_v16 = vor.u32 1.1754944e-38, %v2739_v11  ;;  %vm2738_vm9 = vcmp.eq.f32.partialorder %v2737_v45, 8.507059e+37 }
0x196e   : > { %v6669_v3 = vpop.eup %6668 }
0x196f   : > { %v2729_v12 = vmul.f32 %v6669_v3, %v2727_v6  ;;  %vm2734_vm8 = vweird.f32 %v6669_v3 }
0x1970   : > { %vm2735_vm13 = vmor %vm2733_vm1, %vm2734_vm8  ;;  %vm8799_vm1 = vcmask 523264  }
0x1971   : > { %v2730_v37 = vsub.f32 1.0, %v2729_v12  ;;  %vm8798_vm8 = vmmov %vm8797_vm12 }
0x1973   : > { %v2731_v46 = vmul.f32 %v6669_v3, %v2730_v37 }
0x1975   : > { %v2732_v13 = vadd.f32 %v6669_v3, %v2731_v46 }
0x1977   : > { %v2736_v57 = vsel %vm2735_vm13, %v6669_v3, %v2732_v13  ;;  %vm8800_vm13 = vmmov %vm8799_vm1 }
0x1978   : > { %v2741_v48 = vsel %vm2738_vm9, %v2740_v16, %v2736_v57  ;;  %vm8801_vm9 = vcmask 1043456  }
0x1979   : > { %v2743_v18 = vmul.f32 %v2741_v48, %v7722_v39  ;;  %vm8802_vm4 = vmmov %vm8801_vm9 }
0x197b   : > { %2745 = vrot.lane.b32.xlu0 %v2743_v18, %s6827_s30 }
0x19ed   : > { %v2746_v38 = vpop.permute.xlu0 %2745 }
0x19ee   : > { %v2748_v21 = vsel %vm771_vm2, %v2746_v38, 0.0 }
0x19ef   : > { %v2749_v23 = vmax.f32 %v2743_v18, %v2748_v21 }
0x19f1   : > { %v2750_v24 = vmul.f32 %v5253_v20, %v2749_v23 }
0x19f3   : > { %v2769_v29 = vrot.slane %v2750_v24, 5  ;;  %v2761_v39 = vrot.slane %v2750_v24, 6  ;;  %v2753_v61 = vrot.slane %v2750_v24, 7  ;;  %v2793_v58 = vrot.slane %v2750_v24, 2 }
0x19f4   : > { %v2785_v17 = vrot.slane %v2750_v24, 3  ;;  %v2777_v36 = vrot.slane %v2750_v24, 4  ;;  %v2801_v49 = vrot.slane %v2750_v24, 1 }
0x19f5   : > { %v6128_v62 = vpack.i.bf16 %v2769_v29, %v2768_v0  ;;  %v6123_v33 = vpack.i.bf16 %v2761_v39, %v2760_v26  ;;  %v6118_v44 = vpack.i.bf16 %v2753_v61, %v2752_v27  ;;  %v6143_v40 = vpack.i.bf16 %v2793_v58, %v2792_v54 }
0x19f6   : > { %v6138_v42 = vpack.i.bf16 %v2785_v17, %v2784_v34  ;;  %v6133_v47 = vpack.i.bf16 %v2777_v36, %v2776_v35  ;;  %v6148_v60 = vpack.i.bf16 %v2801_v49, %v2800_v14 }
0x19f7   : > { %6129 = vrot.lane.b32.xlu0 %v6128_v62, %s6838_s6  ;;  %6124 = vrot.lane.b32.xlu1 %v6123_v33, %s6845_s5 }
0x19f8   : > { %6119 = vrot.lane.b32.xlu2 %v6118_v44, %s6827_s30 }
0x19ff   : > { %6144 = vrot.lane.b32.xlu0 %v6143_v40, %s6852_s23  ;;  %6139 = vrot.lane.b32.xlu1 %v6138_v42, %s6854_s29 }
0x1a00   : > { %6134 = vrot.lane.b32.xlu2 %v6133_v47, %s6855_s11 }
0x1a07   : > { %2850 = vperm.xlu0 %5736, %v5404_v59   ;;  %2845 = vperm.xlu1 %5735, %v5403_v10   ;;  %v5407_v59 = vld [vmem:[%s8675_s1 + $0x50] sm:$0xf]  ;;  %v5553_v10 = vld [vmem:[%s8675_s1 + $0x54] sm:$0xf0] }
0x1a08   : > { %6149 = vrot.lane.b32.xlu2 %v6148_v60, %s6851_s9 }
0x1a52   : > { %v6120_v63 = vpop.permute.xlu2 %6119 }
0x1a53   : > { %v6122_v1 = vunpack.i.h.bf16 %v6120_v63  ;;  %v6121_v25 = vunpack.i.l.bf16 %v6120_v63 }
0x1a55   : > { %v2758_v50 = vsel %vm771_vm2, %v6121_v25, %v6122_v1  ;;  %v2808_v31 = vsel %vm771_vm2, %v6122_v1, %v6121_v25  ;;  %v5408_v25 = vor.u32 %v5553_v10, %v5407_v59 }
0x1a56   : > { %v2822_v37 = vsel %vm358_vm5, 0.0, %v2758_v50  ;;  %v2829_v11 = vsel %vm358_vm5, %v2750_v24, %v2808_v31 }
0x1a5a   : > { %v6135_v7 = vpop.permute.xlu2 %6134 }
0x1a5b   : > { %v6137_v46 = vunpack.i.h.bf16 %v6135_v7  ;;  %v6136_v45 = vunpack.i.l.bf16 %v6135_v7 }
0x1a5d   : > { %v2782_v23 = vsel %vm8799_vm1, %v6136_v45, %v6137_v46  ;;  %v2814_v24 = vsel %vm8800_vm13, %v6137_v46, %v6136_v45  ;;  %vm8807_vm1 = vcmask 1045504  }
0x1a5e   : > { %vm8808_vm13 = vmmov %vm8807_vm1 }
0x1a62   : > { %v6150_v38 = vpop.permute.xlu2 %6149 }
0x1a63   : > { %v6152_v0 = vunpack.i.h.bf16 %v6150_v38  ;;  %v6151_v26 = vunpack.i.l.bf16 %v6150_v38 }
0x1a69   : > { %v6130_v4 = vpop.permute.xlu0 %6129  ;;  %v6125_v22 = vpop.permute.xlu1 %6124 }
0x1a6a   : > { %v6132_v5 = vunpack.i.h.bf16 %v6130_v4  ;;  %v6131_v6 = vunpack.i.l.bf16 %v6130_v4  ;;  %v6127_v3 = vunpack.i.h.bf16 %v6125_v22  ;;  %v6126_v12 = vunpack.i.l.bf16 %v6125_v22 }
0x1a6c   : > { %v2766_v13 = vsel %vm1217_vm6, %v6126_v12, %v6127_v3  ;;  %v2810_v16 = vsel %vm1217_vm6, %v6127_v3, %v6126_v12  ;;  %v2774_v57 = vsel %vm1245_vm15, %v6131_v6, %v6132_v5  ;;  %v2812_v48 = vsel %vm1245_vm15, %v6132_v5, %v6131_v6 }
0x1a6d   : > { %v2823_v18 = vsel %vm8795_vm7, %v2822_v37, %v2766_v13  ;;  %v2830_v19 = vsel %vm8796_vm0, %v2829_v11, %v2810_v16  ;;  %vm8803_vm7 = vcmask 1044480  }
0x1a6e   : > { %v2824_v20 = vsel %vm8797_vm12, %v2823_v18, %v2774_v57  ;;  %v2831_v21 = vsel %vm8798_vm8, %v2830_v19, %v2812_v48  ;;  %vm8804_vm0 = vmmov %vm8803_vm7  ;;  %vm8805_vm12 = vcmask 130048   ;;  %v2904_v57 = vstv %s5410_s28  ;;  %s5427_s28 = sld [smem:[#allocation2 + $0x28f]] }
0x1a6f   : > { %v2825_v44 = vsel %vm8801_vm9, %v2824_v20, %v2782_v23  ;;  %v2832_v54 = vsel %vm8802_vm4, %v2831_v21, %v2814_v24  ;;  %v2806_v42 = vsel %vm8805_vm12, %v6151_v26, %v6152_v0  ;;  %vm8806_vm8 = vmmov %vm8805_vm12  ;;  %vm8809_vm9 = vcmask 1046528  }
0x1a70   : > { %v2820_v47 = vsel %vm8806_vm8, %v6152_v0, %v6151_v26  ;;  %vm8810_vm4 = vmmov %vm8809_vm9  ;;  %v2908_v19 = vstv %s5411_s27  ;;  %v2914_v23 = vstv %s5412_s10  ;;  %s5429_s27 = sld [smem:[#allocation2 + $0x291]] }
0x1a71   : > { %v6145_v27 = vpop.permute.xlu0 %6144  ;;  %v6140_v29 = vpop.permute.xlu1 %6139  ;;  %s7891_s10 = sld [smem:[#allocation2 + $0x28d]] }
0x1a72   : > { %v6147_v39 = vunpack.i.h.bf16 %v6145_v27  ;;  %v6146_v61 = vunpack.i.l.bf16 %v6145_v27  ;;  %v6142_v62 = vunpack.i.h.bf16 %v6140_v29  ;;  %v6141_v33 = vunpack.i.l.bf16 %v6140_v29 }
0x1a74   : > { %v2798_v58 = vsel %vm1828_vm14, %v6146_v61, %v6147_v39  ;;  %v2818_v34 = vsel %vm1828_vm14, %v6147_v39, %v6146_v61  ;;  %v2790_v17 = vsel %vm1802_vm10, %v6141_v33, %v6142_v62  ;;  %v2816_v35 = vsel %vm1802_vm10, %v6142_v62, %v6141_v33 }
0x1a75   : > { %v2826_v36 = vsel %vm8803_vm7, %v2825_v44, %v2790_v17  ;;  %v2833_v40 = vsel %vm8804_vm0, %v2832_v54, %v2816_v35  ;;  %vm8811_vm7 = vmmov %vm8806_vm8  ;;  %v2920_v54 = vstv %s5413_s7  ;;  %s7893_s7 = sld [smem:[#allocation2 + $0x287]] }
0x1a76   : > { %v2827_v14 = vsel %vm8807_vm1, %v2826_v36, %v2798_v58  ;;  %v2834_v49 = vsel %vm8808_vm13, %v2833_v40, %v2818_v34  ;;  %vm8812_vm8 = vmmov %vm8810_vm4 }
0x1a77   : > { %v2828_v60 = vsel %vm8809_vm9, %v2827_v14, %v2806_v42  ;;  %v2835_v63 = vsel %vm8810_vm4, %v2834_v49, %v2820_v47  ;;  %vm8813_vm1 = vmmov %vm8810_vm4 }
0x1a78   : > { %v2839_v1 = vpack.c.bf16 %v2835_v63, %v2828_v60 }
0x1a79   : > { %v2846_v7 = vpop.permute.xlu1 %2845  ;;  %v2851_v6 = vpop.permute.xlu0 %2850 }
0x1a7a   : > { %2868 = vmatpush.bf16.msra.mxu3 %v2839_v1 }
0x1a7d   : > { %5409 = vmatmul.msk.bf16.vlgmr.msra.gmra.mxu3 %vm8811_vm7, %v5408_v25 }
0x1b00   : > { %v2870_v50 = vpop.f32.mrf.mxu3 }
0x1b01   : > { %v2871_v31 = vadd.f32 %v2870_v50, %v2846_v7 }
0x1b03   : > { %vm2875_vm0 = vcmp.gt.f32.partialorder %v2871_v31, 0.0  ;;  %v2877_v4 = vmul.f32 0.01, %v2871_v31 }
0x1b05   : > { %v7866_v22 = vsel %vm2875_vm0, %v2871_v31, %v2877_v4 }
0x1b06   : > { %v2881_v5 = vmul.f32 %v7641_v43, %v7866_v22 }
0x1b08   : > { %v2872_v3 = vpop.f32.mrf.mxu3  ;;  %2883 = vadd.xlane.f32.xlu2 %v2881_v5 }
0x1b09   : > { %v2873_v12 = vadd.f32 %v2872_v3, %v2851_v6 }
0x1b0b   : > { %vm2876_vm12 = vcmp.gt.f32.partialorder %v2873_v12, 0.0  ;;  %v2878_v37 = vmul.f32 0.01, %v2873_v12 }
0x1b0d   : > { %v7870_v11 = vsel %vm2876_vm12, %v2873_v12, %v2878_v37 }
0x1b0e   : > { %v2882_v46 = vmul.f32 %v7641_v43, %v7870_v11 }
0x1b10   : > { %2885 = vadd.xlane.f32.xlu1 %v2882_v46 }
0x1b7b   : > { %v2884_v45 = vpop.xlane.xlu2 %2883 }
0x1b7c   : > { %v2887_v13 = vmul.f32 0.125, %v2884_v45 }
0x1b7e   : > { %v2891_v16 = vrot.slane %v2887_v13, 7  ;;  %v2897_v21 = vrot.slane %v2887_v13, 1  ;;  %v2909_v26 = vmul.f32 %v2908_v19, %v2887_v13 }
0x1b80   : > { %v2896_v48 = vsel %vm358_vm5, 0.0, %v2891_v16 }
0x1b81   : > { %v2905_v20 = vmul.f32 %v2904_v57, %v2896_v48 }
0x1b83   : > { %v2886_v18 = vpop.xlane.xlu1 %2885  ;;  %v2911_v61 = vadd.f32 %v2909_v26, %v2905_v20 }
0x1b84   : > { %v2888_v38 = vmul.f32 0.125, %v2886_v18 }
0x1b86   : > { %v2892_v24 = vrot.slane %v2888_v38, 7  ;;  %v2898_v0 = vrot.slane %v2888_v38, 1  ;;  %v2910_v33 = vmul.f32 %v2908_v19, %v2888_v38 }
0x1b88   : > { %v2893_v27 = vsel %vm358_vm5, %v2891_v16, %v2892_v24  ;;  %v2899_v29 = vsel %vm8812_vm8, %v2897_v21, %v2898_v0  ;;  %v2902_v39 = vsel %vm8813_vm1, %v2898_v0, 0.0 }
0x1b89   : > { %v2906_v62 = vmul.f32 %v2904_v57, %v2893_v27  ;;  %v2915_v44 = vmul.f32 %v2914_v23, %v2899_v29  ;;  %v2916_v34 = vmul.f32 %v2914_v23, %v2902_v39 }
0x1b8b   : > { %v2912_v58 = vadd.f32 %v2910_v33, %v2906_v62  ;;  %v2917_v17 = vadd.f32 %v2915_v44, %v2911_v61 }
0x1b8d   : > { %v2918_v35 = vadd.f32 %v2916_v34, %v2912_v58  ;;  %v2921_v36 = vadd.f32 %v2920_v54, %v2917_v17  ;;  %v3043_v34 = vstv %s5427_s28  ;;  %v3051_v17 = vstv %s5429_s27  ;;  %s5421_s28 = sld [smem:[#allocation2 + $0x289]] }
0x1b8e   : > { %s5422_s27 = sld [smem:[#allocation2 + $0x28a]] }
0x1b8f   : > { %v2922_v40 = vadd.f32 %v2920_v54, %v2918_v35  ;;  %v5414_v42 = vmul.f32 -1.442695, %v2921_v36 }
0x1b91   : > { %6670 = vpow2.f32 %v5414_v42  ;;  %v5415_v47 = vmul.f32 -1.442695, %v2922_v40 }
0x1b93   : > { %6672 = vpow2.f32 %v5415_v47 }
0x1b97   : > { %v6671_v14 = vpop.eup %6670 }
0x1b98   : > { %v2929_v49 = vadd.f32 1.0, %v6671_v14 }
0x1b99   : > { %v6673_v59 = vpop.eup %6672 }
0x1b9a   : > { %v2930_v10 = vadd.f32 1.0, %v6673_v59  ;;  %6674 = vrcp.f32 %v2929_v49  ;;  %v2942_v50 = vand.u32 2147483648, %v2929_v49  ;;  %v2940_v4 = vand.u32 2147483647, %v2929_v49 }
0x1b9b   : > { %vm2936_vm9 = vweird.f32 %v2929_v49  ;;  %v3012_v59 = vstv %s7893_s7  ;;  %s5417_s7 = sld [smem:[#allocation2 + $0x285]] }
0x1b9c   : > { %6676 = vrcp.f32 %v2930_v10  ;;  %v2943_v12 = vor.u32 1.1754944e-38, %v2942_v50  ;;  %vm2941_vm7 = vcmp.eq.f32.partialorder %v2940_v4, 8.507059e+37  ;;  %v2957_v13 = vand.u32 2147483648, %v2930_v10 }
0x1b9d   : > { %vm2951_vm12 = vweird.f32 %v2930_v10  ;;  %v2955_v16 = vand.u32 2147483647, %v2930_v10  ;;  %v3020_v50 = vstv %s5421_s28  ;;  %s5418_s28 = sld [smem:[#allocation2 + $0x286]] }
0x1b9e   : > { %v2958_v48 = vor.u32 1.1754944e-38, %v2957_v13 }
0x1b9f   : > { %vm2956_vm1 = vcmp.eq.f32.partialorder %v2955_v16, 8.507059e+37 }
0x1ba0   : > { %v6675_v60 = vpop.eup %6674 }
0x1ba1   : > { %v2932_v63 = vmul.f32 %v6675_v60, %v2929_v49  ;;  %vm2937_vm13 = vweird.f32 %v6675_v60  ;;  %v3035_v49 = vstv %s7891_s10  ;;  %s5428_s10 = sld [smem:[#allocation2 + $0x290]] }
0x1ba2   : > { %v6677_v1 = vpop.eup %6676  ;;  %vm2938_vm4 = vmor %vm2936_vm9, %vm2937_vm13  ;;  %vm8814_vm13 = vcmask 523264  }
0x1ba3   : > { %v2933_v25 = vsub.f32 1.0, %v2932_v63  ;;  %v2947_v7 = vmul.f32 %v6677_v1, %v2930_v10  ;;  %vm2952_vm0 = vweird.f32 %v6677_v1  ;;  %vm8815_vm9 = vmmov %vm8814_vm13 }
0x1ba4   : > { %vm2953_vm8 = vmor %vm2951_vm12, %vm2952_vm0 }
0x1ba5   : > { %v2934_v31 = vmul.f32 %v6675_v60, %v2933_v25  ;;  %v2948_v5 = vsub.f32 1.0, %v2947_v7 }
0x1ba7   : > { %v2935_v6 = vadd.f32 %v6675_v60, %v2934_v31  ;;  %v2949_v3 = vmul.f32 %v6677_v1, %v2948_v5 }
0x1ba9   : > { %v2939_v37 = vsel %vm2938_vm4, %v6675_v60, %v2935_v6  ;;  %v2950_v45 = vadd.f32 %v6677_v1, %v2949_v3  ;;  %v3028_v60 = vstv %s5423_s14  ;;  %s5426_s14 = sld [smem:[#allocation2 + $0x28e]] }
0x1baa   : > { %v2944_v46 = vsel %vm2941_vm7, %v2943_v12, %v2939_v37 }
0x1bab   : > { %2963 = vperm.xlu0 %5736, %v2944_v46   ;;  %v2954_v57 = vsel %vm2953_vm8, %v6677_v1, %v2950_v45  ;;  %vm8816_vm8 = vmmov %vm8815_vm9 }
0x1bac   : > { %v2959_v18 = vsel %vm2956_vm1, %v2958_v48, %v2954_v57  ;;  %v3024_v48 = vstv %s5422_s27  ;;  %s5424_s27 = sld [smem:[#allocation2 + $0x28c]]  ;;  %vm8817_vm1 = vmmov %vm8816_vm8 }
0x1baf   : > { %v3039_v37 = vstv %s5426_s14  ;;  %s5420_s14 = sld [smem:[#allocation2 + $0x288]] }
0x1bb3   : > { %2968 = vperm.xlu0 %5736, %v2959_v18  }
0x1c1d   : > { %v2964_v19 = vpop.permute.xlu0 %2963 }
0x1c1e   : > { %v7879_v20 = vmul.f32 %v2964_v19, %v7866_v22 }
0x1c25   : > { %v2969_v38 = vpop.permute.xlu0 %2968 }
0x1c26   : > { %v7882_v21 = vmul.f32 %v2969_v38, %v7870_v11 }
0x1c28   : > { %v2973_v23 = vadd.f32 %v7882_v21, %v7879_v20  ;;  %v2981_v24 = vmax.f32 %v7879_v20, %v7882_v21 }
0x1c2a   : > { %v2974_v0 = vrot.slane %v2973_v23, 4  ;;  %v2982_v26 = vrot.slane %v2981_v24, 4 }
0x1c2c   : > { %v2975_v27 = vadd.f32 %v2974_v0, %v2973_v23  ;;  %v2983_v29 = vmax.f32 %v2981_v24, %v2982_v26  ;;  %v3047_v0 = vstv %s5428_s10  ;;  %s5416_s10 = sld [smem:[#allocation2 + $0x284]] }
0x1c2e   : > { %v2976_v39 = vrot.slane %v2975_v27, 2  ;;  %v2984_v61 = vrot.slane %v2983_v29, 2 }
0x1c30   : > { %v2977_v62 = vadd.f32 %v2976_v39, %v2975_v27  ;;  %v2985_v33 = vmax.f32 %v2983_v29, %v2984_v61 }
0x1c32   : > { %v2986_v44 = vrot.slane %v2985_v33, 1  ;;  %v2978_v54 = vrot.slane %v2977_v62, 1 }
0x1c34   : > { %v2987_v22 = vmax.f32 %v2985_v33, %v2986_v44  ;;  %v2979_v11 = vadd.f32 %v2978_v54, %v2977_v62  ;;  %v3004_v54 = vstv %s5417_s7  ;;  %s5430_s7 = sld [smem:[#allocation2 + $0x292]] }
0x1c36   : > { %2995 = vrot.lane.b32.xlu0 %v2987_v22, %s6854_s29  ;;  %v2980_v58 = vmul.f32 %v2979_v11, %v7330_v32 }
0x1c3e   : > { %2989 = vrot.lane.b32.xlu0 %v2980_v58, %s6854_s29 }
0x1ca8   : > { %v2996_v35 = vpop.permute.xlu0 %2995 }
0x1ca9   : > { %v7896_v36 = vsel %vm1802_vm10, 0.0, %v2996_v35  ;;  %v7899_v40 = vsel %vm1802_vm10, %v2996_v35, 0.0 }
0x1caa   : > { %v3045_v42 = vmul.f32 %v3043_v34, %v7899_v40  ;;  %v3052_v47 = vmul.f32 %v3051_v17, %v7896_v36  ;;  %v3044_v14 = vmul.f32 %v3043_v34, %v7896_v36  ;;  %v3036_v1 = vmul.f32 %v3035_v49, %v7896_v36 }
0x1cab   : > { %v3029_v7 = vmul.f32 %v3028_v60, %v7896_v36  ;;  %v3053_v4 = vmul.f32 %v3051_v17, %v7899_v40  ;;  %v3037_v5 = vmul.f32 %v3035_v49, %v7899_v40  ;;  %v3040_v45 = vmul.f32 %v3039_v37, %v7896_v36 }
0x1cac   : > { %3106 = vrot.lane.b32.xlu2 %v3045_v42, %s6827_s30  ;;  %3115 = vrot.lane.b32.xlu1 %v3052_v47, %s6827_s30  ;;  %v3041_v26 = vmul.f32 %v3039_v37, %v7899_v40  ;;  %v3049_v27 = vmul.f32 %v3047_v0, %v7899_v40  ;;  %v3048_v39 = vmul.f32 %v3047_v0, %v7896_v36  ;;  %v3008_v17 = vstv %s5418_s28  ;;  %s8820_s28 = smov 104  }
0x1cad   : > { %3104 = vrot.lane.b32.xlu0 %v3044_v14, %s6827_s30 }
0x1cb0   : > { %v2990_v10 = vpop.permute.xlu0 %2989 }
0x1cb1   : > { %v7910_v63 = vsel %vm1802_vm10, %v2990_v10, 0.0  ;;  %v7925_v6 = vsel %vm1802_vm10, 0.0, %v2990_v10 }
0x1cb2   : > { %v3014_v25 = vmul.f32 %v3012_v59, %v7910_v63  ;;  %v3022_v31 = vmul.f32 %v3020_v50, %v7910_v63  ;;  %v3013_v3 = vmul.f32 %v3012_v59, %v7925_v6  ;;  %v3021_v12 = vmul.f32 %v3020_v50, %v7925_v6 }
0x1cb3   : > { %v3025_v18 = vmul.f32 %v3024_v48, %v7925_v6  ;;  %v3026_v19 = vmul.f32 %v3024_v48, %v7910_v63  ;;  %v3005_v58 = vmul.f32 %v3004_v54, %v7925_v6  ;;  %v3006_v34 = vmul.f32 %v3004_v54, %v7910_v63 }
0x1cb4   : > { %3093 = vrot.lane.b32.xlu1 %v3036_v1, %s6827_s30  ;;  %3067 = vrot.lane.b32.xlu2 %v3014_v25, %s6827_s30  ;;  %v3010_v42 = vmul.f32 %v3008_v17, %v7910_v63  ;;  %v3009_v47 = vmul.f32 %v3008_v17, %v7925_v6 }
0x1cb5   : > { %3086 = vrot.lane.b32.xlu0 %v3029_v7, %s6845_s5  ;;  %v3016_v7 = vstv %s5420_s14  ;;  %s8821_s14 = smov 40  }
0x1cbc   : > { %3078 = vrot.lane.b32.xlu2 %v3022_v31, %s6827_s30  ;;  %v3018_v31 = vmul.f32 %v3016_v7, %v7910_v63 }
0x1cbd   : > { %3117 = vrot.lane.b32.xlu0 %v3053_v4, %s6827_s30 }
0x1cc5   : > { %3095 = vrot.lane.b32.xlu0 %v3037_v5, %s6827_s30  ;;  %v3017_v5 = vmul.f32 %v3016_v7, %v7925_v6 }
0x1ccd   : > { %3065 = vrot.lane.b32.xlu0 %v3013_v3, %s6827_s30 }
0x1cd5   : > { %3076 = vrot.lane.b32.xlu0 %v3021_v12, %s6827_s30  ;;  %v3031_v12 = vstv %s5424_s27  ;;  %s8822_s27 = smov 56  }
0x1cd6   : > { %v3033_v48 = vmul.f32 %v3031_v12, %v7899_v40 }
0x1d06   : > { %v3107_v46 = vpop.permute.xlu2 %3106 }
0x1d07   : > { %v3112_v62 = vadd.f32 %v3107_v46, %v3041_v26 }
0x1d0e   : > { %v3068_v35 = vpop.permute.xlu2 %3067 }
0x1d0f   : > { %v3073_v49 = vadd.f32 %v3068_v35, %v3010_v42 }
0x1d16   : > { %v3079_v60 = vpop.permute.xlu2 %3078 }
0x1d17   : > { %v3084_v3 = vadd.f32 %v3079_v60, %v3018_v31 }
0x1d1e   : > { %v3116_v29 = vpop.permute.xlu1 %3115 }
0x1d1f   : > { %v3105_v13 = vpop.permute.xlu0 %3104 }
0x1d20   : > { %v3108_v16 = vsel %vm771_vm2, %v3105_v13, %v3107_v46 }
0x1d21   : > { %v3111_v57 = vadd.f32 %v3108_v16, %v3040_v45 }
0x1d23   : > { %3146 = vrot.lane.b32.xlu0 %v3111_v57, %s6845_s5 }
0x1d26   : > { %v3094_v1 = vpop.permute.xlu1 %3093 }
0x1d27   : > { %v3087_v38 = vpop.permute.xlu0 %3086 }
0x1d28   : > { %v3089_v23 = vadd.f32 %v3087_v38, %v3025_v18  ;;  %v3090_v24 = vadd.f32 %v3087_v38, %v3026_v19  ;;  %v3032_v19 = vmul.f32 %v3031_v12, %v7896_v36 }
0x1d2a   : > { %3137 = vrot.lane.b32.xlu1 %v3090_v24, %s6845_s5  ;;  %3135 = vrot.lane.b32.xlu2 %v3089_v23, %s6845_s5 }
0x1d2f   : > { %v3118_v61 = vpop.permute.xlu0 %3117 }
0x1d30   : > { %v3119_v33 = vsel %vm771_vm2, %v3116_v29, %v3118_v61  ;;  %v3123_v44 = vadd.f32 %v3118_v61, %v3049_v27 }
0x1d31   : > { %v3122_v22 = vadd.f32 %v3119_v33, %v3048_v39 }
0x1d32   : > { %3148 = vrot.lane.b32.xlu2 %v3112_v62, %s6845_s5  ;;  %3168 = vrot.lane.b32.xlu0 %v3123_v44, %s6855_s11  ;;  %v3001_v44 = vstv %s5416_s10  ;;  %s5450_s10 = sld [smem:[#allocation2 + $0x301]] }
0x1d33   : > { %3166 = vrot.lane.b32.xlu1 %v3122_v22, %s6855_s11 }
0x1d37   : > { %v3096_v11 = vpop.permute.xlu0 %3095 }
0x1d38   : > { %v3097_v18 = vsel %vm771_vm2, %v3094_v1, %v3096_v11  ;;  %v3101_v38 = vadd.f32 %v3096_v11, %v3033_v48 }
0x1d39   : > { %v3100_v24 = vadd.f32 %v3097_v18, %v3032_v19 }
0x1d3a   : > { %3056 = vrot.lane.b32.xlu2 %v3005_v58, %s6827_s30  ;;  %v3002_v58 = vmul.f32 %v3001_v44, %v7925_v6 }
0x1d3b   : > { %3058 = vrot.lane.b32.xlu1 %v3006_v34, %s6827_s30 }
0x1d3f   : > { %v3066_v14 = vpop.permute.xlu0 %3065 }
0x1d40   : > { %v3069_v59 = vsel %vm771_vm2, %v3066_v14, %v3068_v35 }
0x1d41   : > { %v3072_v10 = vadd.f32 %v3069_v59, %v3009_v47 }
0x1d42   : > { %3128 = vrot.lane.b32.xlu2 %v3073_v49, %s6845_s5 }
0x1d43   : > { %3126 = vrot.lane.b32.xlu0 %v3072_v10, %s6845_s5  ;;  %v3185_v10 = vstv %s5430_s7  ;;  %s5451_s7 = sld [smem:[#allocation2 + $0x302]] }
0x1d47   : > { %v3077_v25 = vpop.permute.xlu0 %3076 }
0x1d48   : > { %v3080_v4 = vsel %vm771_vm2, %v3077_v25, %v3079_v60 }
0x1d49   : > { %v3083_v37 = vadd.f32 %v3080_v4, %v3017_v5 }
0x1d84   : > { %v3136_v50 = vpop.permute.xlu2 %3135 }
0x1d8c   : > { %v3149_v63 = vpop.permute.xlu2 %3148 }
0x1d8d   : > { %v3154_v0 = vadd.f32 %v3149_v63, %v3101_v38 }
0x1d94   : > { %v3057_v62 = vpop.permute.xlu2 %3056 }
0x1d95   : > { %v3147_v46 = vpop.permute.xlu0 %3146 }
0x1d96   : > { %v3150_v23 = vsel %vm1217_vm6, %v3147_v46, %v3149_v63 }
0x1d97   : > { %v3153_v27 = vadd.f32 %v3150_v23, %v3100_v24 }
0x1d9c   : > { %v3138_v45 = vpop.permute.xlu1 %3137  ;;  %v3129_v22 = vpop.permute.xlu2 %3128 }
0x1d9d   : > { %v3139_v13 = vsel %vm1217_vm6, %v3136_v50, %v3138_v45  ;;  %v3143_v16 = vadd.f32 %v3138_v45, %v3084_v3 }
0x1d9e   : > { %v3142_v57 = vadd.f32 %v3139_v13, %v3083_v37 }
0x1d9f   : > { %3159 = vrot.lane.b32.xlu0 %v3143_v16, %s6855_s11 }
0x1da0   : > { %3157 = vrot.lane.b32.xlu1 %v3142_v57, %s6855_s11 }
0x1da4   : > { %v3169_v26 = vpop.permute.xlu0 %3168 }
0x1da5   : > { %v3174_v29 = vadd.f32 %v3169_v26, %v3154_v0  ;;  %v3167_v39 = vpop.permute.xlu1 %3166 }
0x1da6   : > { %v3170_v40 = vsel %vm8814_vm13, %v3167_v39, %v3169_v26  ;;  %vm8818_vm13 = vmmov %vm8817_vm1 }
0x1da7   : > { %v3173_v61 = vadd.f32 %v3170_v40, %v3153_v27  ;;  %v5435_v40 = vld [vmem:[%s8676_s2 + $0x68] sm:$0xff] }
0x1da8   : > { %3179 = vrot.lane.b32.xlu1 %v3174_v29, %s6827_s30 }
0x1da9   : > { %3177 = vrot.lane.b32.xlu2 %v3173_v61, %s6827_s30  ;;  %v5434_v61 = vld [vmem:[%s8676_s2 + $0x60] sm:$0xff] }
0x1dad   : > { %v3059_v33 = vpop.permute.xlu1 %3058 }
0x1dae   : > { %v3060_v11 = vsel %vm771_vm2, %v3057_v62, %v3059_v33 }
0x1daf   : > { %v3062_v35 = vadd.f32 %v3060_v11, %v3002_v58 }
0x1db5   : > { %v3127_v36 = vpop.permute.xlu0 %3126 }
0x1db6   : > { %v3130_v17 = vsel %vm1217_vm6, %v3127_v36, %v3129_v22 }
0x1db7   : > { %v3132_v47 = vadd.f32 %v3130_v17, %v3062_v35 }
0x1e03   : > { %v3178_v14 = vpop.permute.xlu2 %3177 }
0x1e11   : > { %v3160_v34 = vpop.permute.xlu0 %3159 }
0x1e12   : > { %v3158_v54 = vpop.permute.xlu1 %3157 }
0x1e13   : > { %v3161_v42 = vsel %vm8815_vm9, %v3158_v54, %v3160_v34  ;;  %vm8819_vm9 = vmmov %vm8817_vm1 }
0x1e14   : > { %v3163_v49 = vadd.f32 %v3161_v42, %v3132_v47 }
0x1e1a   : > { %v3180_v59 = vpop.permute.xlu1 %3179 }
0x1e1b   : > { %v3181_v60 = vsel %vm771_vm2, %v3178_v14, %v3180_v59 }
0x1e1c   : > { %v3183_v1 = vadd.f32 %v3181_v60, %v3163_v49 }
0x1e1e   : > { %v3186_v25 = vadd.f32 %v3185_v10, %v3183_v1 }
0x1e20   : > { %v5431_v7 = vmul.f32 -1.442695, %v3186_v25 }
0x1e22   : > { %6678 = vpow2.f32 %v5431_v7 }
0x1e28   : > { %v6679_v50 = vpop.eup %6678 }
0x1e29   : > { %v3190_v31 = vadd.f32 1.0, %v6679_v50 }
0x1e2b   : > { %6680 = vrcp.f32 %v3190_v31  ;;  %v3202_v3 = vand.u32 2147483648, %v3190_v31  ;;  %v3200_v37 = vand.u32 2147483647, %v3190_v31  ;;  %vm3196_vm7 = vweird.f32 %v3190_v31 }
0x1e2d   : > { %v3203_v45 = vor.u32 1.1754944e-38, %v3202_v3  ;;  %vm3201_vm12 = vcmp.eq.f32.partialorder %v3200_v37, 8.507059e+37 }
0x1e31   : > { %v6681_v6 = vpop.eup %6680 }
0x1e32   : > { %v3192_v4 = vmul.f32 %v6681_v6, %v3190_v31  ;;  %vm3197_vm4 = vweird.f32 %v6681_v6 }
0x1e33   : > { %vm3198_vm0 = vmor %vm3196_vm7, %vm3197_vm4  ;;  %vm8823_vm4 = vcmask 64512  }
0x1e34   : > { %v3193_v5 = vsub.f32 1.0, %v3192_v4  ;;  %vm8824_vm7 = vmmov %vm8823_vm4 }
0x1e36   : > { %v3194_v12 = vmul.f32 %v6681_v6, %v3193_v5 }
0x1e38   : > { %v3195_v46 = vadd.f32 %v6681_v6, %v3194_v12 }
0x1e3a   : > { %v3199_v13 = vsel %vm3198_vm0, %v6681_v6, %v3195_v46  ;;  %vm8825_vm0 = vcmask 588800  }
0x1e3b   : > { %v3204_v16 = vsel %vm3201_vm12, %v3203_v45, %v3199_v13  ;;  %vm8826_vm12 = vmmov %vm8825_vm0 }
0x1e3c   : > { %v3206_v57 = vperm.slane %v3204_v16, 0 }
0x1e3e   : > { %v3207_v48 = vmul.f32 %v3206_v57, %v7879_v20  ;;  %v3208_v18 = vmul.f32 %v3206_v57, %v7882_v21 }
0x1e40   : > { %v3209_v63 = vmul.f32 %v7641_v43, %v3207_v48  ;;  %v3210_v19 = vmul.f32 %v7641_v43, %v3208_v18 }
0x1e42   : > { %v3211_v38 = vadd.f32 %v3209_v63, %v7645_v52  ;;  %v3212_v23 = vadd.f32 %v3210_v19, %v7648_v15 }
0x1e44   : > { %v6153_v24 = vpack.i.bf16 %v3212_v23, %v3211_v38 }
0x1e46   : > { %6154 = vrot.lane.b32.xlu0 %v6153_v24, %s6855_s11 }
0x1eb8   : > { %v6155_v0 = vpop.permute.xlu0 %6154 }
0x1eb9   : > { %v7979_v26 = vunpack.i.h.bf16 %v6155_v0  ;;  %v7981_v27 = vunpack.i.l.bf16 %v6155_v0 }
0x1ebb   : > { %v3222_v20 = vsel %vm8816_vm8, 0.0, %v7979_v26  ;;  %v3224_v21 = vsel %vm8817_vm1, %v7979_v26, 0.0  ;;  %v3221_v43 = vsel %vm8818_vm13, 0.0, %v7981_v27  ;;  %v3223_v52 = vsel %vm8819_vm9, %v7981_v27, 0.0 }
0x1ebc   : > { %v6163_v15 = vpack.i.bf16 %v3224_v21, %v3222_v20  ;;  %v6168_v29 = vpack.i.bf16 %v3223_v52, %v3221_v43  ;;  %v5447_v39 = vpack.c.bf16 %v7979_v26, %v7981_v27  ;;  %vm8827_vm8 = vcmask 719872  }
0x1ebd   : > { %vm8828_vm1 = vmmov %vm8827_vm8  ;;  %vm8829_vm13 = vcmask 130048  }
0x1ebe   : > { %6164 = vrot.lane.b32.xlu1 %v6163_v15, %s6840_s8  ;;  %6169 = vrot.lane.b32.xlu0 %v6168_v29, %s8770_s13  ;;  %vm8830_vm9 = vmmov %vm8829_vm13 }
0x1ebf   : > { %6159 = vrot.lane.b32.xlu2 %v6168_v29, %s6840_s8 }
0x1ec6   : > { %6179 = vrot.lane.b32.xlu1 %v6168_v29, %s6838_s6  ;;  %6184 = vrot.lane.b32.xlu0 %v6163_v15, %s6838_s6 }
0x1ec7   : > { %6174 = vrot.lane.b32.xlu2 %v6163_v15, %s8770_s13  ;;  %s5468_s13 = sld [smem:[#allocation2 + $0x311]] }
0x1ece   : > { %6194 = vrot.lane.b32.xlu1 %v6163_v15, %s6851_s9  ;;  %6199 = vrot.lane.b32.xlu0 %v6168_v29, %s6842_s22 }
0x1ecf   : > { %6189 = vrot.lane.b32.xlu2 %v6168_v29, %s6851_s9 }
0x1ed6   : > { %6209 = vrot.lane.b32.xlu1 %v6168_v29, %s6848_s20  ;;  %6214 = vrot.lane.b32.xlu0 %v6163_v15, %s6848_s20 }
0x1ed7   : > { %6204 = vrot.lane.b32.xlu2 %v6163_v15, %s6842_s22 }
0x1ede   : > { %6224 = vrot.lane.b32.xlu1 %v6163_v15, %s6845_s5  ;;  %6229 = vrot.lane.b32.xlu0 %v6168_v29, %s6852_s23 }
0x1edf   : > { %6219 = vrot.lane.b32.xlu2 %v6168_v29, %s6845_s5 }
0x1ee6   : > { %6239 = vrot.lane.b32.xlu1 %v6168_v29, %s8820_s28  ;;  %6244 = vrot.lane.b32.xlu0 %v6163_v15, %s8820_s28 }
0x1ee7   : > { %6234 = vrot.lane.b32.xlu2 %v6163_v15, %s6852_s23 }
0x1eee   : > { %6254 = vrot.lane.b32.xlu1 %v6163_v15, %s8821_s14  ;;  %6259 = vrot.lane.b32.xlu0 %v6168_v29, %s6827_s30 }
0x1eef   : > { %6249 = vrot.lane.b32.xlu2 %v6168_v29, %s8821_s14  ;;  %s5452_s14 = sld [smem:[#allocation2 + $0x303]] }
0x1ef6   : > { %6269 = vrot.lane.b32.xlu1 %v6168_v29, %s6854_s29  ;;  %6274 = vrot.lane.b32.xlu0 %v6163_v15, %s6854_s29 }
0x1ef7   : > { %6264 = vrot.lane.b32.xlu2 %v6163_v15, %s6827_s30 }
0x1efe   : > { %6284 = vrot.lane.b32.xlu1 %v6163_v15, %s6805_s12  ;;  %6289 = vrot.lane.b32.xlu0 %v6168_v29, %s8822_s27 }
0x1eff   : > { %6279 = vrot.lane.b32.xlu2 %v6168_v29, %s6805_s12 }
0x1f06   : > { %6299 = vrot.lane.b32.xlu1 %v6168_v29, %s6855_s11  ;;  %6304 = vrot.lane.b32.xlu0 %v6163_v15, %s6855_s11  ;;  %s5466_s11 = sld [smem:[#allocation2 + $0x30f]] }
0x1f07   : > { %6294 = vrot.lane.b32.xlu2 %v6163_v15, %s8822_s27  ;;  %s5449_s27 = sld [smem:[#allocation2 + $0x300]] }
0x1f0e   : > { %3438 = vperm.xlu1 %5735, %v5435_v40  }
0x1f0f   : > { %3433 = vperm.xlu2 %6117, %v5434_v61  }
0x1f19   : > { %v6160_v62 = vpop.permute.xlu2 %6159 }
0x1f1a   : > { %v6162_v44 = vunpack.i.h.bf16 %v6160_v62  ;;  %v6161_v22 = vunpack.i.l.bf16 %v6160_v62 }
0x1f1c   : > { %v3309_v10 = vsel %vm8825_vm0, %v6161_v22, %v6162_v44  ;;  %vm8833_vm0 = vcmask 326656  }
0x1f21   : > { %v6175_v33 = vpop.permute.xlu2 %6174 }
0x1f22   : > { %v6177_v54 = vunpack.i.h.bf16 %v6175_v33  ;;  %v6176_v11 = vunpack.i.l.bf16 %v6175_v33 }
0x1f24   : > { %v3406_v49 = vsel %vm8823_vm4, %v6176_v11, %v6177_v54  ;;  %vm8831_vm4 = vcmask 850944  }
0x1f29   : > { %v6190_v36 = vpop.permute.xlu2 %6189 }
0x1f2a   : > { %v6192_v45 = vunpack.i.h.bf16 %v6190_v36  ;;  %v6191_v13 = vunpack.i.l.bf16 %v6190_v36 }
0x1f2c   : > { %v3393_v21 = vsel %vm8829_vm13, %v6191_v13, %v6192_v45 }
0x1f30   : > { %v6165_v58 = vpop.permute.xlu1 %6164  ;;  %v6170_v34 = vpop.permute.xlu0 %6169 }
0x1f31   : > { %v6167_v17 = vunpack.i.h.bf16 %v6165_v58  ;;  %v6166_v35 = vunpack.i.l.bf16 %v6165_v58  ;;  %v6172_v42 = vunpack.i.h.bf16 %v6170_v34  ;;  %v6171_v47 = vunpack.i.l.bf16 %v6170_v34  ;;  %v6205_v14 = vpop.permute.xlu2 %6204 }
0x1f32   : > { %v6207_v16 = vunpack.i.h.bf16 %v6205_v14  ;;  %v6206_v57 = vunpack.i.l.bf16 %v6205_v14 }
0x1f33   : > { %v3405_v59 = vsel %vm8824_vm7, %v6171_v47, %v6172_v42  ;;  %v3310_v60 = vsel %vm8826_vm12, %v6166_v35, %v6167_v17  ;;  %vm8832_vm7 = vmmov %vm8831_vm4 }
0x1f34   : > { %v3419_v1 = vpack.c.bf16 %v3310_v60, %v3309_v10  ;;  %v3427_v25 = vpack.c.bf16 %v3406_v49, %v3405_v59  ;;  %v3286_v20 = vsel %vm8828_vm1, %v6206_v57, %v6207_v16  ;;  %vm8834_vm12 = vmmov %vm8833_vm0  ;;  %vm8837_vm1 = vcmask 523264  }
0x1f35   : > { %vm5444_vm13 = vmneg %vm8837_vm1 }
0x1f36   : > { %3451 = vmatpush.bf16.msrb.mxu0 %v3419_v1  ;;  %3465 = vmatpush.bf16.msra.mxu1 %v3427_v25 }
0x1f38   : > { %v6180_v7 = vpop.permute.xlu1 %6179  ;;  %v6185_v50 = vpop.permute.xlu0 %6184 }
0x1f39   : > { %v6182_v31 = vunpack.i.h.bf16 %v6180_v7  ;;  %v6181_v6 = vunpack.i.l.bf16 %v6180_v7  ;;  %v6187_v4 = vunpack.i.h.bf16 %v6185_v50  ;;  %v6186_v5 = vunpack.i.l.bf16 %v6185_v50  ;;  %v6220_v3 = vpop.permute.xlu2 %6219 }
0x1f3a   : > { %v6222_v58 = vunpack.i.h.bf16 %v6220_v3  ;;  %v6221_v34 = vunpack.i.l.bf16 %v6220_v3 }
0x1f3b   : > { %v3297_v12 = vsel %vm1245_vm15, %v6181_v6, %v6182_v31  ;;  %v3298_v37 = vsel %vm1245_vm15, %v6186_v5, %v6187_v4 }
0x1f3c   : > { %v3418_v46 = vpack.c.bf16 %v3298_v37, %v3297_v12  ;;  %v3273_v60 = vsel %vm1217_vm6, %v6221_v34, %v6222_v58 }
0x1f3e   : > { %3452 = vmatpush.bf16.msrb.mxu0 %v3418_v46 }
0x1f40   : > { %v6195_v48 = vpop.permute.xlu1 %6194  ;;  %v6200_v18 = vpop.permute.xlu0 %6199 }
0x1f41   : > { %v6197_v63 = vunpack.i.h.bf16 %v6195_v48  ;;  %v6196_v19 = vunpack.i.l.bf16 %v6195_v48  ;;  %v6202_v38 = vunpack.i.h.bf16 %v6200_v18  ;;  %v6201_v23 = vunpack.i.l.bf16 %v6200_v18  ;;  %v6235_v24 = vpop.permute.xlu2 %6234 }
0x1f42   : > { %v6237_v17 = vunpack.i.h.bf16 %v6235_v24  ;;  %v6236_v35 = vunpack.i.l.bf16 %v6235_v24 }
0x1f43   : > { %v3285_v0 = vsel %vm8827_vm8, %v6201_v23, %v6202_v38  ;;  %v3394_v43 = vsel %vm8830_vm9, %v6196_v19, %v6197_v63  ;;  %vm8835_vm8 = vcmask 457728   ;;  %vm5446_vm9 = vmpackc.low %vm5444_vm13, %vm5444_vm13 }
0x1f44   : > { %v3417_v52 = vpack.c.bf16 %v3286_v20, %v3285_v0  ;;  %v3426_v15 = vpack.c.bf16 %v3394_v43, %v3393_v21  ;;  %v3370_v7 = vsel %vm1828_vm14, %v6236_v35, %v6237_v17 }
0x1f46   : > { %3453 = vmatpush.bf16.msrb.mxu0 %v3417_v52  ;;  %3466 = vmatpush.bf16.msra.mxu1 %v3426_v15 }
0x1f48   : > { %v6210_v29 = vpop.permute.xlu1 %6209  ;;  %v6215_v40 = vpop.permute.xlu0 %6214 }
0x1f49   : > { %v6212_v61 = vunpack.i.h.bf16 %v6210_v29  ;;  %v6211_v62 = vunpack.i.l.bf16 %v6210_v29  ;;  %v6217_v33 = vunpack.i.h.bf16 %v6215_v40  ;;  %v6216_v36 = vunpack.i.l.bf16 %v6215_v40  ;;  %v6250_v11 = vpop.permute.xlu2 %6249 }
0x1f4a   : > { %v6252_v57 = vunpack.i.h.bf16 %v6250_v11  ;;  %v6251_v48 = vunpack.i.l.bf16 %v6250_v11 }
0x1f4b   : > { %v3381_v44 = vsel %vm1841_vm11, %v6211_v62, %v6212_v61  ;;  %v3382_v22 = vsel %vm1841_vm11, %v6216_v36, %v6217_v33 }
0x1f4c   : > { %v3425_v54 = vpack.c.bf16 %v3382_v22, %v3381_v44  ;;  %v3357_v15 = vsel %vm8833_vm0, %v6251_v48, %v6252_v57 }
0x1f4e   : > { %3467 = vmatpush.bf16.msra.mxu1 %v3425_v54 }
0x1f50   : > { %v6225_v42 = vpop.permute.xlu1 %6224  ;;  %v6230_v47 = vpop.permute.xlu0 %6229 }
0x1f51   : > { %v6227_v14 = vunpack.i.h.bf16 %v6225_v42  ;;  %v6226_v49 = vunpack.i.l.bf16 %v6225_v42  ;;  %v6232_v59 = vunpack.i.h.bf16 %v6230_v47  ;;  %v6231_v10 = vunpack.i.l.bf16 %v6230_v47  ;;  %v6265_v6 = vpop.permute.xlu2 %6264 }
0x1f52   : > { %v6267_v18 = vunpack.i.h.bf16 %v6265_v6  ;;  %v6266_v63 = vunpack.i.l.bf16 %v6265_v6 }
0x1f53   : > { %v3274_v1 = vsel %vm1217_vm6, %v6226_v49, %v6227_v14  ;;  %v3369_v25 = vsel %vm1828_vm14, %v6231_v10, %v6232_v59 }
0x1f54   : > { %v3416_v50 = vpack.c.bf16 %v3274_v1, %v3273_v60  ;;  %v3424_v31 = vpack.c.bf16 %v3370_v7, %v3369_v25  ;;  %v3250_v52 = vsel %vm771_vm2, %v6266_v63, %v6267_v18  ;;  %v5554_v18 = vld [vmem:[%s8675_s1 + $0x64] sm:$0xf]  ;;  %v5440_v63 = vld [vmem:[%s8675_s1 + $0x68] sm:$0xf0] }
0x1f56   : > { %3454 = vmatpush.bf16.msrb.mxu0 %v3416_v50  ;;  %3468 = vmatpush.bf16.msra.mxu1 %v3424_v31 }
0x1f58   : > { %v6240_v4 = vpop.permute.xlu1 %6239  ;;  %v6245_v5 = vpop.permute.xlu0 %6244 }
0x1f59   : > { %v6242_v3 = vunpack.i.h.bf16 %v6240_v4  ;;  %v6241_v12 = vunpack.i.l.bf16 %v6240_v4  ;;  %v6247_v37 = vunpack.i.h.bf16 %v6245_v5  ;;  %v6246_v46 = vunpack.i.l.bf16 %v6245_v5  ;;  %v6280_v21 = vpop.permute.xlu2 %6279 }
0x1f5a   : > { %v6282_v35 = vunpack.i.h.bf16 %v6280_v21  ;;  %v6281_v42 = vunpack.i.l.bf16 %v6280_v21 }
0x1f5b   : > { %v3261_v45 = vsel %vm8831_vm4, %v6241_v12, %v6242_v3  ;;  %v3262_v13 = vsel %vm8832_vm7, %v6246_v46, %v6247_v37  ;;  %v5438_v3 = vld [vmem:[%s8675_s1 + $0x60] sm:$0xf]  ;;  %v5555_v12 = vld [vmem:[%s8675_s1 + $0x64] sm:$0xf0]  ;;  %vm8838_vm4 = vmmov %vm8837_vm1 }
0x1f5c   : > { %v3415_v16 = vpack.c.bf16 %v3262_v13, %v3261_v45  ;;  %v3237_v7 = vsel %vm306_vm3, %v6281_v42, %v6282_v35  ;;  %v5439_v45 = vor.u32 %v5555_v12, %v5438_v3  ;;  %vm8839_vm7 = vmmov %vm8837_vm1  ;;  %v3512_v35 = vstv %s5450_s10  ;;  %s8102_s10 = sld [smem:[#allocation2 + $0x309]] }
0x1f5e   : > { %3455 = vmatpush.bf16.msrb.mxu0 %v3415_v16 }
0x1f60   : > { %v6255_v19 = vpop.permute.xlu1 %6254  ;;  %v6260_v38 = vpop.permute.xlu0 %6259 }
0x1f61   : > { %v6257_v23 = vunpack.i.h.bf16 %v6255_v19  ;;  %v6256_v24 = vunpack.i.l.bf16 %v6255_v19  ;;  %v6262_v0 = vunpack.i.h.bf16 %v6260_v38  ;;  %v6261_v20 = vunpack.i.l.bf16 %v6260_v38  ;;  %v6295_v34 = vpop.permute.xlu2 %6294 }
0x1f62   : > { %v6297_v47 = vunpack.i.h.bf16 %v6295_v34  ;;  %v6296_v14 = vunpack.i.l.bf16 %v6295_v34 }
0x1f63   : > { %v3249_v43 = vsel %vm771_vm2, %v6261_v20, %v6262_v0  ;;  %v3358_v29 = vsel %vm8834_vm12, %v6256_v24, %v6257_v23  ;;  %v5443_v24 = vor.u32 %v5554_v18, %v5440_v63 }
0x1f64   : > { %v3414_v40 = vpack.c.bf16 %v3250_v52, %v3249_v43  ;;  %v3423_v61 = vpack.c.bf16 %v3358_v29, %v3357_v15 }
0x1f66   : > { %3456 = vmatpush.bf16.msrb.mxu0 %v3414_v40  ;;  %3469 = vmatpush.bf16.msra.mxu1 %v3423_v61 }
0x1f68   : > { %v6270_v62 = vpop.permute.xlu1 %6269  ;;  %v6275_v33 = vpop.permute.xlu0 %6274 }
0x1f69   : > { %v6272_v36 = vunpack.i.h.bf16 %v6270_v62  ;;  %v6271_v44 = vunpack.i.l.bf16 %v6270_v62  ;;  %v6277_v22 = vunpack.i.h.bf16 %v6275_v33  ;;  %v6276_v54 = vunpack.i.l.bf16 %v6275_v33  ;;  %v3434_v26 = vpop.permute.xlu2 %3433 }
0x1f6b   : > { %v3345_v11 = vsel %vm1802_vm10, %v6271_v44, %v6272_v36  ;;  %v3346_v58 = vsel %vm1802_vm10, %v6276_v54, %v6277_v22  ;;  %vm8836_vm10 = vmmov %vm8835_vm8 }
0x1f6c   : > { %v3422_v17 = vpack.c.bf16 %v3346_v58, %v3345_v11  ;;  %v3334_v6 = vsel %vm8836_vm10, %v6296_v14, %v6297_v47  ;;  %v3508_v58 = vstv %s5449_s27  ;;  %s8100_s27 = sld [smem:[#allocation2 + $0x30d]] }
0x1f6e   : > { %3470 = vmatpush.bf16.msra.mxu1 %v3422_v17 }
0x1f70   : > { %v6285_v49 = vpop.permute.xlu1 %6284  ;;  %v6290_v59 = vpop.permute.xlu0 %6289 }
0x1f71   : > { %v6287_v10 = vunpack.i.h.bf16 %v6285_v49  ;;  %v6286_v60 = vunpack.i.l.bf16 %v6285_v49  ;;  %v6292_v1 = vunpack.i.h.bf16 %v6290_v59  ;;  %v6291_v25 = vunpack.i.l.bf16 %v6290_v59 }
0x1f72   : > { %v3518_v49 = vstv %s5451_s7  ;;  %s5462_s7 = sld [smem:[#allocation2 + $0x30b]] }
0x1f73   : > { %v3238_v50 = vsel %vm306_vm3, %v6286_v60, %v6287_v10  ;;  %v3333_v31 = vsel %vm8835_vm8, %v6291_v25, %v6292_v1  ;;  %vm8840_vm8 = vcmask 1046528  }
0x1f74   : > { %v3413_v4 = vpack.c.bf16 %v3238_v50, %v3237_v7  ;;  %v3421_v5 = vpack.c.bf16 %v3334_v6, %v3333_v31  ;;  %vm8841_vm10 = vmmov %vm8840_vm8 }
0x1f76   : > { %3457 = vmatpush.bf16.msrb.mxu0 %v3413_v4  ;;  %3471 = vmatpush.bf16.msra.mxu1 %v3421_v5  ;;  %v3524_v5 = vstv %s5452_s14  ;;  %s5458_s14 = sld [smem:[#allocation2 + $0x307]] }
0x1f78   : > { %v6300_v37 = vpop.permute.xlu1 %6299  ;;  %v6305_v46 = vpop.permute.xlu0 %6304 }
0x1f79   : > { %v6302_v13 = vunpack.i.h.bf16 %v6300_v37  ;;  %v6301_v16 = vunpack.i.l.bf16 %v6300_v37  ;;  %v6307_v57 = vunpack.i.h.bf16 %v6305_v46  ;;  %v6306_v48 = vunpack.i.l.bf16 %v6305_v46 }
0x1f7a   : > { %5448 = vmatpush.bf16.msk.msrb.mxu0 %vm5446_vm9, %v5447_v39 }
0x1f7b   : > { %v3321_v19 = vsel %vm8838_vm4, %v6301_v16, %v6302_v13  ;;  %v3322_v38 = vsel %vm8839_vm7, %v6306_v48, %v6307_v57 }
0x1f7c   : > { %v3420_v23 = vpack.c.bf16 %v3322_v38, %v3321_v19 }
0x1f7d   : > { %3459 = vmatmul.bf16.vlgmr.msrb.gmra.mxu0 %v5439_v45 }
0x1f7e   : > { %3472 = vmatpush.bf16.msra.mxu1 %v3420_v23 }
0x1f80   : > { %v3439_v15 = vpop.permute.xlu1 %3438 }
0x1f81   : > { %3473 = vmatmul.bf16.vlgmr.msra.gmra.mxu1 %v5443_v24 }
0x1ffa   : > { %v3460_v0 = vpop.f32.mrf.mxu0 }
0x1ffb   : > { %v3461_v27 = vadd.f32 %v3460_v0, %v3434_v26 }
0x1ffe   : > { %v3474_v39 = vpop.f32.mrf.mxu1 }
0x1fff   : > { %v3475_v20 = vadd.f32 %v3474_v39, %v3461_v27 }
0x2001   : > { %vm3479_vm0 = vcmp.gt.f32.partialorder %v3475_v20, 0.0  ;;  %v3481_v21 = vmul.f32 0.01, %v3475_v20 }
0x2002   : > { %v3462_v43 = vpop.f32.mrf.mxu0 }
0x2003   : > { %v8075_v52 = vsel %vm3479_vm0, %v3475_v20, %v3481_v21  ;;  %v3463_v40 = vadd.f32 %v3462_v43, %v3439_v15 }
0x2004   : > { %v3485_v29 = vmul.f32 %v7418_v2, %v8075_v52 }
0x2006   : > { %v3476_v61 = vpop.f32.mrf.mxu1  ;;  %3487 = vadd.xlane.f32.xlu0 %v3485_v29 }
0x2007   : > { %v3477_v62 = vadd.f32 %v3476_v61, %v3463_v40 }
0x2009   : > { %vm3480_vm12 = vcmp.gt.f32.partialorder %v3477_v62, 0.0  ;;  %v3482_v33 = vmul.f32 0.01, %v3477_v62 }
0x200b   : > { %v8079_v36 = vsel %vm3480_vm12, %v3477_v62, %v3482_v33 }
0x200c   : > { %v3486_v44 = vmul.f32 %v7418_v2, %v8079_v36 }
0x200e   : > { %3489 = vadd.xlane.f32.xlu2 %v3486_v44 }
0x2079   : > { %v3488_v22 = vpop.xlane.xlu0 %3487 }
0x207a   : > { %v3491_v54 = vmul.f32 0.0625, %v3488_v22 }
0x207c   : > { %v3495_v11 = vrot.slane %v3491_v54, 7  ;;  %v3501_v14 = vrot.slane %v3491_v54, 1  ;;  %v3513_v60 = vmul.f32 %v3512_v35, %v3491_v54 }
0x207e   : > { %v3500_v34 = vsel %vm358_vm5, 0.0, %v3495_v11 }
0x207f   : > { %v3509_v47 = vmul.f32 %v3508_v58, %v3500_v34 }
0x2081   : > { %v3490_v17 = vpop.xlane.xlu2 %3489  ;;  %v3515_v50 = vadd.f32 %v3513_v60, %v3509_v47 }
0x2082   : > { %v3492_v42 = vmul.f32 0.0625, %v3490_v17 }
0x2084   : > { %v3496_v59 = vrot.slane %v3492_v42, 7  ;;  %v3502_v10 = vrot.slane %v3492_v42, 1  ;;  %v3514_v6 = vmul.f32 %v3512_v35, %v3492_v42 }
0x2086   : > { %v3497_v1 = vsel %vm358_vm5, %v3495_v11, %v3496_v59  ;;  %v3503_v25 = vsel %vm8840_vm8, %v3501_v14, %v3502_v10  ;;  %v3506_v7 = vsel %vm8841_vm10, %v3502_v10, 0.0 }
0x2087   : > { %v3510_v31 = vmul.f32 %v3508_v58, %v3497_v1  ;;  %v3519_v4 = vmul.f32 %v3518_v49, %v3503_v25  ;;  %v3520_v12 = vmul.f32 %v3518_v49, %v3506_v7 }
0x2089   : > { %v3516_v3 = vadd.f32 %v3514_v6, %v3510_v31  ;;  %v3521_v37 = vadd.f32 %v3519_v4, %v3515_v50  ;;  %v3647_v4 = vstv %s5466_s11  ;;  %s5461_s11 = sld [smem:[#allocation2 + $0x30a]] }
0x208b   : > { %v3522_v46 = vadd.f32 %v3520_v12, %v3516_v3  ;;  %v3525_v45 = vadd.f32 %v3524_v5, %v3521_v37 }
0x208d   : > { %v3526_v13 = vadd.f32 %v3524_v5, %v3522_v46  ;;  %v5453_v16 = vmul.f32 -1.442695, %v3525_v45  ;;  %v3655_v5 = vstv %s5468_s13  ;;  %s5467_s13 = sld [smem:[#allocation2 + $0x310]] }
0x208f   : > { %6682 = vpow2.f32 %v5453_v16  ;;  %v5454_v57 = vmul.f32 -1.442695, %v3526_v13  ;;  %v3639_v13 = vstv %s8100_s27  ;;  %v3624_v16 = vstv %s8102_s10  ;;  %s5456_s27 = sld [smem:[#allocation2 + $0x305]] }
0x2090   : > { %s5457_s10 = sld [smem:[#allocation2 + $0x306]] }
0x2091   : > { %6684 = vpow2.f32 %v5454_v57 }
0x2095   : > { %v6683_v48 = vpop.eup %6682 }
0x2096   : > { %v3533_v18 = vadd.f32 1.0, %v6683_v48  ;;  %v3632_v48 = vstv %s5462_s7  ;;  %s5459_s7 = sld [smem:[#allocation2 + $0x308]] }
0x2097   : > { %v6685_v63 = vpop.eup %6684 }
0x2098   : > { %v3534_v19 = vadd.f32 1.0, %v6685_v63  ;;  %6686 = vrcp.f32 %v3533_v18  ;;  %v3546_v27 = vand.u32 2147483648, %v3533_v18  ;;  %v3544_v20 = vand.u32 2147483647, %v3533_v18 }
0x2099   : > { %vm3540_vm13 = vweird.f32 %v3533_v18 }
0x209a   : > { %6688 = vrcp.f32 %v3534_v19  ;;  %v3547_v29 = vor.u32 1.1754944e-38, %v3546_v27  ;;  %vm3545_vm4 = vcmp.eq.f32.partialorder %v3544_v20, 8.507059e+37  ;;  %v3561_v33 = vand.u32 2147483648, %v3534_v19 }
0x209b   : > { %vm3555_vm0 = vweird.f32 %v3534_v19  ;;  %v3559_v44 = vand.u32 2147483647, %v3534_v19 }
0x209c   : > { %v3562_v54 = vor.u32 1.1754944e-38, %v3561_v33 }
0x209d   : > { %vm3560_vm8 = vcmp.eq.f32.partialorder %v3559_v44, 8.507059e+37 }
0x209e   : > { %v6687_v38 = vpop.eup %6686 }
0x209f   : > { %v3536_v23 = vmul.f32 %v6687_v38, %v3533_v18  ;;  %vm3541_vm1 = vweird.f32 %v6687_v38 }
0x20a0   : > { %v6689_v24 = vpop.eup %6688  ;;  %vm3542_vm9 = vmor %vm3540_vm13, %vm3541_vm1 }
0x20a1   : > { %v3537_v0 = vsub.f32 1.0, %v3536_v23  ;;  %v3551_v26 = vmul.f32 %v6689_v24, %v3534_v19  ;;  %vm3556_vm7 = vweird.f32 %v6689_v24  ;;  %v3616_v23 = vstv %s5458_s14  ;;  %s5463_s14 = sld [smem:[#allocation2 + $0x30c]] }
0x20a2   : > { %vm3557_vm12 = vmor %vm3555_vm0, %vm3556_vm7 }
0x20a3   : > { %v3538_v39 = vmul.f32 %v6687_v38, %v3537_v0  ;;  %v3552_v21 = vsub.f32 1.0, %v3551_v26 }
0x20a5   : > { %v3539_v43 = vadd.f32 %v6687_v38, %v3538_v39  ;;  %v3553_v15 = vmul.f32 %v6689_v24, %v3552_v21 }
0x20a7   : > { %v3543_v40 = vsel %vm3542_vm9, %v6687_v38, %v3539_v43  ;;  %v3554_v62 = vadd.f32 %v6689_v24, %v3553_v15  ;;  %vm8850_vm9 = vcmask 818176  }
0x20a8   : > { %v3548_v61 = vsel %vm3545_vm4, %v3547_v29, %v3543_v40  ;;  %vm8851_vm4 = vcmask 556032   ;;  %vm8852_vm7 = vmmov %vm8850_vm9 }
0x20a9   : > { %3567 = vperm.xlu1 %5735, %v3548_v61   ;;  %v3558_v22 = vsel %vm3557_vm12, %v6689_v24, %v3554_v62  ;;  %v3628_v62 = vstv %s5461_s11  ;;  %s5469_s11 = sld [smem:[#allocation2 + $0x312]]  ;;  %vm8853_vm0 = vmmov %vm8851_vm4  ;;  %vm8854_vm12 = vcmask 850944  }
0x20aa   : > { %v3563_v11 = vsel %vm3560_vm8, %v3562_v54, %v3558_v22  ;;  %vm8855_vm8 = vmmov %vm8854_vm12 }
0x20b1   : > { %3572 = vperm.xlu1 %5735, %v3563_v11  }
0x211b   : > { %v3568_v58 = vpop.permute.xlu1 %3567 }
0x211c   : > { %v8088_v17 = vmul.f32 %v3568_v58, %v8075_v52  ;;  %v3651_v58 = vstv %s5467_s13  ;;  %s8843_s13 = smov 68  }
0x2123   : > { %v3573_v34 = vpop.permute.xlu1 %3572 }
0x2124   : > { %v8091_v35 = vmul.f32 %v3573_v34, %v8079_v36 }
0x2126   : > { %v3577_v42 = vadd.f32 %v8091_v35, %v8088_v17  ;;  %v3585_v47 = vmax.f32 %v8088_v17, %v8091_v35 }
0x2128   : > { %v3578_v14 = vrot.slane %v3577_v42, 4  ;;  %v3586_v49 = vrot.slane %v3585_v47, 4 }
0x212a   : > { %v3579_v59 = vadd.f32 %v3578_v14, %v3577_v42  ;;  %v3587_v10 = vmax.f32 %v3585_v47, %v3586_v49 }
0x212c   : > { %v3580_v60 = vrot.slane %v3579_v59, 2  ;;  %v3588_v1 = vrot.slane %v3587_v10, 2 }
0x212e   : > { %v3581_v25 = vadd.f32 %v3580_v60, %v3579_v59  ;;  %v3589_v7 = vmax.f32 %v3587_v10, %v3588_v1 }
0x2130   : > { %v3590_v50 = vrot.slane %v3589_v7, 1  ;;  %v3582_v31 = vrot.slane %v3581_v25, 1 }
0x2132   : > { %v3591_v52 = vmax.f32 %v3589_v7, %v3590_v50  ;;  %v3583_v36 = vadd.f32 %v3582_v31, %v3581_v25  ;;  %v3608_v7 = vstv %s5456_s27  ;;  %s8844_s27 = smov 108  }
0x2134   : > { %3599 = vrot.lane.b32.xlu1 %v3591_v52, %s6848_s20  ;;  %v3584_v6 = vmul.f32 %v3583_v36, %v7330_v32  ;;  %v3612_v36 = vstv %s5457_s10  ;;  %s8845_s10 = smov 76  }
0x213c   : > { %3593 = vrot.lane.b32.xlu1 %v3584_v6, %s6848_s20 }
0x21a6   : > { %v3600_v3 = vpop.permute.xlu1 %3599 }
0x21a7   : > { %v8105_v12 = vsel %vm1841_vm11, 0.0, %v3600_v3  ;;  %v8108_v37 = vsel %vm1841_vm11, %v3600_v3, 0.0 }
0x21a8   : > { %v3649_v32 = vmul.f32 %v3647_v4, %v8108_v37  ;;  %v3656_v46 = vmul.f32 %v3655_v5, %v8105_v12  ;;  %v3648_v45 = vmul.f32 %v3647_v4, %v8105_v12  ;;  %v3640_v63 = vmul.f32 %v3639_v13, %v8105_v12 }
0x21a9   : > { %v3633_v38 = vmul.f32 %v3632_v48, %v8105_v12  ;;  %v3657_v0 = vmul.f32 %v3655_v5, %v8108_v37  ;;  %v3641_v26 = vmul.f32 %v3639_v13, %v8108_v37  ;;  %v3653_v42 = vmul.f32 %v3651_v58, %v8108_v37 }
0x21aa   : > { %3710 = vrot.lane.b32.xlu0 %v3649_v32, %s6805_s12  ;;  %3719 = vrot.lane.b32.xlu2 %v3656_v46, %s6805_s12  ;;  %v3652_v14 = vmul.f32 %v3651_v58, %v8105_v12 }
0x21ab   : > { %3708 = vrot.lane.b32.xlu1 %v3648_v45, %s6805_s12 }
0x21ae   : > { %v3594_v57 = vpop.permute.xlu1 %3593 }
0x21af   : > { %v8119_v18 = vsel %vm1841_vm11, %v3594_v57, 0.0  ;;  %v8134_v27 = vsel %vm1841_vm11, 0.0, %v3594_v57  ;;  %v3620_v57 = vstv %s5459_s7  ;;  %s8846_s7 = smov 116  }
0x21b0   : > { %v3626_v19 = vmul.f32 %v3624_v16, %v8119_v18  ;;  %v3618_v24 = vmul.f32 %v3616_v23, %v8119_v18  ;;  %v3617_v39 = vmul.f32 %v3616_v23, %v8134_v27  ;;  %v3625_v20 = vmul.f32 %v3624_v16, %v8134_v27 }
0x21b1   : > { %v3629_v33 = vmul.f32 %v3628_v62, %v8134_v27  ;;  %v3630_v44 = vmul.f32 %v3628_v62, %v8119_v18  ;;  %v3609_v52 = vmul.f32 %v3608_v7, %v8134_v27  ;;  %v3610_v31 = vmul.f32 %v3608_v7, %v8119_v18 }
0x21b2   : > { %3697 = vrot.lane.b32.xlu0 %v3640_v63, %s6805_s12  ;;  %3682 = vrot.lane.b32.xlu2 %v3626_v19, %s6805_s12  ;;  %v3614_v4 = vmul.f32 %v3612_v36, %v8119_v18  ;;  %v3613_v5 = vmul.f32 %v3612_v36, %v8134_v27  ;;  %v3622_v63 = vmul.f32 %v3620_v57, %v8119_v18 }
0x21b3   : > { %3690 = vrot.lane.b32.xlu1 %v3633_v38, %s6854_s29  ;;  %s5465_s29 = sld [smem:[#allocation2 + $0x30e]]  ;;  %v3621_v38 = vmul.f32 %v3620_v57, %v8134_v27 }
0x21b9   : > { %v3643_v21 = vstv %s5465_s29  ;;  %s5455_s29 = sld [smem:[#allocation2 + $0x304]] }
0x21ba   : > { %3671 = vrot.lane.b32.xlu0 %v3618_v24, %s6805_s12  ;;  %v3644_v15 = vmul.f32 %v3643_v21, %v8105_v12  ;;  %v3645_v34 = vmul.f32 %v3643_v21, %v8108_v37  ;;  %v3635_v24 = vstv %s5463_s14  ;;  %s8847_s14 = smov 84  }
0x21bb   : > { %3721 = vrot.lane.b32.xlu1 %v3657_v0, %s6805_s12 }
0x21c3   : > { %3699 = vrot.lane.b32.xlu1 %v3641_v26, %s6805_s12 }
0x21cb   : > { %3669 = vrot.lane.b32.xlu1 %v3617_v39, %s6805_s12 }
0x21d3   : > { %3680 = vrot.lane.b32.xlu1 %v3625_v20, %s6805_s12 }
0x2204   : > { %v3720_v47 = vpop.permute.xlu2 %3719 }
0x220c   : > { %v3683_v13 = vpop.permute.xlu2 %3682 }
0x220d   : > { %v3688_v23 = vadd.f32 %v3683_v13, %v3622_v63 }
0x221c   : > { %v3711_v43 = vpop.permute.xlu0 %3710 }
0x221d   : > { %v3709_v29 = vpop.permute.xlu1 %3708  ;;  %v3716_v59 = vadd.f32 %v3711_v43, %v3645_v34 }
0x221e   : > { %v3712_v40 = vsel %vm306_vm3, %v3709_v29, %v3711_v43 }
0x221f   : > { %v3715_v61 = vadd.f32 %v3712_v40, %v3644_v15  ;;  %v3637_v15 = vmul.f32 %v3635_v24, %v8108_v37  ;;  %v3636_v40 = vmul.f32 %v3635_v24, %v8105_v12 }
0x2221   : > { %3750 = vrot.lane.b32.xlu1 %v3715_v61, %s6827_s30 }
0x2224   : > { %v3698_v25 = vpop.permute.xlu0 %3697 }
0x2225   : > { %v3691_v22 = vpop.permute.xlu1 %3690 }
0x2226   : > { %v3693_v54 = vadd.f32 %v3691_v22, %v3629_v33  ;;  %v3694_v11 = vadd.f32 %v3691_v22, %v3630_v44 }
0x2228   : > { %3741 = vrot.lane.b32.xlu0 %v3694_v11, %s6827_s30  ;;  %3739 = vrot.lane.b32.xlu2 %v3693_v54, %s6827_s30 }
0x222c   : > { %v3672_v6 = vpop.permute.xlu0 %3671 }
0x222d   : > { %v3722_v49 = vpop.permute.xlu1 %3721  ;;  %v3677_v32 = vadd.f32 %v3672_v6, %v3614_v4  ;;  %v3789_v4 = vstv %s5469_s11  ;;  %s5494_s11 = sld [smem:[#allocation2 + $0x38f]] }
0x222e   : > { %v3723_v10 = vsel %vm306_vm3, %v3720_v47, %v3722_v49  ;;  %v3727_v60 = vadd.f32 %v3722_v49, %v3653_v42 }
0x222f   : > { %v3726_v1 = vadd.f32 %v3723_v10, %v3652_v14  ;;  %v3605_v14 = vstv %s5455_s29  ;;  %s8849_s29 = smov 92  }
0x2230   : > { %3752 = vrot.lane.b32.xlu2 %v3716_v59, %s6827_s30  ;;  %3772 = vrot.lane.b32.xlu1 %v3727_v60, %s6845_s5  ;;  %v3606_v60 = vmul.f32 %v3605_v14, %v8134_v27 }
0x2231   : > { %3770 = vrot.lane.b32.xlu0 %v3726_v1, %s6845_s5 }
0x2235   : > { %v3700_v50 = vpop.permute.xlu1 %3699 }
0x2236   : > { %v3701_v29 = vsel %vm306_vm3, %v3698_v25, %v3700_v50  ;;  %v3705_v61 = vadd.f32 %v3700_v50, %v3637_v15 }
0x2237   : > { %v3704_v33 = vadd.f32 %v3701_v29, %v3636_v40 }
0x2238   : > { %3660 = vrot.lane.b32.xlu2 %v3609_v52, %s6805_s12 }
0x2239   : > { %3662 = vrot.lane.b32.xlu0 %v3610_v31, %s6805_s12 }
0x223d   : > { %v3670_v3 = vpop.permute.xlu1 %3669 }
0x223e   : > { %v3673_v46 = vsel %vm306_vm3, %v3670_v3, %v3672_v6 }
0x223f   : > { %v3676_v45 = vadd.f32 %v3673_v46, %v3613_v5 }
0x2240   : > { %3732 = vrot.lane.b32.xlu2 %v3677_v32, %s6827_s30 }
0x2241   : > { %3730 = vrot.lane.b32.xlu1 %v3676_v45, %s6827_s30 }
0x2245   : > { %v3681_v16 = vpop.permute.xlu1 %3680 }
0x2246   : > { %v3684_v19 = vsel %vm306_vm3, %v3681_v16, %v3683_v13 }
0x2247   : > { %v3687_v0 = vadd.f32 %v3684_v19, %v3621_v38 }
0x2282   : > { %v3740_v48 = vpop.permute.xlu2 %3739 }
0x228a   : > { %v3753_v18 = vpop.permute.xlu2 %3752 }
0x228b   : > { %v3758_v44 = vadd.f32 %v3753_v18, %v3705_v61 }
0x2292   : > { %v3661_v42 = vpop.permute.xlu2 %3660 }
0x2293   : > { %v3751_v26 = vpop.permute.xlu1 %3750 }
0x2294   : > { %v3754_v62 = vsel %vm771_vm2, %v3751_v26, %v3753_v18 }
0x2295   : > { %v3757_v54 = vadd.f32 %v3754_v62, %v3704_v33 }
0x229a   : > { %v3742_v39 = vpop.permute.xlu0 %3741  ;;  %v3733_v49 = vpop.permute.xlu2 %3732 }
0x229b   : > { %v3743_v20 = vsel %vm771_vm2, %v3740_v48, %v3742_v39  ;;  %v3747_v21 = vadd.f32 %v3742_v39, %v3688_v23 }
0x229c   : > { %v3746_v43 = vadd.f32 %v3743_v20, %v3687_v0 }
0x229d   : > { %3763 = vrot.lane.b32.xlu1 %v3747_v21, %s6845_s5 }
0x229e   : > { %3761 = vrot.lane.b32.xlu0 %v3746_v43, %s6845_s5 }
0x22a2   : > { %v3773_v22 = vpop.permute.xlu1 %3772 }
0x22a3   : > { %v3778_v11 = vadd.f32 %v3773_v22, %v3758_v44  ;;  %v3771_v58 = vpop.permute.xlu0 %3770 }
0x22a4   : > { %v3774_v37 = vsel %vm1217_vm6, %v3771_v58, %v3773_v22  ;;  %v5472_v22 = vld [vmem:[%s8676_s2 + $0x70] sm:$0xff] }
0x22a5   : > { %v3777_v34 = vadd.f32 %v3774_v37, %v3757_v54 }
0x22a6   : > { %3783 = vrot.lane.b32.xlu0 %v3778_v11, %s6805_s12 }
0x22a7   : > { %3781 = vrot.lane.b32.xlu2 %v3777_v34, %s6805_s12 }
0x22ab   : > { %v3663_v47 = vpop.permute.xlu0 %3662 }
0x22ac   : > { %v3664_v10 = vsel %vm306_vm3, %v3661_v42, %v3663_v47 }
0x22ad   : > { %v3666_v7 = vadd.f32 %v3664_v10, %v3606_v60 }
0x22b3   : > { %v3731_v12 = vpop.permute.xlu1 %3730 }
0x22b4   : > { %v3734_v25 = vsel %vm771_vm2, %v3731_v12, %v3733_v49 }
0x22b5   : > { %v3736_v52 = vadd.f32 %v3734_v25, %v3666_v7 }
0x2301   : > { %v3782_v31 = vpop.permute.xlu2 %3781 }
0x230f   : > { %v3764_v1 = vpop.permute.xlu1 %3763 }
0x2310   : > { %v3762_v59 = vpop.permute.xlu0 %3761 }
0x2311   : > { %v3765_v50 = vsel %vm1217_vm6, %v3762_v59, %v3764_v1 }
0x2312   : > { %v3767_v36 = vadd.f32 %v3765_v50, %v3736_v52 }
0x2318   : > { %v3784_v6 = vpop.permute.xlu0 %3783 }
0x2319   : > { %v3785_v5 = vsel %vm306_vm3, %v3782_v31, %v3784_v6 }
0x231a   : > { %v3787_v3 = vadd.f32 %v3785_v5, %v3767_v36 }
0x231c   : > { %v3790_v32 = vadd.f32 %v3789_v4, %v3787_v3 }
0x231e   : > { %v5470_v46 = vmul.f32 -1.442695, %v3790_v32 }
0x2320   : > { %6690 = vpow2.f32 %v5470_v46 }
0x2326   : > { %v6691_v45 = vpop.eup %6690 }
0x2327   : > { %v3794_v13 = vadd.f32 1.0, %v6691_v45 }
0x2329   : > { %6692 = vrcp.f32 %v3794_v13  ;;  %v3806_v48 = vand.u32 2147483648, %v3794_v13  ;;  %v3804_v19 = vand.u32 2147483647, %v3794_v13  ;;  %vm3800_vm10 = vweird.f32 %v3794_v13 }
0x232b   : > { %v3807_v23 = vor.u32 1.1754944e-38, %v3806_v48  ;;  %vm3805_vm13 = vcmp.eq.f32.partialorder %v3804_v19, 8.507059e+37 }
0x232f   : > { %v6693_v27 = vpop.eup %6692 }
0x2330   : > { %v3796_v16 = vmul.f32 %v6693_v27, %v3794_v13  ;;  %vm3801_vm11 = vweird.f32 %v6693_v27 }
0x2331   : > { %vm3802_vm1 = vmor %vm3800_vm10, %vm3801_vm11  ;;  %vm8856_vm11 = vcmask 883712  }
0x2332   : > { %v3797_v57 = vsub.f32 1.0, %v3796_v16  ;;  %vm8857_vm10 = vmmov %vm8856_vm11 }
0x2334   : > { %v3798_v63 = vmul.f32 %v6693_v27, %v3797_v57 }
0x2336   : > { %v3799_v38 = vadd.f32 %v6693_v27, %v3798_v63 }
0x2338   : > { %v3803_v24 = vsel %vm3802_vm1, %v6693_v27, %v3799_v38  ;;  %vm8858_vm1 = vcmask 588800  }
0x2339   : > { %v3808_v0 = vsel %vm3805_vm13, %v3807_v23, %v3803_v24  ;;  %vm8859_vm13 = vmmov %vm8858_vm1 }
0x233a   : > { %v3810_v26 = vperm.slane %v3808_v0, 0 }
0x233c   : > { %v3811_v39 = vmul.f32 %v3810_v26, %v8088_v17  ;;  %v3812_v20 = vmul.f32 %v3810_v26, %v8091_v35 }
0x233e   : > { %v3813_v21 = vmul.f32 %v7418_v2, %v3811_v39  ;;  %v3814_v43 = vmul.f32 %v7418_v2, %v3812_v20 }
0x2340   : > { %v3815_v15 = vadd.f32 %v3813_v21, %v7426_v8  ;;  %v3816_v29 = vadd.f32 %v3814_v43, %v7423_v56 }
0x2342   : > { %v6308_v18 = vpack.i.bf16 %v3816_v29, %v3815_v15 }
0x2344   : > { %6309 = vrot.lane.b32.xlu1 %v6308_v18, %s6852_s23  ;;  %s8842_s23 = smov 100  }
0x23b6   : > { %v6310_v40 = vpop.permute.xlu1 %6309 }
0x23b7   : > { %v8188_v61 = vunpack.i.h.bf16 %v6310_v40  ;;  %v8190_v62 = vunpack.i.l.bf16 %v6310_v40 }
0x23b9   : > { %v3826_v17 = vsel %vm1828_vm14, 0.0, %v8188_v61  ;;  %v3828_v35 = vsel %vm1828_vm14, %v8188_v61, 0.0  ;;  %v3825_v2 = vsel %vm1828_vm14, 0.0, %v8190_v62  ;;  %v3827_v56 = vsel %vm1828_vm14, %v8190_v62, 0.0 }
0x23ba   : > { %v6318_v8 = vpack.i.bf16 %v3828_v35, %v3826_v17  ;;  %v6323_v33 = vpack.i.bf16 %v3827_v56, %v3825_v2  ;;  %v5476_v44 = vpack.c.bf16 %v8188_v61, %v8190_v62 }
0x23bc   : > { %6319 = vrot.lane.b32.xlu0 %v6318_v8, %s8842_s23  ;;  %6324 = vrot.lane.b32.xlu1 %v6323_v33, %s8843_s13 }
0x23bd   : > { %6314 = vrot.lane.b32.xlu2 %v6323_v33, %s8842_s23 }
0x23c4   : > { %6334 = vrot.lane.b32.xlu0 %v6323_v33, %s8820_s28  ;;  %6339 = vrot.lane.b32.xlu1 %v6318_v8, %s8820_s28 }
0x23c5   : > { %6329 = vrot.lane.b32.xlu2 %v6318_v8, %s8843_s13  ;;  %s5478_s13 = sld [smem:[#allocation2 + $0x380]] }
0x23cc   : > { %6349 = vrot.lane.b32.xlu0 %v6318_v8, %s6840_s8  ;;  %6354 = vrot.lane.b32.xlu1 %v6323_v33, %s8844_s27 }
0x23cd   : > { %6344 = vrot.lane.b32.xlu2 %v6323_v33, %s6840_s8  ;;  %s8848_s8 = smov 124  }
0x23d4   : > { %6364 = vrot.lane.b32.xlu0 %v6323_v33, %s8845_s10  ;;  %6369 = vrot.lane.b32.xlu1 %v6318_v8, %s8845_s10  ;;  %s5479_s10 = sld [smem:[#allocation2 + $0x381]] }
0x23d5   : > { %6359 = vrot.lane.b32.xlu2 %v6318_v8, %s8844_s27 }
0x23dc   : > { %6379 = vrot.lane.b32.xlu0 %v6318_v8, %s6827_s30  ;;  %6384 = vrot.lane.b32.xlu1 %v6323_v33, %s6838_s6 }
0x23dd   : > { %6374 = vrot.lane.b32.xlu2 %v6323_v33, %s6827_s30 }
0x23e4   : > { %6394 = vrot.lane.b32.xlu0 %v6323_v33, %s8846_s7  ;;  %6399 = vrot.lane.b32.xlu1 %v6318_v8, %s8846_s7 }
0x23e5   : > { %6389 = vrot.lane.b32.xlu2 %v6318_v8, %s6838_s6  ;;  %s8873_s6 = smov 12  }
0x23ec   : > { %6409 = vrot.lane.b32.xlu0 %v6318_v8, %s8847_s14  ;;  %6414 = vrot.lane.b32.xlu1 %v6323_v33, %s6805_s12 }
0x23ed   : > { %6404 = vrot.lane.b32.xlu2 %v6323_v33, %s8847_s14  ;;  %s5480_s14 = sld [smem:[#allocation2 + $0x382]] }
0x23f4   : > { %6424 = vrot.lane.b32.xlu0 %v6323_v33, %s6842_s22  ;;  %6429 = vrot.lane.b32.xlu1 %v6318_v8, %s6842_s22  ;;  %s5496_s22 = sld [smem:[#allocation2 + $0x391]] }
0x23f5   : > { %6419 = vrot.lane.b32.xlu2 %v6318_v8, %s6805_s12 }
0x23fc   : > { %6439 = vrot.lane.b32.xlu0 %v6318_v8, %s8848_s8  ;;  %6444 = vrot.lane.b32.xlu1 %v6323_v33, %s8849_s29 }
0x23fd   : > { %6434 = vrot.lane.b32.xlu2 %v6323_v33, %s8848_s8 }
0x2404   : > { %6454 = vrot.lane.b32.xlu0 %v6323_v33, %s6845_s5  ;;  %6459 = vrot.lane.b32.xlu1 %v6318_v8, %s6845_s5  ;;  %s5490_s5 = sld [smem:[#allocation2 + $0x38b]] }
0x2405   : > { %6449 = vrot.lane.b32.xlu2 %v6318_v8, %s8849_s29  ;;  %s5481_s29 = sld [smem:[#allocation2 + $0x383]] }
0x240d   : > { %4035 = vperm.xlu2 %6117, %v5472_v22  }
0x2417   : > { %v6315_v54 = vpop.permute.xlu2 %6314 }
0x2418   : > { %v6317_v37 = vunpack.i.h.bf16 %v6315_v54  ;;  %v6316_v34 = vunpack.i.l.bf16 %v6315_v54 }
0x241a   : > { %v3913_v25 = vsel %vm8850_vm9, %v6316_v34, %v6317_v37  ;;  %vm8860_vm9 = vcmask 621568  }
0x241f   : > { %v6330_v11 = vpop.permute.xlu2 %6329 }
0x2420   : > { %v6332_v42 = vunpack.i.h.bf16 %v6330_v11  ;;  %v6331_v47 = vunpack.i.l.bf16 %v6330_v11 }
0x2422   : > { %v4010_v7 = vsel %vm8851_vm4, %v6331_v47, %v6332_v42  ;;  %vm8861_vm4 = vmmov %vm8860_vm9 }
0x2427   : > { %v6345_v58 = vpop.permute.xlu2 %6344 }
0x2428   : > { %v6347_v57 = vunpack.i.h.bf16 %v6345_v58  ;;  %v6346_v48 = vunpack.i.l.bf16 %v6345_v58 }
0x242a   : > { %v3997_v15 = vsel %vm8858_vm1, %v6346_v48, %v6347_v57 }
0x242e   : > { %v6320_v12 = vpop.permute.xlu0 %6319  ;;  %v6325_v14 = vpop.permute.xlu1 %6324 }
0x242f   : > { %v6322_v49 = vunpack.i.h.bf16 %v6320_v12  ;;  %v6321_v59 = vunpack.i.l.bf16 %v6320_v12  ;;  %v6327_v10 = vunpack.i.h.bf16 %v6325_v14  ;;  %v6326_v60 = vunpack.i.l.bf16 %v6325_v14  ;;  %v6360_v1 = vpop.permute.xlu2 %6359 }
0x2430   : > { %v6362_v63 = vunpack.i.h.bf16 %v6360_v1  ;;  %v6361_v19 = vunpack.i.l.bf16 %v6360_v1 }
0x2431   : > { %v3914_v50 = vsel %vm8852_vm7, %v6321_v59, %v6322_v49  ;;  %v4009_v52 = vsel %vm8853_vm0, %v6326_v60, %v6327_v10  ;;  %vm8862_vm7 = vcmask 949248  }
0x2432   : > { %v4022_v31 = vpack.c.bf16 %v3914_v50, %v3913_v25  ;;  %v4030_v36 = vpack.c.bf16 %v4010_v7, %v4009_v52  ;;  %v3890_v43 = vsel %vm8857_vm10, %v6361_v19, %v6362_v63  ;;  %vm8863_vm0 = vmmov %vm8862_vm7  ;;  %vm8868_vm10 = vcmask 1014784  }
0x2433   : > { %vm8869_vm1 = vmmov %vm8868_vm10 }
0x2434   : > { %4045 = vmatpush.bf16.msrb.mxu3 %v4022_v31  ;;  %4058 = vmatpush.bf16.msra.mxu2 %v4030_v36 }
0x2436   : > { %v6335_v6 = vpop.permute.xlu0 %6334  ;;  %v6340_v4 = vpop.permute.xlu1 %6339 }
0x2437   : > { %v6337_v5 = vunpack.i.h.bf16 %v6335_v6  ;;  %v6336_v3 = vunpack.i.l.bf16 %v6335_v6  ;;  %v6342_v32 = vunpack.i.h.bf16 %v6340_v4  ;;  %v6341_v46 = vunpack.i.l.bf16 %v6340_v4  ;;  %v6375_v45 = vpop.permute.xlu2 %6374 }
0x2438   : > { %v6377_v37 = vunpack.i.h.bf16 %v6375_v45  ;;  %v6376_v34 = vunpack.i.l.bf16 %v6375_v45 }
0x2439   : > { %v3901_v13 = vsel %vm8854_vm12, %v6336_v3, %v6337_v5  ;;  %v3902_v27 = vsel %vm8855_vm8, %v6341_v46, %v6342_v32  ;;  %vm8866_vm8 = vcmask 719872  }
0x243a   : > { %v4021_v16 = vpack.c.bf16 %v3902_v27, %v3901_v13  ;;  %v3877_v1 = vsel %vm771_vm2, %v6376_v34, %v6377_v37 }
0x243c   : > { %4046 = vmatpush.bf16.msrb.mxu3 %v4021_v16 }
0x243e   : > { %v6350_v38 = vpop.permute.xlu0 %6349  ;;  %v6355_v23 = vpop.permute.xlu1 %6354 }
0x243f   : > { %v6352_v24 = vunpack.i.h.bf16 %v6350_v38  ;;  %v6351_v0 = vunpack.i.l.bf16 %v6350_v38  ;;  %v6357_v26 = vunpack.i.h.bf16 %v6355_v23  ;;  %v6356_v39 = vunpack.i.l.bf16 %v6355_v23  ;;  %v6390_v20 = vpop.permute.xlu2 %6389 }
0x2440   : > { %v6392_v42 = vunpack.i.h.bf16 %v6390_v20  ;;  %v6391_v47 = vunpack.i.l.bf16 %v6390_v20 }
0x2441   : > { %v3889_v21 = vsel %vm8856_vm11, %v6356_v39, %v6357_v26  ;;  %v3998_v29 = vsel %vm8859_vm13, %v6351_v0, %v6352_v24  ;;  %vm8867_vm11 = vmmov %vm8866_vm8  ;;  %vm8870_vm13 = vcmask 752640  }
0x2442   : > { %v4020_v18 = vpack.c.bf16 %v3890_v43, %v3889_v21  ;;  %v4029_v40 = vpack.c.bf16 %v3998_v29, %v3997_v15  ;;  %v3974_v50 = vsel %vm1245_vm15, %v6391_v47, %v6392_v42 }
0x2444   : > { %4047 = vmatpush.bf16.msrb.mxu3 %v4020_v18  ;;  %4059 = vmatpush.bf16.msra.mxu2 %v4029_v40 }
0x2446   : > { %v6365_v17 = vpop.permute.xlu0 %6364  ;;  %v6370_v35 = vpop.permute.xlu1 %6369 }
0x2447   : > { %v6367_v2 = vunpack.i.h.bf16 %v6365_v17  ;;  %v6366_v56 = vunpack.i.l.bf16 %v6365_v17  ;;  %v6372_v8 = vunpack.i.h.bf16 %v6370_v35  ;;  %v6371_v33 = vunpack.i.l.bf16 %v6370_v35  ;;  %v6405_v58 = vpop.permute.xlu2 %6404 }
0x2448   : > { %v6407_v16 = vunpack.i.h.bf16 %v6405_v58  ;;  %v6406_v57 = vunpack.i.l.bf16 %v6405_v58 }
0x2449   : > { %v3985_v22 = vsel %vm8860_vm9, %v6366_v56, %v6367_v2  ;;  %v3986_v54 = vsel %vm8861_vm4, %v6371_v33, %v6372_v8  ;;  %vm8871_vm9 = vmmov %vm8870_vm13 }
0x244a   : > { %v4028_v11 = vpack.c.bf16 %v3986_v54, %v3985_v22  ;;  %vm5473_vm4 = vmneg %vm1828_vm14 }
0x244c   : > { %4060 = vmatpush.bf16.msra.mxu2 %v4028_v11 }
0x244e   : > { %v6380_v12 = vpop.permute.xlu0 %6379  ;;  %v6385_v14 = vpop.permute.xlu1 %6384 }
0x244f   : > { %v6382_v49 = vunpack.i.h.bf16 %v6380_v12  ;;  %v6381_v59 = vunpack.i.l.bf16 %v6380_v12  ;;  %v6387_v10 = vunpack.i.h.bf16 %v6385_v14  ;;  %v6386_v60 = vunpack.i.l.bf16 %v6385_v14  ;;  %v6420_v36 = vpop.permute.xlu2 %6419 }
0x2450   : > { %v6422_v48 = vunpack.i.h.bf16 %v6420_v36  ;;  %v6421_v63 = vunpack.i.l.bf16 %v6420_v36 }
0x2451   : > { %v3878_v25 = vsel %vm771_vm2, %v6381_v59, %v6382_v49  ;;  %v3973_v7 = vsel %vm1245_vm15, %v6386_v60, %v6387_v10  ;;  %vm8864_vm15 = vcmask 687104   ;;  %v5471_v60 = vld [vmem:[%s8675_s1 + $0x70] sm:$0xff] }
0x2452   : > { %v4019_v52 = vpack.c.bf16 %v3878_v25, %v3877_v1  ;;  %v4027_v31 = vpack.c.bf16 %v3974_v50, %v3973_v7  ;;  %v3854_v21 = vsel %vm306_vm3, %v6421_v63, %v6422_v48  ;;  %v3961_v43 = vsel %vm8864_vm15, %v6406_v57, %v6407_v16  ;;  %vm8865_vm12 = vmmov %vm8864_vm15 }
0x2453   : > { %v4039_v36 = vunpack.c.l.b16 %v5471_v60 }
0x2454   : > { %4048 = vmatpush.bf16.msrb.mxu3 %v4019_v52  ;;  %4061 = vmatpush.bf16.msra.mxu2 %v4027_v31 }
0x2456   : > { %v6395_v6 = vpop.permute.xlu0 %6394  ;;  %v6400_v4 = vpop.permute.xlu1 %6399 }
0x2457   : > { %v6397_v5 = vunpack.i.h.bf16 %v6395_v6  ;;  %v6396_v3 = vunpack.i.l.bf16 %v6395_v6  ;;  %v6402_v32 = vunpack.i.h.bf16 %v6400_v4  ;;  %v6401_v46 = vunpack.i.l.bf16 %v6400_v4  ;;  %v6435_v39 = vpop.permute.xlu2 %6434 }
0x2458   : > { %v6437_v58 = vunpack.i.h.bf16 %v6435_v39  ;;  %v6436_v37 = vunpack.i.l.bf16 %v6435_v39 }
0x2459   : > { %v3865_v45 = vsel %vm8862_vm7, %v6396_v3, %v6397_v5  ;;  %v3866_v13 = vsel %vm8863_vm0, %v6401_v46, %v6402_v32  ;;  %vm5475_vm7 = vmpackc.low %vm5473_vm4, %vm5473_vm4  ;;  %v4041_v5 = vpack.c.b16 %v4039_v36, %v4039_v36  ;;  %v4040_v3 = vunpack.c.h.b16 %v5471_v60 }
0x245a   : > { %v4018_v27 = vpack.c.bf16 %v3866_v13, %v3865_v45  ;;  %v3841_v1 = vsel %vm8868_vm10, %v6436_v37, %v6437_v58 }
0x245b   : > { %v4042_v48 = vpack.c.b16 %v4040_v3, %v4040_v3 }
0x245c   : > { %4049 = vmatpush.bf16.msrb.mxu3 %v4018_v27 }
0x245e   : > { %v6410_v19 = vpop.permute.xlu0 %6409  ;;  %v6415_v38 = vpop.permute.xlu1 %6414 }
0x245f   : > { %v6412_v23 = vunpack.i.h.bf16 %v6410_v19  ;;  %v6411_v24 = vunpack.i.l.bf16 %v6410_v19  ;;  %v6417_v0 = vunpack.i.h.bf16 %v6415_v38  ;;  %v6416_v26 = vunpack.i.l.bf16 %v6415_v38  ;;  %v6450_v54 = vpop.permute.xlu2 %6449 }
0x2460   : > { %v6452_v34 = vunpack.i.h.bf16 %v6450_v54  ;;  %v6451_v42 = vunpack.i.l.bf16 %v6450_v54 }
0x2461   : > { %v3853_v20 = vsel %vm306_vm3, %v6416_v26, %v6417_v0  ;;  %v3962_v15 = vsel %vm8865_vm12, %v6411_v24, %v6412_v23 }
0x2462   : > { %v4017_v29 = vpack.c.bf16 %v3854_v21, %v3853_v20  ;;  %v4026_v18 = vpack.c.bf16 %v3962_v15, %v3961_v43  ;;  %v3938_v50 = vsel %vm8871_vm9, %v6451_v42, %v6452_v34  ;;  %v4086_v21 = vstv %s5478_s13  ;;  %s5492_s13 = sld [smem:[#allocation2 + $0x38d]] }
0x2463   : > { %v4089_v43 = vstv %s5479_s10  ;;  %s5488_s10 = sld [smem:[#allocation2 + $0x389]]  ;;  %vm8878_vm9 = vcmask 1014784  }
0x2464   : > { %4050 = vmatpush.bf16.msrb.mxu3 %v4017_v29  ;;  %4062 = vmatpush.bf16.msra.mxu2 %v4026_v18  ;;  %v4093_v18 = vstv %s5480_s14  ;;  %s5486_s14 = sld [smem:[#allocation2 + $0x387]]  ;;  %vm8879_vm4 = vmmov %vm8878_vm9 }
0x2466   : > { %v6425_v40 = vpop.permute.xlu0 %6424  ;;  %v6430_v17 = vpop.permute.xlu1 %6429 }
0x2467   : > { %v6427_v35 = vunpack.i.h.bf16 %v6425_v40  ;;  %v6426_v2 = vunpack.i.l.bf16 %v6425_v40  ;;  %v6432_v56 = vunpack.i.h.bf16 %v6430_v17  ;;  %v6431_v8 = vunpack.i.l.bf16 %v6430_v17  ;;  %v4036_v19 = vpop.permute.xlu2 %4035 }
0x2469   : > { %v3949_v33 = vsel %vm8866_vm8, %v6426_v2, %v6427_v35  ;;  %v3950_v22 = vsel %vm8867_vm11, %v6431_v8, %v6432_v56  ;;  %vm8874_vm11 = vcmask 97280  }
0x246a   : > { %v4025_v11 = vpack.c.bf16 %v3950_v22, %v3949_v33  ;;  %v4097_v33 = vstv %s5481_s29  ;;  %vm8875_vm10 = vmmov %vm8874_vm11  ;;  %s5493_s29 = sld [smem:[#allocation2 + $0x38e]] }
0x246c   : > { %4063 = vmatpush.bf16.msra.mxu2 %v4025_v11 }
0x246e   : > { %v6440_v47 = vpop.permute.xlu0 %6439  ;;  %v6445_v12 = vpop.permute.xlu1 %6444 }
0x246f   : > { %v6442_v14 = vunpack.i.h.bf16 %v6440_v47  ;;  %v6441_v49 = vunpack.i.l.bf16 %v6440_v47  ;;  %v6447_v59 = vunpack.i.h.bf16 %v6445_v12  ;;  %v6446_v10 = vunpack.i.l.bf16 %v6445_v12 }
0x2471   : > { %v3842_v25 = vsel %vm8869_vm1, %v6441_v49, %v6442_v14  ;;  %v3937_v7 = vsel %vm8870_vm13, %v6446_v10, %v6447_v59  ;;  %vm8876_vm1 = vmmov %vm8875_vm10 }
0x2472   : > { %v4016_v52 = vpack.c.bf16 %v3842_v25, %v3841_v1  ;;  %v4024_v31 = vpack.c.bf16 %v3938_v50, %v3937_v7  ;;  %vm8877_vm13 = vmmov %vm8876_vm1 }
0x2474   : > { %4051 = vmatpush.bf16.msrb.mxu3 %v4016_v52  ;;  %4064 = vmatpush.bf16.msra.mxu2 %v4024_v31 }
0x2476   : > { %v6455_v6 = vpop.permute.xlu0 %6454  ;;  %v6460_v4 = vpop.permute.xlu1 %6459 }
0x2477   : > { %v6457_v32 = vunpack.i.h.bf16 %v6455_v6  ;;  %v6456_v46 = vunpack.i.l.bf16 %v6455_v6  ;;  %v6462_v45 = vunpack.i.h.bf16 %v6460_v4  ;;  %v6461_v13 = vunpack.i.l.bf16 %v6460_v4 }
0x2478   : > { %5477 = vmatpush.bf16.msk.msrb.mxu3 %vm5475_vm7, %v5476_v44  ;;  %vm8880_vm7 = vmmov %vm8879_vm4 }
0x2479   : > { %v3925_v27 = vsel %vm1217_vm6, %v6456_v46, %v6457_v32  ;;  %v3926_v16 = vsel %vm1217_vm6, %v6461_v13, %v6462_v45  ;;  %vm8872_vm6 = vcmask 1046528  }
0x247a   : > { %v4023_v57 = vpack.c.bf16 %v3926_v16, %v3925_v27  ;;  %v4192_v27 = vstv %s5494_s11  ;;  %s5495_s11 = sld [smem:[#allocation2 + $0x390]] }
0x247b   : > { %4053 = vmatmul.bf16.vlgmr.msrb.gmra.mxu3 %v4041_v5 }
0x247c   : > { %4065 = vmatpush.bf16.msra.mxu2 %v4023_v57 }
0x247f   : > { %4066 = vmatmul.bf16.vlgmr.msra.gmra.mxu2 %v4042_v48 }
0x24fe   : > { %v4054_v63 = vpop.f32.mrf.mxu3 }
0x24ff   : > { %v4055_v38 = vadd.f32 %v4054_v63, %v4036_v19 }
0x2502   : > { %v4067_v23 = vpop.f32.mrf.mxu2 }
0x2503   : > { %v4068_v24 = vadd.f32 %v4067_v23, %v4055_v38  ;;  %v4200_v38 = vstv %s5496_s22  ;;  %s5491_s22 = sld [smem:[#allocation2 + $0x38c]] }
0x2505   : > { %vm4071_vm14 = vcmp.gt.f32.partialorder %v4068_v24, 0.0  ;;  %v4072_v0 = vmul.f32 0.01, %v4068_v24 }
0x2506   : > { %v4056_v26 = vpop.f32.mrf.mxu3 }
0x2507   : > { %v4073_v39 = vsel %vm4071_vm14, %v4068_v24, %v4072_v0  ;;  %v4184_v0 = vstv %s5492_s13  ;;  %s5485_s13 = sld [smem:[#allocation2 + $0x386]]  ;;  %vm8881_vm14 = vmmov %vm8879_vm4 }
0x2508   : > { %v4074_v61 = vmul.f32 %v7250_v28, %v4073_v39 }
0x250a   : > { %4075 = vadd.xlane.f32.xlu0 %v4074_v61  ;;  %v4069_v62 = vpop.f32.mrf.mxu2  ;;  %v4169_v61 = vstv %s5488_s10  ;;  %s5487_s10 = sld [smem:[#allocation2 + $0x388]] }
0x250b   : > { %v4161_v62 = vstv %s5486_s14  ;;  %s5483_s14 = sld [smem:[#allocation2 + $0x384]] }
0x257d   : > { %v4076_v44 = vpop.xlane.xlu0 %4075 }
0x257e   : > { %v4077_v20 = vmul.f32 0.03125, %v4076_v44 }
0x2580   : > { %v4079_v15 = vrot.slane %v4077_v20, 7  ;;  %v4082_v29 = vrot.slane %v4077_v20, 1  ;;  %v4090_v2 = vmul.f32 %v4089_v43, %v4077_v20 }
0x2582   : > { %v4081_v40 = vsel %vm358_vm5, 0.0, %v4079_v15  ;;  %v4084_v17 = vsel %vm8872_vm6, %v4082_v29, 0.0  ;;  %vm8882_vm6 = vmmov %vm8879_vm4 }
0x2583   : > { %v4087_v35 = vmul.f32 %v4086_v21, %v4081_v40  ;;  %v4094_v8 = vmul.f32 %v4093_v18, %v4084_v17 }
0x2585   : > { %v4091_v56 = vadd.f32 %v4090_v2, %v4087_v35 }
0x2587   : > { %v4095_v22 = vadd.f32 %v4094_v8, %v4091_v56 }
0x2589   : > { %v4098_v54 = vadd.f32 %v4097_v33, %v4095_v22 }
0x258b   : > { %v5482_v11 = vmul.f32 -1.442695, %v4098_v54 }
0x258d   : > { %6694 = vpow2.f32 %v5482_v11  ;;  %v4188_v11 = vstv %s5493_s29  ;;  %s8887_s29 = smov 98  }
0x2593   : > { %v6695_v58 = vpop.eup %6694 }
0x2594   : > { %v4102_v37 = vadd.f32 1.0, %v6695_v58 }
0x2596   : > { %6696 = vrcp.f32 %v4102_v37  ;;  %v4114_v12 = vand.u32 2147483648, %v4102_v37  ;;  %v4112_v49 = vand.u32 2147483647, %v4102_v37  ;;  %vm4108_vm15 = vweird.f32 %v4102_v37 }
0x2598   : > { %v4115_v10 = vor.u32 1.1754944e-38, %v4114_v12  ;;  %vm4113_vm8 = vcmp.eq.f32.partialorder %v4112_v49, 8.507059e+37  ;;  %v4196_v49 = vstv %s5495_s11  ;;  %s8888_s11 = smov 106  }
0x259c   : > { %v6697_v34 = vpop.eup %6696 }
0x259d   : > { %v4104_v42 = vmul.f32 %v6697_v34, %v4102_v37  ;;  %vm4109_vm0 = vweird.f32 %v6697_v34 }
0x259e   : > { %vm4110_vm12 = vmor %vm4108_vm15, %vm4109_vm0 }
0x259f   : > { %v4105_v47 = vsub.f32 1.0, %v4104_v42  ;;  %vm8883_vm0 = vmmov %vm8879_vm4 }
0x25a0   : > { %vm8884_vm15 = vmmov %vm8883_vm0 }
0x25a1   : > { %v4106_v14 = vmul.f32 %v6697_v34, %v4105_v47 }
0x25a3   : > { %v4107_v59 = vadd.f32 %v6697_v34, %v4106_v14 }
0x25a5   : > { %v4111_v60 = vsel %vm4110_vm12, %v6697_v34, %v4107_v59 }
0x25a6   : > { %v4116_v1 = vsel %vm4113_vm8, %v4115_v10, %v4111_v60 }
0x25a7   : > { %4120 = vperm.xlu1 %5735, %v4116_v1  }
0x2619   : > { %v4121_v25 = vpop.permute.xlu1 %4120 }
0x261a   : > { %v8275_v7 = vmul.f32 %v4121_v25, %v4073_v39 }
0x261c   : > { %v4124_v50 = vrot.slane %v8275_v7, 4 }
0x261e   : > { %v4125_v52 = vadd.f32 %v4124_v50, %v8275_v7  ;;  %v4132_v31 = vmax.f32 %v8275_v7, %v4124_v50 }
0x2620   : > { %v4126_v36 = vrot.slane %v4125_v52, 2  ;;  %v4133_v6 = vrot.slane %v4132_v31, 2 }
0x2622   : > { %v4127_v4 = vadd.f32 %v4126_v36, %v4125_v52  ;;  %v4134_v5 = vmax.f32 %v4132_v31, %v4133_v6  ;;  %v4157_v36 = vstv %s5485_s13  ;;  %v4180_v6 = vstv %s5491_s22  ;;  %s8891_s22 = smov 118   ;;  %s8893_s13 = smov 126  }
0x2624   : > { %v4135_v3 = vrot.slane %v4134_v5, 1  ;;  %v4128_v32 = vrot.slane %v4127_v4, 1 }
0x2626   : > { %v4136_v46 = vmax.f32 %v4134_v5, %v4135_v3  ;;  %v4129_v45 = vadd.f32 %v4128_v32, %v4127_v4 }
0x2628   : > { %4144 = vrot.lane.b32.xlu2 %v4136_v46, %s8873_s6  ;;  %v4130_v13 = vmul.f32 %v4129_v45, %v7167_v9  ;;  %v4177_v9 = vstv %s5490_s5  ;;  %s8321_s5 = sld [smem:[#allocation2 + $0x385]] }
0x262a   : > { %4138 = vrot.lane.b32.xlu1 %v4130_v13, %s8873_s6 }
0x262e   : > { %v4153_v59 = vstv %s8321_s5  ;;  %s8890_s5 = smov 110  }
0x2682   : > { %v4145_v16 = vpop.permute.xlu2 %4144 }
0x2683   : > { %v8284_v57 = vsel %vm8874_vm11, 0.0, %v4145_v16  ;;  %v8287_v48 = vsel %vm8875_vm10, %v4145_v16, 0.0 }
0x2684   : > { %v4193_v63 = vmul.f32 %v4192_v27, %v8284_v57  ;;  %v4194_v19 = vmul.f32 %v4192_v27, %v8287_v48  ;;  %v4178_v23 = vmul.f32 %v4177_v9, %v8284_v57  ;;  %v4201_v24 = vmul.f32 %v4200_v38, %v8284_v57 }
0x2685   : > { %v4202_v26 = vmul.f32 %v4200_v38, %v8287_v48  ;;  %v4186_v39 = vmul.f32 %v4184_v0, %v8287_v48  ;;  %v4185_v20 = vmul.f32 %v4184_v0, %v8284_v57  ;;  %v4190_v58 = vmul.f32 %v4188_v11, %v8287_v48 }
0x2686   : > { %4253 = vrot.lane.b32.xlu2 %v4193_v63, %s8848_s8  ;;  %4255 = vrot.lane.b32.xlu1 %v4194_v19, %s8848_s8  ;;  %v4189_v37 = vmul.f32 %v4188_v11, %v8284_v57  ;;  %v4198_v10 = vmul.f32 %v4196_v49, %v8287_v48  ;;  %v4197_v60 = vmul.f32 %v4196_v49, %v8284_v57 }
0x2687   : > { %v4182_v3 = vmul.f32 %v4180_v6, %v8287_v48  ;;  %v4181_v32 = vmul.f32 %v4180_v6, %v8284_v57 }
0x268e   : > { %4235 = vrot.lane.b32.xlu2 %v4178_v23, %s6848_s20  ;;  %4264 = vrot.lane.b32.xlu1 %v4201_v24, %s8848_s8  ;;  %s5489_s20 = sld [smem:[#allocation2 + $0x38a]]  ;;  %v4165_v23 = vstv %s5487_s10 }
0x268f   : > { %s5519_s10 = sld [smem:[#allocation2 + $0x40d]] }
0x2694   : > { %v4173_v35 = vstv %s5489_s20  ;;  %s5497_s20 = sld [smem:[#allocation2 + $0x392]] }
0x2696   : > { %4266 = vrot.lane.b32.xlu2 %v4202_v26, %s8848_s8  ;;  %4244 = vrot.lane.b32.xlu1 %v4186_v39, %s8848_s8 }
0x269c   : > { %v4139_v44 = vpop.permute.xlu1 %4138 }
0x269d   : > { %v8303_v21 = vsel %vm8876_vm1, 0.0, %v4139_v44  ;;  %v8311_v29 = vsel %vm8877_vm13, %v4139_v44, 0.0  ;;  %vm8885_vm1 = vcmask 130048  }
0x269e   : > { %4242 = vrot.lane.b32.xlu2 %v4185_v20, %s8848_s8  ;;  %v4170_v43 = vmul.f32 %v4169_v61, %v8303_v21  ;;  %v4162_v15 = vmul.f32 %v4161_v62, %v8303_v21  ;;  %v4163_v18 = vmul.f32 %v4161_v62, %v8311_v29  ;;  %v4171_v40 = vmul.f32 %v4169_v61, %v8311_v29  ;;  %vm8886_vm13 = vmmov %vm8885_vm1 }
0x269f   : > { %v4174_v2 = vmul.f32 %v4173_v35, %v8303_v21  ;;  %v4175_v56 = vmul.f32 %v4173_v35, %v8311_v29  ;;  %v4154_v50 = vmul.f32 %v4153_v59, %v8303_v21  ;;  %v4159_v5 = vmul.f32 %v4157_v36, %v8311_v29 }
0x26a0   : > { %4225 = vrot.lane.b32.xlu0 %v4170_v43, %s8848_s8  ;;  %4214 = vrot.lane.b32.xlu1 %v4162_v15, %s8848_s8  ;;  %v4155_v63 = vmul.f32 %v4153_v59, %v8311_v29  ;;  %v4158_v19 = vmul.f32 %v4157_v36, %v8303_v21  ;;  %v4167_v0 = vmul.f32 %v4165_v23, %v8311_v29 }
0x26a1   : > { %v4166_v39 = vmul.f32 %v4165_v23, %v8303_v21 }
0x26a6   : > { %4216 = vrot.lane.b32.xlu2 %v4163_v18, %s8848_s8 }
0x26a8   : > { %4227 = vrot.lane.b32.xlu1 %v4171_v40, %s8848_s8 }
0x26e0   : > { %v4254_v17 = vpop.permute.xlu2 %4253 }
0x26e8   : > { %v4236_v8 = vpop.permute.xlu2 %4235 }
0x26e9   : > { %v4238_v33 = vadd.f32 %v4236_v8, %v4174_v2  ;;  %v4239_v22 = vadd.f32 %v4236_v8, %v4175_v56 }
0x26eb   : > { %4284 = vrot.lane.b32.xlu2 %v4238_v33, %s6805_s12  ;;  %4286 = vrot.lane.b32.xlu1 %v4239_v22, %s6805_s12 }
0x26f0   : > { %v4267_v54 = vpop.permute.xlu2 %4266 }
0x26f1   : > { %v4272_v52 = vadd.f32 %v4267_v54, %v4198_v10 }
0x26f8   : > { %v4256_v34 = vpop.permute.xlu1 %4255  ;;  %v4243_v14 = vpop.permute.xlu2 %4242 }
0x26f9   : > { %v4257_v42 = vsel %vm8878_vm9, %v4254_v17, %v4256_v34  ;;  %v4261_v47 = vadd.f32 %v4256_v34, %v4190_v58  ;;  %v4150_v34 = vstv %s5483_s14  ;;  %vm8895_vm9 = vcmask 801792   ;;  %s5523_s14 = sld [smem:[#allocation2 + $0x411]] }
0x26fa   : > { %v4260_v12 = vadd.f32 %v4257_v42, %v4189_v37 }
0x26fb   : > { %4297 = vrot.lane.b32.xlu0 %v4261_v47, %s6805_s12 }
0x26fc   : > { %4295 = vrot.lane.b32.xlu2 %v4260_v12, %s6805_s12  ;;  %v4151_v12 = vmul.f32 %v4150_v34, %v8303_v21 }
0x2700   : > { %v4265_v1 = vpop.permute.xlu1 %4264  ;;  %v4217_v4 = vpop.permute.xlu2 %4216 }
0x2701   : > { %v4268_v25 = vsel %vm8879_vm4, %v4265_v1, %v4267_v54  ;;  %v4222_v45 = vadd.f32 %v4217_v4, %v4159_v5  ;;  %vm8896_vm4 = vcmask 818176  }
0x2702   : > { %v4271_v31 = vadd.f32 %v4268_v25, %v4197_v60 }
0x2703   : > { %4205 = vrot.lane.b32.xlu0 %v4154_v50, %s8848_s8 }
0x2704   : > { %4317 = vrot.lane.b32.xlu2 %v4272_v52, %s6827_s30  ;;  %4315 = vrot.lane.b32.xlu1 %v4271_v31, %s6827_s30  ;;  %v4334_v31 = vstv %s5497_s20  ;;  %s5505_s20 = sld [smem:[#allocation2 + $0x400]] }
0x2708   : > { %v4245_v46 = vpop.permute.xlu1 %4244 }
0x2709   : > { %v4246_v13 = vsel %vm8880_vm7, %v4243_v14, %v4245_v46  ;;  %v4250_v27 = vadd.f32 %v4245_v46, %v4182_v3  ;;  %vm8897_vm7 = vcmask 850944  }
0x270a   : > { %v4249_v16 = vadd.f32 %v4246_v13, %v4181_v32 }
0x270b   : > { %4277 = vrot.lane.b32.xlu0 %v4222_v45, %s6805_s12 }
0x270c   : > { %4207 = vrot.lane.b32.xlu1 %v4155_v63, %s8848_s8 }
0x2712   : > { %v4215_v9 = vpop.permute.xlu1 %4214  ;;  %v4226_v24 = vpop.permute.xlu0 %4225 }
0x2713   : > { %v4218_v38 = vsel %vm8881_vm14, %v4215_v9, %v4217_v4  ;;  %vm8898_vm14 = vcmask 834560  }
0x2714   : > { %v4221_v48 = vadd.f32 %v4218_v38, %v4158_v19 }
0x2716   : > { %4275 = vrot.lane.b32.xlu2 %v4221_v48, %s6805_s12 }
0x271a   : > { %v4228_v57 = vpop.permute.xlu1 %4227 }
0x271b   : > { %v4229_v26 = vsel %vm8882_vm6, %v4226_v24, %v4228_v57  ;;  %v4233_v61 = vadd.f32 %v4228_v57, %v4167_v0  ;;  %vm8899_vm6 = vcmask 883712  }
0x271c   : > { %v4232_v62 = vadd.f32 %v4229_v26, %v4166_v39 }
0x2745   : > { %v4285_v44 = vpop.permute.xlu2 %4284 }
0x2756   : > { %v4296_v40 = vpop.permute.xlu2 %4295 }
0x275d   : > { %v4287_v20 = vpop.permute.xlu1 %4286 }
0x275e   : > { %v4288_v43 = vsel %vm306_vm3, %v4285_v44, %v4287_v20  ;;  %v4292_v15 = vadd.f32 %v4287_v20, %v4233_v61  ;;  %v4318_v29 = vpop.permute.xlu2 %4317 }
0x275f   : > { %v4291_v18 = vadd.f32 %v4288_v43, %v4232_v62 }
0x2760   : > { %4308 = vrot.lane.b32.xlu2 %v4292_v15, %s6827_s30 }
0x2761   : > { %4306 = vrot.lane.b32.xlu1 %v4291_v18, %s6827_s30 }
0x276d   : > { %v4298_v17 = vpop.permute.xlu0 %4297 }
0x276e   : > { %v4303_v35 = vadd.f32 %v4298_v17, %v4250_v27  ;;  %v4299_v56 = vsel %vm306_vm3, %v4296_v40, %v4298_v17 }
0x276f   : > { %v4302_v8 = vadd.f32 %v4299_v56, %v4249_v16 }
0x2770   : > { %v4323_v2 = vadd.f32 %v4318_v29, %v4303_v35  ;;  %v4276_v37 = vpop.permute.xlu2 %4275 }
0x2772   : > { %4328 = vrot.lane.b32.xlu1 %v4323_v2, %s8848_s8 }
0x2775   : > { %v4206_v11 = vpop.permute.xlu0 %4205 }
0x2776   : > { %v4316_v33 = vpop.permute.xlu1 %4315 }
0x2777   : > { %v4319_v22 = vsel %vm771_vm2, %v4316_v33, %v4318_v29 }
0x2778   : > { %v4322_v54 = vadd.f32 %v4319_v22, %v4302_v8 }
0x277a   : > { %4326 = vrot.lane.b32.xlu0 %v4322_v54, %s8848_s8 }
0x277d   : > { %v4278_v47 = vpop.permute.xlu0 %4277 }
0x277e   : > { %v4208_v58 = vpop.permute.xlu1 %4207  ;;  %v4279_v10 = vsel %vm306_vm3, %v4276_v37, %v4278_v47 }
0x277f   : > { %v4209_v42 = vsel %vm8883_vm0, %v4206_v11, %v4208_v58  ;;  %vm8900_vm0 = vcmask 867328  }
0x2780   : > { %v4211_v49 = vadd.f32 %v4209_v42, %v4151_v12 }
0x2782   : > { %v4281_v1 = vadd.f32 %v4279_v10, %v4211_v49 }
0x27ba   : > { %v4309_v59 = vpop.permute.xlu2 %4308 }
0x27d3   : > { %v4307_v14 = vpop.permute.xlu1 %4306 }
0x27d4   : > { %v4310_v60 = vsel %vm771_vm2, %v4307_v14, %v4309_v59 }
0x27d5   : > { %v4312_v25 = vadd.f32 %v4310_v60, %v4281_v1 }
0x27e4   : > { %v4329_v50 = vpop.permute.xlu1 %4328 }
0x27ec   : > { %v4327_v52 = vpop.permute.xlu0 %4326 }
0x27ed   : > { %v4330_v36 = vsel %vm8884_vm15, %v4327_v52, %v4329_v50  ;;  %vm8901_vm15 = vcmask 900096  }
0x27ee   : > { %v4332_v6 = vadd.f32 %v4330_v36, %v4312_v25 }
0x27f0   : > { %v4335_v4 = vadd.f32 %v4334_v31, %v4332_v6 }
0x27f2   : > { %v5498_v5 = vmul.f32 -1.442695, %v4335_v4 }
0x27f4   : > { %6698 = vpow2.f32 %v5498_v5 }
0x27fa   : > { %v6699_v21 = vpop.eup %6698 }
0x27fb   : > { %v4339_v3 = vadd.f32 1.0, %v6699_v21 }
0x27fd   : > { %6700 = vrcp.f32 %v4339_v3  ;;  %v4351_v13 = vand.u32 2147483648, %v4339_v3  ;;  %v4349_v16 = vand.u32 2147483647, %v4339_v3  ;;  %vm4345_vm8 = vweird.f32 %v4339_v3 }
0x27ff   : > { %v4352_v19 = vor.u32 1.1754944e-38, %v4351_v13  ;;  %vm4350_vm10 = vcmp.eq.f32.partialorder %v4349_v16, 8.507059e+37 }
0x2803   : > { %v6701_v32 = vpop.eup %6700 }
0x2804   : > { %v4341_v46 = vmul.f32 %v6701_v32, %v4339_v3  ;;  %vm4346_vm12 = vweird.f32 %v6701_v32 }
0x2805   : > { %vm4347_vm11 = vmor %vm4345_vm8, %vm4346_vm12  ;;  %vm8902_vm12 = vcmask 949248   ;;  %vm8903_vm8 = vcmask 932864  }
0x2806   : > { %v4342_v45 = vsub.f32 1.0, %v4341_v46 }
0x2808   : > { %v4343_v27 = vmul.f32 %v6701_v32, %v4342_v45 }
0x280a   : > { %v4344_v63 = vadd.f32 %v6701_v32, %v4343_v27 }
0x280c   : > { %v4348_v9 = vsel %vm4347_vm11, %v6701_v32, %v4344_v63  ;;  %vm8905_vm11 = vcmask 998400  }
0x280d   : > { %v4353_v38 = vsel %vm4350_vm10, %v4352_v19, %v4348_v9  ;;  %vm8906_vm10 = vcmask 1014784  }
0x280e   : > { %v4355_v48 = vperm.slane %v4353_v38, 0 }
0x2810   : > { %v4356_v57 = vmul.f32 %v4355_v48, %v8275_v7 }
0x2812   : > { %v4357_v23 = vmul.f32 %v7250_v28, %v4356_v57  ;;  %v5500_v28 = vld [vmem:[%s8676_s2 + $0x80] sm:$0xf] }
0x2814   : > { %v4358_v24 = vadd.f32 %v4357_v23, %v7253_v30 }
0x2816   : > { %4360 = vrot.lane.b32.xlu2 %v4358_v24, %s6851_s9  ;;  %s8889_s9 = smov 102  }
0x2870   : > { %v8365_v0 = vpop.permute.xlu2 %4360 }
0x2871   : > { %v4363_v26 = vsel %vm8885_vm1, 0.0, %v8365_v0  ;;  %v4364_v39 = vsel %vm8886_vm13, %v8365_v0, 0.0  ;;  %vm5501_vm13 = vmneg %vm8885_vm1  ;;  %vm8914_vm1 = vcmask 48128  }
0x2872   : > { %v6473_v61 = vpack.i.bf16 %v4364_v39, %v4363_v26 }
0x2874   : > { %6474 = vrot.lane.b32.xlu2 %v6473_v61, %s8820_s28  ;;  %6469 = vrot.lane.b32.xlu1 %v6473_v61, %s8887_s29  ;;  %s8892_s28 = smov 114   ;;  %s5506_s29 = sld [smem:[#allocation2 + $0x401]] }
0x2875   : > { %6464 = vrot.lane.b32.xlu0 %v6473_v61, %s8842_s23  ;;  %s8894_s23 = smov 122  }
0x287c   : > { %6489 = vrot.lane.b32.xlu2 %v6473_v61, %s8888_s11  ;;  %6484 = vrot.lane.b32.xlu1 %v6473_v61, %s8844_s27  ;;  %s5507_s11 = sld [smem:[#allocation2 + $0x402]] }
0x287d   : > { %6479 = vrot.lane.b32.xlu0 %v6473_v61, %s8889_s9  ;;  %s5508_s9 = sld [smem:[#allocation2 + $0x403]] }
0x287e   : > { %s5521_s27 = sld [smem:[#allocation2 + $0x40f]] }
0x2884   : > { %6504 = vrot.lane.b32.xlu2 %v6473_v61, %s8846_s7  ;;  %6499 = vrot.lane.b32.xlu1 %v6473_v61, %s8890_s5  ;;  %s8913_s5 = smov 6  }
0x2885   : > { %6494 = vrot.lane.b32.xlu0 %v6473_v61, %s6827_s30  ;;  %s5517_s30 = sld [smem:[#allocation2 + $0x40b]] }
0x288c   : > { %6519 = vrot.lane.b32.xlu2 %v6473_v61, %s8891_s22  ;;  %6514 = vrot.lane.b32.xlu1 %v6473_v61, %s6805_s12 }
0x288d   : > { %6509 = vrot.lane.b32.xlu0 %v6473_v61, %s8892_s28 }
0x2894   : > { %6534 = vrot.lane.b32.xlu2 %v6473_v61, %s8893_s13  ;;  %6529 = vrot.lane.b32.xlu1 %v6473_v61, %s8894_s23 }
0x2895   : > { %6524 = vrot.lane.b32.xlu0 %v6473_v61, %s8848_s8 }
0x289d   : > { %4471 = vperm.xlu0 %5736, %v5500_v28  }
0x28ce   : > { %v6475_v30 = vpop.permute.xlu2 %6474 }
0x28cf   : > { %v6477_v29 = vunpack.i.h.bf16 %v6475_v30  ;;  %v6476_v2 = vunpack.i.l.bf16 %v6475_v30 }
0x28d1   : > { %v4437_v42 = vsel %vm8897_vm7, %v6476_v2, %v6477_v29 }
0x28d6   : > { %v6490_v62 = vpop.permute.xlu2 %6489 }
0x28d7   : > { %v6492_v37 = vunpack.i.h.bf16 %v6490_v62  ;;  %v6491_v34 = vunpack.i.l.bf16 %v6490_v62 }
0x28d9   : > { %v4431_v59 = vsel %vm8900_vm0, %v6491_v34, %v6492_v37  ;;  %v4506_v37 = vstv %s5506_s29  ;;  %vm8910_vm0 = vcmask 1042432   ;;  %s5515_s29 = sld [smem:[#allocation2 + $0x409]] }
0x28de   : > { %v6505_v58 = vpop.permute.xlu2 %6504 }
0x28df   : > { %v6507_v5 = vunpack.i.h.bf16 %v6505_v58  ;;  %v6506_v21 = vunpack.i.l.bf16 %v6505_v58  ;;  %v4503_v58 = vstv %s5505_s20  ;;  %s5513_s20 = sld [smem:[#allocation2 + $0x407]] }
0x28e1   : > { %v4401_v19 = vsel %vm8902_vm12, %v6506_v21, %v6507_v5 }
0x28e6   : > { %v6470_v7 = vpop.permute.xlu1 %6469  ;;  %v6520_v6 = vpop.permute.xlu2 %6519 }
0x28e7   : > { %v6472_v44 = vunpack.i.h.bf16 %v6470_v7  ;;  %v6471_v20 = vunpack.i.l.bf16 %v6470_v7  ;;  %v6465_v43 = vpop.permute.xlu0 %6464  ;;  %v6522_v16 = vunpack.i.h.bf16 %v6520_v6  ;;  %v6521_v63 = vunpack.i.l.bf16 %v6520_v6 }
0x28e8   : > { %v6467_v15 = vunpack.i.h.bf16 %v6465_v43  ;;  %v6466_v18 = vunpack.i.l.bf16 %v6465_v43 }
0x28e9   : > { %v4455_v40 = vsel %vm8895_vm9, %v6471_v20, %v6472_v44  ;;  %vm8907_vm9 = vcmask 1031168  }
0x28ea   : > { %v4449_v17 = vsel %vm8896_vm4, %v6466_v18, %v6467_v15  ;;  %vm8908_vm4 = vmmov 1  }
0x28eb   : > { %v4466_v35 = vpack.c.bf16 %v4455_v40, %v4449_v17  ;;  %vm5502_vm7 = vmpackc.low %vm8908_vm4, %vm5501_vm13  ;;  %v5499_v17 = vld [vmem:[%s8675_s1 + $0x80] sm:$0x3] }
0x28ec   : > { %vm8915_vm13 = vmmov %vm8914_vm1 }
0x28ed   : > { %4474 = vmatpush.bf16.msra.mxu0 %v4466_v35  ;;  %vm8917_vm4 = vmmov %vm8914_vm1 }
0x28ee   : > { %v6485_v56 = vpop.permute.xlu1 %6484  ;;  %v6535_v57 = vpop.permute.xlu2 %6534 }
0x28ef   : > { %v6480_v8 = vpop.permute.xlu0 %6479  ;;  %v6487_v33 = vunpack.i.h.bf16 %v6485_v56  ;;  %v6486_v22 = vunpack.i.l.bf16 %v6485_v56  ;;  %v6537_v30 = vunpack.i.h.bf16 %v6535_v57  ;;  %v6536_v7 = vunpack.i.l.bf16 %v6535_v57 }
0x28f0   : > { %v6482_v54 = vunpack.i.h.bf16 %v6480_v8  ;;  %v6481_v11 = vunpack.i.l.bf16 %v6480_v8 }
0x28f1   : > { %v4425_v14 = vsel %vm8899_vm6, %v6486_v22, %v6487_v33  ;;  %v4371_v18 = vsel %vm8907_vm9, %v6536_v7, %v6537_v30  ;;  %vm8909_vm6 = vcmask 1043456   ;;  %vm8916_vm9 = vmmov %vm8914_vm1 }
0x28f2   : > { %v4443_v47 = vsel %vm8898_vm14, %v6481_v11, %v6482_v54  ;;  %v4464_v25 = vpack.c.bf16 %v4431_v59, %v4425_v14  ;;  %v5503_v40 = vpack.c.bf16 %v4371_v18, %v8365_v0 }
0x28f3   : > { %v4465_v12 = vpack.c.bf16 %v4443_v47, %v4437_v42  ;;  %v4510_v47 = vstv %s5507_s11  ;;  %s5516_s11 = sld [smem:[#allocation2 + $0x40a]] }
0x28f5   : > { %4475 = vmatpush.bf16.msra.mxu0 %v4465_v12 }
0x28f6   : > { %v6500_v49 = vpop.permute.xlu1 %6499 }
0x28f7   : > { %v6502_v10 = vunpack.i.h.bf16 %v6500_v49  ;;  %v6501_v60 = vunpack.i.l.bf16 %v6500_v49  ;;  %v6495_v1 = vpop.permute.xlu0 %6494 }
0x28f8   : > { %v6497_v50 = vunpack.i.h.bf16 %v6495_v1  ;;  %v6496_v52 = vunpack.i.l.bf16 %v6495_v1  ;;  %v4514_v1 = vstv %s5508_s9  ;;  %s5520_s9 = sld [smem:[#allocation2 + $0x40e]] }
0x28f9   : > { %4476 = vmatpush.bf16.msra.mxu0 %v4464_v25  ;;  %v4419_v31 = vsel %vm8901_vm15, %v6501_v60, %v6502_v10 }
0x28fa   : > { %v4413_v36 = vsel %vm771_vm2, %v6496_v52, %v6497_v50  ;;  %vm8904_vm2 = vcmask 965632  }
0x28fb   : > { %v4463_v4 = vpack.c.bf16 %v4419_v31, %v4413_v36  ;;  %v4395_v24 = vsel %vm8904_vm2, %v6521_v63, %v6522_v16 }
0x28fd   : > { %4477 = vmatpush.bf16.msra.mxu0 %v4463_v4 }
0x28fe   : > { %v6515_v3 = vpop.permute.xlu1 %6514 }
0x28ff   : > { %v6510_v32 = vpop.permute.xlu0 %6509  ;;  %v6517_v46 = vunpack.i.h.bf16 %v6515_v3  ;;  %v6516_v45 = vunpack.i.l.bf16 %v6515_v3 }
0x2900   : > { %v6512_v13 = vunpack.i.h.bf16 %v6510_v32  ;;  %v6511_v27 = vunpack.i.l.bf16 %v6510_v32 }
0x2901   : > { %v4389_v48 = vsel %vm306_vm3, %v6516_v45, %v6517_v46 }
0x2902   : > { %v4407_v9 = vsel %vm8903_vm8, %v6511_v27, %v6512_v13  ;;  %v4461_v28 = vpack.c.bf16 %v4395_v24, %v4389_v48 }
0x2903   : > { %v4462_v38 = vpack.c.bf16 %v4407_v9, %v4401_v19 }
0x2905   : > { %4478 = vmatpush.bf16.msra.mxu0 %v4462_v38 }
0x2906   : > { %v6530_v23 = vpop.permute.xlu1 %6529 }
0x2907   : > { %v6532_v26 = vunpack.i.h.bf16 %v6530_v23  ;;  %v6531_v39 = vunpack.i.l.bf16 %v6530_v23  ;;  %v6525_v61 = vpop.permute.xlu0 %6524 }
0x2908   : > { %v6527_v62 = vunpack.i.h.bf16 %v6525_v61  ;;  %v6526_v44 = vunpack.i.l.bf16 %v6525_v61 }
0x2909   : > { %4479 = vmatpush.bf16.msra.mxu0 %v4461_v28  ;;  %v4383_v20 = vsel %vm8905_vm11, %v6531_v39, %v6532_v26  ;;  %vm8911_vm11 = vmmov %vm8909_vm6 }
0x290a   : > { %v4377_v43 = vsel %vm8906_vm10, %v6526_v44, %v6527_v62  ;;  %vm8912_vm10 = vmmov %vm8909_vm6 }
0x290b   : > { %v4460_v15 = vpack.c.bf16 %v4383_v20, %v4377_v43  ;;  %v4611_v20 = vstv %s5521_s27  ;;  %v4603_v43 = vstv %s5519_s10  ;;  %s5522_s27 = sld [smem:[#allocation2 + $0x410]] }
0x290c   : > { %s5512_s10 = sld [smem:[#allocation2 + $0x406]] }
0x290d   : > { %4480 = vmatpush.bf16.msra.mxu0 %v4460_v15 }
0x290f   : > { %v4472_v35 = vpop.permute.xlu0 %4471 }
0x2911   : > { %5504 = vmatpush.bf16.msk.msra.mxu0 %vm5502_vm7, %v5503_v40  ;;  %vm8918_vm7 = vcmask 1031168  }
0x2914   : > { %4482 = vmatmul.bf16.vlgmr.msra.gmra.mxu0 %v5499_v17 }
0x2991   : > { %v4483_v29 = vpop.f32.mrf.mxu0 }
0x2992   : > { %v4484_v2 = vadd.f32 %v4483_v29, %v4472_v35 }
0x2994   : > { %vm4487_vm14 = vcmp.gt.f32.partialorder %v4484_v2, 0.0  ;;  %v4488_v56 = vmul.f32 0.01, %v4484_v2 }
0x2996   : > { %v4489_v8 = vsel %vm4487_vm14, %v4484_v2, %v4488_v56  ;;  %v4619_v2 = vstv %s5523_s14  ;;  %vm8919_vm14 = vmmov %vm8918_vm7  ;;  %s5514_s14 = sld [smem:[#allocation2 + $0x408]] }
0x2997   : > { %v4490_v33 = vmul.f32 %v7103_v51, %v4489_v8 }
0x2999   : > { %v4491_v22 = vsel %vm8909_vm6, %v4490_v33, 0.0  ;;  %v4485_v54 = vpop.f32.mrf.mxu0  ;;  %vm8920_vm6 = vmmov %vm8918_vm7 }
0x299a   : > { %4492 = vadd.xlane.f32.xlu1 %v4491_v22 }
0x2a0d   : > { %v4493_v0 = vpop.xlane.xlu1 %4492 }
0x2a0e   : > { %v4494_v11 = vmul.f32 0.015625, %v4493_v0 }
0x2a10   : > { %v4496_v34 = vrot.slane %v4494_v11, 7  ;;  %v4499_v42 = vrot.slane %v4494_v11, 1  ;;  %v4507_v59 = vmul.f32 %v4506_v37, %v4494_v11  ;;  %v4580_v11 = vstv %s5513_s20  ;;  %s5510_s20 = sld [smem:[#allocation2 + $0x404]] }
0x2a12   : > { %v4498_v12 = vsel %vm358_vm5, 0.0, %v4496_v34  ;;  %v4501_v14 = vsel %vm8910_vm0, %v4499_v42, 0.0  ;;  %v4588_v42 = vstv %s5515_s29  ;;  %vm8921_vm0 = vmmov %vm8920_vm6  ;;  %s5524_s29 = sld [smem:[#allocation2 + $0x412]] }
0x2a13   : > { %v4504_v49 = vmul.f32 %v4503_v58, %v4498_v12  ;;  %v4511_v60 = vmul.f32 %v4510_v47, %v4501_v14 }
0x2a15   : > { %v4508_v10 = vadd.f32 %v4507_v59, %v4504_v49 }
0x2a17   : > { %v4512_v25 = vadd.f32 %v4511_v60, %v4508_v10 }
0x2a19   : > { %v4515_v50 = vadd.f32 %v4514_v1, %v4512_v25 }
0x2a1b   : > { %v5509_v52 = vmul.f32 -1.442695, %v4515_v50 }
0x2a1d   : > { %6702 = vpow2.f32 %v5509_v52 }
0x2a23   : > { %v6703_v31 = vpop.eup %6702 }
0x2a24   : > { %v4519_v36 = vadd.f32 1.0, %v6703_v31 }
0x2a26   : > { %6704 = vrcp.f32 %v4519_v36  ;;  %v4531_v21 = vand.u32 2147483648, %v4519_v36  ;;  %v4529_v32 = vand.u32 2147483647, %v4519_v36  ;;  %vm4525_vm12 = vweird.f32 %v4519_v36 }
0x2a28   : > { %v4532_v45 = vor.u32 1.1754944e-38, %v4531_v21  ;;  %vm4530_vm2 = vcmp.eq.f32.partialorder %v4529_v32, 8.507059e+37 }
0x2a2c   : > { %v6705_v6 = vpop.eup %6704 }
0x2a2d   : > { %v4521_v4 = vmul.f32 %v6705_v6, %v4519_v36  ;;  %vm4526_vm15 = vweird.f32 %v6705_v6 }
0x2a2e   : > { %vm4527_vm8 = vmor %vm4525_vm12, %vm4526_vm15  ;;  %vm8923_vm12 = vcmask 1014784  }
0x2a2f   : > { %v4522_v5 = vsub.f32 1.0, %v4521_v4  ;;  %vm8922_vm15 = vmmov %vm8921_vm0 }
0x2a31   : > { %v4523_v3 = vmul.f32 %v6705_v6, %v4522_v5 }
0x2a33   : > { %v4524_v46 = vadd.f32 %v6705_v6, %v4523_v3 }
0x2a35   : > { %v4528_v13 = vsel %vm4527_vm8, %v6705_v6, %v4524_v46  ;;  %v4592_v6 = vstv %s5516_s11  ;;  %v4607_v46 = vstv %s5520_s9  ;;  %vm8924_vm8 = vmmov %vm8923_vm12  ;;  %s8931_s11 = smov 119   ;;  %s8932_s9 = smov 115  }
0x2a36   : > { %v4533_v27 = vsel %vm4530_vm2, %v4532_v45, %v4528_v13  ;;  %v4615_v45 = vstv %s5522_s27  ;;  %vm8925_vm2 = vmmov %vm8921_vm0  ;;  %s8933_s27 = smov 113  }
0x2a37   : > { %4537 = vperm.xlu2 %6117, %v4533_v27  }
0x2a91   : > { %v4538_v16 = vpop.permute.xlu2 %4537 }
0x2a92   : > { %v8414_v63 = vmul.f32 %v4538_v16, %v4489_v8 }
0x2a94   : > { %v4541_v19 = vsel %vm8911_vm11, %v8414_v63, 0.0  ;;  %v4549_v9 = vsel %vm8912_vm10, %v8414_v63, -inf  ;;  %vm8926_vm11 = vmmov %vm8924_vm8 }
0x2a95   : > { %v4542_v38 = vrot.slane %v4541_v19, 4  ;;  %v4550_v48 = vrot.slane %v4549_v9, 4  ;;  %vm8927_vm10 = vmmov %vm8921_vm0 }
0x2a97   : > { %v4543_v57 = vadd.f32 %v4542_v38, %v4541_v19  ;;  %v4551_v23 = vmax.f32 %v4549_v9, %v4550_v48 }
0x2a99   : > { %v4544_v24 = vrot.slane %v4543_v57, 2  ;;  %v4552_v26 = vrot.slane %v4551_v23, 2 }
0x2a9b   : > { %v4545_v39 = vadd.f32 %v4544_v24, %v4543_v57  ;;  %v4553_v61 = vmax.f32 %v4551_v23, %v4552_v26  ;;  %v4576_v23 = vstv %s5512_s10  ;;  %s8597_s10 = sld [smem:[#allocation2 + $0x485]] }
0x2a9d   : > { %v4546_v28 = vrot.slane %v4545_v39, 1  ;;  %v4554_v30 = vrot.slane %v4553_v61, 1 }
0x2a9f   : > { %v4555_v7 = vmax.f32 %v4553_v61, %v4554_v30  ;;  %v4547_v62 = vadd.f32 %v4546_v28, %v4545_v39 }
0x2aa1   : > { %4563 = vrot.lane.b32.xlu0 %v4555_v7, %s8913_s5  ;;  %v4548_v44 = vmul.f32 %v4547_v62, %v7017_v41  ;;  %v4596_v41 = vstv %s5517_s30  ;;  %s5511_s30 = sld [smem:[#allocation2 + $0x405]] }
0x2aa3   : > { %4557 = vrot.lane.b32.xlu2 %v4548_v44, %s8913_s5 }
0x2aa7   : > { %v4572_v24 = vstv %s5511_s30  ;;  %s5538_s30 = sld [smem:[#allocation2 + $0x48a]] }
0x2afd   : > { %v4558_v54 = vpop.permute.xlu2 %4557 }
0x2afe   : > { %v8439_v0 = vsel %vm8916_vm9, %v4558_v54, 0.0  ;;  %v8442_v58 = vsel %vm8917_vm4, 0.0, %v4558_v54 }
0x2aff   : > { %v4582_v37 = vmul.f32 %v4580_v11, %v8439_v0  ;;  %v4581_v34 = vmul.f32 %v4580_v11, %v8442_v58  ;;  %v4590_v47 = vmul.f32 %v4588_v42, %v8439_v0  ;;  %v4589_v12 = vmul.f32 %v4588_v42, %v8442_v58 }
0x2b00   : > { %v4593_v4 = vmul.f32 %v4592_v6, %v8442_v58  ;;  %v4594_v5 = vmul.f32 %v4592_v6, %v8439_v0  ;;  %v4577_v30 = vmul.f32 %v4576_v23, %v8442_v58  ;;  %v4573_v62 = vmul.f32 %v4572_v24, %v8442_v58 }
0x2b13   : > { %v4564_v15 = vpop.permute.xlu0 %4563 }
0x2b14   : > { %v8424_v18 = vsel %vm8914_vm1, 0.0, %v4564_v15  ;;  %v4567_v40 = vsel %vm8915_vm13, %v4564_v15, 0.0 }
0x2b15   : > { %v4612_v17 = vmul.f32 %v4611_v20, %v8424_v18  ;;  %v4604_v35 = vmul.f32 %v4603_v43, %v8424_v18  ;;  %v4613_v29 = vmul.f32 %v4611_v20, %v4567_v40  ;;  %v4597_v56 = vmul.f32 %v4596_v41, %v8424_v18 }
0x2b16   : > { %v4620_v8 = vmul.f32 %v4619_v2, %v8424_v18  ;;  %v4621_v33 = vmul.f32 %v4619_v2, %v4567_v40  ;;  %v4605_v22 = vmul.f32 %v4603_v43, %v4567_v40  ;;  %v4609_v13 = vmul.f32 %v4607_v46, %v4567_v40 }
0x2b17   : > { %4672 = vrot.lane.b32.xlu0 %v4612_v17, %s8893_s13  ;;  %4661 = vrot.lane.b32.xlu1 %v4604_v35, %s8893_s13  ;;  %v4617_v16 = vmul.f32 %v4615_v45, %v4567_v40  ;;  %v4608_v19 = vmul.f32 %v4607_v46, %v8424_v18  ;;  %v4616_v61 = vmul.f32 %v4615_v45, %v8424_v18  ;;  %v4584_v17 = vstv %s5514_s14  ;;  %s5544_s14 = sld [smem:[#allocation2 + $0x490]] }
0x2b18   : > { %4674 = vrot.lane.b32.xlu2 %v4613_v29, %s8893_s13  ;;  %v4578_v43 = vmul.f32 %v4576_v23, %v8439_v0  ;;  %v4586_v29 = vmul.f32 %v4584_v17, %v8439_v0 }
0x2b1f   : > { %4654 = vrot.lane.b32.xlu0 %v4597_v56, %s8873_s6  ;;  %s5518_s6 = sld [smem:[#allocation2 + $0x40c]] }
0x2b20   : > { %4683 = vrot.lane.b32.xlu2 %v4620_v8, %s8893_s13 }
0x2b25   : > { %v4599_v59 = vstv %s5518_s6  ;;  %s8928_s6 = smov 8  }
0x2b26   : > { %v4601_v10 = vmul.f32 %v4599_v59, %v4567_v40  ;;  %v4600_v52 = vmul.f32 %v4599_v59, %v8424_v18  ;;  %v4574_v18 = vmul.f32 %v4572_v24, %v8439_v0 }
0x2b27   : > { %4685 = vrot.lane.b32.xlu0 %v4621_v33, %s8893_s13  ;;  %v4585_v33 = vmul.f32 %v4584_v17, %v8442_v58 }
0x2b28   : > { %4663 = vrot.lane.b32.xlu2 %v4605_v22, %s8893_s13 }
0x2b2f   : > { %4635 = vrot.lane.b32.xlu0 %v4582_v37, %s8893_s13 }
0x2b30   : > { %4633 = vrot.lane.b32.xlu2 %v4581_v34, %s8893_s13 }
0x2b37   : > { %4646 = vrot.lane.b32.xlu0 %v4590_v47, %s8893_s13 }
0x2b38   : > { %4644 = vrot.lane.b32.xlu2 %v4589_v12, %s8893_s13 }
0x2b72   : > { %v4675_v14 = vpop.permute.xlu2 %4674 }
0x2b73   : > { %v4680_v38 = vadd.f32 %v4675_v14, %v4609_v13 }
0x2b7a   : > { %v4684_v49 = vpop.permute.xlu2 %4683 }
0x2b82   : > { %v4664_v60 = vpop.permute.xlu2 %4663 }
0x2b83   : > { %v8452_v1 = vadd.f32 %v4664_v60, %v4601_v10 }
0x2b89   : > { %v4673_v25 = vpop.permute.xlu0 %4672  ;;  %v4662_v50 = vpop.permute.xlu1 %4661 }
0x2b8a   : > { %v4665_v31 = vsel %vm8918_vm7, %v4662_v50, %v4664_v60  ;;  %v4676_v27 = vsel %vm8919_vm14, %v4673_v25, %v4675_v14  ;;  %v4634_v39 = vpop.permute.xlu2 %4633  ;;  %vm8929_vm7 = vcmask 64512  }
0x2b8b   : > { %v8456_v36 = vadd.f32 %v4665_v31, %v4600_v52  ;;  %v4679_v57 = vadd.f32 %v4676_v27, %v4608_v19  ;;  %vm8930_vm14 = vmmov %vm8929_vm7 }
0x2b91   : > { %v4655_v21 = vpop.permute.xlu0 %4654 }
0x2b92   : > { %v4657_v3 = vadd.f32 %v4655_v21, %v4593_v4  ;;  %v4658_v32 = vadd.f32 %v4655_v21, %v4594_v5  ;;  %v4645_v40 = vpop.permute.xlu2 %4644 }
0x2b94   : > { %4703 = vrot.lane.b32.xlu0 %v4657_v3, %s8848_s8  ;;  %4705 = vrot.lane.b32.xlu2 %v4658_v32, %s8848_s8 }
0x2b99   : > { %v4686_v9 = vpop.permute.xlu0 %4685 }
0x2b9a   : > { %v4691_v48 = vadd.f32 %v4686_v9, %v4617_v16  ;;  %v4687_v26 = vsel %vm8920_vm6, %v4684_v49, %v4686_v9  ;;  %v4753_v16 = vstv %s5524_s29  ;;  %vm8939_vm6 = vcmask 932864   ;;  %s5529_s29 = sld [smem:[#allocation2 + $0x481]] }
0x2b9b   : > { %v4690_v44 = vadd.f32 %v4687_v26, %v4616_v61 }
0x2b9c   : > { %4736 = vrot.lane.b32.xlu1 %v4691_v48, %s6805_s12  ;;  %4716 = vrot.lane.b32.xlu2 %v4680_v38, %s8848_s8 }
0x2b9d   : > { %4714 = vrot.lane.b32.xlu0 %v4679_v57, %s8848_s8 }
0x2ba1   : > { %v4636_v28 = vpop.permute.xlu0 %4635 }
0x2ba2   : > { %v4637_v7 = vsel %vm8921_vm0, %v4634_v39, %v4636_v28  ;;  %v4641_v15 = vadd.f32 %v4636_v28, %v4578_v43  ;;  %vm8940_vm0 = vcmask 949248  }
0x2ba3   : > { %v4640_v20 = vadd.f32 %v4637_v7, %v4577_v30 }
0x2ba4   : > { %4624 = vrot.lane.b32.xlu2 %v4573_v62, %s8893_s13 }
0x2ba5   : > { %4734 = vrot.lane.b32.xlu0 %v4690_v44, %s6805_s12  ;;  %4694 = vrot.lane.b32.xlu1 %v4640_v20, %s8848_s8 }
0x2ba9   : > { %v4647_v35 = vpop.permute.xlu0 %4646 }
0x2baa   : > { %v4652_v41 = vadd.f32 %v4647_v35, %v4586_v29  ;;  %v4648_v8 = vsel %vm8922_vm15, %v4645_v40, %v4647_v35  ;;  %vm8941_vm15 = vcmask 924672  }
0x2bab   : > { %v4651_v22 = vadd.f32 %v4648_v8, %v4585_v33 }
0x2bac   : > { %4696 = vrot.lane.b32.xlu2 %v4641_v15, %s8848_s8 }
0x2bad   : > { %4626 = vrot.lane.b32.xlu0 %v4574_v18, %s8893_s13 }
0x2bee   : > { %v4706_v2 = vpop.permute.xlu2 %4705 }
0x2bef   : > { %v4711_v56 = vadd.f32 %v4706_v2, %v4652_v41  ;;  %v5527_v41 = vld [vmem:[%s8676_s2 + $0x90] sm:$0x1] }
0x2bf1   : > { %4727 = vrot.lane.b32.xlu1 %v4711_v56, %s6805_s12 }
0x2bf6   : > { %v4717_v34 = vpop.permute.xlu2 %4716 }
0x2bf7   : > { %v4722_v42 = vadd.f32 %v4717_v34, %v8452_v1  ;;  %v4569_v1 = vstv %s5510_s20  ;;  %s5534_s20 = sld [smem:[#allocation2 + $0x486]] }
0x2bf8   : > { %v4570_v4 = vmul.f32 %v4569_v1, %v8442_v58 }
0x2bfe   : > { %v4625_v25 = vpop.permute.xlu2 %4624 }
0x2c06   : > { %v4704_v54 = vpop.permute.xlu0 %4703  ;;  %v4697_v6 = vpop.permute.xlu2 %4696 }
0x2c07   : > { %v4707_v11 = vsel %vm8923_vm12, %v4704_v54, %v4706_v2  ;;  %vm8942_vm12 = vcmask 941056  }
0x2c08   : > { %v4710_v37 = vadd.f32 %v4707_v11, %v4651_v22 }
0x2c0a   : > { %4725 = vrot.lane.b32.xlu0 %v4710_v37, %s6805_s12 }
0x2c0e   : > { %v4737_v0 = vpop.permute.xlu1 %4736 }
0x2c0f   : > { %v4742_v47 = vadd.f32 %v4737_v0, %v4722_v42  ;;  %v4715_v12 = vpop.permute.xlu0 %4714 }
0x2c10   : > { %v4718_v14 = vsel %vm8924_vm8, %v4715_v12, %v4717_v34  ;;  %vm8943_vm8 = vcmask 1043456  }
0x2c11   : > { %v4721_v49 = vadd.f32 %v4718_v14, %v8456_v36 }
0x2c12   : > { %4747 = vrot.lane.b32.xlu0 %v4742_v47, %s8893_s13 }
0x2c17   : > { %v4735_v59 = vpop.permute.xlu0 %4734  ;;  %v4695_v52 = vpop.permute.xlu1 %4694 }
0x2c18   : > { %v4738_v10 = vsel %vm306_vm3, %v4735_v59, %v4737_v0  ;;  %v4698_v3 = vsel %vm8926_vm11, %v4695_v52, %v4697_v6  ;;  %vm8945_vm11 = vcmask 973824  }
0x2c19   : > { %v4741_v60 = vadd.f32 %v4738_v10, %v4721_v49 }
0x2c1b   : > { %4745 = vrot.lane.b32.xlu2 %v4741_v60, %s8893_s13 }
0x2c1f   : > { %v4627_v50 = vpop.permute.xlu0 %4626 }
0x2c20   : > { %v4628_v31 = vsel %vm8925_vm2, %v4625_v25, %v4627_v50  ;;  %vm8944_vm2 = vmmov %vm8943_vm8 }
0x2c21   : > { %v4630_v21 = vadd.f32 %v4628_v31, %v4570_v4 }
0x2c23   : > { %v4700_v46 = vadd.f32 %v4698_v3, %v4630_v21 }
0x2c63   : > { %v4728_v36 = vpop.permute.xlu1 %4727 }
0x2c75   : > { %v4746_v45 = vpop.permute.xlu2 %4745 }
0x2c7c   : > { %v4726_v5 = vpop.permute.xlu0 %4725 }
0x2c7d   : > { %v4729_v32 = vsel %vm306_vm3, %v4726_v5, %v4728_v36 }
0x2c7e   : > { %v4731_v13 = vadd.f32 %v4729_v32, %v4700_v46 }
0x2c84   : > { %v4748_v27 = vpop.permute.xlu0 %4747 }
0x2c85   : > { %v4749_v19 = vsel %vm8927_vm10, %v4746_v45, %v4748_v27  ;;  %vm8946_vm10 = vcmask 965632  }
0x2c86   : > { %v4751_v9 = vadd.f32 %v4749_v19, %v4731_v13 }
0x2c88   : > { %v4754_v38 = vadd.f32 %v4753_v16, %v4751_v9 }
0x2c8a   : > { %v5525_v48 = vmul.f32 -1.442695, %v4754_v38 }
0x2c8c   : > { %6706 = vpow2.f32 %v5525_v48 }
0x2c92   : > { %v6707_v58 = vpop.eup %6706 }
0x2c93   : > { %v4758_v57 = vadd.f32 1.0, %v6707_v58 }
0x2c95   : > { %6708 = vrcp.f32 %v4758_v57  ;;  %v4770_v39 = vand.u32 2147483648, %v4758_v57  ;;  %v4768_v28 = vand.u32 2147483647, %v4758_v57  ;;  %vm4764_vm13 = vweird.f32 %v4758_v57 }
0x2c97   : > { %v4771_v7 = vor.u32 1.1754944e-38, %v4770_v39  ;;  %vm4769_vm4 = vcmp.eq.f32.partialorder %v4768_v28, 8.507059e+37 }
0x2c9b   : > { %v6709_v23 = vpop.eup %6708 }
0x2c9c   : > { %v4760_v24 = vmul.f32 %v6709_v23, %v4758_v57  ;;  %vm4765_vm1 = vweird.f32 %v6709_v23 }
0x2c9d   : > { %vm4766_vm9 = vmor %vm4764_vm13, %vm4765_vm1  ;;  %vm8947_vm1 = vcmask 990208   ;;  %vm8948_vm13 = vcmask 957440  }
0x2c9e   : > { %v4761_v26 = vsub.f32 1.0, %v4760_v24 }
0x2ca0   : > { %v4762_v61 = vmul.f32 %v6709_v23, %v4761_v26 }
0x2ca2   : > { %v4763_v30 = vadd.f32 %v6709_v23, %v4762_v61 }
0x2ca4   : > { %v4767_v62 = vsel %vm4766_vm9, %v6709_v23, %v4763_v30  ;;  %vm8949_vm9 = vcmask 998400  }
0x2ca5   : > { %v4772_v44 = vsel %vm4769_vm4, %v4771_v7, %v4767_v62  ;;  %vm8950_vm4 = vcmask 1014784  }
0x2ca6   : > { %v4774_v20 = vperm.slane %v4772_v44, 0 }
0x2ca8   : > { %v4775_v43 = vmul.f32 %v4774_v20, %v8414_v63 }
0x2caa   : > { %v4776_v15 = vmul.f32 %v7103_v51, %v4775_v43 }
0x2cac   : > { %v4777_v18 = vadd.f32 %v4776_v15, %v7106_v55 }
0x2cae   : > { %4779 = vrot.lane.b32.xlu1 %v4777_v18, %s8928_s6  ;;  %s5530_s6 = sld [smem:[#allocation2 + $0x483]] }
0x2d20   : > { %v4780_v40 = vpop.permute.xlu1 %4779 }
0x2d21   : > { %v8501_v17 = vsel %vm8929_vm7, 0.0, %v4780_v40  ;;  %v4783_v35 = vsel %vm8930_vm14, %v4780_v40, 0.0  ;;  %vm8951_vm7 = vmmov %vm8944_vm2 }
0x2d22   : > { %v6548_v29 = vpack.i.bf16 %v4783_v35, %v8501_v17  ;;  %v4786_v51 = vrot.slane %v8501_v17, 4  ;;  %v4787_v55 = vrot.slane %v4783_v35, 4  ;;  %vm8952_vm14 = vmmov %vm8944_vm2 }
0x2d24   : > { %6549 = vrot.lane.b32.xlu0 %v6548_v29, %s6805_s12  ;;  %6544 = vrot.lane.b32.xlu1 %v6548_v29, %s8892_s28  ;;  %v6578_v63 = vpack.i.bf16 %v4787_v55, %v4786_v51  ;;  %s8934_s12 = smov 121   ;;  %s8935_s28 = smov 117  }
0x2d25   : > { %6539 = vrot.lane.b32.xlu2 %v6548_v29, %s8846_s7  ;;  %s8936_s7 = smov 123  }
0x2d2c   : > { %6564 = vrot.lane.b32.xlu0 %v6548_v29, %s8894_s23  ;;  %6559 = vrot.lane.b32.xlu1 %v6548_v29, %s8848_s8  ;;  %s8937_s23 = smov 125  }
0x2d2d   : > { %6554 = vrot.lane.b32.xlu2 %v6548_v29, %s8891_s22  ;;  %s8938_s22 = smov 127  }
0x2d34   : > { %6579 = vrot.lane.b32.xlu1 %v6578_v63, %s8931_s11  ;;  %6569 = vrot.lane.b32.xlu0 %v6578_v63, %s8932_s9  ;;  %s8962_s11 = smov 3   ;;  %s5543_s9 = sld [smem:[#allocation2 + $0x48f]] }
0x2d35   : > { %6574 = vrot.lane.b32.xlu2 %v6578_v63, %s8933_s27  ;;  %s8560_s27 = sld [smem:[#allocation2 + $0x48d]] }
0x2d3c   : > { %6594 = vrot.lane.b32.xlu1 %v6578_v63, %s8934_s12  ;;  %6584 = vrot.lane.b32.xlu0 %v6578_v63, %s8935_s28  ;;  %s5545_s12 = sld [smem:[#allocation2 + $0x491]] }
0x2d3d   : > { %6589 = vrot.lane.b32.xlu2 %v6578_v63, %s8936_s7  ;;  %s5539_s28 = sld [smem:[#allocation2 + $0x48b]] }
0x2d3e   : > { %s5535_s7 = sld [smem:[#allocation2 + $0x487]] }
0x2d44   : > { %6609 = vrot.lane.b32.xlu1 %v6578_v63, %s8937_s23  ;;  %6604 = vrot.lane.b32.xlu0 %v6548_v29, %s8893_s13  ;;  %s5537_s23 = sld [smem:[#allocation2 + $0x489]] }
0x2d45   : > { %6599 = vrot.lane.b32.xlu2 %v6578_v63, %s8938_s22 }
0x2d4d   : > { %4896 = vperm.xlu2 %6117, %v5527_v41  }
0x2d7f   : > { %v6540_v2 = vpop.permute.xlu2 %6539 }
0x2d80   : > { %v6542_v0 = vunpack.i.h.bf16 %v6540_v2  ;;  %v6541_v47 = vunpack.i.l.bf16 %v6540_v2 }
0x2d82   : > { %v4858_v50 = vsel %vm8940_vm0, %v6541_v47, %v6542_v0  ;;  %vm8955_vm0 = vmmov %vm8944_vm2  ;;  %v5526_v0 = vld [vmem:[%s8675_s1 + $0x90] sm:$0x1] }
0x2d87   : > { %v6555_v56 = vpop.permute.xlu2 %6554 }
0x2d88   : > { %v6557_v36 = vunpack.i.h.bf16 %v6555_v56  ;;  %v6556_v3 = vunpack.i.l.bf16 %v6555_v56 }
0x2d8a   : > { %v4846_v26 = vsel %vm8946_vm10, %v6556_v3, %v6557_v36  ;;  %vm8961_vm10 = vcmask 523264  }
0x2d8f   : > { %v6575_v22 = vpop.permute.xlu2 %6574 }
0x2d90   : > { %v6577_v12 = vunpack.i.h.bf16 %v6575_v22  ;;  %v6576_v14 = vunpack.i.l.bf16 %v6575_v22 }
0x2d92   : > { %v4876_v52 = vsel %vm8941_vm15, %v6576_v14, %v6577_v12  ;;  %vm8956_vm15 = vcmask 1039360  }
0x2d96   : > { %v6550_v8 = vpop.permute.xlu0 %6549  ;;  %v6545_v33 = vpop.permute.xlu1 %6544 }
0x2d97   : > { %v6547_v37 = vunpack.i.h.bf16 %v6545_v33  ;;  %v6546_v34 = vunpack.i.l.bf16 %v6545_v33  ;;  %v6590_v42 = vpop.permute.xlu2 %6589  ;;  %v6552_v32 = vunpack.i.h.bf16 %v6550_v8  ;;  %v6551_v46 = vunpack.i.l.bf16 %v6550_v8 }
0x2d98   : > { %v6592_v61 = vunpack.i.h.bf16 %v6590_v42  ;;  %v6591_v28 = vunpack.i.l.bf16 %v6590_v42 }
0x2d99   : > { %v4870_v10 = vsel %vm8939_vm6, %v6546_v34, %v6547_v37  ;;  %v4834_v39 = vsel %vm306_vm3, %v6551_v46, %v6552_v32  ;;  %vm8953_vm6 = vmmov %vm8944_vm2  ;;  %vm8954_vm3 = vcmask 1006592  }
0x2d9a   : > { %v4885_v5 = vsel %vm8944_vm2, %v4870_v10, %v4876_v52  ;;  %v4816_v29 = vsel %vm8954_vm3, %v6591_v28, %v6592_v61  ;;  %vm8959_vm2 = vmmov %vm8955_vm0 }
0x2d9b   : > { %vm8967_vm3 = vmmov %vm8956_vm15 }
0x2d9e   : > { %v6565_v54 = vpop.permute.xlu0 %6564  ;;  %v6560_v11 = vpop.permute.xlu1 %6559 }
0x2d9f   : > { %v6567_v45 = vunpack.i.h.bf16 %v6565_v54  ;;  %v6600_v13 = vpop.permute.xlu2 %6599  ;;  %v6566_v27 = vunpack.i.l.bf16 %v6565_v54  ;;  %v6562_v16 = vunpack.i.h.bf16 %v6560_v11  ;;  %v6561_v19 = vunpack.i.l.bf16 %v6560_v11 }
0x2da0   : > { %v6602_v30 = vunpack.i.h.bf16 %v6600_v13  ;;  %v6601_v7 = vunpack.i.l.bf16 %v6600_v13 }
0x2da1   : > { %v4822_v20 = vsel %vm8949_vm9, %v6566_v27, %v6567_v45  ;;  %v4810_v43 = vsel %vm8950_vm4, %v6561_v19, %v6562_v16  ;;  %v5001_v16 = vstv %s5543_s9  ;;  %v4993_v19 = vstv %s8560_s27  ;;  %s5175_s27 = scalar_lea.hbm %s8678_s4, %s6902_s19 }
0x2da2   : > { %v4880_v51 = vsel %vm8955_vm0, %v4810_v43, %v4816_v29  ;;  %v4792_v55 = vsel %vm8956_vm15, %v6601_v7, %v6602_v30  ;;  %vm8963_vm4 = vcmask 23552   ;;  %v4970_v7 = vstv %s5535_s7  ;;  %s5179_s7 = sshll.u32 %s5175_s27, 4  ;;  %s5180_s7 = int_to_ptr.hbm [resolvable:$true] %s5179_s7 }
0x2da3   : > { %v4878_v37 = vsel %vm8959_vm2, %v8501_v17, %v4792_v55  ;;  %v4920_v17 = vstv %s5529_s29  ;;  %v4978_v43 = vstv %s5537_s23  ;;  %s5536_s29 = sld [smem:[#allocation2 + $0x488]] }
0x2da6   : > { %v6580_v49 = vpop.permute.xlu1 %6579  ;;  %v6570_v59 = vpop.permute.xlu0 %6569 }
0x2da7   : > { %v6572_v60 = vunpack.i.h.bf16 %v6570_v59  ;;  %v6571_v25 = vunpack.i.l.bf16 %v6570_v59  ;;  %v6582_v31 = vunpack.i.h.bf16 %v6580_v49  ;;  %v6581_v6 = vunpack.i.l.bf16 %v6580_v49  ;;  %v4897_v47 = vpop.permute.xlu2 %4896 }
0x2da9   : > { %v4864_v1 = vsel %vm8942_vm12, %v6571_v25, %v6572_v60  ;;  %v4840_v9 = vsel %vm8945_vm11, %v6581_v6, %v6582_v31  ;;  %vm8957_vm12 = vcmask 1022976   ;;  %vm8960_vm11 = vmmov %vm8955_vm0  ;;  %v4923_v25 = vstv %s5530_s6  ;;  %s5540_s6 = sld [smem:[#allocation2 + $0x48c]] }
0x2daa   : > { %v4884_v4 = vsel %vm8943_vm8, %v4858_v50, %v4864_v1  ;;  %v4882_v15 = vsel %vm8951_vm7, %v4834_v39, %v4840_v9  ;;  %vm8958_vm8 = vcmask 1031168   ;;  %vm8964_vm7 = vmmov %vm8963_vm4 }
0x2dab   : > { %v4891_v21 = vpack.c.bf16 %v4885_v5, %v4884_v4  ;;  %vm8968_vm0 = vmmov %vm8967_vm3 }
0x2dac   : > { %vm8969_vm15 = vmmov %vm8968_vm0 }
0x2dad   : > { %4906 = vmatpush.bf16.msrb.mxu1 %v4891_v21  ;;  %vm8971_vm2 = vmmov %vm8968_vm0 }
0x2dae   : > { %v6595_v38 = vpop.permute.xlu1 %6594  ;;  %v6585_v48 = vpop.permute.xlu0 %6584 }
0x2daf   : > { %v6597_v58 = vunpack.i.h.bf16 %v6595_v38  ;;  %v6596_v57 = vunpack.i.l.bf16 %v6595_v38  ;;  %v6587_v23 = vunpack.i.h.bf16 %v6585_v48  ;;  %v6586_v24 = vunpack.i.l.bf16 %v6585_v48 }
0x2db1   : > { %v4828_v62 = vsel %vm8947_vm1, %v6596_v57, %v6597_v58  ;;  %v4852_v44 = vsel %vm8948_vm13, %v6586_v24, %v6587_v23  ;;  %v5009_v24 = vstv %s5545_s12 }
0x2db2   : > { %v4883_v18 = vsel %vm8952_vm14, %v4846_v26, %v4852_v44  ;;  %v4881_v35 = vsel %vm8953_vm6, %v4822_v20, %v4828_v62  ;;  %v4986_v26 = vstv %s5539_s28  ;;  %vm8965_vm14 = vmmov %vm8963_vm4 }
0x2db3   : > { %v4890_v40 = vpack.c.bf16 %v4883_v18, %v4882_v15  ;;  %v4889_v2 = vpack.c.bf16 %v4881_v35, %v4880_v51  ;;  %vm8966_vm6 = vmmov %vm8963_vm4 }
0x2db5   : > { %4907 = vmatpush.bf16.msrb.mxu1 %v4890_v40 }
0x2db6   : > { %v6610_v63 = vpop.permute.xlu1 %6609  ;;  %v6605_v41 = vpop.permute.xlu0 %6604 }
0x2db7   : > { %v6612_v56 = vunpack.i.h.bf16 %v6610_v63  ;;  %v6611_v8 = vunpack.i.l.bf16 %v6610_v63  ;;  %v6607_v33 = vunpack.i.h.bf16 %v6605_v41  ;;  %v6606_v22 = vunpack.i.l.bf16 %v6605_v41 }
0x2db8   : > { %v4962_v41 = vstv %s8597_s10 }
0x2db9   : > { %v4804_v54 = vsel %vm8957_vm12, %v6611_v8, %v6612_v56  ;;  %v4798_v11 = vsel %vm8958_vm8, %v6606_v22, %v6607_v33  ;;  %4908 = vmatpush.bf16.msrb.mxu1 %v4889_v2  ;;  %v4982_v8 = vstv %s5538_s30  ;;  %vm8970_vm12 = vmmov %vm8968_vm0 }
0x2dba   : > { %v4879_v34 = vsel %vm8960_vm11, %v4798_v11, %v4804_v54  ;;  %vm8972_vm11 = vmmov %vm8958_vm8 }
0x2dbb   : > { %v4888_v42 = vpack.c.bf16 %v4879_v34, %v4878_v37  ;;  %v5005_v34 = vstv %s5544_s14  ;;  %s6753_s14 = scalar_lea.hbm %s8678_s4, 2 }
0x2dbd   : > { %4909 = vmatpush.bf16.msrb.mxu1 %v4888_v42 }
0x2dc0   : > { %5528 = vmatmul.msk.bf16.vlgmr.msrb.gmra.mxu1 %vm8961_vm10, %v5526_v0  ;;  %vm8973_vm10 = vcmask 1014784  }
0x2e3d   : > { %v4911_v12 = vpop.f32.mrf.mxu1 }
0x2e3e   : > { %v4912_v14 = vadd.f32 %v4911_v12, %v4897_v47 }
0x2e40   : > { %v4915_v49 = vsel %vm358_vm5, %v4912_v14, 0.0 }
0x2e41   : > { %4916 = vadd.xlane.f32.xlu0 %v4915_v49 }
0x2e45   : > { %v4913_v59 = vpop.f32.mrf.mxu1 }
0x2eb4   : > { %v4917_v10 = vpop.xlane.xlu0 %4916 }
0x2eb5   : > { %v4918_v60 = vmul.f32 %v4917_v10, %v7005_v53  ;;  %v4966_v10 = vstv %s5534_s20 }
0x2eb7   : > { %v4921_v50 = vmul.f32 %v4920_v17, %v4918_v60 }
0x2eb9   : > { %v4924_v52 = vadd.f32 %v4923_v25, %v4921_v50 }
0x2ebb   : > { %v5531_v1 = vmul.f32 -1.442695, %v4924_v52 }
0x2ebd   : > { %6710 = vpow2.f32 %v5531_v1 }
0x2ec3   : > { %v6711_v31 = vpop.eup %6710 }
0x2ec4   : > { %v4928_v6 = vadd.f32 1.0, %v6711_v31 }
0x2ec6   : > { %6712 = vrcp.f32 %v4928_v6  ;;  %v4940_v36 = vand.u32 2147483648, %v4928_v6  ;;  %v4938_v32 = vand.u32 2147483647, %v4928_v6  ;;  %vm4934_vm1 = vweird.f32 %v4928_v6 }
0x2ec8   : > { %v4941_v45 = vor.u32 1.1754944e-38, %v4940_v36  ;;  %vm4939_vm9 = vcmp.eq.f32.partialorder %v4938_v32, 8.507059e+37  ;;  %v4974_v32 = vstv %s5536_s29 }
0x2ecc   : > { %v6713_v4 = vpop.eup %6712 }
0x2ecd   : > { %v4930_v5 = vmul.f32 %v6713_v4, %v4928_v6  ;;  %vm4935_vm5 = vweird.f32 %v6713_v4 }
0x2ece   : > { %vm4936_vm13 = vmor %vm4934_vm1, %vm4935_vm5 }
0x2ecf   : > { %v4931_v21 = vsub.f32 1.0, %v4930_v5  ;;  %vm8974_vm5 = vmmov %vm8968_vm0 }
0x2ed0   : > { %vm8975_vm1 = vmmov %vm8958_vm8 }
0x2ed1   : > { %v4932_v3 = vmul.f32 %v6713_v4, %v4931_v21 }
0x2ed3   : > { %v4933_v46 = vadd.f32 %v6713_v4, %v4932_v3 }
0x2ed5   : > { %v4937_v53 = vsel %vm4936_vm13, %v6713_v4, %v4933_v46  ;;  %vm8976_vm13 = vmmov %vm8973_vm10 }
0x2ed6   : > { %v4942_v13 = vsel %vm4939_vm9, %v4941_v45, %v4937_v53  ;;  %vm8977_vm9 = vmmov %vm8968_vm0 }
0x2ed7   : > { %v8554_v27 = vmul.f32 %v4942_v13, %v4912_v14 }
0x2ed9   : > { %4947 = vrot.lane.b32.xlu2 %v8554_v27, %s8962_s11  ;;  %4953 = vrot.lane.b32.xlu1 %v8554_v27, %s8962_s11 }
0x2f33   : > { %v4948_v28 = vpop.permute.xlu2 %4947 }
0x2f34   : > { %v8580_v30 = vsel %vm8965_vm14, 0.0, %v4948_v28  ;;  %v8587_v20 = vsel %vm8966_vm6, %v4948_v28, 0.0 }
0x2f35   : > { %v4971_v62 = vmul.f32 %v4970_v7, %v8580_v30  ;;  %v4979_v15 = vmul.f32 %v4978_v43, %v8580_v30  ;;  %v4972_v18 = vmul.f32 %v4970_v7, %v8587_v20  ;;  %v4980_v35 = vmul.f32 %v4978_v43, %v8587_v20 }
0x2f36   : > { %v4963_v2 = vmul.f32 %v4962_v41, %v8580_v30  ;;  %v4983_v33 = vmul.f32 %v4982_v8, %v8580_v30  ;;  %v4984_v22 = vmul.f32 %v4982_v8, %v8587_v20  ;;  %v4968_v25 = vmul.f32 %v4966_v10, %v8587_v20 }
0x2f37   : > { %v4964_v31 = vmul.f32 %v4962_v41, %v8587_v20  ;;  %v4967_v5 = vmul.f32 %v4966_v10, %v8580_v30  ;;  %v4976_v45 = vmul.f32 %v4974_v32, %v8587_v20 }
0x2f4b   : > { %v4954_v9 = vpop.permute.xlu1 %4953 }
0x2f4c   : > { %v8564_v38 = vsel %vm8963_vm4, 0.0, %v4954_v9  ;;  %v8567_v48 = vsel %vm8964_vm7, %v4954_v9, 0.0  ;;  %v4975_v9 = vmul.f32 %v4974_v32, %v8580_v30 }
0x2f4d   : > { %v5003_v58 = vmul.f32 %v5001_v16, %v8567_v48  ;;  %v5002_v57 = vmul.f32 %v5001_v16, %v8564_v38  ;;  %v4994_v23 = vmul.f32 %v4993_v19, %v8564_v38  ;;  %v5010_v39 = vmul.f32 %v5009_v24, %v8564_v38 }
0x2f4e   : > { %v4987_v61 = vmul.f32 %v4986_v26, %v8564_v38  ;;  %v5011_v44 = vmul.f32 %v5009_v24, %v8567_v48  ;;  %v4995_v40 = vmul.f32 %v4993_v19, %v8567_v48  ;;  %v5006_v12 = vmul.f32 %v5005_v34, %v8564_v38 }
0x2f4f   : > { %5064 = vrot.lane.b32.xlu2 %v5003_v58, %s8938_s22  ;;  %5062 = vrot.lane.b32.xlu1 %v5002_v57, %s8938_s22  ;;  %v5007_v60 = vmul.f32 %v5005_v34, %v8567_v48 }
0x2f50   : > { %5051 = vrot.lane.b32.xlu0 %v4994_v23, %s8938_s22 }
0x2f57   : > { %5073 = vrot.lane.b32.xlu2 %v5010_v39, %s8938_s22  ;;  %5044 = vrot.lane.b32.xlu1 %v4987_v61, %s8913_s5  ;;  %s5542_s5 = sld [smem:[#allocation2 + $0x48e]]  ;;  %v4989_v39 = vstv %s5540_s6 }
0x2f58   : > { %v4991_v28 = vmul.f32 %v4989_v39, %v8567_v48 }
0x2f5d   : > { %v4997_v29 = vstv %s5542_s5  ;;  %s6747_s5 = sshra.s32 %s5180_s7, 4  ;;  %s6748_s5 = int_to_ptr.hbm [resolvable:$true] %s6747_s5 }
0x2f5e   : > { %v4999_v51 = vmul.f32 %v4997_v29, %v8567_v48  ;;  %v4998_v0 = vmul.f32 %v4997_v29, %v8564_v38  ;;  %s6749_s19 = scalar_lea.hbm %s6748_s5, 1  ;;  %p6754_p3 = scmp.lt.s32.totalorder %s6748_s5, %s8678_s4 }
0x2f5f   : > { %5023 = vrot.lane.b32.xlu2 %v4971_v62, %s8938_s22  ;;  %5075 = vrot.lane.b32.xlu1 %v5011_v44, %s8938_s22  ;;  %v4990_v62 = vmul.f32 %v4989_v39, %v8564_v38  ;;  %p6750_p0 = scmp.ne.s32.totalorder %s6748_s5, %s6749_s19  ;;  %p6755_p4 = scmp.lt.s32.totalorder %s6753_s14, %s6749_s19 }
0x2f61   : > { %p6751_p1 = pnand %p6750_p0, %p6919_p5  ;;  %p6756_p7 = por %p6755_p4, %p6754_p3 }
0x2f63   : > { %p6752_p2 = pneg %p6751_p1 }
0x2f65   : > { %p6757_p8 = pnand %p6756_p7, %p6752_p2 }
0x2f67   : > { %5034 = vrot.lane.b32.xlu2 %v4979_v15, %s8938_s22  ;;  %5025 = vrot.lane.b32.xlu1 %v4972_v18, %s8938_s22 }
0x2f6f   : > { %5053 = vrot.lane.b32.xlu2 %v4995_v40, %s8938_s22  ;;  %5036 = vrot.lane.b32.xlu1 %v4980_v35, %s8938_s22 }
0x2fa9   : > { %v5065_v55 = vpop.permute.xlu2 %5064 }
0x2faa   : > { %v5070_v63 = vadd.f32 %v5065_v55, %v4999_v51 }
0x2fac   : > { %5106 = vrot.lane.b32.xlu0 %v5070_v63, %s8893_s13 }
0x2fb1   : > { %v5074_v47 = vpop.permute.xlu2 %5073 }
0x2fb4   : > { %5014 = vrot.lane.b32.xlu0 %v4963_v2, %s8938_s22 }
0x2fb9   : > { %v5024_v6 = vpop.permute.xlu2 %5023 }
0x2fc1   : > { %v5063_v56 = vpop.permute.xlu1 %5062  ;;  %v5035_v36 = vpop.permute.xlu2 %5034 }
0x2fc2   : > { %v5066_v42 = vsel %vm8967_vm3, %v5063_v56, %v5065_v55  ;;  %v5052_v26 = vpop.permute.xlu0 %5051 }
0x2fc3   : > { %v5069_v49 = vadd.f32 %v5066_v42, %v4998_v0 }
0x2fc9   : > { %v5045_v54 = vpop.permute.xlu1 %5044  ;;  %v5054_v3 = vpop.permute.xlu2 %5053 }
0x2fca   : > { %v5047_v11 = vadd.f32 %v5045_v54, %v4983_v33  ;;  %v5048_v37 = vadd.f32 %v5045_v54, %v4984_v22  ;;  %v5055_v7 = vsel %vm8971_vm2, %v5052_v26, %v5054_v3  ;;  %v5059_v20 = vadd.f32 %v5054_v3, %v4991_v28 }
0x2fcb   : > { %v5058_v15 = vadd.f32 %v5055_v7, %v4990_v62 }
0x2fcc   : > { %5095 = vrot.lane.b32.xlu2 %v5048_v37, %s8893_s13  ;;  %5093 = vrot.lane.b32.xlu1 %v5047_v11, %s8893_s13 }
0x2fd1   : > { %v5076_v14 = vpop.permute.xlu1 %5075 }
0x2fd2   : > { %v5077_v59 = vsel %vm8968_vm0, %v5074_v47, %v5076_v14  ;;  %v5081_v52 = vadd.f32 %v5076_v14, %v5007_v60 }
0x2fd3   : > { %v5080_v17 = vadd.f32 %v5077_v59, %v5006_v12 }
0x2fd4   : > { %5104 = vrot.lane.b32.xlu1 %v5069_v49, %s8893_s13 }
0x2fd5   : > { %5124 = vrot.lane.b32.xlu2 %v5080_v17, %s8848_s8 }
0x2fd9   : > { %v5026_v50 = vpop.permute.xlu1 %5025 }
0x2fda   : > { %v5031_v1 = vadd.f32 %v5026_v50, %v4968_v25  ;;  %v5027_v4 = vsel %vm8969_vm15, %v5024_v6, %v5026_v50 }
0x2fdb   : > { %v5030_v21 = vadd.f32 %v5027_v4, %v4967_v5 }
0x2fdc   : > { %5126 = vrot.lane.b32.xlu1 %v5081_v52, %s8848_s8  ;;  %5086 = vrot.lane.b32.xlu0 %v5031_v1, %s8893_s13 }
0x2fdd   : > { %5016 = vrot.lane.b32.xlu2 %v4964_v31, %s8938_s22 }
0x2fe1   : > { %v5037_v46 = vpop.permute.xlu1 %5036 }
0x2fe2   : > { %v5042_v53 = vadd.f32 %v5037_v46, %v4976_v45  ;;  %v5038_v19 = vsel %vm8970_vm12, %v5035_v36, %v5037_v46 }
0x2fe3   : > { %v5041_v58 = vadd.f32 %v5038_v19, %v4975_v9 }
0x2fe4   : > { %5084 = vrot.lane.b32.xlu1 %v5030_v21, %s8893_s13  ;;  %s5546_s13 = sld [smem:[#allocation2 + $0x492]] }
0x2fea   : > { %v5143_v14 = vstv %s5546_s13 }
0x301e   : > { %v5107_v44 = vpop.permute.xlu0 %5106 }
0x301f   : > { %v5112_v18 = vadd.f32 %v5107_v44, %v5059_v20 }
0x3026   : > { %v5096_v13 = vpop.permute.xlu2 %5095  ;;  %v5015_v48 = vpop.permute.xlu0 %5014 }
0x3027   : > { %v5101_v16 = vadd.f32 %v5096_v13, %v5042_v53 }
0x3029   : > { %5117 = vrot.lane.b32.xlu1 %v5101_v16, %s8848_s8 }
0x302f   : > { %v5125_v40 = vpop.permute.xlu2 %5124 }
0x3037   : > { %v5017_v38 = vpop.permute.xlu2 %5016 }
0x3038   : > { %v5018_v33 = vsel %vm8974_vm5, %v5015_v48, %v5017_v38 }
0x303e   : > { %v5094_v57 = vpop.permute.xlu1 %5093 }
0x303f   : > { %v5097_v23 = vsel %vm8958_vm8, %v5094_v57, %v5096_v13 }
0x3040   : > { %v5100_v24 = vadd.f32 %v5097_v23, %v5041_v58 }
0x3042   : > { %5115 = vrot.lane.b32.xlu2 %v5100_v24, %s8848_s8  ;;  %s5532_s8 = sld [smem:[#allocation2 + $0x484]] }
0x3046   : > { %v5105_v61 = vpop.permute.xlu1 %5104 }
0x3047   : > { %v5108_v43 = vsel %vm8972_vm11, %v5105_v61, %v5107_v44 }
0x3048   : > { %v5111_v35 = vadd.f32 %v5108_v43, %v5058_v15  ;;  %v4959_v2 = vstv %s5532_s8 }
0x3049   : > { %v4960_v22 = vmul.f32 %v4959_v2, %v8580_v30 }
0x304b   : > { %v5020_v37 = vadd.f32 %v5018_v33, %v4960_v22 }
0x304e   : > { %v5127_v29 = vpop.permute.xlu1 %5126  ;;  %v5087_v56 = vpop.permute.xlu0 %5086 }
0x304f   : > { %v5128_v51 = vsel %vm8973_vm10, %v5125_v40, %v5127_v29  ;;  %v5132_v55 = vadd.f32 %v5127_v29, %v5112_v18 }
0x3050   : > { %v5131_v63 = vadd.f32 %v5128_v51, %v5111_v35 }
0x3051   : > { %5137 = vrot.lane.b32.xlu2 %v5132_v55, %s8938_s22 }
0x3052   : > { %5135 = vrot.lane.b32.xlu0 %v5131_v63, %s8938_s22  ;;  %s200_s22 = sand.u32 1, %s6791_s16  }
0x3053   : > { %s201_s12 = scalar_lea.vmem [#allocation5], %s200_s22  ;;  %s5167_s23 = scalar_lea.sflag [#allocation3], %s200_s22 }
0x3054   : > { %s5177_s28 = sshll.u32 %s201_s12, 4  ;;  %s5178_s28 = int_to_ptr.vmem [resolvable:$true] %s5177_s28 }
0x3056   : > { %v5085_v41 = vpop.permute.xlu1 %5084 }
0x3057   : > { %v5088_v11 = vsel %vm8975_vm1, %v5085_v41, %v5087_v56 }
0x3058   : > { %v5090_v42 = vadd.f32 %v5088_v11, %v5020_v37 }
0x309b   : > { %v5118_v54 = vpop.permute.xlu1 %5117 }
0x309c   : > { %v5116_v8 = vpop.permute.xlu2 %5115 }
0x309d   : > { %v5119_v34 = vsel %vm8976_vm13, %v5116_v8, %v5118_v54 }
0x309e   : > { %v5121_v0 = vadd.f32 %v5119_v34, %v5090_v42 }
0x30ab   : > { %v5138_v47 = vpop.permute.xlu2 %5137 }
0x30c4   : > { %v5136_v12 = vpop.permute.xlu0 %5135 }
0x30c5   : > { %v5139_v49 = vsel %vm8977_vm9, %v5136_v12, %v5138_v47 }
0x30c6   : > { %v5141_v59 = vadd.f32 %v5139_v49, %v5121_v0 }
0x30c8   : > { %v5144_v17 = vadd.f32 %v5143_v14, %v5141_v59 }
0x30ca   : > { %v5547_v10 = vmul.f32 -1.442695, %v5144_v17 }
0x30cc   : > { %6714 = vpow2.f32 %v5547_v10 }
0x30d2   : > { %v6715_v30 = vpop.eup %6714 }
0x30d3   : > { %v5148_v60 = vadd.f32 1.0, %v6715_v30 }
0x30d5   : > { %6716 = vrcp.f32 %v5148_v60  ;;  %v5160_v1 = vand.u32 2147483648, %v5148_v60  ;;  %v5158_v6 = vand.u32 2147483647, %v5148_v60  ;;  %vm5154_vm7 = vweird.f32 %v5148_v60 }
0x30d7   : > { %v5161_v5 = vor.u32 1.1754944e-38, %v5160_v1  ;;  %vm5159_vm6 = vcmp.eq.f32.partialorder %v5158_v6, 8.507059e+37 }
0x30db   : > { %v6717_v25 = vpop.eup %6716 }
0x30dc   : > { %v5150_v50 = vmul.f32 %v6717_v25, %v5148_v60  ;;  %vm5155_vm4 = vweird.f32 %v6717_v25 }
0x30dd   : > { %vm5156_vm14 = vmor %vm5154_vm7, %vm5155_vm4 }
0x30de   : > { %v5151_v52 = vsub.f32 1.0, %v5150_v50 }
0x30e0   : > { %v5152_v31 = vmul.f32 %v6717_v25, %v5151_v52 }
0x30e2   : > { %v5153_v4 = vadd.f32 %v6717_v25, %v5152_v31 }
0x30e4   : > { %v5157_v21 = vsel %vm5156_vm14, %v6717_v25, %v5153_v4 }
0x30e5   : > { %v5162_v36 = vsel %vm5159_vm6, %v5161_v5, %v5157_v21 }
0x30e6   : > { %v5164_v3 = vmul.f32 %v5162_v36, %v8554_v27 }
0x30e8   : > { %5165 = vst [vmem:[%s201_s12] sm:$0x1] %v5164_v3 }
0x30e9   : > { %6760 = shalt.err (!%p6757_p8)
}
0x30ea   : > { %5560 = dma.vmem_to_hbm [thread:$0]  (%p6919_p5), %s5178_s28, 16, %s5180_s7, %s5167_s23  }
0x30eb PF: > { %p5572_p9 = scmp.ge.s32.totalorder %s6799_s18, 2  ;;  %s5191_s6 = sand.u32 1, %s6787_s15  }
0x30ec   : > { %s5192_s8 = scalar_lea.sflag [#allocation3], %s5191_s6 }
0x30ed   : > { %p5567_p10 = pnand %p5572_p9, %p6923_p6 }
0x30ef   : > { %p5568_p11 = pneg %p5567_p10 }
0x30f1   : > { %6782 = dma.done.wait (%p5568_p11), %s5192_s8, 16  }
0x30f2   : > { %6784 = vsyncadd (%p5568_p11), %s5192_s8, 4294967280  ;;  %p15_p12 = scmp.ge.s32.totalorder %s6906_s21, 4   ;;  %s8978_s15 = smov %s6791_s16 }
0x30f3   : > { %s8979_s16 = smov %s6795_s17  ;;  %s8980_s17 = smov %s6917_s24 }
0x30f4   : > { %s8981_s18 = smov %s6906_s21  ;;  %17 = sbr.rel (!%p15_p12) target bundleno = 4 (0x4), region = 94 }
0x30f9   :  { %5197 = vsyncpa [#allocation3], 1 }
0x30fa   :  { %5199 = vsyncpa [#allocation3 + $0x1], 1 }
0x30fb   :  { %5200 = vsyncpa [#allocation4], 1 }
0x30fc   :  { %5202 = vsyncpa [#allocation4 + $0x1], 1 }

</bundles_post_ra>
